<compile_context>
chip_gen: v7x
topology: tpu7x:2x2x1
jax: 0.10.0
libtpu: 0.0.40
codegen_flags: <defaults>
</compile_context>

<pallas_src>
import functools

import jax
import jax.numpy as jnp
from jax.experimental import pallas as pl
from jax.experimental.pallas import tpu as pltpu


# ----------------------------------------------------------------------------
# Pallas kernel
# ----------------------------------------------------------------------------
def _elu(x):
    return jnp.where(x > 0, x, jnp.exp(jnp.minimum(x, 0.0)) - 1.0)


def _make_kernel(k, pad, n_keep, n_mid):
    # x_ref   : (n_mid + 2*pad, Cin)   width-padded + guard rows, positions-major
    # w1_ref  : (k, Cin, Cin)          conv1 (BN1 folded), tap-major, in-major
    # w2_ref  : (k, Cin, Hid)          conv2 (BN2 folded)
    # w3_ref  : (Hid, Cin)             1x1 conv
    # mask_ref: (n_mid, 1)             1 at real positions, 0 at padding rows
    def kernel(x_ref, w1_ref, b1_ref, w2_ref, b2_ref, w3_ref, b3_ref, mask_ref, out_ref):
        x = x_ref[...]

        # --- self.conv : Conv2d(inn, inn, (1,k)) + BN (folded) + ELU ----------
        y1 = jnp.dot(x[0:n_mid, :], w1_ref[0], preferred_element_type=jnp.float32)
        for t in range(1, k):
            y1 = y1 + jnp.dot(x[t:t + n_mid, :], w1_ref[t],
                              preferred_element_type=jnp.float32)
        # mask re-applies zero padding at width borders so conv2 sees proper padding
        h1 = _elu(y1 + b1_ref[...]) * mask_ref[...]          # (n_mid, Cin)

        # --- self.layer[0:3] : Conv2d(inn, hid, (1,k)) + BN (folded) + ELU ----
        y2 = jnp.dot(h1[0:n_keep, :], w2_ref[0], preferred_element_type=jnp.float32)
        for t in range(1, k):
            y2 = y2 + jnp.dot(h1[t:t + n_keep, :], w2_ref[t],
                              preferred_element_type=jnp.float32)
        h2 = _elu(y2 + b2_ref[...])                          # (n_keep, Hid)

        # --- self.layer[3] : Conv2d(hid, inn, 1) + residual + final ELU -------
        y3 = jnp.dot(h2, w3_ref[...], preferred_element_type=jnp.float32) + b3_ref[...]
        out_ref[...] = _elu(y3 + h1[pad:pad + n_keep, :])    # (n_keep, Cin)

    return kernel


def res_block_pallas(x, packed, *, k):
    """x: (B, C, H, W) float32 NCHW. packed: host-folded / packed parameters."""
    B, C, H, W = x.shape
    pad = k // 2
    G = W + 2 * pad                     # padded width per (b, h) row
    n_keep = B * H * G                  # rows of conv2/conv3/output
    n_mid = n_keep + 2 * pad            # rows of h1 (incl. re-padding range)
    # host-side layout: NCHW -> positions-major (B*H*G, C) with zero width-padding,
    # plus 2*pad global guard rows so every conv tap is a static, in-bounds slice.
    x_nhwc = jnp.transpose(x, (0, 2, 3, 1))
    x_padw = jnp.pad(x_nhwc, ((0, 0), (0, 0), (pad, pad), (0, 0)))
    x_ext = jnp.pad(x_padw.reshape(n_keep, C), ((2 * pad, 2 * pad), (0, 0)))

    # mask[m] = 1 iff row m of h1 corresponds to a real (non-padding) position
    m_idx = jnp.arange(n_mid)
    n_idx = m_idx - pad
    gpos = n_idx % G
    keep = (n_idx >= 0) & (n_idx < n_keep) & (gpos >= pad) & (gpos < pad + W)
    mask = keep.astype(jnp.float32)[:, None]                 # (n_mid, 1)

    kernel = _make_kernel(k, pad, n_keep, n_mid)
    out_flat = pl.pallas_call(
        kernel,
        out_shape=jax.ShapeDtypeStruct((n_keep, C), jnp.float32),
        in_specs=[pl.BlockSpec(memory_space=pltpu.MemorySpace.VMEM) for _ in range(8)],
        out_specs=pl.BlockSpec(memory_space=pltpu.MemorySpace.VMEM),
    )(x_ext, packed["w1"], packed["b1"], packed["w2"], packed["b2"],
      packed["w3"], packed["b3"], mask)

    out = out_flat.reshape(B, H, G, C)[:, :, pad:pad + W, :]  # drop width padding
    return jnp.transpose(out, (0, 3, 1, 2))                   # back to NCHW


# ----------------------------------------------------------------------------
# Host-side parameter init, BN fold and MXU-friendly packing
# ----------------------------------------------------------------------------
def init_res_block_params(key, inn, hid, k):
    """Deterministic init mimicking PyTorch defaults (+ non-trivial BN running stats)."""
    ks = jax.random.split(key, 14)

    def conv_w(kk, out_c, in_c, kw):
        bound = 1.0 / jnp.sqrt(in_c * kw)
        return jax.random.uniform(kk, (out_c, in_c, 1, kw), jnp.float32, -bound, bound)

    def conv_b(kk, out_c, in_c, kw):
        bound = 1.0 / jnp.sqrt(in_c * kw)
        return jax.random.uniform(kk, (out_c,), jnp.float32, -bound, bound)

    return {
        "cw1": conv_w(ks[0], inn, inn, k), "cb1": conv_b(ks[1], inn, inn, k),
        "g1": 1.0 + 0.1 * jax.random.normal(ks[2], (inn,), jnp.float32),
        "be1": 0.1 * jax.random.normal(ks[3], (inn,), jnp.float32),
        "m1": 0.1 * jax.random.normal(ks[4], (inn,), jnp.float32),
        "v1": jax.random.uniform(ks[5], (inn,), jnp.float32, 0.5, 1.5),
        "cw2": conv_w(ks[6], hid, inn, k), "cb2": conv_b(ks[7], hid, inn, k),
        "g2": 1.0 + 0.1 * jax.random.normal(ks[8], (hid,), jnp.float32),
        "be2": 0.1 * jax.random.normal(ks[9], (hid,), jnp.float32),
        "m2": 0.1 * jax.random.normal(ks[10], (hid,), jnp.float32),
        "v2": jax.random.uniform(ks[11], (hid,), jnp.float32, 0.5, 1.5),
        "cw3": conv_w(ks[12], inn, hid, 1), "cb3": conv_b(ks[13], inn, hid, 1),
    }


def _fold_bn(w, b, gamma, beta, mean, var, eps=1e-5):
    scale = gamma / jnp.sqrt(var + eps)                       # (out,)
    return w * scale[:, None, None, None], (b - mean) * scale + beta


def _pack_taps(w):
    # (out, in, 1, k) -> (k, in, out): pre-transposed, one (in,out) matrix per tap
    return jnp.transpose(w[:, :, 0, :], (2, 1, 0))


def pack_params(p):
    """Inference-mode BN fold + MXU-friendly packing (done once on the host)."""
    w1f, b1f = _fold_bn(p["cw1"], p["cb1"], p["g1"], p["be1"], p["m1"], p["v1"])
    w2f, b2f = _fold_bn(p["cw2"], p["cb2"], p["g2"], p["be2"], p["m2"], p["v2"])
    return {
        "w1": _pack_taps(w1f), "b1": b1f[None, :],
        "w2": _pack_taps(w2f), "b2": b2f[None, :],
        "w3": jnp.transpose(p["cw3"][:, :, 0, 0]), "b3": p["cb3"][None, :],
    }


# ----------------------------------------------------------------------------
# Pure-JAX reference (faithful translation of the PyTorch module, eval-mode BN)
# ----------------------------------------------------------------------------
def res_block_ref(x, p, k):
    pad = k // 2

    def conv(x, w, b, pd):
        y = jax.lax.conv_general_dilated(
            x, w, window_strides=(1, 1), padding=((0, 0), (pd, pd)),
            dimension_numbers=("NCHW", "OIHW", "NCHW"))
        return y + b[None, :, None, None]

    def bn(x, g, be, m, v, eps=1e-5):
        inv = (g / jnp.sqrt(v + eps))[None, :, None, None]
        return (x - m[None, :, None, None]) * inv + be[None, :, None, None]

    h1 = jax.nn.elu(bn(conv(x, p["cw1"], p["cb1"], pad), p["g1"], p["be1"], p["m1"], p["v1"]))
    h2 = jax.nn.elu(bn(conv(h1, p["cw2"], p["cb2"], pad), p["g2"], p["be2"], p["m2"], p["v2"]))
    h3 = conv(h2, p["cw3"], p["cb3"], 0)
    return jax.nn.elu(h3 + h1)


# ----------------------------------------------------------------------------
if __name__ == "__main__":
    B, INN, H, W = 2, 4, 16, 16      # NCHW input
    HID, K = 32, 3                   # hidden channels, (1,k) kernel width (odd)

    key = jax.random.PRNGKey(0)
    kx, kp = jax.random.split(key)
    x = jax.random.normal(kx, (B, INN, H, W), jnp.float32)

    params = init_res_block_params(kp, INN, HID, K)
    packed = pack_params(params)

    fwd = jax.jit(functools.partial(res_block_pallas, k=K))
    out = fwd(x, packed)
    jax.block_until_ready(out)
    assert out.shape == (B, INN, H, W)

    ref = res_block_ref(x, params, K)
    err = float(jnp.max(jnp.abs(out - ref)))
    assert jnp.allclose(out, ref, atol=2e-2, rtol=2e-2), err

    print("KERNEL_OK")
</pallas_src>

<mosaic_0001>
module attributes {stable_mosaic.version = 11 : i64} {
  func.func @kernel(%arg0: memref<580x4xf32, #tpu.memory_space<vmem>>, %arg1: memref<3x4x4xf32, #tpu.memory_space<vmem>>, %arg2: memref<1x4xf32, #tpu.memory_space<vmem>>, %arg3: memref<3x4x32xf32, #tpu.memory_space<vmem>>, %arg4: memref<1x32xf32, #tpu.memory_space<vmem>>, %arg5: memref<32x4xf32, #tpu.memory_space<vmem>>, %arg6: memref<1x4xf32, #tpu.memory_space<vmem>>, %arg7: memref<578x1xf32, #tpu.memory_space<vmem>>, %arg8: memref<576x4xf32, #tpu.memory_space<vmem>>) attributes {dimension_semantics = [], scalar_prefetch = 0 : i64, scratch_operands = 0 : i64, tpu.core_type = #tpu.core_type<tc>} {
    %c0 = arith.constant 0 : index
    %c0_0 = arith.constant 0 : index
    %0 = vector.load %arg0[%c0, %c0_0] : memref<580x4xf32, #tpu.memory_space<vmem>>, vector<580x4xf32>
    %1 = vector.extract_strided_slice %0 {offsets = [0, 0], sizes = [578, 4], strides = [1, 1]} : vector<580x4xf32> to vector<578x4xf32>
    %c0_1 = arith.constant 0 : index
    %c0_2 = arith.constant 0 : index
    %c0_3 = arith.constant 0 : index
    %2 = vector.load %arg1[%c0_1, %c0_2, %c0_3] : memref<3x4x4xf32, #tpu.memory_space<vmem>>, vector<1x4x4xf32>
    %3 = vector.shape_cast %2 : vector<1x4x4xf32> to vector<4x4xf32>
    %cst = arith.constant dense<0.000000e+00> : vector<578x4xf32>
    %4 = tpu.matmul %1, %3, %cst {dimension_numbers = #tpu.dot_dimension_numbers<[1], [0], [0], [1], [0, 0, 1, 1], [], []>} : vector<578x4xf32>, vector<4x4xf32>, vector<578x4xf32> -> vector<578x4xf32>
    %5 = vector.extract_strided_slice %0 {offsets = [1, 0], sizes = [578, 4], strides = [1, 1]} : vector<580x4xf32> to vector<578x4xf32>
    %c1 = arith.constant 1 : index
    %c0_4 = arith.constant 0 : index
    %c0_5 = arith.constant 0 : index
    %6 = vector.load %arg1[%c1, %c0_4, %c0_5] : memref<3x4x4xf32, #tpu.memory_space<vmem>>, vector<1x4x4xf32>
    %7 = vector.shape_cast %6 : vector<1x4x4xf32> to vector<4x4xf32>
    %cst_6 = arith.constant dense<0.000000e+00> : vector<578x4xf32>
    %8 = tpu.matmul %5, %7, %cst_6 {dimension_numbers = #tpu.dot_dimension_numbers<[1], [0], [0], [1], [0, 0, 1, 1], [], []>} : vector<578x4xf32>, vector<4x4xf32>, vector<578x4xf32> -> vector<578x4xf32>
    %9 = arith.addf %4, %8 : vector<578x4xf32>
    %10 = vector.extract_strided_slice %0 {offsets = [2, 0], sizes = [578, 4], strides = [1, 1]} : vector<580x4xf32> to vector<578x4xf32>
    %c2 = arith.constant 2 : index
    %c0_7 = arith.constant 0 : index
    %c0_8 = arith.constant 0 : index
    %11 = vector.load %arg1[%c2, %c0_7, %c0_8] : memref<3x4x4xf32, #tpu.memory_space<vmem>>, vector<1x4x4xf32>
    %12 = vector.shape_cast %11 : vector<1x4x4xf32> to vector<4x4xf32>
    %cst_9 = arith.constant dense<0.000000e+00> : vector<578x4xf32>
    %13 = tpu.matmul %10, %12, %cst_9 {dimension_numbers = #tpu.dot_dimension_numbers<[1], [0], [0], [1], [0, 0, 1, 1], [], []>} : vector<578x4xf32>, vector<4x4xf32>, vector<578x4xf32> -> vector<578x4xf32>
    %14 = arith.addf %9, %13 : vector<578x4xf32>
    %c0_10 = arith.constant 0 : index
    %c0_11 = arith.constant 0 : index
    %15 = vector.load %arg2[%c0_10, %c0_11] : memref<1x4xf32, #tpu.memory_space<vmem>>, vector<1x4xf32>
    %16 = vector.broadcast %15 : vector<1x4xf32> to vector<578x4xf32>
    %17 = arith.addf %14, %16 : vector<578x4xf32>
    %cst_12 = arith.constant 0.000000e+00 : f32
    %18 = vector.broadcast %cst_12 : f32 to vector<578x4xf32>
    %19 = arith.cmpf ogt, %17, %18 : vector<578x4xf32>
    %cst_13 = arith.constant 0.000000e+00 : f32
    %20 = vector.broadcast %cst_13 : f32 to vector<578x4xf32>
    %21 = arith.minimumf %17, %20 : vector<578x4xf32>
    %22 = math.exp %21 : vector<578x4xf32>
    %cst_14 = arith.constant 1.000000e+00 : f32
    %23 = vector.broadcast %cst_14 : f32 to vector<578x4xf32>
    %24 = arith.subf %22, %23 : vector<578x4xf32>
    %25 = arith.select %19, %17, %24 : vector<578x4xi1>, vector<578x4xf32>
    %c0_15 = arith.constant 0 : index
    %c0_16 = arith.constant 0 : index
    %26 = vector.load %arg7[%c0_15, %c0_16] : memref<578x1xf32, #tpu.memory_space<vmem>>, vector<578x1xf32>
    %27 = vector.broadcast %26 : vector<578x1xf32> to vector<578x4xf32>
    %28 = arith.mulf %25, %27 : vector<578x4xf32>
    %29 = vector.extract_strided_slice %28 {offsets = [0, 0], sizes = [576, 4], strides = [1, 1]} : vector<578x4xf32> to vector<576x4xf32>
    %c0_17 = arith.constant 0 : index
    %c0_18 = arith.constant 0 : index
    %c0_19 = arith.constant 0 : index
    %30 = vector.load %arg3[%c0_17, %c0_18, %c0_19] : memref<3x4x32xf32, #tpu.memory_space<vmem>>, vector<1x4x32xf32>
    %31 = vector.shape_cast %30 : vector<1x4x32xf32> to vector<4x32xf32>
    %cst_20 = arith.constant dense<0.000000e+00> : vector<576x32xf32>
    %32 = tpu.matmul %29, %31, %cst_20 {dimension_numbers = #tpu.dot_dimension_numbers<[1], [0], [0], [1], [0, 0, 1, 1], [], []>} : vector<576x4xf32>, vector<4x32xf32>, vector<576x32xf32> -> vector<576x32xf32>
    %33 = vector.extract_strided_slice %28 {offsets = [1, 0], sizes = [576, 4], strides = [1, 1]} : vector<578x4xf32> to vector<576x4xf32>
    %c1_21 = arith.constant 1 : index
    %c0_22 = arith.constant 0 : index
    %c0_23 = arith.constant 0 : index
    %34 = vector.load %arg3[%c1_21, %c0_22, %c0_23] : memref<3x4x32xf32, #tpu.memory_space<vmem>>, vector<1x4x32xf32>
    %35 = vector.shape_cast %34 : vector<1x4x32xf32> to vector<4x32xf32>
    %cst_24 = arith.constant dense<0.000000e+00> : vector<576x32xf32>
    %36 = tpu.matmul %33, %35, %cst_24 {dimension_numbers = #tpu.dot_dimension_numbers<[1], [0], [0], [1], [0, 0, 1, 1], [], []>} : vector<576x4xf32>, vector<4x32xf32>, vector<576x32xf32> -> vector<576x32xf32>
    %37 = arith.addf %32, %36 : vector<576x32xf32>
    %38 = vector.extract_strided_slice %28 {offsets = [2, 0], sizes = [576, 4], strides = [1, 1]} : vector<578x4xf32> to vector<576x4xf32>
    %c2_25 = arith.constant 2 : index
    %c0_26 = arith.constant 0 : index
    %c0_27 = arith.constant 0 : index
    %39 = vector.load %arg3[%c2_25, %c0_26, %c0_27] : memref<3x4x32xf32, #tpu.memory_space<vmem>>, vector<1x4x32xf32>
    %40 = vector.shape_cast %39 : vector<1x4x32xf32> to vector<4x32xf32>
    %cst_28 = arith.constant dense<0.000000e+00> : vector<576x32xf32>
    %41 = tpu.matmul %38, %40, %cst_28 {dimension_numbers = #tpu.dot_dimension_numbers<[1], [0], [0], [1], [0, 0, 1, 1], [], []>} : vector<576x4xf32>, vector<4x32xf32>, vector<576x32xf32> -> vector<576x32xf32>
    %42 = arith.addf %37, %41 : vector<576x32xf32>
    %c0_29 = arith.constant 0 : index
    %c0_30 = arith.constant 0 : index
    %43 = vector.load %arg4[%c0_29, %c0_30] : memref<1x32xf32, #tpu.memory_space<vmem>>, vector<1x32xf32>
    %44 = vector.broadcast %43 : vector<1x32xf32> to vector<576x32xf32>
    %45 = arith.addf %42, %44 : vector<576x32xf32>
    %cst_31 = arith.constant 0.000000e+00 : f32
    %46 = vector.broadcast %cst_31 : f32 to vector<576x32xf32>
    %47 = arith.cmpf ogt, %45, %46 : vector<576x32xf32>
    %cst_32 = arith.constant 0.000000e+00 : f32
    %48 = vector.broadcast %cst_32 : f32 to vector<576x32xf32>
    %49 = arith.minimumf %45, %48 : vector<576x32xf32>
    %50 = math.exp %49 : vector<576x32xf32>
    %cst_33 = arith.constant 1.000000e+00 : f32
    %51 = vector.broadcast %cst_33 : f32 to vector<576x32xf32>
    %52 = arith.subf %50, %51 : vector<576x32xf32>
    %53 = arith.select %47, %45, %52 : vector<576x32xi1>, vector<576x32xf32>
    %c0_34 = arith.constant 0 : index
    %c0_35 = arith.constant 0 : index
    %54 = vector.load %arg5[%c0_34, %c0_35] : memref<32x4xf32, #tpu.memory_space<vmem>>, vector<32x4xf32>
    %cst_36 = arith.constant dense<0.000000e+00> : vector<576x4xf32>
    %55 = tpu.matmul %53, %54, %cst_36 {dimension_numbers = #tpu.dot_dimension_numbers<[1], [0], [0], [1], [0, 0, 1, 1], [], []>} : vector<576x32xf32>, vector<32x4xf32>, vector<576x4xf32> -> vector<576x4xf32>
    %c0_37 = arith.constant 0 : index
    %c0_38 = arith.constant 0 : index
    %56 = vector.load %arg6[%c0_37, %c0_38] : memref<1x4xf32, #tpu.memory_space<vmem>>, vector<1x4xf32>
    %57 = vector.broadcast %56 : vector<1x4xf32> to vector<576x4xf32>
    %58 = arith.addf %55, %57 : vector<576x4xf32>
    %59 = vector.extract_strided_slice %28 {offsets = [1, 0], sizes = [576, 4], strides = [1, 1]} : vector<578x4xf32> to vector<576x4xf32>
    %60 = arith.addf %58, %59 : vector<576x4xf32>
    %cst_39 = arith.constant 0.000000e+00 : f32
    %61 = vector.broadcast %cst_39 : f32 to vector<576x4xf32>
    %62 = arith.cmpf ogt, %60, %61 : vector<576x4xf32>
    %cst_40 = arith.constant 0.000000e+00 : f32
    %63 = vector.broadcast %cst_40 : f32 to vector<576x4xf32>
    %64 = arith.minimumf %60, %63 : vector<576x4xf32>
    %65 = math.exp %64 : vector<576x4xf32>
    %cst_41 = arith.constant 1.000000e+00 : f32
    %66 = vector.broadcast %cst_41 : f32 to vector<576x4xf32>
    %67 = arith.subf %65, %66 : vector<576x4xf32>
    %68 = arith.select %62, %60, %67 : vector<576x4xi1>, vector<576x4xf32>
    %c0_42 = arith.constant 0 : index
    %c0_43 = arith.constant 0 : index
    %69 = vector.load %arg8[%c0_42, %c0_43] : memref<576x4xf32, #tpu.memory_space<vmem>>, vector<576x4xf32>
    tpu.vector_store %arg8[%c0_42, %c0_43], %68 {strides = array<i32>} : memref<576x4xf32, #tpu.memory_space<vmem>>, vector<576x4xf32>,
    return
  }
}

</mosaic_0001>

<bundles_post_ra>
// kernel: res_block_pallas.1
= control target key start
LH: loop header
LB: loop body
LE: loop exit
PB: predicated region body
PF: predicated region fallthrough
CT: control target
= control target key end

     0   :  { %vm471_vm0 = vcmask 1043456   ;;  %v14817_v0 = vmov 0.0   ;;  %vm324_vm1 = vcmask 31744   ;;  %vm10315_vm2 = vmmov 0   ;;  %s14808_s1 = inlined_call_operand.vmem [shape: f32[3,4,4], index: 1, kind: input, shape index: {}]   ;;  %s14809_s0 = inlined_call_operand.vmem [shape: f32[580,4], index: 0, kind: input, shape index: {}]   ;;  %s14810_s3 = inlined_call_operand.vmem [shape: f32[3,4,32], index: 3, kind: input, shape index: {}]   ;;  %s14811_s7 = inlined_call_operand.vmem [shape: f32[578,1], index: 7, kind: input, shape index: {}]   ;;  %s14812_s2 = inlined_call_operand.vmem [shape: f32[1,4], index: 2, kind: input, shape index: {}]   ;;  %s14813_s5 = inlined_call_operand.vmem [shape: f32[32,4], index: 5, kind: input, shape index: {}]   ;;  %s14814_s4 = inlined_call_operand.vmem [shape: f32[1,32], index: 4, kind: input, shape index: {}]   ;;  %s14815_s6 = inlined_call_operand.vmem [shape: f32[1,4], index: 6, kind: input, shape index: {}]   ;;  %s14816_s8 = inlined_call_operand.vmem [shape: f32[576,4], index: 8, kind: output, shape index: {}]  }
   0x1   :  { %8539 = vmatprep.subr.mxu0 %v14817_v0  ;;  %v7285_v1 = vld [vmem:[%s14808_s1 + $0x4] sm:$0xf]  ;;  %8760 = vmatprep.subr.mxu1 %v14817_v0  ;;  %v102_v2 = vld [vmem:[%s14808_s1] sm:$0xf]  ;;  %v10381_v4 = vld [vmem:[%s14809_s0 + $0x8] sm:$0xff]  ;;  %vm178_vm3 = vcmask 1046528  }
   0x2   :  { %v10373_v3 = vld [vmem:[%s14809_s0] sm:$0xff]  ;;  %8540 = vmatpush3.msk.msra.mxu0 %vm471_vm0, %v7285_v1  ;;  %8541 = vmatprep.mubr.msk.f32.mxu0 %vm10315_vm2, %v14817_v0  ;;  %v31_v6 = vld [vmem:[%s14809_s0 + $0x10] sm:$0xff]  ;;  %v180_v7 = vrot.slane %v10381_v4, 1  ;;  %v7434_v9 = vld [vmem:[%s14808_s1 + $0x8] sm:$0xf]  ;;  %vm1486_vm4 = vcmask 1045504  }
   0x3   :  { %v179_v5 = vrot.slane %v10373_v3, 1  ;;  %8761 = vmatpush3.msk.msra.mxu1 %vm471_vm0, %v102_v2  ;;  %8762 = vmatprep.mubr.msk.f32.mxu1 %vm10315_vm2, %v14817_v0  ;;  %v182_v8 = vrot.slane %v31_v6, 1  ;;  %v32_v10 = vld [vmem:[%s14809_s0 + $0x18] sm:$0xff]  ;;  %v33_v14 = vld [vmem:[%s14809_s0 + $0x20] sm:$0xff]  ;;  %v34_v17 = vld [vmem:[%s14809_s0 + $0x28] sm:$0xff] }
   0x4   :  { %8981 = vmatprep.subr.mxu0 %v14817_v0  ;;  %8763 = vmatmul.mubr.msk.f32.vlgmr.msra.gmra.mrb[0].mxu1 %vm324_vm1, %v10373_v3  ;;  %v184_v13 = vrot.slane %v32_v10, 1  ;;  %v186_v16 = vrot.slane %v33_v14, 1  ;;  %v188_v19 = vrot.slane %v34_v17, 1  ;;  %v35_v20 = vld [vmem:[%s14809_s0 + $0x30] sm:$0xff]  ;;  %v36_v23 = vld [vmem:[%s14809_s0 + $0x38] sm:$0xff]  ;;  %v37_v26 = vld [vmem:[%s14809_s0 + $0x40] sm:$0xff] }
   0x5   :  { %v181_v11 = vsel %vm178_vm3, %v179_v5, %v180_v7  ;;  %8765 = vmatprep.mubr.msk.f32.mxu1 %vm10315_vm2, %v14817_v0  ;;  %v183_v12 = vsel %vm178_vm3, %v180_v7, %v182_v8  ;;  %v190_v22 = vrot.slane %v35_v20, 1  ;;  %v192_v25 = vrot.slane %v36_v23, 1  ;;  %v38_v29 = vld [vmem:[%s14809_s0 + $0x48] sm:$0xff]  ;;  %v39_v32 = vld [vmem:[%s14809_s0 + $0x50] sm:$0xff]  ;;  %v40_v35 = vld [vmem:[%s14809_s0 + $0x58] sm:$0xff] }
   0x6   :  { %8542 = vmatmul.mubr.msk.f32.vlgmr.msra.gmra.mrb[0].mxu0 %vm324_vm1, %v181_v11  ;;  %v185_v15 = vsel %vm178_vm3, %v182_v8, %v184_v13  ;;  %v187_v18 = vsel %vm178_vm3, %v184_v13, %v186_v16  ;;  %v189_v21 = vsel %vm178_vm3, %v186_v16, %v188_v19  ;;  %v194_v28 = vrot.slane %v37_v26, 1  ;;  %v41_v38 = vld [vmem:[%s14809_s0 + $0x60] sm:$0xff]  ;;  %v42_v41 = vld [vmem:[%s14809_s0 + $0x68] sm:$0xff]  ;;  %v43_v44 = vld [vmem:[%s14809_s0 + $0x70] sm:$0xff] }
   0x7   :  { %8982 = vmatpush3.msk.msra.mxu0 %vm471_vm0, %v7434_v9  ;;  %8544 = vmatprep.mubr.msk.f32.mxu0 %vm10315_vm2, %v14817_v0  ;;  %v191_v24 = vsel %vm178_vm3, %v188_v19, %v190_v22  ;;  %v193_v27 = vsel %vm178_vm3, %v190_v22, %v192_v25  ;;  %v196_v31 = vrot.slane %v38_v29, 1  ;;  %v198_v34 = vrot.slane %v39_v32, 1  ;;  %v44_v47 = vld [vmem:[%s14809_s0 + $0x78] sm:$0xff]  ;;  %v45_v50 = vld [vmem:[%s14809_s0 + $0x80] sm:$0xff]  ;;  %v46_v53 = vld [vmem:[%s14809_s0 + $0x88] sm:$0xff] }
   0x8   :  { %8766 = vmatmul.mubr.msk.f32.gmra.mrb[2].mxu1 %vm324_vm1, %v10381_v4  ;;  %v195_v30 = vsel %vm178_vm3, %v192_v25, %v194_v28  ;;  %v200_v37 = vrot.slane %v40_v35, 1  ;;  %v202_v40 = vrot.slane %v41_v38, 1  ;;  %v204_v43 = vrot.slane %v42_v41, 1  ;;  %v47_v56 = vld [vmem:[%s14809_s0 + $0x90] sm:$0xff]  ;;  %v48_v59 = vld [vmem:[%s14809_s0 + $0x98] sm:$0xff]  ;;  %v49_v62 = vld [vmem:[%s14809_s0 + $0xa0] sm:$0xff] }
   0x9   :  { %8768 = vmatprep.mubr.msk.f32.mxu1 %vm10315_vm2, %v14817_v0  ;;  %v197_v33 = vsel %vm178_vm3, %v194_v28, %v196_v31  ;;  %v199_v36 = vsel %vm178_vm3, %v196_v31, %v198_v34  ;;  %v206_v46 = vrot.slane %v43_v44, 1  ;;  %v208_v49 = vrot.slane %v44_v47, 1  ;;  %v50_v2 = vld [vmem:[%s14809_s0 + $0xa8] sm:$0xff]  ;;  %v51_v7 = vld [vmem:[%s14809_s0 + $0xb0] sm:$0xff]  ;;  %v53_v13 = vld [vmem:[%s14809_s0 + $0xc0] sm:$0xff] }
   0xa   :  { %8545 = vmatmul.mubr.msk.f32.gmra.mrb[2].mxu0 %vm324_vm1, %v183_v12  ;;  %v201_v39 = vsel %vm178_vm3, %v198_v34, %v200_v37  ;;  %v203_v42 = vsel %vm178_vm3, %v200_v37, %v202_v40  ;;  %v205_v45 = vsel %vm178_vm3, %v202_v40, %v204_v43  ;;  %v210_v52 = vrot.slane %v45_v50, 1  ;;  %v54_v16 = vld [vmem:[%s14809_s0 + $0xc8] sm:$0xff]  ;;  %v55_v19 = vld [vmem:[%s14809_s0 + $0xd0] sm:$0xff]  ;;  %v56_v22 = vld [vmem:[%s14809_s0 + $0xd8] sm:$0xff] }
   0xb   :  { %8547 = vmatprep.mubr.msk.f32.mxu0 %vm10315_vm2, %v14817_v0  ;;  %v207_v48 = vsel %vm178_vm3, %v204_v43, %v206_v46  ;;  %v209_v51 = vsel %vm178_vm3, %v206_v46, %v208_v49  ;;  %v212_v55 = vrot.slane %v46_v53, 1  ;;  %v214_v58 = vrot.slane %v47_v56, 1  ;;  %v57_v25 = vld [vmem:[%s14809_s0 + $0xe0] sm:$0xff]  ;;  %v58_v28 = vld [vmem:[%s14809_s0 + $0xe8] sm:$0xff]  ;;  %v59_v31 = vld [vmem:[%s14809_s0 + $0xf0] sm:$0xff] }
   0xc   :  { %8769 = vmatmul.mubr.msk.f32.gmra.mrb[4].mxu1 %vm324_vm1, %v31_v6  ;;  %v211_v54 = vsel %vm178_vm3, %v208_v49, %v210_v52  ;;  %v216_v61 = vrot.slane %v48_v59, 1  ;;  %v218_v1 = vrot.slane %v49_v62, 1  ;;  %v220_v6 = vrot.slane %v50_v2, 1  ;;  %v60_v34 = vld [vmem:[%s14809_s0 + $0xf8] sm:$0xff]  ;;  %v61_v37 = vld [vmem:[%s14809_s0 + $0x100] sm:$0xff]  ;;  %v62_v40 = vld [vmem:[%s14809_s0 + $0x108] sm:$0xff] }
   0xd   :  { %8771 = vmatprep.mubr.msk.f32.mxu1 %vm10315_vm2, %v14817_v0  ;;  %v213_v57 = vsel %vm178_vm3, %v210_v52, %v212_v55  ;;  %v215_v60 = vsel %vm178_vm3, %v212_v55, %v214_v58  ;;  %v222_v9 = vrot.slane %v51_v7, 1  ;;  %v63_v43 = vld [vmem:[%s14809_s0 + $0x110] sm:$0xff]  ;;  %v64_v46 = vld [vmem:[%s14809_s0 + $0x118] sm:$0xff]  ;;  %v65_v49 = vld [vmem:[%s14809_s0 + $0x120] sm:$0xff] }
   0xe   :  { %8548 = vmatmul.mubr.msk.f32.gmra.mrb[4].mxu0 %vm324_vm1, %v185_v15  ;;  %v217_v63 = vsel %vm178_vm3, %v214_v58, %v216_v61  ;;  %v219_v5 = vsel %vm178_vm3, %v216_v61, %v218_v1  ;;  %v221_v8 = vsel %vm178_vm3, %v218_v1, %v220_v6  ;;  %v226_v15 = vrot.slane %v53_v13, 1  ;;  %v66_v52 = vld [vmem:[%s14809_s0 + $0x128] sm:$0xff]  ;;  %v67_v55 = vld [vmem:[%s14809_s0 + $0x130] sm:$0xff]  ;;  %v68_v58 = vld [vmem:[%s14809_s0 + $0x138] sm:$0xff] }
   0xf   :  { %8550 = vmatprep.mubr.msk.f32.mxu0 %vm10315_vm2, %v14817_v0  ;;  %v223_v11 = vsel %vm178_vm3, %v220_v6, %v222_v9  ;;  %v69_v61 = vld [vmem:[%s14809_s0 + $0x140] sm:$0xff]  ;;  %v70_v1 = vld [vmem:[%s14809_s0 + $0x148] sm:$0xff]  ;;  %v71_v6 = vld [vmem:[%s14809_s0 + $0x150] sm:$0xff] }
  0x10   :  { %8772 = vmatmul.mubr.msk.f32.gmra.mrb[6].mxu1 %vm324_vm1, %v32_v10  ;;  %v52_v10 = vld [vmem:[%s14809_s0 + $0xb8] sm:$0xff] }
  0x11   :  { %8774 = vmatprep.mubr.msk.f32.mxu1 %vm10315_vm2, %v14817_v0  ;;  %v224_v12 = vrot.slane %v52_v10, 1 }
  0x12   :  { %8551 = vmatmul.mubr.msk.f32.gmra.mrb[6].mxu0 %vm324_vm1, %v187_v18  ;;  %v228_v18 = vrot.slane %v54_v16, 1 }
  0x13   :  { %8553 = vmatprep.mubr.msk.f32.mxu0 %vm10315_vm2, %v14817_v0 }
  0x14   :  { %8775 = vmatmul.mubr.msk.f32.gmra.mrb[8].mxu1 %vm324_vm1, %v33_v14  ;;  %v225_v14 = vsel %vm178_vm3, %v222_v9, %v224_v12  ;;  %v72_v9 = vld [vmem:[%s14809_s0 + $0x158] sm:$0xff] }
  0x15   :  { %8777 = vmatprep.mubr.msk.f32.mxu1 %vm10315_vm2, %v14817_v0 }
  0x16   :  { %8554 = vmatmul.mubr.msk.f32.gmra.mrb[8].mxu0 %vm324_vm1, %v189_v21  ;;  %v230_v21 = vrot.slane %v55_v19, 1 }
  0x17   :  { %8556 = vmatprep.mubr.msk.f32.mxu0 %vm10315_vm2, %v14817_v0 }
  0x18   :  { %8778 = vmatmul.mubr.msk.f32.gmra.mrb[10].mxu1 %vm324_vm1, %v34_v17  ;;  %v227_v17 = vsel %vm178_vm3, %v224_v12, %v226_v15 }
  0x19   :  { %8780 = vmatprep.mubr.msk.f32.mxu1 %vm10315_vm2, %v14817_v0 }
  0x1a   :  { %8557 = vmatmul.mubr.msk.f32.gmra.mrb[10].mxu0 %vm324_vm1, %v191_v24  ;;  %v232_v24 = vrot.slane %v56_v22, 1 }
  0x1b   :  { %8559 = vmatprep.mubr.msk.f32.mxu0 %vm10315_vm2, %v14817_v0 }
  0x1c   :  { %8781 = vmatmul.mubr.msk.f32.gmra.mrb[12].mxu1 %vm324_vm1, %v35_v20  ;;  %v229_v20 = vsel %vm178_vm3, %v226_v15, %v228_v18 }
  0x1d   :  { %8783 = vmatprep.mubr.msk.f32.mxu1 %vm10315_vm2, %v14817_v0 }
  0x1e   :  { %8560 = vmatmul.mubr.msk.f32.gmra.mrb[12].mxu0 %vm324_vm1, %v193_v27  ;;  %v234_v27 = vrot.slane %v57_v25, 1 }
  0x1f   :  { %8562 = vmatprep.mubr.msk.f32.mxu0 %vm10315_vm2, %v14817_v0 }
  0x20   :  { %8784 = vmatmul.mubr.msk.f32.gmra.mrb[14].mxu1 %vm324_vm1, %v36_v23  ;;  %v231_v23 = vsel %vm178_vm3, %v228_v18, %v230_v21 }
  0x21   :  { %8786 = vmatprep.mubr.msk.f32.mxu1 %vm10315_vm2, %v14817_v0 }
  0x22   :  { %8563 = vmatmul.mubr.msk.f32.gmra.mrb[14].mxu0 %vm324_vm1, %v195_v30  ;;  %v236_v30 = vrot.slane %v58_v28, 1 }
  0x23   :  { %8565 = vmatprep.mubr.msk.f32.mxu0 %vm10315_vm2, %v14817_v0 }
  0x24   :  { %8787 = vmatmul.mubr.msk.f32.gmra.mrb[16].mxu1 %vm324_vm1, %v37_v26  ;;  %v233_v26 = vsel %vm178_vm3, %v230_v21, %v232_v24 }
  0x25   :  { %8789 = vmatprep.mubr.msk.f32.mxu1 %vm10315_vm2, %v14817_v0 }
  0x26   :  { %8566 = vmatmul.mubr.msk.f32.gmra.mrb[16].mxu0 %vm324_vm1, %v197_v33  ;;  %v238_v33 = vrot.slane %v59_v31, 1 }
  0x27   :  { %8568 = vmatprep.mubr.msk.f32.mxu0 %vm10315_vm2, %v14817_v0 }
  0x28   :  { %8790 = vmatmul.mubr.msk.f32.gmra.mrb[18].mxu1 %vm324_vm1, %v38_v29  ;;  %v235_v29 = vsel %vm178_vm3, %v232_v24, %v234_v27 }
  0x29   :  { %8792 = vmatprep.mubr.msk.f32.mxu1 %vm10315_vm2, %v14817_v0 }
  0x2a   :  { %8569 = vmatmul.mubr.msk.f32.gmra.mrb[18].mxu0 %vm324_vm1, %v199_v36  ;;  %v240_v36 = vrot.slane %v60_v34, 1 }
  0x2b   :  { %8571 = vmatprep.mubr.msk.f32.mxu0 %vm10315_vm2, %v14817_v0 }
  0x2c   :  { %8793 = vmatmul.mubr.msk.f32.gmra.mrb[20].mxu1 %vm324_vm1, %v39_v32  ;;  %v237_v32 = vsel %vm178_vm3, %v234_v27, %v236_v30 }
  0x2d   :  { %8795 = vmatprep.mubr.msk.f32.mxu1 %vm10315_vm2, %v14817_v0 }
  0x2e   :  { %8572 = vmatmul.mubr.msk.f32.gmra.mrb[20].mxu0 %vm324_vm1, %v201_v39  ;;  %v242_v39 = vrot.slane %v61_v37, 1 }
  0x2f   :  { %8574 = vmatprep.mubr.msk.f32.mxu0 %vm10315_vm2, %v14817_v0 }
  0x30   :  { %8796 = vmatmul.mubr.msk.f32.gmra.mrb[22].mxu1 %vm324_vm1, %v40_v35  ;;  %v239_v35 = vsel %vm178_vm3, %v236_v30, %v238_v33 }
  0x31   :  { %8798 = vmatprep.mubr.msk.f32.mxu1 %vm10315_vm2, %v14817_v0 }
  0x32   :  { %8575 = vmatmul.mubr.msk.f32.gmra.mrb[22].mxu0 %vm324_vm1, %v203_v42  ;;  %v244_v42 = vrot.slane %v62_v40, 1 }
  0x33   :  { %8577 = vmatprep.mubr.msk.f32.mxu0 %vm10315_vm2, %v14817_v0 }
  0x34   :  { %8799 = vmatmul.mubr.msk.f32.gmra.mrb[24].mxu1 %vm324_vm1, %v41_v38  ;;  %v241_v38 = vsel %vm178_vm3, %v238_v33, %v240_v36 }
  0x35   :  { %8801 = vmatprep.mubr.msk.f32.mxu1 %vm10315_vm2, %v14817_v0 }
  0x36   :  { %8578 = vmatmul.mubr.msk.f32.gmra.mrb[24].mxu0 %vm324_vm1, %v205_v45  ;;  %v246_v45 = vrot.slane %v63_v43, 1 }
  0x37   :  { %8580 = vmatprep.mubr.msk.f32.mxu0 %vm10315_vm2, %v14817_v0 }
  0x38   :  { %8802 = vmatmul.mubr.msk.f32.gmra.mrb[26].mxu1 %vm324_vm1, %v42_v41  ;;  %v243_v41 = vsel %vm178_vm3, %v240_v36, %v242_v39 }
  0x39   :  { %8804 = vmatprep.mubr.msk.f32.mxu1 %vm10315_vm2, %v14817_v0 }
  0x3a   :  { %8581 = vmatmul.mubr.msk.f32.gmra.mrb[26].mxu0 %vm324_vm1, %v207_v48  ;;  %v248_v48 = vrot.slane %v64_v46, 1 }
  0x3b   :  { %8583 = vmatprep.mubr.msk.f32.mxu0 %vm10315_vm2, %v14817_v0 }
  0x3c   :  { %8805 = vmatmul.mubr.msk.f32.gmra.mrb[28].mxu1 %vm324_vm1, %v43_v44  ;;  %v245_v44 = vsel %vm178_vm3, %v242_v39, %v244_v42 }
  0x3d   :  { %8807 = vmatprep.mubr.msk.f32.mxu1 %vm10315_vm2, %v14817_v0 }
  0x3e   :  { %8584 = vmatmul.mubr.msk.f32.gmra.mrb[28].mxu0 %vm324_vm1, %v209_v51  ;;  %v250_v51 = vrot.slane %v65_v49, 1 }
  0x3f   :  { %8586 = vmatprep.mubr.msk.f32.mxu0 %vm10315_vm2, %v14817_v0 }
  0x40   :  { %8808 = vmatmul.mubr.msk.f32.gmra.mrb[30].mxu1 %vm324_vm1, %v44_v47  ;;  %v247_v47 = vsel %vm178_vm3, %v244_v42, %v246_v45 }
  0x41   :  { %8810 = vmatprep.mubr.msk.f32.mxu1 %vm10315_vm2, %v14817_v0 }
  0x42   :  { %8587 = vmatmul.mubr.msk.f32.gmra.mrb[30].mxu0 %vm324_vm1, %v211_v54  ;;  %v252_v54 = vrot.slane %v66_v52, 1 }
  0x43   :  { %8589 = vmatprep.mubr.msk.f32.mxu0 %vm10315_vm2, %v14817_v0 }
  0x44   :  { %8811 = vmatmul.mubr.msk.f32.gmra.mrb[32].mxu1 %vm324_vm1, %v45_v50  ;;  %v249_v50 = vsel %vm178_vm3, %v246_v45, %v248_v48 }
  0x45   :  { %8813 = vmatprep.mubr.msk.f32.mxu1 %vm10315_vm2, %v14817_v0 }
  0x46   :  { %8590 = vmatmul.mubr.msk.f32.gmra.mrb[32].mxu0 %vm324_vm1, %v213_v57  ;;  %v254_v57 = vrot.slane %v67_v55, 1 }
  0x47   :  { %8592 = vmatprep.mubr.msk.f32.mxu0 %vm10315_vm2, %v14817_v0 }
  0x48   :  { %8814 = vmatmul.mubr.msk.f32.gmra.mrb[34].mxu1 %vm324_vm1, %v46_v53  ;;  %v251_v53 = vsel %vm178_vm3, %v248_v48, %v250_v51 }
  0x49   :  { %8816 = vmatprep.mubr.msk.f32.mxu1 %vm10315_vm2, %v14817_v0 }
  0x4a   :  { %8593 = vmatmul.mubr.msk.f32.gmra.mrb[34].mxu0 %vm324_vm1, %v215_v60  ;;  %v256_v60 = vrot.slane %v68_v58, 1 }
  0x4b   :  { %8595 = vmatprep.mubr.msk.f32.mxu0 %vm10315_vm2, %v14817_v0 }
  0x4c   :  { %8817 = vmatmul.mubr.msk.f32.gmra.mrb[36].mxu1 %vm324_vm1, %v47_v56  ;;  %v253_v56 = vsel %vm178_vm3, %v250_v51, %v252_v54 }
  0x4d   :  { %8819 = vmatprep.mubr.msk.f32.mxu1 %vm10315_vm2, %v14817_v0 }
  0x4e   :  { %8596 = vmatmul.mubr.msk.f32.gmra.mrb[36].mxu0 %vm324_vm1, %v217_v63  ;;  %v258_v63 = vrot.slane %v69_v61, 1 }
  0x4f   :  { %8598 = vmatprep.mubr.msk.f32.mxu0 %vm10315_vm2, %v14817_v0 }
  0x50   :  { %8820 = vmatmul.mubr.msk.f32.gmra.mrb[38].mxu1 %vm324_vm1, %v48_v59  ;;  %v255_v59 = vsel %vm178_vm3, %v252_v54, %v254_v57 }
  0x51   :  { %8822 = vmatprep.mubr.msk.f32.mxu1 %vm10315_vm2, %v14817_v0 }
  0x52   :  { %8599 = vmatmul.mubr.msk.f32.gmra.mrb[38].mxu0 %vm324_vm1, %v219_v5  ;;  %v260_v5 = vrot.slane %v70_v1, 1 }
  0x53   :  { %8601 = vmatprep.mubr.msk.f32.mxu0 %vm10315_vm2, %v14817_v0 }
  0x54   :  { %8823 = vmatmul.mubr.msk.f32.gmra.mrb[40].mxu1 %vm324_vm1, %v49_v62  ;;  %v257_v62 = vsel %vm178_vm3, %v254_v57, %v256_v60 }
  0x55   :  { %8825 = vmatprep.mubr.msk.f32.mxu1 %vm10315_vm2, %v14817_v0 }
  0x56   :  { %8602 = vmatmul.mubr.msk.f32.gmra.mrb[40].mxu0 %vm324_vm1, %v221_v8  ;;  %v262_v8 = vrot.slane %v71_v6, 1 }
  0x57   :  { %8604 = vmatprep.mubr.msk.f32.mxu0 %vm10315_vm2, %v14817_v0 }
  0x58   :  { %8826 = vmatmul.mubr.msk.f32.gmra.mrb[42].mxu1 %vm324_vm1, %v50_v2  ;;  %v259_v2 = vsel %vm178_vm3, %v256_v60, %v258_v63  ;;  %v263_v12 = vsel %vm178_vm3, %v260_v5, %v262_v8  ;;  %v86_v60 = vld [vmem:[%s14809_s0 + $0x1c8] sm:$0xff] }
  0x59   :  { %8828 = vmatprep.mubr.msk.f32.mxu1 %vm10315_vm2, %v14817_v0 }
  0x5a   :  { %8605 = vmatmul.mubr.msk.f32.gmra.mrb[42].mxu0 %vm324_vm1, %v223_v11  ;;  %v1488_v11 = vrot.slane %v10381_v4, 2  ;;  %v2813_v4 = vld [vmem:[%s14811_s7 + $0x58] sm:$0xff] }
  0x5b   :  { %8607 = vmatprep.mubr.msk.f32.mxu0 %vm10315_vm2, %v14817_v0 }
  0x5c   :  { %8829 = vmatmul.mubr.msk.f32.gmra.mrb[44].mxu1 %vm324_vm1, %v51_v7  ;;  %v261_v7 = vsel %vm178_vm3, %v258_v63, %v260_v5  ;;  %v292_v5 = vrot.slane %v86_v60, 1 }
  0x5d   :  { %8831 = vmatprep.mubr.msk.f32.mxu1 %vm10315_vm2, %v14817_v0 }
  0x5e   :  { %8608 = vmatmul.mubr.msk.f32.gmra.mrb[44].mxu0 %vm324_vm1, %v225_v14  ;;  %v73_v14 = vld [vmem:[%s14809_s0 + $0x160] sm:$0xff] }
  0x5f   :  { %8610 = vmatprep.mubr.msk.f32.mxu0 %vm10315_vm2, %v14817_v0 }
  0x60   :  { %8832 = vmatmul.mubr.msk.f32.gmra.mrb[46].mxu1 %vm324_vm1, %v52_v10  ;;  %v1487_v10 = vrot.slane %v10373_v3, 2 }
  0x61   :  { %8834 = vmatprep.mubr.msk.f32.mxu1 %vm10315_vm2, %v14817_v0 }
  0x62   :  { %8611 = vmatmul.mubr.msk.f32.gmra.mrb[46].mxu0 %vm324_vm1, %v227_v17  ;;  %v10820_v3 = vsel %vm1486_vm4, %v1487_v10, %v1488_v11  ;;  %v74_v17 = vld [vmem:[%s14809_s0 + $0x168] sm:$0xff] }
  0x63   :  { %8613 = vmatprep.mubr.msk.f32.mxu0 %vm10315_vm2, %v14817_v0 }
  0x64   :  { %8835 = vmatmul.mubr.msk.f32.gmra.mrb[48].mxu1 %vm324_vm1, %v53_v13  ;;  %v264_v13 = vrot.slane %v72_v9, 1 }
  0x65   :  { %8837 = vmatprep.mubr.msk.f32.mxu1 %vm10315_vm2, %v14817_v0 }
  0x66   :  { %8614 = vmatmul.mubr.msk.f32.gmra.mrb[48].mxu0 %vm324_vm1, %v229_v20  ;;  %v265_v15 = vsel %vm178_vm3, %v262_v8, %v264_v13  ;;  %v75_v20 = vld [vmem:[%s14809_s0 + $0x170] sm:$0xff] }
  0x67   :  { %8616 = vmatprep.mubr.msk.f32.mxu0 %vm10315_vm2, %v14817_v0 }
  0x68   :  { %8838 = vmatmul.mubr.msk.f32.gmra.mrb[50].mxu1 %vm324_vm1, %v54_v16  ;;  %v266_v16 = vrot.slane %v73_v14, 1 }
  0x69   :  { %8840 = vmatprep.mubr.msk.f32.mxu1 %vm10315_vm2, %v14817_v0 }
  0x6a   :  { %8617 = vmatmul.mubr.msk.f32.gmra.mrb[50].mxu0 %vm324_vm1, %v231_v23  ;;  %v267_v18 = vsel %vm178_vm3, %v264_v13, %v266_v16  ;;  %v76_v23 = vld [vmem:[%s14809_s0 + $0x178] sm:$0xff] }
  0x6b   :  { %8619 = vmatprep.mubr.msk.f32.mxu0 %vm10315_vm2, %v14817_v0 }
  0x6c   :  { %8841 = vmatmul.mubr.msk.f32.gmra.mrb[52].mxu1 %vm324_vm1, %v55_v19  ;;  %v268_v19 = vrot.slane %v74_v17, 1 }
  0x6d   :  { %8843 = vmatprep.mubr.msk.f32.mxu1 %vm10315_vm2, %v14817_v0 }
  0x6e   :  { %8620 = vmatmul.mubr.msk.f32.gmra.mrb[52].mxu0 %vm324_vm1, %v233_v26  ;;  %v269_v21 = vsel %vm178_vm3, %v266_v16, %v268_v19  ;;  %v77_v26 = vld [vmem:[%s14809_s0 + $0x180] sm:$0xff]  ;;  %v88_v16 = vld [vmem:[%s14809_s0 + $0x1d8] sm:$0xff] }
  0x6f   :  { %8622 = vmatprep.mubr.msk.f32.mxu0 %vm10315_vm2, %v14817_v0 }
  0x70   :  { %8844 = vmatmul.mubr.msk.f32.gmra.mrb[54].mxu1 %vm324_vm1, %v56_v22  ;;  %v270_v22 = vrot.slane %v75_v20, 1 }
  0x71   :  { %8846 = vmatprep.mubr.msk.f32.mxu1 %vm10315_vm2, %v14817_v0 }
  0x72   :  { %8623 = vmatmul.mubr.msk.f32.gmra.mrb[54].mxu0 %vm324_vm1, %v235_v29  ;;  %v271_v24 = vsel %vm178_vm3, %v268_v19, %v270_v22  ;;  %v78_v29 = vld [vmem:[%s14809_s0 + $0x188] sm:$0xff] }
  0x73   :  { %8625 = vmatprep.mubr.msk.f32.mxu0 %vm10315_vm2, %v14817_v0 }
  0x74   :  { %8847 = vmatmul.mubr.msk.f32.gmra.mrb[56].mxu1 %vm324_vm1, %v57_v25  ;;  %v272_v25 = vrot.slane %v76_v23, 1 }
  0x75   :  { %8849 = vmatprep.mubr.msk.f32.mxu1 %vm10315_vm2, %v14817_v0 }
  0x76   :  { %8626 = vmatmul.mubr.msk.f32.gmra.mrb[56].mxu0 %vm324_vm1, %v237_v32  ;;  %v273_v27 = vsel %vm178_vm3, %v270_v22, %v272_v25  ;;  %v79_v32 = vld [vmem:[%s14809_s0 + $0x190] sm:$0xff]  ;;  %v296_v22 = vrot.slane %v88_v16, 1 }
  0x77   :  { %8628 = vmatprep.mubr.msk.f32.mxu0 %vm10315_vm2, %v14817_v0 }
  0x78   :  { %8850 = vmatmul.mubr.msk.f32.gmra.mrb[58].mxu1 %vm324_vm1, %v58_v28  ;;  %v274_v28 = vrot.slane %v77_v26, 1 }
  0x79   :  { %8852 = vmatprep.mubr.msk.f32.mxu1 %vm10315_vm2, %v14817_v0 }
  0x7a   :  { %8629 = vmatmul.mubr.msk.f32.gmra.mrb[58].mxu0 %vm324_vm1, %v239_v35  ;;  %v275_v30 = vsel %vm178_vm3, %v272_v25, %v274_v28  ;;  %v80_v35 = vld [vmem:[%s14809_s0 + $0x198] sm:$0xff] }
  0x7b   :  { %8631 = vmatprep.mubr.msk.f32.mxu0 %vm10315_vm2, %v14817_v0 }
  0x7c   :  { %8853 = vmatmul.mubr.msk.f32.gmra.mrb[60].mxu1 %vm324_vm1, %v59_v31  ;;  %v276_v31 = vrot.slane %v78_v29, 1 }
  0x7d   :  { %8855 = vmatprep.mubr.msk.f32.mxu1 %vm10315_vm2, %v14817_v0 }
  0x7e   :  { %8632 = vmatmul.mubr.msk.f32.gmra.mrb[60].mxu0 %vm324_vm1, %v241_v38  ;;  %v277_v33 = vsel %vm178_vm3, %v274_v28, %v276_v31  ;;  %v81_v38 = vld [vmem:[%s14809_s0 + $0x1a0] sm:$0xff] }
  0x7f   :  { %8634 = vmatprep.mubr.msk.f32.mxu0 %vm10315_vm2, %v14817_v0 }
  0x80   :  { %8856 = vmatmul.mubr.msk.f32.gmra.mrb[62].mxu1 %vm324_vm1, %v60_v34  ;;  %v278_v34 = vrot.slane %v79_v32, 1 }
  0x81   :  { %8858 = vmatprep.mubr.msk.f32.mxu1 %vm10315_vm2, %v14817_v0 }
  0x82   :  { %8635 = vmatmul.mubr.msk.f32.gmra.mrb[62].mxu0 %vm324_vm1, %v243_v41  ;;  %v279_v36 = vsel %vm178_vm3, %v276_v31, %v278_v34  ;;  %v82_v41 = vld [vmem:[%s14809_s0 + $0x1a8] sm:$0xff] }
  0x83   :  { %8637 = vmatprep.mubr.msk.f32.mxu0 %vm10315_vm2, %v14817_v0 }
  0x84   :  { %8859 = vmatmul.mubr.msk.f32.gmra.mrb[64].mxu1 %vm324_vm1, %v61_v37  ;;  %v280_v37 = vrot.slane %v80_v35, 1 }
  0x85   :  { %8861 = vmatprep.mubr.msk.f32.mxu1 %vm10315_vm2, %v14817_v0 }
  0x86   :  { %8638 = vmatmul.mubr.msk.f32.gmra.mrb[64].mxu0 %vm324_vm1, %v245_v44  ;;  %v281_v39 = vsel %vm178_vm3, %v278_v34, %v280_v37  ;;  %v83_v44 = vld [vmem:[%s14809_s0 + $0x1b0] sm:$0xff] }
  0x87   :  { %8640 = vmatprep.mubr.msk.f32.mxu0 %vm10315_vm2, %v14817_v0 }
  0x88   :  { %8862 = vmatmul.mubr.msk.f32.gmra.mrb[66].mxu1 %vm324_vm1, %v62_v40  ;;  %v282_v40 = vrot.slane %v81_v38, 1 }
  0x89   :  { %8864 = vmatprep.mubr.msk.f32.mxu1 %vm10315_vm2, %v14817_v0 }
  0x8a   :  { %8641 = vmatmul.mubr.msk.f32.gmra.mrb[66].mxu0 %vm324_vm1, %v247_v47  ;;  %v283_v42 = vsel %vm178_vm3, %v280_v37, %v282_v40  ;;  %v84_v47 = vld [vmem:[%s14809_s0 + $0x1b8] sm:$0xff] }
  0x8b   :  { %8643 = vmatprep.mubr.msk.f32.mxu0 %vm10315_vm2, %v14817_v0 }
  0x8c   :  { %8865 = vmatmul.mubr.msk.f32.gmra.mrb[68].mxu1 %vm324_vm1, %v63_v43  ;;  %v284_v43 = vrot.slane %v82_v41, 1 }
  0x8d   :  { %8867 = vmatprep.mubr.msk.f32.mxu1 %vm10315_vm2, %v14817_v0 }
  0x8e   :  { %8644 = vmatmul.mubr.msk.f32.gmra.mrb[68].mxu0 %vm324_vm1, %v249_v50  ;;  %v285_v45 = vsel %vm178_vm3, %v282_v40, %v284_v43  ;;  %v288_v50 = vrot.slane %v84_v47, 1  ;;  %v91_v40 = vld [vmem:[%s14809_s0 + $0x1f0] sm:$0xff] }
  0x8f   :  { %8646 = vmatprep.mubr.msk.f32.mxu0 %vm10315_vm2, %v14817_v0 }
  0x90   :  { %8868 = vmatmul.mubr.msk.f32.gmra.mrb[70].mxu1 %vm324_vm1, %v64_v46  ;;  %v286_v46 = vrot.slane %v83_v44, 1 }
  0x91   :  { %8870 = vmatprep.mubr.msk.f32.mxu1 %vm10315_vm2, %v14817_v0 }
  0x92   :  { %8647 = vmatmul.mubr.msk.f32.gmra.mrb[70].mxu0 %vm324_vm1, %v251_v53  ;;  %v289_v57 = vsel %vm178_vm3, %v286_v46, %v288_v50 }
  0x93   :  { %8649 = vmatprep.mubr.msk.f32.mxu0 %vm10315_vm2, %v14817_v0 }
  0x94   :  { %8871 = vmatmul.mubr.msk.f32.gmra.mrb[72].mxu1 %vm324_vm1, %v65_v49  ;;  %v287_v49 = vsel %vm178_vm3, %v284_v43, %v286_v46  ;;  %v302_v46 = vrot.slane %v91_v40, 1 }
  0x95   :  { %8873 = vmatprep.mubr.msk.f32.mxu1 %vm10315_vm2, %v14817_v0 }
  0x96   :  { %8650 = vmatmul.mubr.msk.f32.gmra.mrb[72].mxu0 %vm324_vm1, %v253_v56 }
  0x97   :  { %8652 = vmatprep.mubr.msk.f32.mxu0 %vm10315_vm2, %v14817_v0 }
  0x98   :  { %8874 = vmatmul.mubr.msk.f32.gmra.mrb[74].mxu1 %vm324_vm1, %v66_v52  ;;  %v85_v52 = vld [vmem:[%s14809_s0 + $0x1c0] sm:$0xff] }
  0x99   :  { %8876 = vmatprep.mubr.msk.f32.mxu1 %vm10315_vm2, %v14817_v0 }
  0x9a   :  { %8653 = vmatmul.mubr.msk.f32.gmra.mrb[74].mxu0 %vm324_vm1, %v255_v59 }
  0x9b   :  { %8655 = vmatprep.mubr.msk.f32.mxu0 %vm10315_vm2, %v14817_v0 }
  0x9c   :  { %8877 = vmatmul.mubr.msk.f32.gmra.mrb[76].mxu1 %vm324_vm1, %v67_v55 }
  0x9d   :  { %8879 = vmatprep.mubr.msk.f32.mxu1 %vm10315_vm2, %v14817_v0 }
  0x9e   :  { %8656 = vmatmul.mubr.msk.f32.gmra.mrb[76].mxu0 %vm324_vm1, %v257_v62 }
  0x9f   :  { %8658 = vmatprep.mubr.msk.f32.mxu0 %vm10315_vm2, %v14817_v0 }
  0xa0   :  { %8880 = vmatmul.mubr.msk.f32.gmra.mrb[78].mxu1 %vm324_vm1, %v68_v58  ;;  %v290_v58 = vrot.slane %v85_v52, 1 }
  0xa1   :  { %8882 = vmatprep.mubr.msk.f32.mxu1 %vm10315_vm2, %v14817_v0 }
  0xa2   :  { %8659 = vmatmul.mubr.msk.f32.gmra.mrb[78].mxu0 %vm324_vm1, %v259_v2  ;;  %v291_v2 = vsel %vm178_vm3, %v288_v50, %v290_v58  ;;  %v293_v13 = vsel %vm178_vm3, %v290_v58, %v292_v5 }
  0xa3   :  { %8661 = vmatprep.mubr.msk.f32.mxu0 %vm10315_vm2, %v14817_v0 }
  0xa4   :  { %8883 = vmatmul.mubr.msk.f32.gmra.mrb[80].mxu1 %vm324_vm1, %v69_v61 }
  0xa5   :  { %8885 = vmatprep.mubr.msk.f32.mxu1 %vm10315_vm2, %v14817_v0 }
  0xa6   :  { %8662 = vmatmul.mubr.msk.f32.gmra.mrb[80].mxu0 %vm324_vm1, %v261_v7  ;;  %v87_v7 = vld [vmem:[%s14809_s0 + $0x1d0] sm:$0xff] }
  0xa7   :  { %8664 = vmatprep.mubr.msk.f32.mxu0 %vm10315_vm2, %v14817_v0 }
  0xa8   :  { %8886 = vmatmul.mubr.msk.f32.gmra.mrb[82].mxu1 %vm324_vm1, %v70_v1 }
  0xa9   :  { %8888 = vmatprep.mubr.msk.f32.mxu1 %vm10315_vm2, %v14817_v0 }
  0xaa   :  { %8665 = vmatmul.mubr.msk.f32.gmra.mrb[82].mxu0 %vm324_vm1, %v263_v12 }
  0xab   :  { %8667 = vmatprep.mubr.msk.f32.mxu0 %vm10315_vm2, %v14817_v0 }
  0xac   :  { %8889 = vmatmul.mubr.msk.f32.gmra.mrb[84].mxu1 %vm324_vm1, %v71_v6 }
  0xad   :  { %8891 = vmatprep.mubr.msk.f32.mxu1 %vm10315_vm2, %v14817_v0 }
  0xae   :  { %8668 = vmatmul.mubr.msk.f32.gmra.mrb[84].mxu0 %vm324_vm1, %v265_v15 }
  0xaf   :  { %8670 = vmatprep.mubr.msk.f32.mxu0 %vm10315_vm2, %v14817_v0 }
  0xb0   :  { %8892 = vmatmul.mubr.msk.f32.gmra.mrb[86].mxu1 %vm324_vm1, %v72_v9 }
  0xb1   :  { %8894 = vmatprep.mubr.msk.f32.mxu1 %vm10315_vm2, %v14817_v0 }
  0xb2   :  { %8671 = vmatmul.mubr.msk.f32.gmra.mrb[86].mxu0 %vm324_vm1, %v267_v18 }
  0xb3   :  { %8673 = vmatprep.mubr.msk.f32.mxu0 %vm10315_vm2, %v14817_v0 }
  0xb4   :  { %8895 = vmatmul.mubr.msk.f32.gmra.mrb[88].mxu1 %vm324_vm1, %v73_v14  ;;  %v294_v14 = vrot.slane %v87_v7, 1 }
  0xb5   :  { %8897 = vmatprep.mubr.msk.f32.mxu1 %vm10315_vm2, %v14817_v0 }
  0xb6   :  { %8674 = vmatmul.mubr.msk.f32.gmra.mrb[88].mxu0 %vm324_vm1, %v269_v21  ;;  %v295_v21 = vsel %vm178_vm3, %v292_v5, %v294_v14  ;;  %v94_v5 = vld [vmem:[%s14809_s0 + $0x208] sm:$0xff] }
  0xb7   :  { %8676 = vmatprep.mubr.msk.f32.mxu0 %vm10315_vm2, %v14817_v0 }
  0xb8   :  { %8898 = vmatmul.mubr.msk.f32.gmra.mrb[90].mxu1 %vm324_vm1, %v74_v17 }
  0xb9   :  { %8900 = vmatprep.mubr.msk.f32.mxu1 %vm10315_vm2, %v14817_v0 }
  0xba   :  { %8677 = vmatmul.mubr.msk.f32.gmra.mrb[90].mxu0 %vm324_vm1, %v271_v24  ;;  %v89_v24 = vld [vmem:[%s14809_s0 + $0x1e0] sm:$0xff] }
  0xbb   :  { %8679 = vmatprep.mubr.msk.f32.mxu0 %vm10315_vm2, %v14817_v0 }
  0xbc   :  { %8901 = vmatmul.mubr.msk.f32.gmra.mrb[92].mxu1 %vm324_vm1, %v75_v20 }
  0xbd   :  { %8903 = vmatprep.mubr.msk.f32.mxu1 %vm10315_vm2, %v14817_v0 }
  0xbe   :  { %8680 = vmatmul.mubr.msk.f32.gmra.mrb[92].mxu0 %vm324_vm1, %v273_v27 }
  0xbf   :  { %8682 = vmatprep.mubr.msk.f32.mxu0 %vm10315_vm2, %v14817_v0 }
  0xc0   :  { %8904 = vmatmul.mubr.msk.f32.gmra.mrb[94].mxu1 %vm324_vm1, %v76_v23 }
  0xc1   :  { %8906 = vmatprep.mubr.msk.f32.mxu1 %vm10315_vm2, %v14817_v0 }
  0xc2   :  { %8683 = vmatmul.mubr.msk.f32.gmra.mrb[94].mxu0 %vm324_vm1, %v275_v30  ;;  %v298_v30 = vrot.slane %v89_v24, 1 }
  0xc3   :  { %8685 = vmatprep.mubr.msk.f32.mxu0 %vm10315_vm2, %v14817_v0 }
  0xc4   :  { %8907 = vmatmul.mubr.msk.f32.gmra.mrb[96].mxu1 %vm324_vm1, %v77_v26  ;;  %v299_v37 = vsel %vm178_vm3, %v296_v22, %v298_v30 }
  0xc5   :  { %8909 = vmatprep.mubr.msk.f32.mxu1 %vm10315_vm2, %v14817_v0 }
  0xc6   :  { %8686 = vmatmul.mubr.msk.f32.gmra.mrb[96].mxu0 %vm324_vm1, %v277_v33 }
  0xc7   :  { %8688 = vmatprep.mubr.msk.f32.mxu0 %vm10315_vm2, %v14817_v0 }
  0xc8   :  { %8910 = vmatmul.mubr.msk.f32.gmra.mrb[98].mxu1 %vm324_vm1, %v78_v29  ;;  %v297_v29 = vsel %vm178_vm3, %v294_v14, %v296_v22 }
  0xc9   :  { %8912 = vmatprep.mubr.msk.f32.mxu1 %vm10315_vm2, %v14817_v0 }
  0xca   :  { %8689 = vmatmul.mubr.msk.f32.gmra.mrb[98].mxu0 %vm324_vm1, %v279_v36 }
  0xcb   :  { %8691 = vmatprep.mubr.msk.f32.mxu0 %vm10315_vm2, %v14817_v0 }
  0xcc   :  { %8913 = vmatmul.mubr.msk.f32.gmra.mrb[100].mxu1 %vm324_vm1, %v79_v32  ;;  %v90_v32 = vld [vmem:[%s14809_s0 + $0x1e8] sm:$0xff] }
  0xcd   :  { %8915 = vmatprep.mubr.msk.f32.mxu1 %vm10315_vm2, %v14817_v0 }
  0xce   :  { %8692 = vmatmul.mubr.msk.f32.gmra.mrb[100].mxu0 %vm324_vm1, %v281_v39 }
  0xcf   :  { %8694 = vmatprep.mubr.msk.f32.mxu0 %vm10315_vm2, %v14817_v0 }
  0xd0   :  { %8916 = vmatmul.mubr.msk.f32.gmra.mrb[102].mxu1 %vm324_vm1, %v80_v35 }
  0xd1   :  { %8918 = vmatprep.mubr.msk.f32.mxu1 %vm10315_vm2, %v14817_v0 }
  0xd2   :  { %8695 = vmatmul.mubr.msk.f32.gmra.mrb[102].mxu0 %vm324_vm1, %v283_v42 }
  0xd3   :  { %8697 = vmatprep.mubr.msk.f32.mxu0 %vm10315_vm2, %v14817_v0 }
  0xd4   :  { %8919 = vmatmul.mubr.msk.f32.gmra.mrb[104].mxu1 %vm324_vm1, %v81_v38  ;;  %v300_v38 = vrot.slane %v90_v32, 1 }
  0xd5   :  { %8921 = vmatprep.mubr.msk.f32.mxu1 %vm10315_vm2, %v14817_v0 }
  0xd6   :  { %8698 = vmatmul.mubr.msk.f32.gmra.mrb[104].mxu0 %vm324_vm1, %v285_v45  ;;  %v301_v45 = vsel %vm178_vm3, %v298_v30, %v300_v38 }
  0xd7   :  { %8700 = vmatprep.mubr.msk.f32.mxu0 %vm10315_vm2, %v14817_v0  ;;  %v1120_v48 = vpop.f32.mrb[0].mxu1 }
  0xd8   :  { %8922 = vmatmul.mubr.msk.f32.gmra.mrb[106].mxu1 %vm324_vm1, %v82_v41  ;;  %v8764_v51 = vpop.f32.mrb[1].mxu1 }
  0xd9   :  { %v541_v53 = vpop.f32.mrb[0].mxu0  ;;  %8924 = vmatprep.mubr.msk.f32.mxu1 %vm10315_vm2, %v14817_v0 }
  0xda   :  { %v10942_v54 = vadd.f32 %v1120_v48, %v541_v53  ;;  %v8543_v55 = vpop.f32.mrb[1].mxu0  ;;  %8701 = vmatmul.mubr.msk.f32.gmra.mrb[106].mxu0 %vm324_vm1, %v287_v49  ;;  %v92_v48 = vld [vmem:[%s14809_s0 + $0x1f8] sm:$0xff]  ;;  %v303_v53 = vsel %vm178_vm3, %v300_v38, %v302_v46 }
  0xdb   :  { %8703 = vmatprep.mubr.msk.f32.mxu0 %vm10315_vm2, %v14817_v0  ;;  %v1125_v56 = vpop.f32.mrb[2].mxu1  ;;  %v304_v55 = vrot.slane %v92_v48, 1 }
  0xdc   :  { %8925 = vmatmul.mubr.msk.f32.gmra.mrb[108].mxu1 %vm324_vm1, %v83_v44  ;;  %v8767_v59 = vpop.f32.mrb[3].mxu1 }
  0xdd   :  { %v546_v61 = vpop.f32.mrb[2].mxu0  ;;  %8927 = vmatprep.mubr.msk.f32.mxu1 %vm10315_vm2, %v14817_v0 }
  0xde   :  { %v10954_v62 = vadd.f32 %v1125_v56, %v546_v61  ;;  %v8546_v63 = vpop.f32.mrb[3].mxu0  ;;  %8704 = vmatmul.mubr.msk.f32.gmra.mrb[108].mxu0 %vm324_vm1, %v289_v57  ;;  %v93_v57 = vld [vmem:[%s14809_s0 + $0x200] sm:$0xff] }
  0xdf   :  { %8706 = vmatprep.mubr.msk.f32.mxu0 %vm10315_vm2, %v14817_v0  ;;  %v1130_v1 = vpop.f32.mrb[4].mxu1  ;;  %v305_v63 = vsel %vm178_vm3, %v302_v46, %v304_v55 }
  0xe0   :  { %8928 = vmatmul.mubr.msk.f32.gmra.mrb[110].mxu1 %vm324_vm1, %v84_v47  ;;  %v8770_v6 = vpop.f32.mrb[5].mxu1 }
  0xe1   :  { %v551_v8 = vpop.f32.mrb[4].mxu0  ;;  %8930 = vmatprep.mubr.msk.f32.mxu1 %vm10315_vm2, %v14817_v0 }
  0xe2   :  { %v10966_v9 = vadd.f32 %v1130_v1, %v551_v8  ;;  %v8549_v10 = vpop.f32.mrb[5].mxu0  ;;  %8707 = vmatmul.mubr.msk.f32.gmra.mrb[110].mxu0 %vm324_vm1, %v291_v2  ;;  %v306_v1 = vrot.slane %v93_v57, 1 }
  0xe3   :  { %8709 = vmatprep.mubr.msk.f32.mxu0 %vm10315_vm2, %v14817_v0  ;;  %v1135_v12 = vpop.f32.mrb[6].mxu1 }
  0xe4   :  { %8931 = vmatmul.mubr.msk.f32.gmra.mrb[112].mxu1 %vm324_vm1, %v85_v52  ;;  %v8773_v15 = vpop.f32.mrb[7].mxu1 }
  0xe5   :  { %v556_v17 = vpop.f32.mrb[6].mxu0  ;;  %8933 = vmatprep.mubr.msk.f32.mxu1 %vm10315_vm2, %v14817_v0  ;;  %v95_v15 = vld [vmem:[%s14809_s0 + $0x210] sm:$0xff] }
  0xe6   :  { %v10978_v18 = vadd.f32 %v1135_v12, %v556_v17  ;;  %v8552_v19 = vpop.f32.mrb[7].mxu0  ;;  %8710 = vmatmul.mubr.msk.f32.gmra.mrb[112].mxu0 %vm324_vm1, %v293_v13  ;;  %v307_v12 = vsel %vm178_vm3, %v304_v55, %v306_v1  ;;  %v308_v13 = vrot.slane %v94_v5, 1  ;;  %v310_v22 = vrot.slane %v95_v15, 1 }
  0xe7   :  { %8712 = vmatprep.mubr.msk.f32.mxu0 %vm10315_vm2, %v14817_v0  ;;  %v1140_v20 = vpop.f32.mrb[8].mxu1 }
  0xe8   :  { %8934 = vmatmul.mubr.msk.f32.gmra.mrb[114].mxu1 %vm324_vm1, %v86_v60  ;;  %v8776_v23 = vpop.f32.mrb[9].mxu1  ;;  %v311_v30 = vsel %vm178_vm3, %v308_v13, %v310_v22 }
  0xe9   :  { %v561_v25 = vpop.f32.mrb[8].mxu0  ;;  %8936 = vmatprep.mubr.msk.f32.mxu1 %vm10315_vm2, %v14817_v0 }
  0xea   :  { %v10990_v26 = vadd.f32 %v1140_v20, %v561_v25  ;;  %v8555_v27 = vpop.f32.mrb[9].mxu0  ;;  %8713 = vmatmul.mubr.msk.f32.gmra.mrb[114].mxu0 %vm324_vm1, %v295_v21  ;;  %v309_v21 = vsel %vm178_vm3, %v306_v1, %v308_v13 }
  0xeb   :  { %8715 = vmatprep.mubr.msk.f32.mxu0 %vm10315_vm2, %v14817_v0  ;;  %v1145_v28 = vpop.f32.mrb[10].mxu1 }
  0xec   :  { %8937 = vmatmul.mubr.msk.f32.gmra.mrb[116].mxu1 %vm324_vm1, %v87_v7  ;;  %v8779_v31 = vpop.f32.mrb[11].mxu1 }
  0xed   :  { %v566_v33 = vpop.f32.mrb[10].mxu0  ;;  %8939 = vmatprep.mubr.msk.f32.mxu1 %vm10315_vm2, %v14817_v0 }
  0xee   :  { %v11002_v34 = vadd.f32 %v1145_v28, %v566_v33  ;;  %v8558_v35 = vpop.f32.mrb[11].mxu0  ;;  %8716 = vmatmul.mubr.msk.f32.gmra.mrb[116].mxu0 %vm324_vm1, %v297_v29 }
  0xef   :  { %8718 = vmatprep.mubr.msk.f32.mxu0 %vm10315_vm2, %v14817_v0  ;;  %v1150_v36 = vpop.f32.mrb[12].mxu1  ;;  %v97_v35 = vld [vmem:[%s14809_s0 + $0x220] sm:$0xff] }
  0xf0   :  { %8940 = vmatmul.mubr.msk.f32.gmra.mrb[118].mxu1 %vm324_vm1, %v88_v16  ;;  %v8782_v39 = vpop.f32.mrb[13].mxu1 }
  0xf1   :  { %v571_v41 = vpop.f32.mrb[12].mxu0  ;;  %8942 = vmatprep.mubr.msk.f32.mxu1 %vm10315_vm2, %v14817_v0 }
  0xf2   :  { %v11014_v42 = vadd.f32 %v1150_v36, %v571_v41  ;;  %v8561_v43 = vpop.f32.mrb[13].mxu0  ;;  %8719 = vmatmul.mubr.msk.f32.gmra.mrb[118].mxu0 %vm324_vm1, %v299_v37  ;;  %v314_v41 = vrot.slane %v97_v35, 1 }
  0xf3   :  { %8721 = vmatprep.mubr.msk.f32.mxu0 %vm10315_vm2, %v14817_v0  ;;  %v1155_v44 = vpop.f32.mrb[14].mxu1 }
  0xf4   :  { %8943 = vmatmul.mubr.msk.f32.gmra.mrb[120].mxu1 %vm324_vm1, %v89_v24  ;;  %v8785_v47 = vpop.f32.mrb[15].mxu1  ;;  %v96_v24 = vld [vmem:[%s14809_s0 + $0x218] sm:$0xff] }
  0xf5   :  { %v576_v49 = vpop.f32.mrb[14].mxu0  ;;  %8945 = vmatprep.mubr.msk.f32.mxu1 %vm10315_vm2, %v14817_v0  ;;  %v312_v31 = vrot.slane %v96_v24, 1 }
  0xf6   :  { %v11026_v50 = vadd.f32 %v1155_v44, %v576_v49  ;;  %v8564_v51 = vpop.f32.mrb[15].mxu0  ;;  %8722 = vmatmul.mubr.msk.f32.gmra.mrb[120].mxu0 %vm324_vm1, %v301_v45  ;;  %v98_v44 = vld [vmem:[%s14809_s0 + $0x228] sm:$0xff] }
  0xf7   :  { %8724 = vmatprep.mubr.msk.f32.mxu0 %vm10315_vm2, %v14817_v0  ;;  %v1160_v52 = vpop.f32.mrb[16].mxu1  ;;  %v315_v49 = vsel %vm178_vm3, %v312_v31, %v314_v41  ;;  %v316_v51 = vrot.slane %v98_v44, 1 }
  0xf8   :  { %8946 = vmatmul.mubr.msk.f32.gmra.mrb[122].mxu1 %vm324_vm1, %v90_v32  ;;  %v8788_v56 = vpop.f32.mrb[17].mxu1  ;;  %v7583_v32 = vld [vmem:[%s14810_s3 + $0x4] sm:$0xf] }
  0xf9   :  { %v581_v58 = vpop.f32.mrb[16].mxu0  ;;  %8948 = vmatprep.mubr.msk.f32.mxu1 %vm10315_vm2, %v14817_v0  ;;  %9202 = vmatprep.subr.msk.mxu1 %vm471_vm0, %v7583_v32 }
  0xfa   :  { %v11038_v59 = vadd.f32 %v1160_v52, %v581_v58  ;;  %v8567_v60 = vpop.f32.mrb[17].mxu0  ;;  %8725 = vmatmul.mubr.msk.f32.gmra.mrb[122].mxu0 %vm324_vm1, %v303_v53  ;;  %9203 = vmatpush3.msk.msra.mxu1 %vm471_vm0, %v7583_v32  ;;  %v99_v53 = vld [vmem:[%s14809_s0 + $0x230] sm:$0xff]  ;;  %v10316_v58 = vmov 0  }
  0xfb   :  { %8727 = vmatprep.mubr.msk.f32.mxu0 %vm10315_vm2, %v14817_v0  ;;  %v1165_v61 = vpop.f32.mrb[18].mxu1  ;;  %9803 = vset.pattern.permute.xlu0 %v10316_v58  ;;  %v2802_v60 = vld [vmem:[%s14811_s7] sm:$0xff]  ;;  %v318_v1 = vrot.slane %v99_v53, 1 }
  0xfc   :  { %8949 = vmatmul.mubr.msk.f32.gmra.mrb[124].mxu1 %vm324_vm1, %v91_v40  ;;  %v8791_v2 = vpop.f32.mrb[19].mxu1  ;;  %v313_v40 = vsel %vm178_vm3, %v310_v22, %v312_v31  ;;  %2877 = vperm.xlu0 %9803, %v2802_v60   ;;  %v10239_v60 = vld [vmem:[%s14809_s0 + $0x10] sm:$0xff] }
  0xfd   :  { %v586_v6 = vpop.f32.mrb[18].mxu0  ;;  %8951 = vmatprep.mubr.msk.f32.mxu1 %vm10315_vm2, %v14817_v0  ;;  %9804 = vset.pattern.permute.xlu1 %v10316_v58 }
  0xfe   :  { %v11050_v7 = vadd.f32 %v1165_v61, %v586_v6  ;;  %v8570_v8 = vpop.f32.mrb[19].mxu0  ;;  %8728 = vmatmul.mubr.msk.f32.gmra.mrb[124].mxu0 %vm324_vm1, %v305_v63  ;;  %v317_v63 = vsel %vm178_vm3, %v314_v41, %v316_v51 }
  0xff   :  { %8730 = vmatprep.mubr.msk.f32.mxu0 %vm10315_vm2, %v14817_v0  ;;  %v1170_v10 = vpop.f32.mrb[20].mxu1 }
 0x100   :  { %8952 = vmatmul.mubr.msk.f32.gmra.mrb[126].mxu1 %vm324_vm1, %v92_v48  ;;  %v8794_v14 = vpop.f32.mrb[21].mxu1 }
 0x101   :  { %v591_v16 = vpop.f32.mrb[20].mxu0  ;;  %8954 = vmatprep.mubr.msk.f32.mxu1 %vm10315_vm2, %v14817_v0  ;;  %v319_v14 = vsel %vm178_vm3, %v316_v51, %v318_v1 }
 0x102   :  { %v11062_v17 = vadd.f32 %v1170_v10, %v591_v16  ;;  %v8573_v19 = vpop.f32.mrb[21].mxu0  ;;  %8731 = vmatmul.mubr.msk.f32.gmra.mrb[126].mxu0 %vm324_vm1, %v307_v12  ;;  %v2803_v12 = vld [vmem:[%s14811_s7 + $0x8] sm:$0xff] }
 0x103   :  { %8733 = vmatprep.mubr.msk.f32.mxu0 %vm10315_vm2, %v14817_v0  ;;  %v1175_v20 = vpop.f32.mrb[22].mxu1  ;;  %2882 = vperm.xlu0 %9803, %v2803_v12   ;;  %v101_v19 = vld [vmem:[%s14809_s0 + $0x240] sm:$0xf] }
 0x104   :  { %8955 = vmatmul.mubr.msk.f32.gmra.mrb[128].mxu1 %vm324_vm1, %v93_v57  ;;  %v8797_v23 = vpop.f32.mrb[23].mxu1 }
 0x105   :  { %v596_v25 = vpop.f32.mrb[22].mxu0  ;;  %8957 = vmatprep.mubr.msk.f32.mxu1 %vm10315_vm2, %v14817_v0  ;;  %v2804_v23 = vld [vmem:[%s14811_s7 + $0x10] sm:$0xff] }
 0x106   :  { %v11074_v27 = vadd.f32 %v1175_v20, %v596_v25  ;;  %v8576_v28 = vpop.f32.mrb[23].mxu0  ;;  %8734 = vmatmul.mubr.msk.f32.gmra.mrb[128].mxu0 %vm324_vm1, %v309_v21  ;;  %2887 = vperm.xlu1 %9804, %v2804_v23  }
 0x107   :  { %8736 = vmatprep.mubr.msk.f32.mxu0 %vm10315_vm2, %v14817_v0  ;;  %v1180_v29 = vpop.f32.mrb[24].mxu1 }
 0x108   :  { %8958 = vmatmul.mubr.msk.f32.gmra.mrb[130].mxu1 %vm324_vm1, %v94_v5  ;;  %v8800_v33 = vpop.f32.mrb[25].mxu1  ;;  %v100_v5 = vld [vmem:[%s14809_s0 + $0x238] sm:$0xff] }
 0x109   :  { %v601_v36 = vpop.f32.mrb[24].mxu0  ;;  %8960 = vmatprep.mubr.msk.f32.mxu1 %vm10315_vm2, %v14817_v0 }
 0x10a   :  { %v11091_v37 = vadd.f32 %v1180_v29, %v601_v36  ;;  %v8579_v38 = vpop.f32.mrb[25].mxu0  ;;  %8737 = vmatmul.mubr.msk.f32.gmra.mrb[130].mxu0 %vm324_vm1, %v311_v30  ;;  %v322_v29 = vrot.slane %v101_v19, 1  ;;  %v2808_v36 = vld [vmem:[%s14811_s7 + $0x30] sm:$0xff] }
 0x10b   :  { %8739 = vmatprep.mubr.msk.f32.mxu0 %vm10315_vm2, %v14817_v0  ;;  %v1185_v39 = vpop.f32.mrb[26].mxu1 }
 0x10c   :  { %8961 = vmatmul.mubr.msk.f32.gmra.mrb[132].mxu1 %vm324_vm1, %v95_v15  ;;  %v8803_v43 = vpop.f32.mrb[27].mxu1  ;;  %v320_v15 = vrot.slane %v100_v5, 1 }
 0x10d   :  { %v606_v45 = vpop.f32.mrb[26].mxu0  ;;  %8963 = vmatprep.mubr.msk.f32.mxu1 %vm10315_vm2, %v14817_v0 }
 0x10e   :  { %v11103_v46 = vadd.f32 %v1185_v39, %v606_v45  ;;  %v8582_v47 = vpop.f32.mrb[27].mxu0  ;;  %8740 = vmatmul.mubr.msk.f32.gmra.mrb[132].mxu0 %vm324_vm1, %v313_v40  ;;  %v321_v28 = vsel %vm178_vm3, %v318_v1, %v320_v15  ;;  %v323_v39 = vsel %vm178_vm3, %v320_v15, %v322_v29  ;;  %v2807_v45 = vld [vmem:[%s14811_s7 + $0x28] sm:$0xff] }
 0x10f   :  { %8742 = vmatprep.mubr.msk.f32.mxu0 %vm10315_vm2, %v14817_v0  ;;  %v1190_v48 = vpop.f32.mrb[28].mxu1  ;;  %v2810_v47 = vld [vmem:[%s14811_s7 + $0x40] sm:$0xff] }
 0x110   :  { %8964 = vmatmul.mubr.msk.f32.gmra.mrb[134].mxu1 %vm324_vm1, %v96_v24  ;;  %v8806_v52 = vpop.f32.mrb[29].mxu1  ;;  %v2806_v24 = vld [vmem:[%s14811_s7 + $0x20] sm:$0xff] }
 0x111   :  { %v611_v55 = vpop.f32.mrb[28].mxu0  ;;  %8966 = vmatprep.mubr.msk.f32.mxu1 %vm10315_vm2, %v14817_v0  ;;  %2897 = vperm.xlu0 %9803, %v2806_v24   ;;  %v10241_v24 = vld [vmem:[%s14809_s0 + $0x20] sm:$0xff] }
 0x112   :  { %v11115_v56 = vadd.f32 %v1190_v48, %v611_v55  ;;  %v8585_v57 = vpop.f32.mrb[29].mxu0  ;;  %8743 = vmatmul.mubr.msk.f32.gmra.mrb[134].mxu0 %vm324_vm1, %v315_v49  ;;  %v2809_v55 = vld [vmem:[%s14811_s7 + $0x38] sm:$0xff] }
 0x113   :  { %8745 = vmatprep.mubr.msk.f32.mxu0 %vm10315_vm2, %v14817_v0  ;;  %v1195_v61 = vpop.f32.mrb[30].mxu1  ;;  %v2812_v57 = vld [vmem:[%s14811_s7 + $0x50] sm:$0xff] }
 0x114   :  { %8967 = vmatmul.mubr.msk.f32.gmra.mrb[136].mxu1 %vm324_vm1, %v97_v35  ;;  %v8809_v2 = vpop.f32.mrb[31].mxu1  ;;  %v2805_v35 = vld [vmem:[%s14811_s7 + $0x18] sm:$0xff] }
 0x115   :  { %v616_v6 = vpop.f32.mrb[30].mxu0  ;;  %8969 = vmatprep.mubr.msk.f32.mxu1 %vm10315_vm2, %v14817_v0  ;;  %2892 = vperm.xlu1 %9804, %v2805_v35   ;;  %v2818_v35 = vld [vmem:[%s14811_s7 + $0x80] sm:$0xff] }
 0x116   :  { %v11130_v8 = vadd.f32 %v1195_v61, %v616_v6  ;;  %v8588_v10 = vpop.f32.mrb[31].mxu0  ;;  %8746 = vmatmul.mubr.msk.f32.gmra.mrb[136].mxu0 %vm324_vm1, %v317_v63  ;;  %2907 = vperm.xlu0 %9803, %v2808_v36   ;;  %v1490_v61 = vrot.slane %v10239_v60, 2  ;;  %v2811_v6 = vld [vmem:[%s14811_s7 + $0x48] sm:$0xff] }
 0x117   :  { %8748 = vmatprep.mubr.msk.f32.mxu0 %vm10315_vm2, %v14817_v0  ;;  %v1200_v13 = vpop.f32.mrb[32].mxu1  ;;  %v2814_v10 = vld [vmem:[%s14811_s7 + $0x60] sm:$0xff] }
 0x118   :  { %8970 = vmatmul.mubr.msk.f32.gmra.mrb[138].mxu1 %vm324_vm1, %v98_v44  ;;  %v8812_v16 = vpop.f32.mrb[33].mxu1 }
 0x119   :  { %v621_v20 = vpop.f32.mrb[32].mxu0  ;;  %8972 = vmatprep.mubr.msk.f32.mxu1 %vm10315_vm2, %v14817_v0  ;;  %2902 = vperm.xlu1 %9804, %v2807_v45  }
 0x11a   :  { %v11145_v21 = vadd.f32 %v1200_v13, %v621_v20  ;;  %v8591_v22 = vpop.f32.mrb[33].mxu0  ;;  %8749 = vmatmul.mubr.msk.f32.gmra.mrb[138].mxu0 %vm324_vm1, %v319_v14  ;;  %2917 = vperm.xlu0 %9803, %v2810_v47   ;;  %v1491_v13 = vsel %vm1486_vm4, %v1488_v11, %v1490_v61  ;;  %v2816_v11 = vld [vmem:[%s14811_s7 + $0x70] sm:$0xff] }
 0x11b   :  { %8751 = vmatprep.mubr.msk.f32.mxu0 %vm10315_vm2, %v14817_v0  ;;  %v1205_v25 = vpop.f32.mrb[34].mxu1 }
 0x11c   :  { %8973 = vmatmul.mubr.msk.f32.gmra.mrb[140].mxu1 %vm324_vm1, %v99_v53  ;;  %v8815_v30 = vpop.f32.mrb[35].mxu1 }
 0x11d   :  { %v626_v31 = vpop.f32.mrb[34].mxu0  ;;  %8975 = vmatprep.mubr.msk.f32.mxu1 %vm10315_vm2, %v14817_v0  ;;  %2912 = vperm.xlu1 %9804, %v2809_v55   ;;  %v10243_v55 = vld [vmem:[%s14809_s0 + $0x30] sm:$0xff] }
 0x11e   :  { %v11160_v32 = vadd.f32 %v1205_v25, %v626_v31  ;;  %v8594_v33 = vpop.f32.mrb[35].mxu0  ;;  %8752 = vmatmul.mubr.msk.f32.gmra.mrb[140].mxu0 %vm324_vm1, %v321_v28  ;;  %2927 = vperm.xlu0 %9803, %v2812_v57   ;;  %v1494_v25 = vrot.slane %v10241_v24, 2  ;;  %v1498_v57 = vrot.slane %v10243_v55, 2 }
 0x11f   :  { %8754 = vmatprep.mubr.msk.f32.mxu0 %vm10315_vm2, %v14817_v0  ;;  %v1210_v38 = vpop.f32.mrb[36].mxu1  ;;  %v2815_v33 = vld [vmem:[%s14811_s7 + $0x68] sm:$0xff] }
 0x120   :  { %8976 = vmatmul.mubr.msk.f32.gmra.mrb[142].mxu1 %vm324_vm1, %v100_v5  ;;  %v8818_v40 = vpop.f32.mrb[37].mxu1 }
 0x121   :  { %v631_v41 = vpop.f32.mrb[36].mxu0  ;;  %8978 = vmatprep.mubr.msk.f32.mxu1 %vm10315_vm2, %v14817_v0  ;;  %2922 = vperm.xlu1 %9804, %v2811_v6  }
 0x122   :  { %v11175_v43 = vadd.f32 %v1210_v38, %v631_v41  ;;  %v8597_v44 = vpop.f32.mrb[37].mxu0  ;;  %8755 = vmatmul.mubr.msk.f32.gmra.mrb[142].mxu0 %vm324_vm1, %v323_v39  ;;  %2937 = vperm.xlu0 %9803, %v2814_v10   ;;  %v10242_v39 = vld [vmem:[%s14809_s0 + $0x28] sm:$0xff] }
 0x123   :  { %8757 = vmatprep.mubr.msk.f32.mxu0 %vm10315_vm2, %v14817_v0  ;;  %v1215_v48 = vpop.f32.mrb[38].mxu1  ;;  %v1496_v40 = vrot.slane %v10242_v39, 2  ;;  %v10246_v39 = vld [vmem:[%s14809_s0 + $0x48] sm:$0xff] }
 0x124   :  { %8979 = vmatmul.mubr.msk.f32.gmra.mrb[144].mxu1 %vm324_vm1, %v101_v19  ;;  %v8821_v49 = vpop.f32.mrb[39].mxu1 }
 0x125   :  { %v636_v51 = vpop.f32.mrb[38].mxu0  ;;  %2932 = vperm.xlu1 %9804, %v2813_v4   ;;  %v2820_v49 = vld [vmem:[%s14811_s7 + $0x90] sm:$0xff]  ;;  %v1499_v10 = vsel %vm1486_vm4, %v1496_v40, %v1498_v57 }
 0x126   :  { %v11187_v52 = vadd.f32 %v1215_v48, %v636_v51  ;;  %v8600_v53 = vpop.f32.mrb[39].mxu0  ;;  %8758 = vmatmul.mubr.msk.f32.gmra.mrb[144].mxu0 %vm324_vm1, %v322_v29  ;;  %2947 = vperm.xlu0 %9803, %v2816_v11   ;;  %v2817_v48 = vld [vmem:[%s14811_s7 + $0x78] sm:$0xff]  ;;  %v2824_v4 = vld [vmem:[%s14811_s7 + $0xb0] sm:$0xff] }
 0x127   :  { %v1220_v58 = vpop.f32.mrb[40].mxu1  ;;  %8983 = vmatprep.mubr.msk.f32.mxu0 %vm10315_vm2, %v14817_v0  ;;  %v1497_v53 = vsel %vm1486_vm4, %v1494_v25, %v1496_v40  ;;  %v1504_v40 = vrot.slane %v10246_v39, 2  ;;  %v2831_v39 = vld [vmem:[%s14811_s7 + $0xe8] sm:$0xff] }
 0x128   :  { %v8824_v63 = vpop.f32.mrb[41].mxu1 }
 0x129   :  { %v641_v1 = vpop.f32.mrb[40].mxu0  ;;  %2942 = vperm.xlu1 %9804, %v2815_v33   ;;  %v2823_v33 = vld [vmem:[%s14811_s7 + $0xa8] sm:$0xff] }
 0x12a   :  { %v11201_v2 = vadd.f32 %v1220_v58, %v641_v1  ;;  %v8603_v5 = vpop.f32.mrb[41].mxu0  ;;  %8984 = vmatmul.mubr.msk.f32.vlgmr.msra.gmra.mrb[146].mxu0 %vm324_vm1, %v10820_v3  ;;  %v10240_v3 = vld [vmem:[%s14809_s0 + $0x18] sm:$0xff]  ;;  %2957 = vperm.xlu0 %9803, %v2818_v35   ;;  %v2819_v1 = vld [vmem:[%s14811_s7 + $0x88] sm:$0xff]  ;;  %v2826_v35 = vld [vmem:[%s14811_s7 + $0xc0] sm:$0xff] }
 0x12b   :  { %v1225_v12 = vpop.f32.mrb[42].mxu1  ;;  %8986 = vmatprep.mubr.msk.f32.mxu0 %vm10315_vm2, %v14817_v0  ;;  %v1492_v14 = vrot.slane %v10240_v3, 2  ;;  %v2822_v5 = vld [vmem:[%s14811_s7 + $0xa0] sm:$0xff] }
 0x12c   :  { %v8827_v15 = vpop.f32.mrb[43].mxu1 }
 0x12d   :  { %v646_v16 = vpop.f32.mrb[42].mxu0  ;;  %v1493_v23 = vsel %vm1486_vm4, %v1490_v61, %v1492_v14  ;;  %v1495_v38 = vsel %vm1486_vm4, %v1492_v14, %v1494_v25  ;;  %2952 = vperm.xlu1 %9804, %v2817_v48  }
 0x12e   :  { %v11219_v19 = vadd.f32 %v1225_v12, %v646_v16  ;;  %v8606_v20 = vpop.f32.mrb[43].mxu0  ;;  %8987 = vmatmul.mubr.msk.f32.gmra.mrb[148].mxu0 %vm324_vm1, %v1491_v13  ;;  %2967 = vperm.xlu0 %9803, %v2820_v49   ;;  %v10244_v12 = vld [vmem:[%s14809_s0 + $0x38] sm:$0xff] }
 0x12f   :  { %v1230_v22 = vpop.f32.mrb[44].mxu1  ;;  %8989 = vmatprep.mubr.msk.f32.mxu0 %vm10315_vm2, %v14817_v0  ;;  %v1500_v13 = vrot.slane %v10244_v12, 2  ;;  %v2821_v20 = vld [vmem:[%s14811_s7 + $0x98] sm:$0xff] }
 0x130   :  { %v8830_v28 = vpop.f32.mrb[45].mxu1  ;;  %v2825_v49 = vld [vmem:[%s14811_s7 + $0xb8] sm:$0xff] }
 0x131   :  { %v651_v29 = vpop.f32.mrb[44].mxu0  ;;  %2962 = vperm.xlu1 %9804, %v2819_v1  }
 0x132   :  { %v11234_v30 = vadd.f32 %v1230_v22, %v651_v29  ;;  %v8609_v31 = vpop.f32.mrb[45].mxu0  ;;  %8990 = vmatmul.mubr.msk.f32.gmra.mrb[150].mxu0 %vm324_vm1, %v1493_v23  ;;  %2977 = vperm.xlu0 %9803, %v2822_v5   ;;  %v1501_v22 = vsel %vm1486_vm4, %v1498_v57, %v1500_v13  ;;  %v10245_v23 = vld [vmem:[%s14809_s0 + $0x40] sm:$0xff]  ;;  %v10247_v57 = vld [vmem:[%s14809_s0 + $0x50] sm:$0xff] }
 0x133   :  { %v1235_v36 = vpop.f32.mrb[46].mxu1  ;;  %8992 = vmatprep.mubr.msk.f32.mxu0 %vm10315_vm2, %v14817_v0  ;;  %v1502_v24 = vrot.slane %v10245_v23, 2  ;;  %v2832_v23 = vld [vmem:[%s14811_s7 + $0xf0] sm:$0xff] }
 0x134   :  { %v8833_v41 = vpop.f32.mrb[47].mxu1 }
 0x135   :  { %v656_v44 = vpop.f32.mrb[46].mxu0  ;;  %2972 = vperm.xlu1 %9804, %v2821_v20   ;;  %v1505_v55 = vsel %vm1486_vm4, %v1502_v24, %v1504_v40 }
 0x136   :  { %v11249_v45 = vadd.f32 %v1235_v36, %v656_v44  ;;  %v8612_v47 = vpop.f32.mrb[47].mxu0  ;;  %8993 = vmatmul.mubr.msk.f32.gmra.mrb[152].mxu0 %vm324_vm1, %v1495_v38  ;;  %2987 = vperm.xlu0 %9803, %v2824_v4   ;;  %v1503_v38 = vsel %vm1486_vm4, %v1500_v13, %v1502_v24 }
 0x137   :  { %v1240_v51 = vpop.f32.mrb[48].mxu1  ;;  %8995 = vmatprep.mubr.msk.f32.mxu0 %vm10315_vm2, %v14817_v0 }
 0x138   :  { %v8836_v58 = vpop.f32.mrb[49].mxu1 }
 0x139   :  { %v661_v60 = vpop.f32.mrb[48].mxu0  ;;  %2982 = vperm.xlu1 %9804, %v2823_v33   ;;  %v1506_v58 = vrot.slane %v10247_v57, 2 }
 0x13a   :  { %v11264_v61 = vadd.f32 %v1240_v51, %v661_v60  ;;  %v8615_v63 = vpop.f32.mrb[49].mxu0  ;;  %8996 = vmatmul.mubr.msk.f32.gmra.mrb[154].mxu0 %vm324_vm1, %v1497_v53  ;;  %2997 = vperm.xlu0 %9803, %v2826_v35   ;;  %v2828_v51 = vld [vmem:[%s14811_s7 + $0xd0] sm:$0xff] }
 0x13b   :  { %v1245_v6 = vpop.f32.mrb[50].mxu1  ;;  %8998 = vmatprep.mubr.msk.f32.mxu0 %vm10315_vm2, %v14817_v0  ;;  %v1507_v13 = vsel %vm1486_vm4, %v1504_v40, %v1506_v58  ;;  %v2834_v40 = vld [vmem:[%s14811_s7 + $0x100] sm:$0xff] }
 0x13c   :  { %v8839_v3 = vpop.f32.mrb[51].mxu1 }
 0x13d   :  { %v666_v14 = vpop.f32.mrb[50].mxu0  ;;  %2992 = vperm.xlu1 %9804, %v2825_v49   ;;  %v10248_v3 = vld [vmem:[%s14809_s0 + $0x58] sm:$0xff] }
 0x13e   :  { %v11279_v15 = vadd.f32 %v1245_v6, %v666_v14  ;;  %v8618_v16 = vpop.f32.mrb[51].mxu0  ;;  %8999 = vmatmul.mubr.msk.f32.gmra.mrb[156].mxu0 %vm324_vm1, %v1499_v10  ;;  %3007 = vperm.xlu0 %9803, %v2828_v51   ;;  %v2827_v6 = vld [vmem:[%s14811_s7 + $0xc8] sm:$0xff]  ;;  %v2830_v10 = vld [vmem:[%s14811_s7 + $0xe0] sm:$0xff]  ;;  %v1508_v14 = vrot.slane %v10248_v3, 2 }
 0x13f   :  { %v1250_v11 = vpop.f32.mrb[52].mxu1  ;;  %9001 = vmatprep.mubr.msk.f32.mxu0 %vm10315_vm2, %v14817_v0 }
 0x140   :  { %v8842_v25 = vpop.f32.mrb[53].mxu1 }
 0x141   :  { %v671_v28 = vpop.f32.mrb[52].mxu0  ;;  %3002 = vperm.xlu1 %9804, %v2827_v6   ;;  %v1509_v25 = vsel %vm1486_vm4, %v1506_v58, %v1508_v14  ;;  %v2833_v58 = vld [vmem:[%s14811_s7 + $0xf8] sm:$0xff]  ;;  %v10251_v6 = vld [vmem:[%s14809_s0 + $0x70] sm:$0xff] }
 0x142   :  { %v11294_v29 = vadd.f32 %v1250_v11, %v671_v28  ;;  %v8621_v31 = vpop.f32.mrb[53].mxu0  ;;  %9002 = vmatmul.mubr.msk.f32.gmra.mrb[158].mxu0 %vm324_vm1, %v1501_v22  ;;  %3017 = vperm.xlu0 %9803, %v2830_v10   ;;  %v2829_v22 = vld [vmem:[%s14811_s7 + $0xd8] sm:$0xff]  ;;  %v10249_v28 = vld [vmem:[%s14809_s0 + $0x60] sm:$0xff]  ;;  %v1514_v10 = vrot.slane %v10251_v6, 2 }
 0x143   :  { %v1255_v36 = vpop.f32.mrb[54].mxu1  ;;  %9004 = vmatprep.mubr.msk.f32.mxu0 %vm10315_vm2, %v14817_v0  ;;  %v1510_v31 = vrot.slane %v10249_v28, 2 }
 0x144   :  { %v8845_v41 = vpop.f32.mrb[55].mxu1 }
 0x145   :  { %v676_v44 = vpop.f32.mrb[54].mxu0  ;;  %3012 = vperm.xlu1 %9804, %v2829_v22  }
 0x146   :  { %v11309_v47 = vadd.f32 %v1255_v36, %v676_v44  ;;  %v8624_v48 = vpop.f32.mrb[55].mxu0  ;;  %9005 = vmatmul.mubr.msk.f32.gmra.mrb[160].mxu0 %vm324_vm1, %v1503_v38  ;;  %3027 = vperm.xlu0 %9803, %v2832_v23   ;;  %v1511_v44 = vsel %vm1486_vm4, %v1508_v14, %v1510_v31  ;;  %v10252_v23 = vld [vmem:[%s14809_s0 + $0x78] sm:$0xff] }
 0x147   :  { %v1260_v53 = vpop.f32.mrb[56].mxu1  ;;  %9007 = vmatprep.mubr.msk.f32.mxu0 %vm10315_vm2, %v14817_v0  ;;  %v10250_v48 = vld [vmem:[%s14809_s0 + $0x68] sm:$0xff] }
 0x148   :  { %v8848_v60 = vpop.f32.mrb[57].mxu1  ;;  %v1512_v49 = vrot.slane %v10250_v48, 2 }
 0x149   :  { %v681_v63 = vpop.f32.mrb[56].mxu0  ;;  %3022 = vperm.xlu1 %9804, %v2831_v39   ;;  %v2836_v60 = vld [vmem:[%s14811_s7 + $0x110] sm:$0xff] }
 0x14a   :  { %v11324_v1 = vadd.f32 %v1260_v53, %v681_v63  ;;  %v8627_v5 = vpop.f32.mrb[57].mxu0  ;;  %9008 = vmatmul.mubr.msk.f32.gmra.mrb[162].mxu0 %vm324_vm1, %v1505_v55  ;;  %3037 = vperm.xlu0 %9803, %v2834_v40   ;;  %v1515_v22 = vsel %vm1486_vm4, %v1512_v49, %v1514_v10 }
 0x14b   :  { %v1265_v12 = vpop.f32.mrb[58].mxu1  ;;  %9010 = vmatprep.mubr.msk.f32.mxu0 %vm10315_vm2, %v14817_v0  ;;  %v1513_v5 = vsel %vm1486_vm4, %v1510_v31, %v1512_v49 }
 0x14c   :  { %v8851_v16 = vpop.f32.mrb[59].mxu1 }
 0x14d   :  { %v686_v20 = vpop.f32.mrb[58].mxu0  ;;  %3032 = vperm.xlu1 %9804, %v2833_v58   ;;  %v2835_v16 = vld [vmem:[%s14811_s7 + $0x108] sm:$0xff]  ;;  %v2842_v58 = vld [vmem:[%s14811_s7 + $0x140] sm:$0xff] }
 0x14e   :  { %v11339_v4 = vadd.f32 %v1265_v12, %v686_v20  ;;  %v8630_v11 = vpop.f32.mrb[59].mxu0  ;;  %9011 = vmatmul.mubr.msk.f32.gmra.mrb[164].mxu0 %vm324_vm1, %v1507_v13  ;;  %3047 = vperm.xlu0 %9803, %v2836_v60   ;;  %v2838_v20 = vld [vmem:[%s14811_s7 + $0x120] sm:$0xff] }
 0x14f   :  { %v1270_v24 = vpop.f32.mrb[60].mxu1  ;;  %9013 = vmatprep.mubr.msk.f32.mxu0 %vm10315_vm2, %v14817_v0 }
 0x150   :  { %v8854_v33 = vpop.f32.mrb[61].mxu1 }
 0x151   :  { %v691_v35 = vpop.f32.mrb[60].mxu0  ;;  %3042 = vperm.xlu1 %9804, %v2835_v16   ;;  %v2841_v16 = vld [vmem:[%s14811_s7 + $0x138] sm:$0xff] }
 0x152   :  { %v11354_v36 = vadd.f32 %v1270_v24, %v691_v35  ;;  %v8633_v38 = vpop.f32.mrb[61].mxu0  ;;  %9014 = vmatmul.mubr.msk.f32.gmra.mrb[166].mxu0 %vm324_vm1, %v1509_v25  ;;  %v1516_v24 = vrot.slane %v10252_v23, 2  ;;  %3057 = vperm.xlu0 %9803, %v2838_v20   ;;  %v2837_v35 = vld [vmem:[%s14811_s7 + $0x118] sm:$0xff]  ;;  %v2844_v20 = vld [vmem:[%s14811_s7 + $0x150] sm:$0xff] }
 0x153   :  { %v1275_v41 = vpop.f32.mrb[62].mxu1  ;;  %9016 = vmatprep.mubr.msk.f32.mxu0 %vm10315_vm2, %v14817_v0  ;;  %v2840_v38 = vld [vmem:[%s14811_s7 + $0x130] sm:$0xff] }
 0x154   :  { %v8857_v51 = vpop.f32.mrb[63].mxu1  ;;  %v1517_v40 = vsel %vm1486_vm4, %v1514_v10, %v1516_v24  ;;  %v10255_v23 = vld [vmem:[%s14809_s0 + $0x90] sm:$0xff] }
 0x155   :  { %v696_v53 = vpop.f32.mrb[62].mxu0  ;;  %3052 = vperm.xlu1 %9804, %v2837_v35  }
 0x156   :  { %v11369_v55 = vadd.f32 %v1275_v41, %v696_v53  ;;  %v8636_v57 = vpop.f32.mrb[63].mxu0  ;;  %9017 = vmatmul.mubr.msk.f32.gmra.mrb[168].mxu0 %vm324_vm1, %v1511_v44  ;;  %v10253_v41 = vld [vmem:[%s14809_s0 + $0x80] sm:$0xff]  ;;  %3067 = vperm.xlu0 %9803, %v2840_v38   ;;  %v2843_v38 = vld [vmem:[%s14811_s7 + $0x148] sm:$0xff] }
 0x157   :  { %v1280_v63 = vpop.f32.mrb[64].mxu1  ;;  %9019 = vmatprep.mubr.msk.f32.mxu0 %vm10315_vm2, %v14817_v0  ;;  %v1518_v44 = vrot.slane %v10253_v41, 2  ;;  %v2839_v57 = vld [vmem:[%s14811_s7 + $0x128] sm:$0xff] }
 0x158   :  { %v8860_v12 = vpop.f32.mrb[65].mxu1 }
 0x159   :  { %v701_v13 = vpop.f32.mrb[64].mxu0  ;;  %3062 = vperm.xlu1 %9804, %v2839_v57  }
 0x15a   :  { %v11384_v3 = vadd.f32 %v1280_v63, %v701_v13  ;;  %v8639_v14 = vpop.f32.mrb[65].mxu0  ;;  %9020 = vmatmul.mubr.msk.f32.gmra.mrb[170].mxu0 %vm324_vm1, %v1513_v5  ;;  %v1519_v63 = vsel %vm1486_vm4, %v1516_v24, %v1518_v44  ;;  %v10254_v5 = vld [vmem:[%s14809_s0 + $0x88] sm:$0xff]  ;;  %3077 = vperm.xlu0 %9803, %v2842_v58   ;;  %v1522_v24 = vrot.slane %v10255_v23, 2  ;;  %v2850_v23 = vld [vmem:[%s14811_s7 + $0x180] sm:$0xff] }
 0x15b   :  { %v1285_v11 = vpop.f32.mrb[66].mxu1  ;;  %9022 = vmatprep.mubr.msk.f32.mxu0 %vm10315_vm2, %v14817_v0  ;;  %v1520_v6 = vrot.slane %v10254_v5, 2 }
 0x15c   :  { %v8863_v25 = vpop.f32.mrb[67].mxu1 }
 0x15d   :  { %v706_v28 = vpop.f32.mrb[66].mxu0  ;;  %3072 = vperm.xlu1 %9804, %v2841_v16   ;;  %v1523_v41 = vsel %vm1486_vm4, %v1520_v6, %v1522_v24 }
 0x15e   :  { %v11399_v31 = vadd.f32 %v1285_v11, %v706_v28  ;;  %v8642_v33 = vpop.f32.mrb[67].mxu0  ;;  %9023 = vmatmul.mubr.msk.f32.gmra.mrb[172].mxu0 %vm324_vm1, %v1515_v22  ;;  %v1521_v22 = vsel %vm1486_vm4, %v1518_v44, %v1520_v6  ;;  %3087 = vperm.xlu0 %9803, %v2844_v20   ;;  %v10256_v44 = vld [vmem:[%s14809_s0 + $0x98] sm:$0xff] }
 0x15f   :  { %v1290_v39 = vpop.f32.mrb[68].mxu1  ;;  %9025 = vmatprep.mubr.msk.f32.mxu0 %vm10315_vm2, %v14817_v0 }
 0x160   :  { %v8866_v48 = vpop.f32.mrb[69].mxu1 }
 0x161   :  { %v711_v49 = vpop.f32.mrb[68].mxu0  ;;  %v1524_v48 = vrot.slane %v10256_v44, 2  ;;  %3082 = vperm.xlu1 %9804, %v2843_v38   ;;  %v2849_v44 = vld [vmem:[%s14811_s7 + $0x178] sm:$0xff] }
 0x162   :  { %v11414_v51 = vadd.f32 %v1290_v39, %v711_v49  ;;  %v8645_v53 = vpop.f32.mrb[69].mxu0  ;;  %9026 = vmatmul.mubr.msk.f32.gmra.mrb[174].mxu0 %vm324_vm1, %v1517_v40  ;;  %v2846_v39 = vld [vmem:[%s14811_s7 + $0x160] sm:$0xff] }
 0x163   :  { %v1295_v60 = vpop.f32.mrb[70].mxu1  ;;  %9028 = vmatprep.mubr.msk.f32.mxu0 %vm10315_vm2, %v14817_v0  ;;  %3097 = vperm.xlu0 %9803, %v2846_v39   ;;  %v1525_v6 = vsel %vm1486_vm4, %v1522_v24, %v1524_v48 }
 0x164   :  { %v8869_v10 = vpop.f32.mrb[71].mxu1 }
 0x165   :  { %v716_v12 = vpop.f32.mrb[70].mxu0  ;;  %v10257_v10 = vld [vmem:[%s14809_s0 + $0xa0] sm:$0xff] }
 0x166   :  { %v11429_v13 = vadd.f32 %v1295_v60, %v716_v12  ;;  %v8648_v14 = vpop.f32.mrb[71].mxu0  ;;  %9029 = vmatmul.mubr.msk.f32.gmra.mrb[176].mxu0 %vm324_vm1, %v1519_v63  ;;  %v2845_v60 = vld [vmem:[%s14811_s7 + $0x158] sm:$0xff]  ;;  %v2848_v63 = vld [vmem:[%s14811_s7 + $0x170] sm:$0xff]  ;;  %v1526_v12 = vrot.slane %v10257_v10, 2 }
 0x167   :  { %v1300_v11 = vpop.f32.mrb[72].mxu1  ;;  %9031 = vmatprep.mubr.msk.f32.mxu0 %vm10315_vm2, %v14817_v0  ;;  %3092 = vperm.xlu1 %9804, %v2845_v60  }
 0x168   :  { %v8872_v25 = vpop.f32.mrb[73].mxu1  ;;  %3107 = vperm.xlu0 %9803, %v2848_v63  }
 0x169   :  { %v721_v28 = vpop.f32.mrb[72].mxu0  ;;  %v1527_v25 = vsel %vm1486_vm4, %v1524_v48, %v1526_v12  ;;  %v2852_v48 = vld [vmem:[%s14811_s7 + $0x190] sm:$0xff] }
 0x16a   :  { %v11444_v33 = vadd.f32 %v1300_v11, %v721_v28  ;;  %v8651_v35 = vpop.f32.mrb[73].mxu0  ;;  %9032 = vmatmul.mubr.msk.f32.gmra.mrb[178].mxu0 %vm324_vm1, %v1521_v22  ;;  %v2847_v22 = vld [vmem:[%s14811_s7 + $0x168] sm:$0xff] }
 0x16b   :  { %v1305_v40 = vpop.f32.mrb[74].mxu1  ;;  %9034 = vmatprep.mubr.msk.f32.mxu0 %vm10315_vm2, %v14817_v0  ;;  %v10258_v28 = vld [vmem:[%s14809_s0 + $0xa8] sm:$0xff]  ;;  %3102 = vperm.xlu1 %9804, %v2847_v22   ;;  %v10260_v22 = vld [vmem:[%s14809_s0 + $0xb8] sm:$0xff] }
 0x16c   :  { %v8875_v49 = vpop.f32.mrb[75].mxu1  ;;  %v1528_v35 = vrot.slane %v10258_v28, 2  ;;  %3117 = vperm.xlu0 %9803, %v2850_v23   ;;  %v1532_v23 = vrot.slane %v10260_v22, 2 }
 0x16d   :  { %v726_v53 = vpop.f32.mrb[74].mxu0 }
 0x16e   :  { %v11459_v57 = vadd.f32 %v1305_v40, %v726_v53  ;;  %v8654_v58 = vpop.f32.mrb[75].mxu0  ;;  %9035 = vmatmul.mubr.msk.f32.gmra.mrb[180].mxu0 %vm324_vm1, %v1523_v41  ;;  %v1529_v53 = vsel %vm1486_vm4, %v1526_v12, %v1528_v35  ;;  %v2854_v12 = vld [vmem:[%s14811_s7 + $0x1a0] sm:$0xff] }
 0x16f   :  { %v1310_v5 = vpop.f32.mrb[76].mxu1  ;;  %9037 = vmatprep.mubr.msk.f32.mxu0 %vm10315_vm2, %v14817_v0  ;;  %v10259_v58 = vld [vmem:[%s14809_s0 + $0xb0] sm:$0xff]  ;;  %3112 = vperm.xlu1 %9804, %v2849_v44  }
 0x170   :  { %v8878_v14 = vpop.f32.mrb[77].mxu1  ;;  %v1530_v60 = vrot.slane %v10259_v58, 2  ;;  %3127 = vperm.xlu0 %9803, %v2852_v48   ;;  %v10261_v48 = vld [vmem:[%s14809_s0 + $0xc0] sm:$0xff] }
 0x171   :  { %v731_v16 = vpop.f32.mrb[76].mxu0  ;;  %v2851_v14 = vld [vmem:[%s14811_s7 + $0x188] sm:$0xff] }
 0x172   :  { %v11474_v20 = vadd.f32 %v1310_v5, %v731_v16  ;;  %v8657_v11 = vpop.f32.mrb[77].mxu0  ;;  %9038 = vmatmul.mubr.msk.f32.gmra.mrb[182].mxu0 %vm324_vm1, %v1525_v6  ;;  %v1533_v44 = vsel %vm1486_vm4, %v1530_v60, %v1532_v23 }
 0x173   :  { %v1315_v24 = vpop.f32.mrb[78].mxu1  ;;  %9040 = vmatprep.mubr.msk.f32.mxu0 %vm10315_vm2, %v14817_v0  ;;  %v1531_v11 = vsel %vm1486_vm4, %v1528_v35, %v1530_v60  ;;  %3122 = vperm.xlu1 %9804, %v2851_v14   ;;  %v2856_v35 = vld [vmem:[%s14811_s7 + $0x1b0] sm:$0xff]  ;;  %v2858_v60 = vld [vmem:[%s14811_s7 + $0x1c0] sm:$0xff] }
 0x174   :  { %v8881_v38 = vpop.f32.mrb[79].mxu1  ;;  %3137 = vperm.xlu0 %9803, %v2854_v12  }
 0x175   :  { %v736_v39 = vpop.f32.mrb[78].mxu0 }
 0x176   :  { %v11489_v40 = vadd.f32 %v1315_v24, %v736_v39  ;;  %v8660_v41 = vpop.f32.mrb[79].mxu0  ;;  %9041 = vmatmul.mubr.msk.f32.gmra.mrb[184].mxu0 %vm324_vm1, %v1527_v25  ;;  %v2853_v39 = vld [vmem:[%s14811_s7 + $0x198] sm:$0xff] }
 0x177   :  { %v1320_v49 = vpop.f32.mrb[80].mxu1  ;;  %9043 = vmatprep.mubr.msk.f32.mxu0 %vm10315_vm2, %v14817_v0  ;;  %3132 = vperm.xlu1 %9804, %v2853_v39   ;;  %v2857_v39 = vld [vmem:[%s14811_s7 + $0x1b8] sm:$0xff] }
 0x178   :  { %v8884_v63 = vpop.f32.mrb[81].mxu1  ;;  %3147 = vperm.xlu0 %9803, %v2856_v35  }
 0x179   :  { %v741_v5 = vpop.f32.mrb[80].mxu0 }
 0x17a   :  { %v11504_v6 = vadd.f32 %v1320_v49, %v741_v5  ;;  %v8663_v10 = vpop.f32.mrb[81].mxu0  ;;  %9044 = vmatmul.mubr.msk.f32.gmra.mrb[186].mxu0 %vm324_vm1, %v1529_v53  ;;  %v1534_v49 = vrot.slane %v10261_v48, 2 }
 0x17b   :  { %v1325_v16 = vpop.f32.mrb[82].mxu1  ;;  %9046 = vmatprep.mubr.msk.f32.mxu0 %vm10315_vm2, %v14817_v0  ;;  %v2855_v10 = vld [vmem:[%s14811_s7 + $0x1a8] sm:$0xff] }
 0x17c   :  { %v8887_v24 = vpop.f32.mrb[83].mxu1  ;;  %v1535_v12 = vsel %vm1486_vm4, %v1532_v23, %v1534_v49  ;;  %3142 = vperm.xlu1 %9804, %v2855_v10   ;;  %3157 = vperm.xlu0 %9803, %v2858_v60   ;;  %v2860_v23 = vld [vmem:[%s14811_s7 + $0x1d0] sm:$0xff]  ;;  %v2859_v60 = vld [vmem:[%s14811_s7 + $0x1c8] sm:$0xff] }
 0x17d   :  { %v746_v25 = vpop.f32.mrb[82].mxu0 }
 0x17e   :  { %v11519_v28 = vadd.f32 %v1325_v16, %v746_v25  ;;  %v8666_v38 = vpop.f32.mrb[83].mxu0  ;;  %9047 = vmatmul.mubr.msk.f32.gmra.mrb[188].mxu0 %vm324_vm1, %v1531_v11  ;;  %v10262_v16 = vld [vmem:[%s14809_s0 + $0xc8] sm:$0xff] }
 0x17f   :  { %v1330_v41 = vpop.f32.mrb[84].mxu1  ;;  %9049 = vmatprep.mubr.msk.f32.mxu0 %vm10315_vm2, %v14817_v0  ;;  %v1536_v11 = vrot.slane %v10262_v16, 2  ;;  %v10264_v16 = vld [vmem:[%s14809_s0 + $0xd8] sm:$0xff] }
 0x180   :  { %v8890_v53 = vpop.f32.mrb[85].mxu1  ;;  %3152 = vperm.xlu1 %9804, %v2857_v39   ;;  %3167 = vperm.xlu0 %9803, %v2860_v23  }
 0x181   :  { %v751_v58 = vpop.f32.mrb[84].mxu0 }
 0x182   :  { %v11534_v63 = vadd.f32 %v1330_v41, %v751_v58  ;;  %v8669_v5 = vpop.f32.mrb[85].mxu0  ;;  %9050 = vmatmul.mubr.msk.f32.gmra.mrb[190].mxu0 %vm324_vm1, %v1533_v44  ;;  %v1537_v41 = vsel %vm1486_vm4, %v1534_v49, %v1536_v11  ;;  %v10263_v44 = vld [vmem:[%s14809_s0 + $0xd0] sm:$0xff]  ;;  %v2862_v49 = vld [vmem:[%s14811_s7 + $0x1e0] sm:$0xff] }
 0x183   :  { %v1335_v14 = vpop.f32.mrb[86].mxu1  ;;  %9052 = vmatprep.mubr.msk.f32.mxu0 %vm10315_vm2, %v14817_v0  ;;  %v1538_v48 = vrot.slane %v10263_v44, 2 }
 0x184   :  { %v8893_v22 = vpop.f32.mrb[87].mxu1  ;;  %3162 = vperm.xlu1 %9804, %v2859_v60   ;;  %3177 = vperm.xlu0 %9803, %v2862_v49  }
 0x185   :  { %v756_v24 = vpop.f32.mrb[86].mxu0  ;;  %v1540_v22 = vrot.slane %v10264_v16, 2 }
 0x186   :  { %v11549_v25 = vadd.f32 %v1335_v14, %v756_v24  ;;  %v8672_v38 = vpop.f32.mrb[87].mxu0  ;;  %9053 = vmatmul.mubr.msk.f32.gmra.mrb[192].mxu0 %vm324_vm1, %v1535_v12  ;;  %v1539_v12 = vsel %vm1486_vm4, %v1536_v11, %v1538_v48  ;;  %v2864_v11 = vld [vmem:[%s14811_s7 + $0x1f0] sm:$0xff] }
 0x187   :  { %v1340_v35 = vpop.f32.mrb[88].mxu1  ;;  %9055 = vmatprep.mubr.msk.f32.mxu0 %vm10315_vm2, %v14817_v0  ;;  %v1541_v44 = vsel %vm1486_vm4, %v1538_v48, %v1540_v22  ;;  %v2866_v48 = vld [vmem:[%s14811_s7 + $0x200] sm:$0xff] }
 0x188   :  { %v8896_v53 = vpop.f32.mrb[89].mxu1  ;;  %3187 = vperm.xlu0 %9803, %v2864_v11  }
 0x189   :  { %v761_v58 = vpop.f32.mrb[88].mxu0  ;;  %v10265_v53 = vld [vmem:[%s14809_s0 + $0xe0] sm:$0xff] }
 0x18a   :  { %v11564_v5 = vadd.f32 %v1340_v35, %v761_v58  ;;  %v8675_v10 = vpop.f32.mrb[89].mxu0  ;;  %9056 = vmatmul.mubr.msk.f32.gmra.mrb[194].mxu0 %vm324_vm1, %v1537_v41  ;;  %v2861_v35 = vld [vmem:[%s14811_s7 + $0x1d8] sm:$0xff]  ;;  %v1542_v58 = vrot.slane %v10265_v53, 2 }
 0x18b   :  { %v1345_v14 = vpop.f32.mrb[90].mxu1  ;;  %9058 = vmatprep.mubr.msk.f32.mxu0 %vm10315_vm2, %v14817_v0  ;;  %3172 = vperm.xlu1 %9804, %v2861_v35  }
 0x18c   :  { %v8899_v24 = vpop.f32.mrb[91].mxu1  ;;  %3197 = vperm.xlu0 %9803, %v2866_v48  }
 0x18d   :  { %v766_v38 = vpop.f32.mrb[90].mxu0  ;;  %v1543_v24 = vsel %vm1486_vm4, %v1540_v22, %v1542_v58 }
 0x18e   :  { %v11579_v39 = vadd.f32 %v1345_v14, %v766_v38  ;;  %v8678_v23 = vpop.f32.mrb[91].mxu0  ;;  %9059 = vmatmul.mubr.msk.f32.gmra.mrb[196].mxu0 %vm324_vm1, %v1539_v12  ;;  %v2863_v12 = vld [vmem:[%s14811_s7 + $0x1e8] sm:$0xff] }
 0x18f   :  { %v1350_v41 = vpop.f32.mrb[92].mxu1  ;;  %9061 = vmatprep.mubr.msk.f32.mxu0 %vm10315_vm2, %v14817_v0  ;;  %v10266_v38 = vld [vmem:[%s14809_s0 + $0xe8] sm:$0xff]  ;;  %3182 = vperm.xlu1 %9804, %v2863_v12   ;;  %v2868_v12 = vld [vmem:[%s14811_s7 + $0x210] sm:$0xff] }
 0x190   :  { %14951 = vst [vmem:[#allocation2_spill] sm:$0xff] %v11579_v39  ;;  %v8902_v10 = vpop.f32.mrb[93].mxu1  ;;  %v1544_v23 = vrot.slane %v10266_v38, 2  ;;  %3207 = vperm.xlu0 %9803, %v2868_v12  }
 0x191   :  { %v771_v60 = vpop.f32.mrb[92].mxu0  ;;  %v10267_v10 = vld [vmem:[%s14809_s0 + $0xf0] sm:$0xff] }
 0x192   :  { %v11594_v49 = vadd.f32 %v1350_v41, %v771_v60  ;;  %v8681_v14 = vpop.f32.mrb[93].mxu0  ;;  %9062 = vmatmul.mubr.msk.f32.gmra.mrb[198].mxu0 %vm324_vm1, %v1541_v44  ;;  %v1545_v22 = vsel %vm1486_vm4, %v1542_v58, %v1544_v23  ;;  %v1546_v60 = vrot.slane %v10267_v10, 2  ;;  %v2867_v10 = vld [vmem:[%s14811_s7 + $0x208] sm:$0xff] }
 0x193   :  { %v1355_v16 = vpop.f32.mrb[94].mxu1  ;;  %9064 = vmatprep.mubr.msk.f32.mxu0 %vm10315_vm2, %v14817_v0  ;;  %v2865_v14 = vld [vmem:[%s14811_s7 + $0x1f8] sm:$0xff] }
 0x194   :  { %14952 = vst [vmem:[#allocation3_spill] sm:$0xff] %v11594_v49  ;;  %v8905_v35 = vpop.f32.mrb[95].mxu1  ;;  %3192 = vperm.xlu1 %9804, %v2865_v14  }
 0x195   :  { %v776_v11 = vpop.f32.mrb[94].mxu0  ;;  %v1547_v35 = vsel %vm1486_vm4, %v1544_v23, %v1546_v60 }
 0x196   :  { %v11609_v41 = vadd.f32 %v1355_v16, %v776_v11  ;;  %v8684_v44 = vpop.f32.mrb[95].mxu0  ;;  %9065 = vmatmul.mubr.msk.f32.gmra.mrb[200].mxu0 %vm324_vm1, %v1543_v24  ;;  %v10268_v11 = vld [vmem:[%s14809_s0 + $0xf8] sm:$0xff] }
 0x197   :  { %v1360_v53 = vpop.f32.mrb[96].mxu1  ;;  %9067 = vmatprep.mubr.msk.f32.mxu0 %vm10315_vm2, %v14817_v0  ;;  %v1548_v44 = vrot.slane %v10268_v11, 2 }
 0x198   :  { %14953 = vst [vmem:[#allocation4_spill] sm:$0xff] %v11609_v41  ;;  %v8908_v48 = vpop.f32.mrb[97].mxu1  ;;  %3202 = vperm.xlu1 %9804, %v2867_v10   ;;  %v2869_v10 = vld [vmem:[%s14811_s7 + $0x218] sm:$0xff]  ;;  %v14979_v41 = vmov 0.0  }
 0x199   :  { %v781_v16 = vpop.f32.mrb[96].mxu0 }
 0x19a   :  { %v11624_v24 = vadd.f32 %v1360_v53, %v781_v16  ;;  %v8687_v58 = vpop.f32.mrb[97].mxu0  ;;  %9068 = vmatmul.mubr.msk.f32.gmra.mrb[202].mxu0 %vm324_vm1, %v1545_v22  ;;  %v2870_v53 = vld [vmem:[%s14811_s7 + $0x220] sm:$0xff]  ;;  %v1549_v16 = vsel %vm1486_vm4, %v1546_v60, %v1548_v44 }
 0x19b   :  { %v1365_v38 = vpop.f32.mrb[98].mxu1  ;;  %9070 = vmatprep.mubr.msk.f32.mxu0 %vm10315_vm2, %v14817_v0  ;;  %3217 = vperm.xlu0 %9803, %v2870_v53   ;;  %v10269_v58 = vld [vmem:[%s14809_s0 + $0x100] sm:$0xff] }
 0x19c   :  { %14954 = vst [vmem:[#allocation5_spill] sm:$0xff] %v11624_v24  ;;  %v8911_v22 = vpop.f32.mrb[99].mxu1  ;;  %v1550_v11 = vrot.slane %v10269_v58, 2  ;;  %3212 = vperm.xlu1 %9804, %v2869_v10   ;;  %v10270_v58 = vld [vmem:[%s14809_s0 + $0x108] sm:$0xff] }
 0x19d   :  { %v786_v14 = vpop.f32.mrb[98].mxu0  ;;  %v2871_v10 = vld [vmem:[%s14811_s7 + $0x228] sm:$0xff] }
 0x19e   :  { %v11639_v12 = vadd.f32 %v1365_v38, %v786_v14  ;;  %v8690_v23 = vpop.f32.mrb[99].mxu0  ;;  %9071 = vmatmul.mubr.msk.f32.gmra.mrb[204].mxu0 %vm324_vm1, %v1547_v35  ;;  %v2872_v38 = vld [vmem:[%s14811_s7 + $0x230] sm:$0xff] }
 0x19f   :  { %v1370_v48 = vpop.f32.mrb[100].mxu1  ;;  %9073 = vmatprep.mubr.msk.f32.mxu0 %vm10315_vm2, %v14817_v0  ;;  %3227 = vperm.xlu0 %9803, %v2872_v38   ;;  %v1551_v23 = vsel %vm1486_vm4, %v1548_v44, %v1550_v11 }
 0x1a0   :  { %14955 = vst [vmem:[#allocation6_spill] sm:$0xff] %v11639_v12  ;;  %v8914_v35 = vpop.f32.mrb[101].mxu1  ;;  %v1552_v12 = vrot.slane %v10270_v58, 2  ;;  %3222 = vperm.xlu1 %9804, %v2871_v10   ;;  %v10271_v58 = vld [vmem:[%s14809_s0 + $0x110] sm:$0xff]  ;;  %v2873_v10 = vld [vmem:[%s14811_s7 + $0x238] sm:$0xff] }
 0x1a1   :  { %v791_v53 = vpop.f32.mrb[100].mxu0 }
 0x1a2   :  { %v11654_v22 = vadd.f32 %v1370_v48, %v791_v53  ;;  %v8693_v60 = vpop.f32.mrb[101].mxu0  ;;  %9074 = vmatmul.mubr.msk.f32.gmra.mrb[206].mxu0 %vm324_vm1, %v1549_v16  ;;  %v2874_v48 = vld [vmem:[%s14811_s7 + $0x240] sm:$0x3] }
 0x1a3   :  { %v1375_v14 = vpop.f32.mrb[102].mxu1  ;;  %9076 = vmatprep.mubr.msk.f32.mxu0 %vm10315_vm2, %v14817_v0  ;;  %3237 = vperm.xlu0 %9803, %v2874_v48   ;;  %v1553_v60 = vsel %vm1486_vm4, %v1550_v11, %v1552_v12 }
 0x1a4   :  { %14956 = vst [vmem:[#allocation7_spill] sm:$0xff] %v11654_v22  ;;  %v8917_v16 = vpop.f32.mrb[103].mxu1  ;;  %v1554_v22 = vrot.slane %v10271_v58, 2  ;;  %3232 = vperm.xlu1 %9804, %v2873_v10  }
 0x1a5   :  { %v796_v38 = vpop.f32.mrb[102].mxu0 }
 0x1a6   :  { %v11669_v35 = vadd.f32 %v1375_v14, %v796_v38  ;;  %v8696_v44 = vpop.f32.mrb[103].mxu0  ;;  %9077 = vmatmul.mubr.msk.f32.gmra.mrb[208].mxu0 %vm324_vm1, %v1551_v23  ;;  %v1555_v11 = vsel %vm1486_vm4, %v1552_v12, %v1554_v22  ;;  %v10273_v12 = vld [vmem:[%s14809_s0 + $0x120] sm:$0xff] }
 0x1a7   :  { %v1380_v53 = vpop.f32.mrb[104].mxu1  ;;  %9079 = vmatprep.mubr.msk.f32.mxu0 %vm10315_vm2, %v14817_v0  ;;  %v10272_v44 = vld [vmem:[%s14809_s0 + $0x118] sm:$0xff] }
 0x1a8   :  { %14957 = vst [vmem:[#allocation8_spill] sm:$0xff] %v11669_v35  ;;  %v8920_v14 = vpop.f32.mrb[105].mxu1  ;;  %v1556_v58 = vrot.slane %v10272_v44, 2 }
 0x1a9   :  { %v801_v48 = vpop.f32.mrb[104].mxu0 }
 0x1aa   :  { %v11681_v16 = vadd.f32 %v1380_v53, %v801_v48  ;;  %v8699_v23 = vpop.f32.mrb[105].mxu0  ;;  %9080 = vmatmul.mubr.msk.f32.gmra.mrb[210].mxu0 %vm324_vm1, %v1553_v60  ;;  %v1557_v60 = vsel %vm1486_vm4, %v1554_v22, %v1556_v58  ;;  %v10274_v22 = vld [vmem:[%s14809_s0 + $0x128] sm:$0xff] }
 0x1ab   :  { %v1385_v38 = vpop.f32.mrb[106].mxu1  ;;  %9082 = vmatprep.mubr.msk.f32.mxu0 %vm10315_vm2, %v14817_v0  ;;  %v1558_v23 = vrot.slane %v10273_v12, 2 }
 0x1ac   :  { %14958 = vst [vmem:[#allocation9_spill] sm:$0xff] %v11681_v16  ;;  %v8923_v35 = vpop.f32.mrb[107].mxu1 }
 0x1ad   :  { %v806_v14 = vpop.f32.mrb[106].mxu0 }
 0x1ae   :  { %v11690_v10 = vadd.f32 %v1385_v38, %v806_v14  ;;  %v8702_v53 = vpop.f32.mrb[107].mxu0  ;;  %9083 = vmatmul.mubr.msk.f32.gmra.mrb[212].mxu0 %vm324_vm1, %v1555_v11  ;;  %v1559_v11 = vsel %vm1486_vm4, %v1556_v58, %v1558_v23  ;;  %v10275_v58 = vld [vmem:[%s14809_s0 + $0x130] sm:$0xff] }
 0x1af   :  { %v1390_v48 = vpop.f32.mrb[108].mxu1  ;;  %9085 = vmatprep.mubr.msk.f32.mxu0 %vm10315_vm2, %v14817_v0  ;;  %v1560_v53 = vrot.slane %v10274_v22, 2 }
 0x1b0   :  { %14959 = vst [vmem:[#allocation10_spill] sm:$0xff] %v11690_v10  ;;  %v8926_v16 = vpop.f32.mrb[109].mxu1 }
 0x1b1   :  { %v811_v44 = vpop.f32.mrb[108].mxu0 }
 0x1b2   :  { %v11699_v35 = vadd.f32 %v1390_v48, %v811_v44  ;;  %v8705_v38 = vpop.f32.mrb[109].mxu0  ;;  %9086 = vmatmul.mubr.msk.f32.gmra.mrb[214].mxu0 %vm324_vm1, %v1557_v60  ;;  %v1561_v60 = vsel %vm1486_vm4, %v1558_v23, %v1560_v53  ;;  %v10276_v23 = vld [vmem:[%s14809_s0 + $0x138] sm:$0xff] }
 0x1b3   :  { %v1395_v14 = vpop.f32.mrb[110].mxu1  ;;  %9088 = vmatprep.mubr.msk.f32.mxu0 %vm10315_vm2, %v14817_v0  ;;  %v1562_v38 = vrot.slane %v10275_v58, 2 }
 0x1b4   :  { %14960 = vst [vmem:[#allocation11_spill] sm:$0xff] %v11699_v35  ;;  %v8929_v10 = vpop.f32.mrb[111].mxu1 }
 0x1b5   :  { %v816_v12 = vpop.f32.mrb[110].mxu0 }
 0x1b6   :  { %v11708_v16 = vadd.f32 %v1395_v14, %v816_v12  ;;  %v8708_v48 = vpop.f32.mrb[111].mxu0  ;;  %9089 = vmatmul.mubr.msk.f32.gmra.mrb[216].mxu0 %vm324_vm1, %v1559_v11  ;;  %v1563_v11 = vsel %vm1486_vm4, %v1560_v53, %v1562_v38  ;;  %v10277_v53 = vld [vmem:[%s14809_s0 + $0x140] sm:$0xff] }
 0x1b7   :  { %v1400_v44 = vpop.f32.mrb[112].mxu1  ;;  %9091 = vmatprep.mubr.msk.f32.mxu0 %vm10315_vm2, %v14817_v0  ;;  %v1564_v48 = vrot.slane %v10276_v23, 2 }
 0x1b8   :  { %14961 = vst [vmem:[#allocation12_spill] sm:$0xff] %v11708_v16  ;;  %v8932_v35 = vpop.f32.mrb[113].mxu1 }
 0x1b9   :  { %v821_v22 = vpop.f32.mrb[112].mxu0 }
 0x1ba   :  { %v11717_v10 = vadd.f32 %v1400_v44, %v821_v22  ;;  %v8711_v14 = vpop.f32.mrb[113].mxu0  ;;  %9092 = vmatmul.mubr.msk.f32.gmra.mrb[218].mxu0 %vm324_vm1, %v1561_v60  ;;  %v1565_v60 = vsel %vm1486_vm4, %v1562_v38, %v1564_v48  ;;  %v10278_v38 = vld [vmem:[%s14809_s0 + $0x148] sm:$0xff] }
 0x1bb   :  { %v1405_v12 = vpop.f32.mrb[114].mxu1  ;;  %9094 = vmatprep.mubr.msk.f32.mxu0 %vm10315_vm2, %v14817_v0  ;;  %v1566_v14 = vrot.slane %v10277_v53, 2 }
 0x1bc   :  { %14962 = vst [vmem:[#allocation13_spill] sm:$0xff] %v11717_v10  ;;  %v8935_v16 = vpop.f32.mrb[115].mxu1 }
 0x1bd   :  { %v826_v58 = vpop.f32.mrb[114].mxu0 }
 0x1be   :  { %v11726_v35 = vadd.f32 %v1405_v12, %v826_v58  ;;  %v8714_v44 = vpop.f32.mrb[115].mxu0  ;;  %9095 = vmatmul.mubr.msk.f32.gmra.mrb[220].mxu0 %vm324_vm1, %v1563_v11  ;;  %v1567_v11 = vsel %vm1486_vm4, %v1564_v48, %v1566_v14  ;;  %v10279_v48 = vld [vmem:[%s14809_s0 + $0x150] sm:$0xff] }
 0x1bf   :  { %v1410_v22 = vpop.f32.mrb[116].mxu1  ;;  %9097 = vmatprep.mubr.msk.f32.mxu0 %vm10315_vm2, %v14817_v0  ;;  %v1568_v44 = vrot.slane %v10278_v38, 2 }
 0x1c0   :  { %14963 = vst [vmem:[#allocation14_spill] sm:$0xff] %v11726_v35  ;;  %v8938_v10 = vpop.f32.mrb[117].mxu1 }
 0x1c1   :  { %v831_v23 = vpop.f32.mrb[116].mxu0 }
 0x1c2   :  { %v11735_v16 = vadd.f32 %v1410_v22, %v831_v23  ;;  %v8717_v12 = vpop.f32.mrb[117].mxu0  ;;  %9098 = vmatmul.mubr.msk.f32.gmra.mrb[222].mxu0 %vm324_vm1, %v1565_v60  ;;  %v1569_v60 = vsel %vm1486_vm4, %v1566_v14, %v1568_v44  ;;  %v10280_v14 = vld [vmem:[%s14809_s0 + $0x158] sm:$0xff] }
 0x1c3   :  { %v1415_v58 = vpop.f32.mrb[118].mxu1  ;;  %9100 = vmatprep.mubr.msk.f32.mxu0 %vm10315_vm2, %v14817_v0  ;;  %v1570_v12 = vrot.slane %v10279_v48, 2 }
 0x1c4   :  { %14964 = vst [vmem:[#allocation15_spill] sm:$0xff] %v11735_v16  ;;  %v8941_v35 = vpop.f32.mrb[119].mxu1 }
 0x1c5   :  { %v836_v53 = vpop.f32.mrb[118].mxu0 }
 0x1c6   :  { %v11744_v10 = vadd.f32 %v1415_v58, %v836_v53  ;;  %v8720_v22 = vpop.f32.mrb[119].mxu0  ;;  %9101 = vmatmul.mubr.msk.f32.gmra.mrb[224].mxu0 %vm324_vm1, %v1567_v11  ;;  %v1571_v11 = vsel %vm1486_vm4, %v1568_v44, %v1570_v12  ;;  %v10281_v44 = vld [vmem:[%s14809_s0 + $0x160] sm:$0xff] }
 0x1c7   :  { %v1420_v23 = vpop.f32.mrb[120].mxu1  ;;  %9103 = vmatprep.mubr.msk.f32.mxu0 %vm10315_vm2, %v14817_v0  ;;  %v1572_v22 = vrot.slane %v10280_v14, 2 }
 0x1c8   :  { %14965 = vst [vmem:[#allocation16_spill] sm:$0xff] %v11744_v10  ;;  %v8944_v16 = vpop.f32.mrb[121].mxu1 }
 0x1c9   :  { %v841_v38 = vpop.f32.mrb[120].mxu0 }
 0x1ca   :  { %v11753_v35 = vadd.f32 %v1420_v23, %v841_v38  ;;  %v8723_v58 = vpop.f32.mrb[121].mxu0  ;;  %9104 = vmatmul.mubr.msk.f32.gmra.mrb[226].mxu0 %vm324_vm1, %v1569_v60  ;;  %v1573_v60 = vsel %vm1486_vm4, %v1570_v12, %v1572_v22  ;;  %v10282_v12 = vld [vmem:[%s14809_s0 + $0x168] sm:$0xff] }
 0x1cb   :  { %v1425_v53 = vpop.f32.mrb[122].mxu1  ;;  %9106 = vmatprep.mubr.msk.f32.mxu0 %vm10315_vm2, %v14817_v0  ;;  %v1574_v58 = vrot.slane %v10281_v44, 2 }
 0x1cc   :  { %14966 = vst [vmem:[#allocation17_spill] sm:$0xff] %v11753_v35  ;;  %v8947_v10 = vpop.f32.mrb[123].mxu1 }
 0x1cd   :  { %v846_v48 = vpop.f32.mrb[122].mxu0 }
 0x1ce   :  { %v11762_v16 = vadd.f32 %v1425_v53, %v846_v48  ;;  %v8726_v23 = vpop.f32.mrb[123].mxu0  ;;  %9107 = vmatmul.mubr.msk.f32.gmra.mrb[228].mxu0 %vm324_vm1, %v1571_v11  ;;  %v1575_v11 = vsel %vm1486_vm4, %v1572_v22, %v1574_v58  ;;  %v10283_v22 = vld [vmem:[%s14809_s0 + $0x170] sm:$0xff] }
 0x1cf   :  { %v1430_v38 = vpop.f32.mrb[124].mxu1  ;;  %9109 = vmatprep.mubr.msk.f32.mxu0 %vm10315_vm2, %v14817_v0  ;;  %v1576_v23 = vrot.slane %v10282_v12, 2 }
 0x1d0   :  { %14967 = vst [vmem:[#allocation18_spill] sm:$0xff] %v11762_v16  ;;  %v8950_v35 = vpop.f32.mrb[125].mxu1 }
 0x1d1   :  { %v851_v14 = vpop.f32.mrb[124].mxu0 }
 0x1d2   :  { %v11771_v10 = vadd.f32 %v1430_v38, %v851_v14  ;;  %v8729_v53 = vpop.f32.mrb[125].mxu0  ;;  %9110 = vmatmul.mubr.msk.f32.gmra.mrb[230].mxu0 %vm324_vm1, %v1573_v60  ;;  %v1577_v60 = vsel %vm1486_vm4, %v1574_v58, %v1576_v23  ;;  %v10284_v58 = vld [vmem:[%s14809_s0 + $0x178] sm:$0xff] }
 0x1d3   :  { %v1435_v48 = vpop.f32.mrb[126].mxu1  ;;  %9112 = vmatprep.mubr.msk.f32.mxu0 %vm10315_vm2, %v14817_v0  ;;  %v1578_v53 = vrot.slane %v10283_v22, 2 }
 0x1d4   :  { %14968 = vst [vmem:[#allocation19_spill] sm:$0xff] %v11771_v10  ;;  %v8953_v16 = vpop.f32.mrb[127].mxu1 }
 0x1d5   :  { %v856_v44 = vpop.f32.mrb[126].mxu0 }
 0x1d6   :  { %v11780_v35 = vadd.f32 %v1435_v48, %v856_v44  ;;  %v8732_v38 = vpop.f32.mrb[127].mxu0  ;;  %9113 = vmatmul.mubr.msk.f32.gmra.mrb[232].mxu0 %vm324_vm1, %v1575_v11  ;;  %v1579_v11 = vsel %vm1486_vm4, %v1576_v23, %v1578_v53  ;;  %v10285_v23 = vld [vmem:[%s14809_s0 + $0x180] sm:$0xff] }
 0x1d7   :  { %v1440_v14 = vpop.f32.mrb[128].mxu1  ;;  %9115 = vmatprep.mubr.msk.f32.mxu0 %vm10315_vm2, %v14817_v0  ;;  %v1580_v38 = vrot.slane %v10284_v58, 2 }
 0x1d8   :  { %14969 = vst [vmem:[#allocation20_spill] sm:$0xff] %v11780_v35  ;;  %v8956_v10 = vpop.f32.mrb[129].mxu1 }
 0x1d9   :  { %v861_v12 = vpop.f32.mrb[128].mxu0 }
 0x1da   :  { %v11789_v16 = vadd.f32 %v1440_v14, %v861_v12  ;;  %v8735_v48 = vpop.f32.mrb[129].mxu0  ;;  %9116 = vmatmul.mubr.msk.f32.gmra.mrb[234].mxu0 %vm324_vm1, %v1577_v60  ;;  %v1581_v60 = vsel %vm1486_vm4, %v1578_v53, %v1580_v38  ;;  %v10286_v53 = vld [vmem:[%s14809_s0 + $0x188] sm:$0xff] }
 0x1db   :  { %v1445_v44 = vpop.f32.mrb[130].mxu1  ;;  %9118 = vmatprep.mubr.msk.f32.mxu0 %vm10315_vm2, %v14817_v0  ;;  %v1582_v48 = vrot.slane %v10285_v23, 2 }
 0x1dc   :  { %14970 = vst [vmem:[#allocation21_spill] sm:$0xff] %v11789_v16  ;;  %v8959_v35 = vpop.f32.mrb[131].mxu1 }
 0x1dd   :  { %v866_v22 = vpop.f32.mrb[130].mxu0 }
 0x1de   :  { %v11798_v10 = vadd.f32 %v1445_v44, %v866_v22  ;;  %v8738_v14 = vpop.f32.mrb[131].mxu0  ;;  %9119 = vmatmul.mubr.msk.f32.gmra.mrb[236].mxu0 %vm324_vm1, %v1579_v11  ;;  %v1583_v11 = vsel %vm1486_vm4, %v1580_v38, %v1582_v48  ;;  %v10287_v38 = vld [vmem:[%s14809_s0 + $0x190] sm:$0xff] }
 0x1df   :  { %v1450_v12 = vpop.f32.mrb[132].mxu1  ;;  %9121 = vmatprep.mubr.msk.f32.mxu0 %vm10315_vm2, %v14817_v0  ;;  %v1584_v14 = vrot.slane %v10286_v53, 2 }
 0x1e0   :  { %14971 = vst [vmem:[#allocation22_spill] sm:$0xff] %v11798_v10  ;;  %v8962_v16 = vpop.f32.mrb[133].mxu1 }
 0x1e1   :  { %v871_v58 = vpop.f32.mrb[132].mxu0 }
 0x1e2   :  { %v11807_v35 = vadd.f32 %v1450_v12, %v871_v58  ;;  %v8741_v44 = vpop.f32.mrb[133].mxu0  ;;  %9122 = vmatmul.mubr.msk.f32.gmra.mrb[238].mxu0 %vm324_vm1, %v1581_v60  ;;  %v1585_v60 = vsel %vm1486_vm4, %v1582_v48, %v1584_v14  ;;  %v10288_v48 = vld [vmem:[%s14809_s0 + $0x198] sm:$0xff] }
 0x1e3   :  { %v1455_v22 = vpop.f32.mrb[134].mxu1  ;;  %9124 = vmatprep.mubr.msk.f32.mxu0 %vm10315_vm2, %v14817_v0  ;;  %v1586_v44 = vrot.slane %v10287_v38, 2 }
 0x1e4   :  { %14972 = vst [vmem:[#allocation23_spill] sm:$0xff] %v11807_v35  ;;  %v8965_v10 = vpop.f32.mrb[135].mxu1 }
 0x1e5   :  { %v876_v23 = vpop.f32.mrb[134].mxu0 }
 0x1e6   :  { %v11816_v16 = vadd.f32 %v1455_v22, %v876_v23  ;;  %v8744_v12 = vpop.f32.mrb[135].mxu0  ;;  %9125 = vmatmul.mubr.msk.f32.gmra.mrb[240].mxu0 %vm324_vm1, %v1583_v11  ;;  %v1587_v11 = vsel %vm1486_vm4, %v1584_v14, %v1586_v44  ;;  %v10289_v14 = vld [vmem:[%s14809_s0 + $0x1a0] sm:$0xff] }
 0x1e7   :  { %v1460_v58 = vpop.f32.mrb[136].mxu1  ;;  %9127 = vmatprep.mubr.msk.f32.mxu0 %vm10315_vm2, %v14817_v0  ;;  %v1588_v12 = vrot.slane %v10288_v48, 2 }
 0x1e8   :  { %14973 = vst [vmem:[#allocation24_spill] sm:$0xff] %v11816_v16  ;;  %v8968_v35 = vpop.f32.mrb[137].mxu1 }
 0x1e9   :  { %v881_v53 = vpop.f32.mrb[136].mxu0 }
 0x1ea   :  { %v11825_v10 = vadd.f32 %v1460_v58, %v881_v53  ;;  %v8747_v22 = vpop.f32.mrb[137].mxu0  ;;  %9128 = vmatmul.mubr.msk.f32.gmra.mrb[242].mxu0 %vm324_vm1, %v1585_v60  ;;  %v1589_v60 = vsel %vm1486_vm4, %v1586_v44, %v1588_v12  ;;  %v10290_v44 = vld [vmem:[%s14809_s0 + $0x1a8] sm:$0xff] }
 0x1eb   :  { %v1465_v23 = vpop.f32.mrb[138].mxu1  ;;  %9130 = vmatprep.mubr.msk.f32.mxu0 %vm10315_vm2, %v14817_v0  ;;  %v1590_v22 = vrot.slane %v10289_v14, 2 }
 0x1ec   :  { %14974 = vst [vmem:[#allocation25_spill] sm:$0xff] %v11825_v10  ;;  %v8971_v16 = vpop.f32.mrb[139].mxu1 }
 0x1ed   :  { %v886_v38 = vpop.f32.mrb[138].mxu0 }
 0x1ee   :  { %v11834_v35 = vadd.f32 %v1465_v23, %v886_v38  ;;  %v8750_v58 = vpop.f32.mrb[139].mxu0  ;;  %9131 = vmatmul.mubr.msk.f32.gmra.mrb[244].mxu0 %vm324_vm1, %v1587_v11  ;;  %v1591_v11 = vsel %vm1486_vm4, %v1588_v12, %v1590_v22  ;;  %v10291_v12 = vld [vmem:[%s14809_s0 + $0x1b0] sm:$0xff] }
 0x1ef   :  { %v1470_v53 = vpop.f32.mrb[140].mxu1  ;;  %9133 = vmatprep.mubr.msk.f32.mxu0 %vm10315_vm2, %v14817_v0  ;;  %v1592_v58 = vrot.slane %v10290_v44, 2 }
 0x1f0   :  { %14975 = vst [vmem:[#allocation26_spill] sm:$0xff] %v11834_v35  ;;  %v8974_v10 = vpop.f32.mrb[141].mxu1 }
 0x1f1   :  { %v891_v48 = vpop.f32.mrb[140].mxu0 }
 0x1f2   :  { %v11843_v16 = vadd.f32 %v1470_v53, %v891_v48  ;;  %v8753_v23 = vpop.f32.mrb[141].mxu0  ;;  %9134 = vmatmul.mubr.msk.f32.gmra.mrb[246].mxu0 %vm324_vm1, %v1589_v60  ;;  %v1593_v60 = vsel %vm1486_vm4, %v1590_v22, %v1592_v58  ;;  %v10292_v22 = vld [vmem:[%s14809_s0 + $0x1b8] sm:$0xff] }
 0x1f3   :  { %v1475_v38 = vpop.f32.mrb[142].mxu1  ;;  %9136 = vmatprep.mubr.msk.f32.mxu0 %vm10315_vm2, %v14817_v0  ;;  %v1594_v23 = vrot.slane %v10291_v12, 2 }
 0x1f4   :  { %14976 = vst [vmem:[#allocation27_spill] sm:$0xff] %v11843_v16  ;;  %v8977_v35 = vpop.f32.mrb[143].mxu1 }
 0x1f5   :  { %v896_v14 = vpop.f32.mrb[142].mxu0 }
 0x1f6   :  { %v11852_v10 = vadd.f32 %v1475_v38, %v896_v14  ;;  %v8756_v53 = vpop.f32.mrb[143].mxu0  ;;  %9137 = vmatmul.mubr.msk.f32.gmra.mrb[248].mxu0 %vm324_vm1, %v1591_v11  ;;  %v1595_v11 = vsel %vm1486_vm4, %v1592_v58, %v1594_v23  ;;  %v1596_v14 = vrot.slane %v10292_v22, 2  ;;  %v10293_v58 = vld [vmem:[%s14809_s0 + $0x1c0] sm:$0xff] }
 0x1f7   :  { %v1480_v48 = vpop.f32.mrb[144].mxu1  ;;  %9139 = vmatprep.mubr.msk.f32.mxu0 %vm10315_vm2, %v14817_v0 }
 0x1f8   :  { %14977 = vst [vmem:[#allocation28_spill] sm:$0xff] %v11852_v10  ;;  %v8980_v16 = vpop.f32.mrb[145].mxu1 }
 0x1f9   :  { %v901_v44 = vpop.f32.mrb[144].mxu0  ;;  %v11873_v16 = vld [vmem:[%s14812_s2] ss:$0 sm:$0xff] }
 0x1fa   :  { %v11861_v35 = vadd.f32 %v1480_v48, %v901_v44  ;;  %v8759_v38 = vpop.f32.mrb[145].mxu0  ;;  %9140 = vmatmul.mubr.msk.f32.gmra.mrb[250].mxu0 %vm324_vm1, %v1593_v60  ;;  %v1598_v60 = vrot.slane %v10293_v58, 2  ;;  %v1597_v44 = vsel %vm1486_vm4, %v1594_v23, %v1596_v14 }
 0x1fb   :  { %9142 = vmatprep.mubr.msk.f32.mxu0 %vm10315_vm2, %v14817_v0 }
 0x1fc   :  { %14978 = vst [vmem:[#allocation29_spill] sm:$0xff] %v11861_v35 }
 0x1fd   :  { %v1847_v53 = vpop.f32.mrb[146].mxu0 }
 0x1fe   :  { %v2211_v48 = vadd.f32 %v1847_v53, %v10942_v54  ;;  %v8985_v12 = vpop.f32.mrb[147].mxu0  ;;  %9143 = vmatmul.mubr.msk.f32.gmra.mrb[252].mxu0 %vm324_vm1, %v1595_v11  ;;  %v10294_v11 = vld [vmem:[%s14809_s0 + $0x1c8] sm:$0xff] }
 0x1ff   :  { %9145 = vmatprep.mubr.msk.f32.mxu0 %vm10315_vm2, %v14817_v0  ;;  %v1600_v53 = vrot.slane %v10294_v11, 2  ;;  %v1599_v12 = vsel %vm1486_vm4, %v1596_v14, %v1598_v60 }
 0x200   :  { %v2291_v38 = vadd.f32 %v11873_v16, %v2211_v48 }
 0x201   :  { %v1852_v22 = vpop.f32.mrb[148].mxu0 }
 0x202   :  { %v2437_v35 = vmin.f32 %v2291_v38, 0.0  ;;  %v2212_v10 = vadd.f32 %v1852_v22, %v10954_v62  ;;  %v8988_v54 = vpop.f32.mrb[149].mxu0  ;;  %9146 = vmatmul.mubr.msk.f32.gmra.mrb[254].mxu0 %vm324_vm1, %v1597_v44  ;;  %vm2364_vm5 = vcmp.gt.f32.partialorder %v2291_v38, 0.0 }
 0x203   :  { %9148 = vmatprep.mubr.msk.f32.mxu0 %vm10315_vm2, %v14817_v0  ;;  %v10295_v54 = vld [vmem:[%s14809_s0 + $0x1d0] sm:$0xff] }
 0x204   :  { %v2510_v23 = vmul.f32 1.442695, %v2437_v35  ;;  %v11893_v48 = vadd.f32 %v11873_v16, %v2212_v10  ;;  %v1602_v11 = vrot.slane %v10295_v54, 2  ;;  %v1601_v10 = vsel %vm1486_vm4, %v1598_v60, %v1600_v53 }
 0x205   :  { %v1857_v58 = vpop.f32.mrb[150].mxu0 }
 0x206   :  { %9805 = vpow2.f32 %v2510_v23  ;;  %v2438_v62 = vmin.f32 %v11893_v48, 0.0  ;;  %v2213_v44 = vadd.f32 %v1857_v58, %v10966_v9  ;;  %v8991_v22 = vpop.f32.mrb[151].mxu0  ;;  %9149 = vmatmul.mubr.msk.f32.gmra.mrb[0].mxu0 %vm324_vm1, %v1599_v12  ;;  %v1603_v60 = vsel %vm1486_vm4, %v1600_v53, %v1602_v11  ;;  %v2878_v53 = vpop.permute.xlu0 %2877 }
 0x207   :  { %9151 = vmatprep.mubr.msk.f32.mxu0 %vm10315_vm2, %v14817_v0  ;;  %v10296_v22 = vld [vmem:[%s14809_s0 + $0x1d8] sm:$0xff]  ;;  %vm2365_vm6 = vcmp.gt.f32.partialorder %v11893_v48, 0.0 }
 0x208   :  { %v2512_v35 = vmul.f32 1.442695, %v2438_v62  ;;  %v11905_v14 = vadd.f32 %v11873_v16, %v2213_v44  ;;  %v1604_v54 = vrot.slane %v10296_v22, 2 }
 0x209   :  { %v1862_v23 = vpop.f32.mrb[152].mxu0 }
 0x20a   :  { %9807 = vpow2.f32 %v2512_v35  ;;  %v2439_v9 = vmin.f32 %v11905_v14, 0.0  ;;  %v2214_v12 = vadd.f32 %v1862_v23, %v10978_v18  ;;  %v8994_v58 = vpop.f32.mrb[153].mxu0  ;;  %9152 = vmatmul.mubr.msk.f32.gmra.mrb[2].mxu0 %vm324_vm1, %v1601_v10  ;;  %vm2366_vm7 = vcmp.gt.f32.partialorder %v11905_v14, 0.0 }
 0x20b   :  { %9154 = vmatprep.mubr.msk.f32.mxu0 %vm10315_vm2, %v14817_v0  ;;  %v10297_v58 = vld [vmem:[%s14809_s0 + $0x1e0] sm:$0xff] }
 0x20c   :  { %v2514_v62 = vmul.f32 1.442695, %v2439_v9  ;;  %v11917_v44 = vadd.f32 %v11873_v16, %v2214_v12  ;;  %v1606_v22 = vrot.slane %v10297_v58, 2  ;;  %v1605_v9 = vsel %vm1486_vm4, %v1602_v11, %v1604_v54  ;;  %v10298_v11 = vld [vmem:[%s14809_s0 + $0x1e8] sm:$0xff] }
 0x20d   :  { %v1867_v35 = vpop.f32.mrb[154].mxu0 }
 0x20e   :  { %9809 = vpow2.f32 %v2514_v62  ;;  %v2440_v18 = vmin.f32 %v11917_v44, 0.0  ;;  %v2215_v10 = vadd.f32 %v1867_v35, %v10990_v26  ;;  %v8997_v23 = vpop.f32.mrb[155].mxu0  ;;  %9155 = vmatmul.mubr.msk.f32.gmra.mrb[4].mxu0 %vm324_vm1, %v1603_v60  ;;  %vm2367_vm8 = vcmp.gt.f32.partialorder %v11917_v44, 0.0 }
 0x20f   :  { %9157 = vmatprep.mubr.msk.f32.mxu0 %vm10315_vm2, %v14817_v0  ;;  %v1608_v0 = vrot.slane %v10298_v11, 2  ;;  %v2888_v11 = vpop.permute.xlu1 %2887 }
 0x210   :  { %v9806_v12 = vpop.eup %9805  ;;  %v2516_v62 = vmul.f32 1.442695, %v2440_v18  ;;  %v11929_v24 = vadd.f32 %v11873_v16, %v2215_v10  ;;  %v1607_v10 = vsel %vm1486_vm4, %v1604_v54, %v1606_v22  ;;  %v10299_v54 = vld [vmem:[%s14809_s0 + $0x1f0] sm:$0xff] }
 0x211   :  { %v1872_v26 = vpop.f32.mrb[156].mxu0  ;;  %v7510_v35 = vadd.f32 -1.0, %v9806_v12 }
 0x212   :  { %9811 = vpow2.f32 %v2516_v62  ;;  %v2441_v60 = vmin.f32 %v11929_v24, 0.0  ;;  %v2216_v23 = vadd.f32 %v1872_v26, %v11002_v34  ;;  %v9000_v58 = vpop.f32.mrb[157].mxu0  ;;  %9158 = vmatmul.mubr.msk.f32.gmra.mrb[6].mxu0 %vm324_vm1, %v1605_v9  ;;  %v2883_v26 = vpop.permute.xlu0 %2882  ;;  %vm2368_vm9 = vcmp.gt.f32.partialorder %v11929_v24, 0.0 }
 0x213   :  { %v2729_v18 = vsel %vm2364_vm5, %v2291_v38, %v7510_v35  ;;  %9160 = vmatprep.mubr.msk.f32.mxu0 %vm10315_vm2, %v14979_v41  ;;  %v1610_v35 = vrot.slane %v10299_v54, 2 }
 0x214   :  { %v9808_v12 = vpop.eup %9807  ;;  %v2518_v62 = vmul.f32 1.442695, %v2441_v60  ;;  %v11941_v49 = vadd.f32 %v11873_v16, %v2216_v23  ;;  %v11944_v39 = vmul.f32 %v2878_v53, %v2729_v18  ;;  %v1609_v53 = vsel %vm1486_vm4, %v1606_v22, %v1608_v0  ;;  %v10300_v22 = vld [vmem:[%s14809_s0 + $0x1f8] sm:$0xff] }
 0x215   :  { %v1877_v34 = vpop.f32.mrb[158].mxu0  ;;  %v7511_v58 = vadd.f32 -1.0, %v9808_v12 }
 0x216   :  { %9813 = vpow2.f32 %v2518_v62  ;;  %v2442_v9 = vmin.f32 %v11941_v49, 0.0  ;;  %v9003_v38 = vpop.f32.mrb[159].mxu0  ;;  %9161 = vmatmul.mubr.msk.f32.gmra.mrb[8].mxu0 %vm324_vm1, %v1607_v10  ;;  %v2217_v60 = vadd.f32 %v1877_v34, %v11014_v42  ;;  %v3389_v42 = vrot.slane %v11944_v39, 1 }
 0x217   :  { %v2730_v23 = vsel %vm2365_vm6, %v11893_v48, %v7511_v58  ;;  %9163 = vmatprep.mubr.msk.f32.mxu0 %vm10315_vm2, %v14979_v41  ;;  %vm2369_vm10 = vcmp.gt.f32.partialorder %v11941_v49, 0.0 }
 0x218   :  { %v9810_v18 = vpop.eup %9809  ;;  %v2520_v12 = vmul.f32 1.442695, %v2442_v9  ;;  %v11956_v62 = vmul.f32 %v2883_v26, %v2730_v23  ;;  %v11959_v10 = vadd.f32 %v11873_v16, %v2217_v60  ;;  %v1612_v26 = vrot.slane %v10300_v22, 2 }
 0x219   :  { %v1882_v38 = vpop.f32.mrb[160].mxu0  ;;  %v7512_v54 = vadd.f32 -1.0, %v9810_v18  ;;  %v1611_v23 = vsel %vm1486_vm4, %v1608_v0, %v1610_v35 }
 0x21a   :  { %14980 = vst [vmem:[#allocation30_spill] sm:$0xff] %v11956_v62  ;;  %9815 = vpow2.f32 %v2520_v12  ;;  %v3390_v48 = vrot.slane %v11956_v62, 1  ;;  %v2218_v34 = vadd.f32 %v1882_v38, %v11026_v50  ;;  %v9006_v58 = vpop.f32.mrb[161].mxu0  ;;  %9164 = vmatmul.mubr.msk.f32.gmra.mrb[10].mxu0 %vm324_vm1, %v1609_v53  ;;  %v2443_v9 = vmin.f32 %v11959_v10, 0.0 }
 0x21b   :  { %v2731_v60 = vsel %vm2366_vm7, %v11905_v14, %v7512_v54  ;;  %9166 = vmatprep.mubr.msk.f32.mxu0 %vm10315_vm2, %v14979_v41  ;;  %v2893_v14 = vpop.permute.xlu1 %2892  ;;  %vm2370_vm11 = vcmp.gt.f32.partialorder %v11959_v10, 0.0 }
 0x21c   :  { %v9812_v18 = vpop.eup %9811  ;;  %v11975_v50 = vadd.f32 %v11873_v16, %v2218_v34  ;;  %v11977_v12 = vmul.f32 %v2888_v11, %v2731_v60  ;;  %v11980_v53 = vsel %vm178_vm3, %v3389_v42, %v3390_v48  ;;  %v2522_v38 = vmul.f32 1.442695, %v2443_v9  ;;  %v10301_v42 = vld [vmem:[%s14809_s0 + $0x200] sm:$0xff] }
 0x21d   :  { %14981 = vst [vmem:[#allocation31_spill] sm:$0xff] %v11980_v53  ;;  %v1887_v58 = vpop.f32.mrb[162].mxu0  ;;  %9204 = vmatprep.mubr.msk.f32.mxu1 %vm324_vm1, %v11980_v53  ;;  %v7513_v54 = vadd.f32 -1.0, %v9812_v18  ;;  %v1614_v34 = vrot.slane %v10301_v42, 2  ;;  %v1613_v60 = vsel %vm1486_vm4, %v1610_v35, %v1612_v26 }
 0x21e   :  { %v2444_v22 = vmin.f32 %v11975_v50, 0.0  ;;  %v3392_v0 = vrot.slane %v11977_v12, 1  ;;  %v2219_v62 = vadd.f32 %v1887_v58, %v11038_v59  ;;  %v9009_v11 = vpop.f32.mrb[163].mxu0  ;;  %9167 = vmatmul.mubr.msk.f32.gmra.mrb[12].mxu0 %vm324_vm1, %v1611_v23  ;;  %9817 = vpow2.f32 %v2522_v38 }
 0x21f   :  { %v2732_v9 = vsel %vm2367_vm8, %v11917_v44, %v7513_v54  ;;  %9169 = vmatprep.mubr.msk.f32.mxu0 %vm10315_vm2, %v14979_v41  ;;  %vm2371_vm12 = vcmp.gt.f32.partialorder %v11975_v50, 0.0 }
 0x220   :  { %v9814_v18 = vpop.eup %9813  ;;  %v2524_v59 = vmul.f32 1.442695, %v2444_v22  ;;  %v11997_v58 = vadd.f32 %v11873_v16, %v2219_v62  ;;  %v11999_v11 = vmul.f32 %v2893_v14, %v2732_v9  ;;  %v12002_v23 = vsel %vm178_vm3, %v3390_v48, %v3392_v0  ;;  %v10302_v62 = vld [vmem:[%s14809_s0 + $0x208] sm:$0xff]  ;;  %v2898_v14 = vpop.permute.xlu0 %2897 }
 0x221   :  { %14983 = vst [vmem:[#allocation33_spill] sm:$0xff] %v12002_v23  ;;  %v7514_v53 = vadd.f32 -1.0, %v9814_v18  ;;  %v1892_v42 = vpop.f32.mrb[164].mxu0  ;;  %9205 = vmatmul.mubr.msk.f32.vlgmr.msra.gmra.mrb[146].mxu1 %vm324_vm1, %v12002_v23  ;;  %v1616_v48 = vrot.slane %v10302_v62, 2  ;;  %v1615_v9 = vsel %vm1486_vm4, %v1612_v26, %v1614_v34 }
 0x222   :  { %14982 = vst [vmem:[#allocation32_spill] sm:$0xff] %v11999_v11  ;;  %9819 = vpow2.f32 %v2524_v59  ;;  %v2445_v44 = vmin.f32 %v11997_v58, 0.0  ;;  %v3394_v35 = vrot.slane %v11999_v11, 1  ;;  %v9012_v38 = vpop.f32.mrb[165].mxu0  ;;  %9170 = vmatmul.mubr.msk.f32.gmra.mrb[14].mxu0 %vm324_vm1, %v1613_v60  ;;  %v2220_v22 = vadd.f32 %v1892_v42, %v11050_v7 }
 0x223   :  { %v2733_v54 = vsel %vm2368_vm9, %v11929_v24, %v7514_v53  ;;  %9172 = vmatprep.mubr.msk.f32.mxu0 %vm10315_vm2, %v14979_v41  ;;  %v10303_v53 = vld [vmem:[%s14809_s0 + $0x210] sm:$0xff]  ;;  %vm2372_vm13 = vcmp.gt.f32.partialorder %v11997_v58, 0.0 }
 0x224   :  { %v9816_v18 = vpop.eup %9815  ;;  %v12018_v59 = vmul.f32 %v2898_v14, %v2733_v54  ;;  %v2526_v38 = vmul.f32 1.442695, %v2445_v44  ;;  %v12021_v60 = vsel %vm178_vm3, %v3392_v0, %v3394_v35  ;;  %v12024_v23 = vadd.f32 %v11873_v16, %v2220_v22  ;;  %v2903_v44 = vpop.permute.xlu1 %2902 }
 0x225   :  { %14984 = vst [vmem:[#allocation34_spill] sm:$0xff] %v12021_v60  ;;  %v7515_v62 = vadd.f32 -1.0, %v9816_v18  ;;  %v1897_v11 = vpop.f32.mrb[166].mxu0  ;;  %9207 = vmatprep.mubr.msk.f32.mxu1 %vm324_vm1, %v12021_v60  ;;  %v1618_v0 = vrot.slane %v10303_v53, 2  ;;  %v1617_v54 = vsel %vm1486_vm4, %v1614_v34, %v1616_v48 }
 0x226   :  { %v3396_v7 = vrot.slane %v12018_v59, 1  ;;  %9821 = vpow2.f32 %v2526_v38  ;;  %v2221_v24 = vadd.f32 %v1897_v11, %v11062_v17  ;;  %v9015_v26 = vpop.f32.mrb[167].mxu0  ;;  %9173 = vmatmul.mubr.msk.f32.gmra.mrb[16].mxu0 %vm324_vm1, %v1615_v9  ;;  %v2446_v42 = vmin.f32 %v12024_v23, 0.0 }
 0x227   :  { %v2734_v14 = vsel %vm2369_vm10, %v11941_v49, %v7515_v62  ;;  %9175 = vmatprep.mubr.msk.f32.mxu0 %vm10315_vm2, %v14979_v41  ;;  %v10304_v49 = vld [vmem:[%s14809_s0 + $0x218] sm:$0xff]  ;;  %vm2373_vm14 = vcmp.gt.f32.partialorder %v12024_v23, 0.0 }
 0x228   :  { %v12040_v22 = vmul.f32 %v2903_v44, %v2734_v14  ;;  %v12043_v17 = vadd.f32 %v11873_v16, %v2221_v24  ;;  %v12046_v11 = vsel %vm178_vm3, %v3394_v35, %v3396_v7  ;;  %v9818_v9 = vpop.eup %9817  ;;  %v2528_v18 = vmul.f32 1.442695, %v2446_v42  ;;  %v2908_v14 = vpop.permute.xlu0 %2907 }
 0x229   :  { %14985 = vst [vmem:[#allocation35_spill] sm:$0xff] %v12046_v11  ;;  %v1902_v38 = vpop.f32.mrb[168].mxu0  ;;  %9208 = vmatmul.mubr.msk.f32.gmra.mrb[148].mxu1 %vm324_vm1, %v12046_v11  ;;  %v1620_v62 = vrot.slane %v10304_v49, 2  ;;  %v7516_v34 = vadd.f32 -1.0, %v9818_v9  ;;  %v1619_v42 = vsel %vm1486_vm4, %v1616_v48, %v1618_v0  ;;  %v10305_v48 = vld [vmem:[%s14809_s0 + $0x220] sm:$0xff] }
 0x22a   :  { %v3398_v26 = vrot.slane %v12040_v22, 1  ;;  %v2447_v24 = vmin.f32 %v12043_v17, 0.0  ;;  %v9018_v53 = vpop.f32.mrb[169].mxu0  ;;  %9176 = vmatmul.mubr.msk.f32.gmra.mrb[18].mxu0 %vm324_vm1, %v1617_v54  ;;  %9823 = vpow2.f32 %v2528_v18  ;;  %v2222_v35 = vadd.f32 %v1902_v38, %v11074_v27 }
 0x22b   :  { %9178 = vmatprep.mubr.msk.f32.mxu0 %vm10315_vm2, %v14979_v41  ;;  %v2735_v9 = vsel %vm2370_vm11, %v11959_v10, %v7516_v34  ;;  %v1622_v38 = vrot.slane %v10305_v48, 2  ;;  %vm2374_vm15 = vcmp.gt.f32.partialorder %v12043_v17, 0.0 }
 0x22c   :  { %v9820_v44 = vpop.eup %9819  ;;  %v2530_v49 = vmul.f32 1.442695, %v2447_v24  ;;  %v12063_v60 = vsel %vm178_vm3, %v3396_v7, %v3398_v26  ;;  %v12065_v53 = vmul.f32 %v2908_v14, %v2735_v9  ;;  %v12068_v18 = vadd.f32 %v11873_v16, %v2222_v35  ;;  %v2913_v24 = vpop.permute.xlu1 %2912 }
 0x22d   :  { %14986 = vst [vmem:[#allocation36_spill] sm:$0xff] %v12063_v60  ;;  %v7517_v54 = vadd.f32 -1.0, %v9820_v44  ;;  %v1907_v27 = vpop.f32.mrb[170].mxu0  ;;  %9210 = vmatprep.mubr.msk.f32.mxu1 %vm324_vm1, %v12063_v60  ;;  %v1621_v14 = vsel %vm1486_vm4, %v1618_v0, %v1620_v62 }
 0x22e   :  { %9825 = vpow2.f32 %v2530_v49  ;;  %v2223_v10 = vadd.f32 %v1907_v27, %v11091_v37  ;;  %v9021_v7 = vpop.f32.mrb[171].mxu0  ;;  %9179 = vmatmul.mubr.msk.f32.gmra.mrb[20].mxu0 %vm324_vm1, %v1619_v42  ;;  %v3400_v34 = vrot.slane %v12065_v53, 1  ;;  %v2448_v44 = vmin.f32 %v12068_v18, 0.0 }
 0x22f   :  { %v2736_v35 = vsel %vm2371_vm12, %v11975_v50, %v7517_v54  ;;  %9181 = vmatprep.mubr.msk.f32.mxu0 %vm10315_vm2, %v14979_v41  ;;  %v10306_v50 = vld [vmem:[%s14809_s0 + $0x228] sm:$0xff]  ;;  %vm2375_vm5 = vcmp.gt.f32.partialorder %v12068_v18, 0.0 }
 0x230   :  { %v9822_v9 = vpop.eup %9821  ;;  %v12084_v49 = vmul.f32 %v2913_v24, %v2736_v35  ;;  %v12087_v37 = vadd.f32 %v11873_v16, %v2223_v10  ;;  %v2532_v42 = vmul.f32 1.442695, %v2448_v44  ;;  %v12090_v7 = vsel %vm178_vm3, %v3398_v26, %v3400_v34  ;;  %v2918_v35 = vpop.permute.xlu0 %2917 }
 0x231   :  { %v7518_v27 = vadd.f32 -1.0, %v9822_v9  ;;  %v1912_v48 = vpop.f32.mrb[172].mxu0  ;;  %14987 = vst [vmem:[#allocation37_spill] sm:$0xff] %v12090_v7  ;;  %v1624_v54 = vrot.slane %v10306_v50, 2  ;;  %9211 = vmatmul.mubr.msk.f32.gmra.mrb[150].mxu1 %vm324_vm1, %v12090_v7  ;;  %v1623_v9 = vsel %vm1486_vm4, %v1620_v62, %v1622_v38 }
 0x232   :  { %v3402_v0 = vrot.slane %v12084_v49, 1  ;;  %v2449_v24 = vmin.f32 %v12087_v37, 0.0  ;;  %v9024_v10 = vpop.f32.mrb[173].mxu0  ;;  %9182 = vmatmul.mubr.msk.f32.gmra.mrb[22].mxu0 %vm324_vm1, %v1621_v14  ;;  %9827 = vpow2.f32 %v2532_v42  ;;  %v2224_v44 = vadd.f32 %v1912_v48, %v11103_v46  ;;  %v10307_v46 = vld [vmem:[%s14809_s0 + $0x230] sm:$0xff] }
 0x233   :  { %v2737_v26 = vsel %vm2372_vm13, %v11997_v58, %v7518_v27  ;;  %9184 = vmatprep.mubr.msk.f32.mxu0 %vm10315_vm2, %v14979_v41  ;;  %v1626_v58 = vrot.slane %v10307_v46, 2  ;;  %vm2376_vm6 = vcmp.gt.f32.partialorder %v12087_v37, 0.0 }
 0x234   :  { %v12106_v50 = vmul.f32 %v2918_v35, %v2737_v26  ;;  %v2534_v60 = vmul.f32 1.442695, %v2449_v24  ;;  %v12109_v11 = vsel %vm178_vm3, %v3400_v34, %v3402_v0  ;;  %v9824_v10 = vpop.eup %9823  ;;  %v12112_v14 = vadd.f32 %v11873_v16, %v2224_v44  ;;  %v2923_v26 = vpop.permute.xlu1 %2922 }
 0x235   :  { %14988 = vst [vmem:[#allocation38_spill] sm:$0xff] %v12109_v11  ;;  %v1917_v7 = vpop.f32.mrb[174].mxu0  ;;  %9213 = vmatprep.mubr.msk.f32.mxu1 %vm324_vm1, %v12109_v11  ;;  %v7519_v27 = vadd.f32 -1.0, %v9824_v10  ;;  %v1625_v24 = vsel %vm1486_vm4, %v1622_v38, %v1624_v54  ;;  %v10308_v38 = vld [vmem:[%s14809_s0 + $0x238] sm:$0xff] }
 0x236   :  { %v3404_v62 = vrot.slane %v12106_v50, 1  ;;  %9829 = vpow2.f32 %v2534_v60  ;;  %v9027_v42 = vpop.f32.mrb[175].mxu0  ;;  %9185 = vmatmul.mubr.msk.f32.gmra.mrb[24].mxu0 %vm324_vm1, %v1623_v9  ;;  %v2450_v34 = vmin.f32 %v12112_v14, 0.0  ;;  %v2225_v48 = vadd.f32 %v1917_v7, %v11115_v56 }
 0x237   :  { %9187 = vmatprep.mubr.msk.f32.mxu0 %vm10315_vm2, %v14979_v41  ;;  %v2738_v44 = vsel %vm2373_vm14, %v12024_v23, %v7519_v27  ;;  %v1628_v7 = vrot.slane %v10308_v38, 2  ;;  %v2928_v27 = vpop.permute.xlu0 %2927  ;;  %vm2377_vm7 = vcmp.gt.f32.partialorder %v12112_v14, 0.0 }
 0x238   :  { %v9826_v35 = vpop.eup %9825  ;;  %v12129_v60 = vsel %vm178_vm3, %v3402_v0, %v3404_v62  ;;  %v12131_v9 = vmul.f32 %v2923_v26, %v2738_v44  ;;  %v2536_v46 = vmul.f32 1.442695, %v2450_v34  ;;  %v12134_v42 = vadd.f32 %v11873_v16, %v2225_v48 }
 0x239   :  { %14989 = vst [vmem:[#allocation39_spill] sm:$0xff] %v12129_v60  ;;  %v7520_v10 = vadd.f32 -1.0, %v9826_v35  ;;  %v1922_v56 = vpop.f32.mrb[176].mxu0  ;;  %9214 = vmatmul.mubr.msk.f32.gmra.mrb[152].mxu1 %vm324_vm1, %v12129_v60  ;;  %v1627_v35 = vsel %vm1486_vm4, %v1624_v54, %v1626_v58 }
 0x23a   :  { %v2226_v23 = vadd.f32 %v1922_v56, %v11130_v8  ;;  %v9030_v0 = vpop.f32.mrb[177].mxu0  ;;  %9188 = vmatmul.mubr.msk.f32.gmra.mrb[26].mxu0 %vm324_vm1, %v1625_v24  ;;  %v3406_v48 = vrot.slane %v12131_v9, 1  ;;  %9831 = vpow2.f32 %v2536_v46  ;;  %v2451_v44 = vmin.f32 %v12134_v42, 0.0 }
 0x23b   :  { %v2739_v34 = vsel %vm2374_vm15, %v12043_v17, %v7520_v10  ;;  %9190 = vmatprep.mubr.msk.f32.mxu0 %vm10315_vm2, %v14979_v41  ;;  %v12161_v17 = vld [vmem:[%s14809_s0 + $0x240] sm:$0xf] }
 0x23c   :  { %v12149_v26 = vmul.f32 %v2928_v27, %v2739_v34  ;;  %v12153_v8 = vadd.f32 %v11873_v16, %v2226_v23  ;;  %v9828_v56 = vpop.eup %9827  ;;  %v12156_v38 = vsel %vm178_vm3, %v3404_v62, %v3406_v48  ;;  %v2538_v0 = vmul.f32 1.442695, %v2451_v44 }
 0x23d   :  { %v1927_v24 = vpop.f32.mrb[178].mxu0  ;;  %14990 = vst [vmem:[#allocation40_spill] sm:$0xff] %v12156_v38  ;;  %v7521_v46 = vadd.f32 -1.0, %v9828_v56  ;;  %9216 = vmatprep.mubr.msk.f32.mxu1 %vm324_vm1, %v12156_v38  ;;  %v1629_v34 = vsel %vm1486_vm4, %v1626_v58, %v1628_v7  ;;  %v2933_v56 = vpop.permute.xlu1 %2932  ;;  %v3313_v58 = vld [vmem:[%s14810_s3] sm:$0xf] }
 0x23e   :  { %v3408_v54 = vrot.slane %v12149_v26, 1  ;;  %v9033_v23 = vpop.f32.mrb[179].mxu0  ;;  %9191 = vmatmul.mubr.msk.f32.gmra.mrb[28].mxu0 %vm324_vm1, %v1627_v35  ;;  %v2452_v62 = vmin.f32 %v12153_v8, 0.0  ;;  %v2227_v27 = vadd.f32 %v1927_v24, %v11145_v21  ;;  %9833 = vpow2.f32 %v2538_v0  ;;  %9312 = vmatprep.subr.msk.mxu1 %vm471_vm0, %v3313_v58  ;;  %v2938_v24 = vpop.permute.xlu0 %2937 }
 0x23f   :  { %9193 = vmatprep.mubr.msk.f32.mxu0 %vm10315_vm2, %v14979_v41  ;;  %v2740_v44 = vsel %vm2375_vm5, %v12068_v18, %v7521_v46  ;;  %v14992_v0 = vrot.slane %v12161_v17, 2  ;;  %9313 = vmatpush3.msk.msra.mxu1 %vm471_vm0, %v3313_v58  ;;  %vm2379_vm8 = vcmp.gt.f32.partialorder %v12153_v8, 0.0 }
 0x240   :  { %v9830_v10 = vpop.eup %9829  ;;  %v12176_v23 = vsel %vm178_vm3, %v3406_v48, %v3408_v54  ;;  %v12178_v38 = vmul.f32 %v2933_v56, %v2740_v44  ;;  %v2540_v11 = vmul.f32 1.442695, %v2452_v62  ;;  %v12181_v60 = vadd.f32 %v11873_v16, %v2227_v27 }
 0x241   :  { %14991 = vst [vmem:[#allocation41_spill] sm:$0xff] %v12176_v23  ;;  %v7522_v35 = vadd.f32 -1.0, %v9830_v10  ;;  %v1932_v21 = vpop.f32.mrb[180].mxu0  ;;  %9217 = vmatmul.mubr.msk.f32.gmra.mrb[154].mxu1 %vm324_vm1, %v12176_v23  ;;  %v1631_v62 = vsel %vm1486_vm4, %v1628_v7, %v14992_v0 }
 0x242   :  { %v2228_v18 = vadd.f32 %v1932_v21, %v11160_v32  ;;  %v9036_v48 = vpop.f32.mrb[181].mxu0  ;;  %9194 = vmatmul.mubr.msk.f32.gmra.mrb[30].mxu0 %vm324_vm1, %v1629_v34  ;;  %v3410_v46 = vrot.slane %v12178_v38, 1  ;;  %9835 = vpow2.f32 %v2540_v11  ;;  %v2453_v27 = vmin.f32 %v12181_v60, 0.0 }
 0x243   :  { %v2741_v10 = vsel %vm2376_vm6, %v12087_v37, %v7522_v35  ;;  %9196 = vmatprep.mubr.msk.f32.mxu0 %vm10315_vm2, %v14979_v41  ;;  %vm2380_vm9 = vcmp.gt.f32.partialorder %v12181_v60, 0.0 }
 0x244   :  { %v12200_v32 = vmul.f32 %v2938_v24, %v2741_v10  ;;  %v12204_v34 = vadd.f32 %v11873_v16, %v2228_v18  ;;  %v9832_v37 = vpop.eup %9831  ;;  %v12207_v11 = vsel %vm178_vm3, %v3408_v54, %v3410_v46  ;;  %v2542_v35 = vmul.f32 1.442695, %v2453_v27  ;;  %v2943_v18 = vpop.permute.xlu1 %2942 }
 0x245   :  { %v1937_v56 = vpop.f32.mrb[182].mxu0  ;;  %14993 = vst [vmem:[#allocation42_spill] sm:$0xff] %v12207_v11  ;;  %v7523_v44 = vadd.f32 -1.0, %v9832_v37  ;;  %9219 = vmatprep.mubr.msk.f32.mxu1 %vm324_vm1, %v12207_v11 }
 0x246   :  { %v2454_v21 = vmin.f32 %v12204_v34, 0.0  ;;  %v9039_v7 = vpop.f32.mrb[183].mxu0  ;;  %9197 = vmatmul.mubr.msk.f32.gmra.mrb[32].mxu0 %vm324_vm1, %v1631_v62  ;;  %v2229_v58 = vadd.f32 %v1937_v56, %v11175_v43  ;;  %v3412_v54 = vrot.slane %v12200_v32, 1  ;;  %9837 = vpow2.f32 %v2542_v35 }
 0x247   :  { %9199 = vmatprep.mubr.msk.f32.mxu0 %vm10315_vm2, %v14979_v41  ;;  %v2742_v48 = vsel %vm2377_vm7, %v12112_v14, %v7523_v44  ;;  %v14995_v14 = vrot.slane %v12161_v17, 2  ;;  %vm2378_vm2 = vcmp.gt.f32.partialorder %v12134_v42, 0.0  ;;  %vm2381_vm10 = vcmp.gt.f32.partialorder %v12204_v34, 0.0 }
 0x248   :  { %v2544_v24 = vmul.f32 1.442695, %v2454_v21  ;;  %v12219_v10 = vmul.f32 %v2943_v18, %v2742_v48  ;;  %v12222_v0 = vadd.f32 %v11873_v16, %v2229_v58  ;;  %v12225_v27 = vsel %vm178_vm3, %v3410_v46, %v3412_v54  ;;  %v9834_v43 = vpop.eup %9833 }
 0x249   :  { %v1942_v62 = vpop.f32.mrb[184].mxu0  ;;  %14994 = vst [vmem:[#allocation43_spill] sm:$0xff] %v12225_v27  ;;  %9220 = vmatmul.mubr.msk.f32.gmra.mrb[156].mxu1 %vm324_vm1, %v12225_v27  ;;  %v7524_v44 = vadd.f32 -1.0, %v9834_v43 }
 0x24a   :  { %9839 = vpow2.f32 %v2544_v24  ;;  %v2230_v41 = vadd.f32 %v1942_v62, %v11187_v52  ;;  %v9042_v37 = vpop.f32.mrb[185].mxu0  ;;  %9200 = vmatmul.mubr.msk.f32.gmra.mrb[34].mxu0 %vm324_vm1, %v14995_v14  ;;  %v3414_v56 = vrot.slane %v12219_v10, 1  ;;  %v2455_v46 = vmin.f32 %v12222_v0, 0.0  ;;  %v2948_v52 = vpop.permute.xlu0 %2947 }
 0x24b   :  { %v2743_v7 = vsel %vm2378_vm2, %v12134_v42, %v7524_v44  ;;  %v2953_v37 = vpop.permute.xlu1 %2952  ;;  %vm2382_vm11 = vcmp.gt.f32.partialorder %v12222_v0, 0.0 }
 0x24c   :  { %v12237_v35 = vadd.f32 %v11873_v16, %v2230_v41  ;;  %v9836_v21 = vpop.eup %9835  ;;  %v12241_v18 = vsel %vm178_vm3, %v3412_v54, %v3414_v56  ;;  %v12243_v17 = vmul.f32 %v2948_v52, %v2743_v7  ;;  %v2546_v24 = vmul.f32 1.442695, %v2455_v46 }
 0x24d   :  { %v1947_v58 = vpop.f32.mrb[186].mxu0  ;;  %14996 = vst [vmem:[#allocation44_spill] sm:$0xff] %v12241_v18  ;;  %v7525_v48 = vadd.f32 -1.0, %v9836_v21  ;;  %9222 = vmatprep.mubr.msk.f32.mxu1 %vm324_vm1, %v12241_v18 }
 0x24e   :  { %v9045_v62 = vpop.f32.mrb[187].mxu0  ;;  %v2456_v43 = vmin.f32 %v12237_v35, 0.0  ;;  %v2231_v41 = vadd.f32 %v1947_v58, %v11201_v2  ;;  %9841 = vpow2.f32 %v2546_v24  ;;  %v3416_v54 = vrot.slane %v12243_v17, 1 }
 0x24f   :  { %v2744_v42 = vsel %vm2379_vm8, %v12153_v8, %v7525_v48  ;;  %v2963_v18 = vpop.permute.xlu1 %2962  ;;  %vm2383_vm12 = vcmp.gt.f32.partialorder %v12237_v35, 0.0 }
 0x250   :  { %v12252_v14 = vmul.f32 %v2953_v37, %v2744_v42  ;;  %v2548_v44 = vmul.f32 1.442695, %v2456_v43  ;;  %v12255_v46 = vadd.f32 %v11873_v16, %v2231_v41  ;;  %v9838_v52 = vpop.eup %9837  ;;  %v12259_v62 = vsel %vm178_vm3, %v3414_v56, %v3416_v54 }
 0x251   :  { %v1952_v21 = vpop.f32.mrb[188].mxu0  ;;  %14997 = vst [vmem:[#allocation45_spill] sm:$0xff] %v12259_v62  ;;  %v7526_v58 = vadd.f32 -1.0, %v9838_v52  ;;  %9223 = vmatmul.mubr.msk.f32.gmra.mrb[158].mxu1 %vm324_vm1, %v12259_v62 }
 0x252   :  { %v2232_v7 = vadd.f32 %v1952_v21, %v11219_v19  ;;  %v9048_v2 = vpop.f32.mrb[189].mxu0  ;;  %9843 = vpow2.f32 %v2548_v44  ;;  %v2457_v8 = vmin.f32 %v12255_v46, 0.0  ;;  %v3418_v43 = vrot.slane %v12252_v14, 1  ;;  %v2958_v19 = vpop.permute.xlu0 %2957 }
 0x253   :  { %v2745_v56 = vsel %vm2380_vm9, %v12181_v60, %v7526_v58  ;;  %vm2384_vm13 = vcmp.gt.f32.partialorder %v12255_v46, 0.0 }
 0x254   :  { %v9840_v48 = vpop.eup %9839  ;;  %v12266_v24 = vadd.f32 %v11873_v16, %v2232_v7  ;;  %v2550_v37 = vmul.f32 1.442695, %v2457_v8  ;;  %v12270_v44 = vmul.f32 %v2958_v19, %v2745_v56  ;;  %v12277_v62 = vsel %vm178_vm3, %v3416_v54, %v3418_v43 }
 0x255   :  { %v7527_v41 = vadd.f32 -1.0, %v9840_v48  ;;  %v1957_v42 = vpop.f32.mrb[190].mxu0  ;;  %14998 = vst [vmem:[#allocation46_spill] sm:$0xff] %v12277_v62  ;;  %9225 = vmatprep.mubr.msk.f32.mxu1 %vm324_vm1, %v12277_v62 }
 0x256   :  { %v2458_v21 = vmin.f32 %v12266_v24, 0.0  ;;  %v2233_v52 = vadd.f32 %v1957_v42, %v11234_v30  ;;  %v9051_v2 = vpop.f32.mrb[191].mxu0  ;;  %9845 = vpow2.f32 %v2550_v37  ;;  %v3420_v48 = vrot.slane %v12270_v44, 1 }
 0x257   :  { %v2746_v7 = vsel %vm2381_vm10, %v12204_v34, %v7527_v41  ;;  %v2968_v2 = vpop.permute.xlu0 %2967  ;;  %vm2385_vm14 = vcmp.gt.f32.partialorder %v12266_v24, 0.0 }
 0x258   :  { %v12279_v60 = vmul.f32 %v2963_v18, %v2746_v7  ;;  %v2552_v58 = vmul.f32 1.442695, %v2458_v21  ;;  %v12282_v8 = vadd.f32 %v11873_v16, %v2233_v52  ;;  %v9842_v19 = vpop.eup %9841  ;;  %v12290_v18 = vsel %vm178_vm3, %v3418_v43, %v3420_v48 }
 0x259   :  { %v1962_v30 = vpop.f32.mrb[192].mxu0  ;;  %v7528_v41 = vadd.f32 -1.0, %v9842_v19  ;;  %14999 = vst [vmem:[#allocation47_spill] sm:$0xff] %v12290_v18  ;;  %9226 = vmatmul.mubr.msk.f32.gmra.mrb[160].mxu1 %vm324_vm1, %v12290_v18 }
 0x25a   :  { %9847 = vpow2.f32 %v2552_v58  ;;  %v2459_v34 = vmin.f32 %v12282_v8, 0.0  ;;  %v2234_v56 = vadd.f32 %v1962_v30, %v11249_v45  ;;  %v9054_v54 = vpop.f32.mrb[193].mxu0  ;;  %v3422_v37 = vrot.slane %v12279_v60, 1 }
 0x25b   :  { %v2747_v45 = vsel %vm2382_vm11, %v12222_v0, %v7528_v41  ;;  %v2973_v54 = vpop.permute.xlu1 %2972  ;;  %vm2386_vm15 = vcmp.gt.f32.partialorder %v12282_v8, 0.0 }
 0x25c   :  { %v2554_v42 = vmul.f32 1.442695, %v2459_v34  ;;  %v12295_v21 = vadd.f32 %v11873_v16, %v2234_v56  ;;  %v9844_v52 = vpop.eup %9843  ;;  %v12301_v58 = vsel %vm178_vm3, %v3420_v48, %v3422_v37  ;;  %v12303_v43 = vmul.f32 %v2968_v2, %v2747_v45 }
 0x25d   :  { %v1967_v7 = vpop.f32.mrb[194].mxu0  ;;  %15000 = vst [vmem:[#allocation48_spill] sm:$0xff] %v12301_v58  ;;  %v7529_v30 = vadd.f32 -1.0, %v9844_v52  ;;  %9228 = vmatprep.mubr.msk.f32.mxu1 %vm324_vm1, %v12301_v58 }
 0x25e   :  { %9849 = vpow2.f32 %v2554_v42  ;;  %v9057_v19 = vpop.f32.mrb[195].mxu0  ;;  %v2460_v34 = vmin.f32 %v12295_v21, 0.0  ;;  %v2235_v56 = vadd.f32 %v1967_v7, %v11264_v61  ;;  %v3424_v48 = vrot.slane %v12303_v43, 1 }
 0x25f   :  { %v2748_v0 = vsel %vm2383_vm12, %v12237_v35, %v7529_v30  ;;  %vm2387_vm5 = vcmp.gt.f32.partialorder %v12295_v21, 0.0 }
 0x260   :  { %v9846_v41 = vpop.eup %9845  ;;  %v12312_v2 = vmul.f32 %v2973_v54, %v2748_v0  ;;  %v2556_v52 = vmul.f32 1.442695, %v2460_v34  ;;  %v12315_v42 = vadd.f32 %v11873_v16, %v2235_v56  ;;  %v12319_v62 = vsel %vm178_vm3, %v3422_v37, %v3424_v48  ;;  %v2978_v34 = vpop.permute.xlu0 %2977 }
 0x261   :  { %v1972_v45 = vpop.f32.mrb[196].mxu0  ;;  %v7530_v19 = vadd.f32 -1.0, %v9846_v41  ;;  %15001 = vst [vmem:[#allocation49_spill] sm:$0xff] %v12319_v62  ;;  %9229 = vmatmul.mubr.msk.f32.gmra.mrb[162].mxu1 %vm324_vm1, %v12319_v62 }
 0x262   :  { %v2236_v58 = vadd.f32 %v1972_v45, %v11279_v15  ;;  %v9060_v61 = vpop.f32.mrb[197].mxu0  ;;  %9851 = vpow2.f32 %v2556_v52  ;;  %v2461_v35 = vmin.f32 %v12315_v42, 0.0  ;;  %v3426_v7 = vrot.slane %v12312_v2, 1 }
 0x263   :  { %v2749_v56 = vsel %vm2384_vm13, %v12255_v46, %v7530_v19  ;;  %vm2388_vm6 = vcmp.gt.f32.partialorder %v12315_v42, 0.0 }
 0x264   :  { %v9848_v30 = vpop.eup %9847  ;;  %v12328_v15 = vadd.f32 %v11873_v16, %v2236_v58  ;;  %v12330_v37 = vmul.f32 %v2978_v34, %v2749_v56  ;;  %v2558_v0 = vmul.f32 1.442695, %v2461_v35  ;;  %v12333_v52 = vsel %vm178_vm3, %v3424_v48, %v3426_v7  ;;  %v2983_v58 = vpop.permute.xlu1 %2982 }
 0x265   :  { %v7531_v54 = vadd.f32 -1.0, %v9848_v30  ;;  %v1977_v41 = vpop.f32.mrb[198].mxu0  ;;  %15002 = vst [vmem:[#allocation50_spill] sm:$0xff] %v12333_v52  ;;  %9231 = vmatprep.mubr.msk.f32.mxu1 %vm324_vm1, %v12333_v52 }
 0x266   :  { %v2462_v45 = vmin.f32 %v12328_v15, 0.0  ;;  %v2237_v61 = vadd.f32 %v1977_v41, %v11294_v29  ;;  %v9063_v46 = vpop.f32.mrb[199].mxu0  ;;  %9853 = vpow2.f32 %v2558_v0  ;;  %v3428_v35 = vrot.slane %v12330_v37, 1  ;;  %v2988_v41 = vpop.permute.xlu0 %2987 }
 0x267   :  { %v2750_v19 = vsel %vm2385_vm14, %v12266_v24, %v7531_v54  ;;  %vm2389_vm7 = vcmp.gt.f32.partialorder %v12328_v15, 0.0 }
 0x268   :  { %v9850_v30 = vpop.eup %9849  ;;  %v12342_v34 = vmul.f32 %v2983_v58, %v2750_v19  ;;  %v2560_v48 = vmul.f32 1.442695, %v2462_v45  ;;  %v12345_v56 = vadd.f32 %v11873_v16, %v2237_v61  ;;  %v12348_v29 = vsel %vm178_vm3, %v3426_v7, %v3428_v35 }
 0x269   :  { %v7532_v62 = vadd.f32 -1.0, %v9850_v30  ;;  %v1982_v18 = vpop.f32.mrb[200].mxu0  ;;  %15003 = vst [vmem:[#allocation51_spill] sm:$0xff] %v12348_v29  ;;  %9232 = vmatmul.mubr.msk.f32.gmra.mrb[164].mxu1 %vm324_vm1, %v12348_v29 }
 0x26a   :  { %9855 = vpow2.f32 %v2560_v48  ;;  %v2463_v24 = vmin.f32 %v12345_v56, 0.0  ;;  %v2238_v54 = vadd.f32 %v1982_v18, %v11309_v47  ;;  %v9066_v0 = vpop.f32.mrb[201].mxu0  ;;  %v3430_v61 = vrot.slane %v12342_v34, 1 }
 0x26b   :  { %v2751_v45 = vsel %vm2386_vm15, %v12282_v8, %v7532_v62  ;;  %vm2390_vm2 = vcmp.gt.f32.partialorder %v12345_v56, 0.0 }
 0x26c   :  { %v12357_v46 = vmul.f32 %v2988_v41, %v2751_v45  ;;  %v2562_v7 = vmul.f32 1.442695, %v2463_v24  ;;  %v12360_v58 = vadd.f32 %v11873_v16, %v2238_v54  ;;  %v9852_v19 = vpop.eup %9851  ;;  %v12363_v48 = vsel %vm178_vm3, %v3428_v35, %v3430_v61  ;;  %v2993_v54 = vpop.permute.xlu1 %2992 }
 0x26d   :  { %v1987_v30 = vpop.f32.mrb[202].mxu0  ;;  %15004 = vst [vmem:[#allocation52_spill] sm:$0xff] %v12363_v48  ;;  %v7533_v47 = vadd.f32 -1.0, %v9852_v19  ;;  %9234 = vmatprep.mubr.msk.f32.mxu1 %vm324_vm1, %v12363_v48 }
 0x26e   :  { %9857 = vpow2.f32 %v2562_v7  ;;  %v2464_v18 = vmin.f32 %v12360_v58, 0.0  ;;  %v9069_v62 = vpop.f32.mrb[203].mxu0  ;;  %v2239_v8 = vadd.f32 %v1987_v30, %v11324_v1  ;;  %v3432_v24 = vrot.slane %v12357_v46, 1 }
 0x26f   :  { %v2752_v0 = vsel %vm2387_vm5, %v12295_v21, %v7533_v47  ;;  %vm2391_vm8 = vcmp.gt.f32.partialorder %v12360_v58, 0.0 }
 0x270   :  { %v2564_v41 = vmul.f32 1.442695, %v2464_v18  ;;  %v9854_v35 = vpop.eup %9853  ;;  %v12372_v45 = vmul.f32 %v2993_v54, %v2752_v0  ;;  %v12375_v7 = vadd.f32 %v11873_v16, %v2239_v8  ;;  %v12378_v48 = vsel %vm178_vm3, %v3430_v61, %v3432_v24  ;;  %v2998_v8 = vpop.permute.xlu0 %2997 }
 0x271   :  { %v1992_v19 = vpop.f32.mrb[204].mxu0  ;;  %15005 = vst [vmem:[#allocation53_spill] sm:$0xff] %v12378_v48  ;;  %v7534_v62 = vadd.f32 -1.0, %v9854_v35  ;;  %9235 = vmatmul.mubr.msk.f32.gmra.mrb[166].mxu1 %vm324_vm1, %v12378_v48 }
 0x272   :  { %9859 = vpow2.f32 %v2564_v41  ;;  %v2240_v1 = vadd.f32 %v1992_v19, %v11339_v4  ;;  %v9072_v30 = vpop.f32.mrb[205].mxu0  ;;  %v2465_v21 = vmin.f32 %v12375_v7, 0.0  ;;  %v3434_v47 = vrot.slane %v12372_v45, 1 }
 0x273   :  { %v2753_v54 = vsel %vm2388_vm6, %v12315_v42, %v7534_v62  ;;  %vm2392_vm9 = vcmp.gt.f32.partialorder %v12375_v7, 0.0 }
 0x274   :  { %v9856_v18 = vpop.eup %9855  ;;  %v12388_v61 = vadd.f32 %v11873_v16, %v2240_v1  ;;  %v12390_v0 = vmul.f32 %v2998_v8, %v2753_v54  ;;  %v2566_v41 = vmul.f32 1.442695, %v2465_v21  ;;  %v12393_v19 = vsel %vm178_vm3, %v3432_v24, %v3434_v47  ;;  %v3003_v16 = vpop.permute.xlu1 %3002  ;;  %v12407_v8 = vld [vmem:[%s14812_s2] ss:$0 sm:$0xff] }
 0x275   :  { %v7535_v4 = vadd.f32 -1.0, %v9856_v18  ;;  %v1997_v35 = vpop.f32.mrb[206].mxu0  ;;  %15006 = vst [vmem:[#allocation54_spill] sm:$0xff] %v12393_v19  ;;  %9237 = vmatprep.mubr.msk.f32.mxu1 %vm324_vm1, %v12393_v19 }
 0x276   :  { %v2466_v30 = vmin.f32 %v12388_v61, 0.0  ;;  %v2241_v48 = vadd.f32 %v1997_v35, %v11354_v36  ;;  %v9075_v42 = vpop.f32.mrb[207].mxu0  ;;  %9861 = vpow2.f32 %v2566_v41  ;;  %v3436_v1 = vrot.slane %v12390_v0, 1 }
 0x277   :  { %v2754_v62 = vsel %vm2389_vm7, %v12328_v15, %v7535_v4  ;;  %vm2393_vm10 = vcmp.gt.f32.partialorder %v12388_v61, 0.0 }
 0x278   :  { %v9858_v21 = vpop.eup %9857  ;;  %v12402_v18 = vmul.f32 %v3003_v16, %v2754_v62  ;;  %v2568_v24 = vmul.f32 1.442695, %v2466_v30  ;;  %v12410_v36 = vadd.f32 %v12407_v8, %v2241_v48  ;;  %v12413_v42 = vsel %vm178_vm3, %v3434_v47, %v3436_v1  ;;  %v3008_v30 = vpop.permute.xlu0 %3007 }
 0x279   :  { %v7536_v54 = vadd.f32 -1.0, %v9858_v21  ;;  %v2002_v35 = vpop.f32.mrb[208].mxu0  ;;  %15007 = vst [vmem:[#allocation55_spill] sm:$0xff] %v12413_v42  ;;  %9238 = vmatmul.mubr.msk.f32.gmra.mrb[168].mxu1 %vm324_vm1, %v12413_v42 }
 0x27a   :  { %9863 = vpow2.f32 %v2568_v24  ;;  %v2467_v15 = vmin.f32 %v12410_v36, 0.0  ;;  %v2242_v4 = vadd.f32 %v2002_v35, %v11369_v55  ;;  %v9078_v41 = vpop.f32.mrb[209].mxu0  ;;  %v3438_v16 = vrot.slane %v12402_v18, 1 }
 0x27b   :  { %v2755_v48 = vsel %vm2390_vm2, %v12345_v56, %v7536_v54  ;;  %vm2394_vm11 = vcmp.gt.f32.partialorder %v12410_v36, 0.0 }
 0x27c   :  { %v9860_v62 = vpop.eup %9859  ;;  %v12422_v21 = vmul.f32 %v3008_v30, %v2755_v48  ;;  %v2570_v47 = vmul.f32 1.442695, %v2467_v15  ;;  %v12425_v19 = vadd.f32 %v12407_v8, %v2242_v4  ;;  %v12428_v55 = vsel %vm178_vm3, %v3436_v1, %v3438_v16  ;;  %v3013_v15 = vpop.permute.xlu1 %3012 }
 0x27d   :  { %v7537_v24 = vadd.f32 -1.0, %v9860_v62  ;;  %v2007_v52 = vpop.f32.mrb[210].mxu0  ;;  %15008 = vst [vmem:[#allocation56_spill] sm:$0xff] %v12428_v55  ;;  %9240 = vmatprep.mubr.msk.f32.mxu1 %vm324_vm1, %v12428_v55 }
 0x27e   :  { %9865 = vpow2.f32 %v2570_v47  ;;  %v2468_v35 = vmin.f32 %v12425_v19, 0.0  ;;  %v2243_v56 = vadd.f32 %v2007_v52, %v11384_v3  ;;  %v9081_v54 = vpop.f32.mrb[211].mxu0  ;;  %v3440_v41 = vrot.slane %v12422_v21, 1 }
 0x27f   :  { %v2756_v4 = vsel %vm2391_vm8, %v12360_v58, %v7537_v24  ;;  %v3018_v54 = vpop.permute.xlu0 %3017  ;;  %vm2395_vm12 = vcmp.gt.f32.partialorder %v12425_v19, 0.0 }
 0x280   :  { %v12437_v30 = vmul.f32 %v3013_v15, %v2756_v4  ;;  %v2572_v1 = vmul.f32 1.442695, %v2468_v35  ;;  %v12440_v48 = vadd.f32 %v12407_v8, %v2243_v56  ;;  %v9862_v62 = vpop.eup %9861  ;;  %v12443_v42 = vsel %vm178_vm3, %v3438_v16, %v3440_v41 }
 0x281   :  { %v2012_v47 = vpop.f32.mrb[212].mxu0  ;;  %15009 = vst [vmem:[#allocation57_spill] sm:$0xff] %v12443_v42  ;;  %v7538_v3 = vadd.f32 -1.0, %v9862_v62  ;;  %9241 = vmatmul.mubr.msk.f32.gmra.mrb[170].mxu1 %vm324_vm1, %v12443_v42 }
 0x282   :  { %9867 = vpow2.f32 %v2572_v1  ;;  %v2469_v52 = vmin.f32 %v12440_v48, 0.0  ;;  %v9084_v58 = vpop.f32.mrb[213].mxu0  ;;  %v2244_v24 = vadd.f32 %v2012_v47, %v11399_v31  ;;  %v3442_v35 = vrot.slane %v12437_v30, 1  ;;  %v3023_v47 = vpop.permute.xlu1 %3022 }
 0x283   :  { %v2757_v15 = vsel %vm2392_vm9, %v12375_v7, %v7538_v3  ;;  %vm2396_vm13 = vcmp.gt.f32.partialorder %v12440_v48, 0.0 }
 0x284   :  { %v9864_v56 = vpop.eup %9863  ;;  %v2574_v16 = vmul.f32 1.442695, %v2469_v52  ;;  %v12452_v4 = vmul.f32 %v3018_v54, %v2757_v15  ;;  %v12455_v62 = vadd.f32 %v12407_v8, %v2244_v24  ;;  %v12458_v58 = vsel %vm178_vm3, %v3440_v41, %v3442_v35 }
 0x285   :  { %v7539_v1 = vadd.f32 -1.0, %v9864_v56  ;;  %v2017_v55 = vpop.f32.mrb[214].mxu0  ;;  %15010 = vst [vmem:[#allocation58_spill] sm:$0xff] %v12458_v58  ;;  %9243 = vmatprep.mubr.msk.f32.mxu1 %vm324_vm1, %v12458_v58 }
 0x286   :  { %9869 = vpow2.f32 %v2574_v16  ;;  %v2245_v31 = vadd.f32 %v2017_v55, %v11414_v51  ;;  %v9087_v7 = vpop.f32.mrb[215].mxu0  ;;  %v2470_v52 = vmin.f32 %v12455_v62, 0.0  ;;  %v3444_v24 = vrot.slane %v12452_v4, 1 }
 0x287   :  { %v2758_v3 = vsel %vm2393_vm10, %v12388_v61, %v7539_v1  ;;  %vm2397_vm14 = vcmp.gt.f32.partialorder %v12455_v62, 0.0 }
 0x288   :  { %v9866_v56 = vpop.eup %9865  ;;  %v12467_v54 = vmul.f32 %v3023_v47, %v2758_v3  ;;  %v12470_v41 = vadd.f32 %v12407_v8, %v2245_v31  ;;  %v2576_v16 = vmul.f32 1.442695, %v2470_v52  ;;  %v12473_v55 = vsel %vm178_vm3, %v3442_v35, %v3444_v24  ;;  %v3028_v31 = vpop.permute.xlu0 %3027 }
 0x289   :  { %v7540_v15 = vadd.f32 -1.0, %v9866_v56  ;;  %v2022_v51 = vpop.f32.mrb[216].mxu0  ;;  %15011 = vst [vmem:[#allocation59_spill] sm:$0xff] %v12473_v55  ;;  %9244 = vmatmul.mubr.msk.f32.gmra.mrb[172].mxu1 %vm324_vm1, %v12473_v55 }
 0x28a   :  { %v2471_v61 = vmin.f32 %v12470_v41, 0.0  ;;  %v2246_v1 = vadd.f32 %v2022_v51, %v11429_v13  ;;  %v9090_v7 = vpop.f32.mrb[217].mxu0  ;;  %v3446_v47 = vrot.slane %v12467_v54, 1  ;;  %9871 = vpow2.f32 %v2576_v16 }
 0x28b   :  { %v2759_v3 = vsel %vm2394_vm11, %v12410_v36, %v7540_v15  ;;  %vm2398_vm15 = vcmp.gt.f32.partialorder %v12470_v41, 0.0 }
 0x28c   :  { %v9868_v52 = vpop.eup %9867  ;;  %v12482_v56 = vmul.f32 %v3028_v31, %v2759_v3  ;;  %v2578_v35 = vmul.f32 1.442695, %v2471_v61  ;;  %v12485_v58 = vadd.f32 %v12407_v8, %v2246_v1  ;;  %v12488_v42 = vsel %vm178_vm3, %v3444_v24, %v3446_v47  ;;  %v3033_v61 = vpop.permute.xlu1 %3032 }
 0x28d   :  { %15012 = vst [vmem:[#allocation60_spill] sm:$0xff] %v12488_v42  ;;  %v7541_v13 = vadd.f32 -1.0, %v9868_v52  ;;  %v2027_v51 = vpop.f32.mrb[218].mxu0  ;;  %9246 = vmatprep.mubr.msk.f32.mxu1 %vm324_vm1, %v12488_v42 }
 0x28e   :  { %9873 = vpow2.f32 %v2578_v35  ;;  %v2472_v36 = vmin.f32 %v12485_v58, 0.0  ;;  %v2247_v15 = vadd.f32 %v2027_v51, %v11444_v33  ;;  %v9093_v16 = vpop.f32.mrb[219].mxu0  ;;  %v3448_v7 = vrot.slane %v12482_v56, 1  ;;  %v3038_v51 = vpop.permute.xlu0 %3037 }
 0x28f   :  { %v2760_v1 = vsel %vm2395_vm12, %v12425_v19, %v7541_v13  ;;  %vm2399_vm5 = vcmp.gt.f32.partialorder %v12485_v58, 0.0 }
 0x290   :  { %v9870_v24 = vpop.eup %9869  ;;  %v12497_v31 = vmul.f32 %v3033_v61, %v2760_v1  ;;  %v2580_v3 = vmul.f32 1.442695, %v2472_v36  ;;  %v12500_v52 = vadd.f32 %v12407_v8, %v2247_v15  ;;  %v12503_v35 = vsel %vm178_vm3, %v3446_v47, %v3448_v7 }
 0x291   :  { %v7542_v42 = vadd.f32 -1.0, %v9870_v24  ;;  %v2032_v55 = vpop.f32.mrb[220].mxu0  ;;  %15013 = vst [vmem:[#allocation61_spill] sm:$0xff] %v12503_v35  ;;  %9247 = vmatmul.mubr.msk.f32.gmra.mrb[174].mxu1 %vm324_vm1, %v12503_v35 }
 0x292   :  { %9875 = vpow2.f32 %v2580_v3  ;;  %v2473_v33 = vmin.f32 %v12500_v52, 0.0  ;;  %v2248_v19 = vadd.f32 %v2032_v55, %v11459_v57  ;;  %v9096_v13 = vpop.f32.mrb[221].mxu0  ;;  %v3450_v15 = vrot.slane %v12497_v31, 1 }
 0x293   :  { %v2761_v36 = vsel %vm2396_vm13, %v12440_v48, %v7542_v42  ;;  %v3043_v13 = vpop.permute.xlu1 %3042  ;;  %vm2400_vm6 = vcmp.gt.f32.partialorder %v12500_v52, 0.0 }
 0x294   :  { %v12512_v16 = vmul.f32 %v3038_v51, %v2761_v36  ;;  %v2582_v47 = vmul.f32 1.442695, %v2473_v33  ;;  %v12515_v61 = vadd.f32 %v12407_v8, %v2248_v19  ;;  %v9872_v1 = vpop.eup %9871  ;;  %v12518_v3 = vsel %vm178_vm3, %v3448_v7, %v3450_v15 }
 0x295   :  { %v2037_v24 = vpop.f32.mrb[222].mxu0  ;;  %15014 = vst [vmem:[#allocation62_spill] sm:$0xff] %v12518_v3  ;;  %v7543_v57 = vadd.f32 -1.0, %v9872_v1  ;;  %9249 = vmatprep.mubr.msk.f32.mxu1 %vm324_vm1, %v12518_v3 }
 0x296   :  { %9877 = vpow2.f32 %v2582_v47  ;;  %v2474_v55 = vmin.f32 %v12515_v61, 0.0  ;;  %v9099_v42 = vpop.f32.mrb[223].mxu0  ;;  %v2249_v48 = vadd.f32 %v2037_v24, %v11474_v20  ;;  %v3452_v33 = vrot.slane %v12512_v16, 1  ;;  %v3048_v24 = vpop.permute.xlu0 %3047 }
 0x297   :  { %v2762_v51 = vsel %vm2397_vm14, %v12455_v62, %v7543_v57  ;;  %vm2401_vm7 = vcmp.gt.f32.partialorder %v12515_v61, 0.0 }
 0x298   :  { %v9874_v19 = vpop.eup %9873  ;;  %v2584_v7 = vmul.f32 1.442695, %v2474_v55  ;;  %v12527_v36 = vmul.f32 %v3043_v13, %v2762_v51  ;;  %v12530_v1 = vadd.f32 %v12407_v8, %v2249_v48  ;;  %v12533_v42 = vsel %vm178_vm3, %v3450_v15, %v3452_v33 }
 0x299   :  { %v7544_v47 = vadd.f32 -1.0, %v9874_v19  ;;  %v2042_v35 = vpop.f32.mrb[224].mxu0  ;;  %15015 = vst [vmem:[#allocation63_spill] sm:$0xff] %v12533_v42  ;;  %9250 = vmatmul.mubr.msk.f32.gmra.mrb[176].mxu1 %vm324_vm1, %v12533_v42 }
 0x29a   :  { %9879 = vpow2.f32 %v2584_v7  ;;  %v2250_v20 = vadd.f32 %v2042_v35, %v11489_v40  ;;  %v9102_v62 = vpop.f32.mrb[225].mxu0  ;;  %v2475_v55 = vmin.f32 %v12530_v1, 0.0  ;;  %v3454_v48 = vrot.slane %v12527_v36, 1 }
 0x29b   :  { %v2763_v57 = vsel %vm2398_vm15, %v12470_v41, %v7544_v47  ;;  %vm2402_vm2 = vcmp.gt.f32.partialorder %v12530_v1, 0.0 }
 0x29c   :  { %v9876_v19 = vpop.eup %9875  ;;  %v12542_v13 = vmul.f32 %v3048_v24, %v2763_v57  ;;  %v12545_v15 = vadd.f32 %v12407_v8, %v2250_v20  ;;  %v2586_v7 = vmul.f32 1.442695, %v2475_v55  ;;  %v12548_v35 = vsel %vm178_vm3, %v3452_v33, %v3454_v48  ;;  %v3053_v20 = vpop.permute.xlu1 %3052 }
 0x29d   :  { %v7545_v51 = vadd.f32 -1.0, %v9876_v19  ;;  %v2047_v40 = vpop.f32.mrb[226].mxu0  ;;  %15016 = vst [vmem:[#allocation64_spill] sm:$0xff] %v12548_v35  ;;  %9252 = vmatprep.mubr.msk.f32.mxu1 %vm324_vm1, %v12548_v35 }
 0x29e   :  { %v2476_v41 = vmin.f32 %v12545_v15, 0.0  ;;  %v2251_v47 = vadd.f32 %v2047_v40, %v11504_v6  ;;  %v9105_v62 = vpop.f32.mrb[227].mxu0  ;;  %v3456_v24 = vrot.slane %v12542_v13, 1  ;;  %9881 = vpow2.f32 %v2586_v7 }
 0x29f   :  { %v2764_v57 = vsel %vm2399_vm5, %v12485_v58, %v7545_v51  ;;  %vm2403_vm8 = vcmp.gt.f32.partialorder %v12545_v15, 0.0 }
 0x2a0   :  { %v9878_v55 = vpop.eup %9877  ;;  %v12557_v19 = vmul.f32 %v3053_v20, %v2764_v57  ;;  %v2588_v33 = vmul.f32 1.442695, %v2476_v41  ;;  %v12560_v3 = vadd.f32 %v12407_v8, %v2251_v47  ;;  %v12563_v42 = vsel %vm178_vm3, %v3454_v48, %v3456_v24  ;;  %v3058_v41 = vpop.permute.xlu0 %3057 }
 0x2a1   :  { %15017 = vst [vmem:[#allocation65_spill] sm:$0xff] %v12563_v42  ;;  %v7546_v6 = vadd.f32 -1.0, %v9878_v55  ;;  %v2052_v40 = vpop.f32.mrb[228].mxu0  ;;  %9253 = vmatmul.mubr.msk.f32.gmra.mrb[178].mxu1 %vm324_vm1, %v12563_v42 }
 0x2a2   :  { %9883 = vpow2.f32 %v2588_v33  ;;  %v2477_v58 = vmin.f32 %v12560_v3, 0.0  ;;  %v2252_v51 = vadd.f32 %v2052_v40, %v11519_v28  ;;  %v9108_v7 = vpop.f32.mrb[229].mxu0  ;;  %v3458_v62 = vrot.slane %v12557_v19, 1  ;;  %v3063_v40 = vpop.permute.xlu1 %3062 }
 0x2a3   :  { %v2765_v47 = vsel %vm2400_vm6, %v12500_v52, %v7546_v6  ;;  %vm2404_vm9 = vcmp.gt.f32.partialorder %v12560_v3, 0.0 }
 0x2a4   :  { %v9880_v48 = vpop.eup %9879  ;;  %v12572_v20 = vmul.f32 %v3058_v41, %v2765_v47  ;;  %v2590_v57 = vmul.f32 1.442695, %v2477_v58  ;;  %v12575_v55 = vadd.f32 %v12407_v8, %v2252_v51  ;;  %v12578_v33 = vsel %vm178_vm3, %v3456_v24, %v3458_v62 }
 0x2a5   :  { %v7547_v35 = vadd.f32 -1.0, %v9880_v48  ;;  %v2057_v42 = vpop.f32.mrb[230].mxu0  ;;  %15018 = vst [vmem:[#allocation66_spill] sm:$0xff] %v12578_v33  ;;  %9255 = vmatprep.mubr.msk.f32.mxu1 %vm324_vm1, %v12578_v33 }
 0x2a6   :  { %9885 = vpow2.f32 %v2590_v57  ;;  %v2478_v28 = vmin.f32 %v12575_v55, 0.0  ;;  %v2253_v52 = vadd.f32 %v2057_v42, %v11534_v63  ;;  %v9111_v6 = vpop.f32.mrb[231].mxu0  ;;  %v3460_v51 = vrot.slane %v12572_v20, 1 }
 0x2a7   :  { %v2766_v58 = vsel %vm2401_vm7, %v12515_v61, %v7547_v35  ;;  %v3068_v6 = vpop.permute.xlu0 %3067  ;;  %vm2405_vm10 = vcmp.gt.f32.partialorder %v12575_v55, 0.0 }
 0x2a8   :  { %v12587_v7 = vmul.f32 %v3063_v40, %v2766_v58  ;;  %v2592_v24 = vmul.f32 1.442695, %v2478_v28  ;;  %v12590_v41 = vadd.f32 %v12407_v8, %v2253_v52  ;;  %v9882_v47 = vpop.eup %9881  ;;  %v12593_v57 = vsel %vm178_vm3, %v3458_v62, %v3460_v51 }
 0x2a9   :  { %v2062_v48 = vpop.f32.mrb[232].mxu0  ;;  %15019 = vst [vmem:[#allocation67_spill] sm:$0xff] %v12593_v57  ;;  %v7548_v63 = vadd.f32 -1.0, %v9882_v47  ;;  %9256 = vmatmul.mubr.msk.f32.gmra.mrb[180].mxu1 %vm324_vm1, %v12593_v57 }
 0x2aa   :  { %9887 = vpow2.f32 %v2592_v24  ;;  %v2479_v42 = vmin.f32 %v12590_v41, 0.0  ;;  %v9114_v61 = vpop.f32.mrb[233].mxu0  ;;  %v2254_v35 = vadd.f32 %v2062_v48, %v11549_v25  ;;  %v3462_v28 = vrot.slane %v12587_v7, 1  ;;  %v3073_v48 = vpop.permute.xlu1 %3072 }
 0x2ab   :  { %v2767_v40 = vsel %vm2402_vm2, %v12530_v1, %v7548_v63  ;;  %vm2406_vm11 = vcmp.gt.f32.partialorder %v12590_v41, 0.0 }
 0x2ac   :  { %v9884_v52 = vpop.eup %9883  ;;  %v2594_v62 = vmul.f32 1.442695, %v2479_v42  ;;  %v12602_v58 = vmul.f32 %v3068_v6, %v2767_v40  ;;  %v12605_v47 = vadd.f32 %v12407_v8, %v2254_v35  ;;  %v12608_v61 = vsel %vm178_vm3, %v3460_v51, %v3462_v28 }
 0x2ad   :  { %v7549_v24 = vadd.f32 -1.0, %v9884_v52  ;;  %v2067_v33 = vpop.f32.mrb[234].mxu0  ;;  %15020 = vst [vmem:[#allocation68_spill] sm:$0xff] %v12608_v61  ;;  %9258 = vmatprep.mubr.msk.f32.mxu1 %vm324_vm1, %v12608_v61 }
 0x2ae   :  { %9889 = vpow2.f32 %v2594_v62  ;;  %v2255_v25 = vadd.f32 %v2067_v33, %v11564_v5  ;;  %v9117_v1 = vpop.f32.mrb[235].mxu0  ;;  %v2480_v42 = vmin.f32 %v12605_v47, 0.0  ;;  %v3464_v35 = vrot.slane %v12602_v58, 1 }
 0x2af   :  { %v2768_v63 = vsel %vm2403_vm8, %v12545_v15, %v7549_v24  ;;  %v15022_v24 = vld [vmem:[#allocation2_spill] sm:$0xff]  ;;  %vm2407_vm12 = vcmp.gt.f32.partialorder %v12605_v47, 0.0 }
 0x2b0   :  { %v9886_v52 = vpop.eup %9885  ;;  %v12617_v6 = vmul.f32 %v3073_v48, %v2768_v63  ;;  %v12620_v51 = vadd.f32 %v12407_v8, %v2255_v25  ;;  %v2596_v62 = vmul.f32 1.442695, %v2480_v42  ;;  %v12623_v33 = vsel %vm178_vm3, %v3462_v28, %v3464_v35  ;;  %v3078_v25 = vpop.permute.xlu0 %3077 }
 0x2b1   :  { %v7550_v40 = vadd.f32 -1.0, %v9886_v52  ;;  %v2072_v5 = vpop.f32.mrb[236].mxu0  ;;  %15021 = vst [vmem:[#allocation69_spill] sm:$0xff] %v12623_v33  ;;  %9259 = vmatmul.mubr.msk.f32.gmra.mrb[182].mxu1 %vm324_vm1, %v12623_v33 }
 0x2b2   :  { %v2481_v15 = vmin.f32 %v12620_v51, 0.0  ;;  %v2256_v1 = vadd.f32 %v2072_v5, %v15022_v24  ;;  %v9120_v48 = vpop.f32.mrb[237].mxu0  ;;  %v3466_v63 = vrot.slane %v12617_v6, 1  ;;  %9891 = vpow2.f32 %v2596_v62 }
 0x2b3   :  { %v2769_v52 = vsel %vm2404_vm9, %v12560_v3, %v7550_v40  ;;  %v15025_v40 = vld [vmem:[#allocation3_spill] sm:$0xff]  ;;  %vm2408_vm13 = vcmp.gt.f32.partialorder %v12620_v51, 0.0 }
 0x2b4   :  { %v9888_v42 = vpop.eup %9887  ;;  %v12632_v61 = vmul.f32 %v3078_v25, %v2769_v52  ;;  %v2598_v28 = vmul.f32 1.442695, %v2481_v15  ;;  %v12635_v57 = vadd.f32 %v12407_v8, %v2256_v1  ;;  %v12638_v29 = vsel %vm178_vm3, %v3464_v35, %v3466_v63  ;;  %v3083_v15 = vpop.permute.xlu1 %3082 }
 0x2b5   :  { %15024 = vst [vmem:[#allocation70_spill] sm:$0xff] %v12638_v29  ;;  %v7551_v5 = vadd.f32 -1.0, %v9888_v42  ;;  %v2077_v24 = vpop.f32.mrb[238].mxu0  ;;  %9261 = vmatprep.mubr.msk.f32.mxu1 %vm324_vm1, %v12638_v29 }
 0x2b6   :  { %15023 = vst [vmem:[#allocation2_spill] sm:$0xff] %v12632_v61  ;;  %9893 = vpow2.f32 %v2598_v28  ;;  %v2482_v3 = vmin.f32 %v12635_v57, 0.0  ;;  %v2257_v62 = vadd.f32 %v2077_v24, %v15025_v40  ;;  %v9123_v48 = vpop.f32.mrb[239].mxu0  ;;  %v3468_v25 = vrot.slane %v12632_v61, 1 }
 0x2b7   :  { %v2770_v1 = vsel %vm2405_vm10, %v12575_v55, %v7551_v5  ;;  %v15028_v55 = vld [vmem:[#allocation4_spill] sm:$0xff]  ;;  %vm2409_vm14 = vcmp.gt.f32.partialorder %v12635_v57, 0.0 }
 0x2b8   :  { %v9890_v35 = vpop.eup %9889  ;;  %v12647_v52 = vmul.f32 %v3083_v15, %v2770_v1  ;;  %v2600_v42 = vmul.f32 1.442695, %v2482_v3  ;;  %v12650_v33 = vadd.f32 %v12407_v8, %v2257_v62  ;;  %v12653_v28 = vsel %vm178_vm3, %v3466_v63, %v3468_v25  ;;  %v12663_v3 = vld [vmem:[%s14810_s3 + $0x8] sm:$0xf]  ;;  %v3088_v62 = vpop.permute.xlu0 %3087 }
 0x2b9   :  { %v7552_v29 = vadd.f32 -1.0, %v9890_v35  ;;  %v2082_v11 = vpop.f32.mrb[240].mxu0  ;;  %15027 = vst [vmem:[#allocation71_spill] sm:$0xff] %v12653_v28  ;;  %9262 = vmatmul.mubr.msk.f32.gmra.mrb[184].mxu1 %vm324_vm1, %v12653_v28  ;;  %9422 = vmatprep.subr.msk.mxu1 %vm471_vm0, %v12663_v3  ;;  %v3093_v28 = vpop.permute.xlu1 %3092 }
 0x2ba   :  { %15026 = vst [vmem:[#allocation3_spill] sm:$0xff] %v12647_v52  ;;  %9895 = vpow2.f32 %v2600_v42  ;;  %v2483_v24 = vmin.f32 %v12650_v33, 0.0  ;;  %v2258_v5 = vadd.f32 %v2082_v11, %v15028_v55  ;;  %v9126_v40 = vpop.f32.mrb[241].mxu0  ;;  %v3470_v48 = vrot.slane %v12647_v52, 1 }
 0x2bb   :  { %v2771_v63 = vsel %vm2406_vm11, %v12590_v41, %v7552_v29  ;;  %vm2410_vm15 = vcmp.gt.f32.partialorder %v12650_v33, 0.0 }
 0x2bc   :  { %v12669_v15 = vmul.f32 %v3088_v62, %v2771_v63  ;;  %v2602_v11 = vmul.f32 1.442695, %v2483_v24  ;;  %v12672_v1 = vadd.f32 %v12407_v8, %v2258_v5  ;;  %v9892_v35 = vpop.eup %9891  ;;  %v12675_v55 = vsel %vm178_vm3, %v3468_v25, %v3470_v48  ;;  %v15031_v62 = vld [vmem:[#allocation5_spill] sm:$0xff] }
 0x2bd   :  { %v2087_v42 = vpop.f32.mrb[242].mxu0  ;;  %15030 = vst [vmem:[#allocation72_spill] sm:$0xff] %v12675_v55  ;;  %v7553_v40 = vadd.f32 -1.0, %v9892_v35  ;;  %9264 = vmatprep.mubr.msk.f32.mxu1 %vm324_vm1, %v12675_v55 }
 0x2be   :  { %15029 = vst [vmem:[#allocation4_spill] sm:$0xff] %v12669_v15  ;;  %9897 = vpow2.f32 %v2602_v11  ;;  %v2484_v29 = vmin.f32 %v12672_v1, 0.0  ;;  %v9129_v41 = vpop.f32.mrb[243].mxu0  ;;  %v2259_v24 = vadd.f32 %v2087_v42, %v15031_v62  ;;  %v3472_v5 = vrot.slane %v12669_v15, 1  ;;  %v15034_v42 = vld [vmem:[#allocation6_spill] sm:$0xff] }
 0x2bf   :  { %v2772_v27 = vsel %vm2407_vm12, %v12605_v47, %v7553_v40  ;;  %v3098_v40 = vpop.permute.xlu0 %3097  ;;  %vm2411_vm5 = vcmp.gt.f32.partialorder %v12672_v1, 0.0 }
 0x2c0   :  { %v9894_v63 = vpop.eup %9893  ;;  %v2604_v25 = vmul.f32 1.442695, %v2484_v29  ;;  %v12684_v23 = vmul.f32 %v3093_v28, %v2772_v27  ;;  %v12687_v35 = vadd.f32 %v12407_v8, %v2259_v24  ;;  %v12690_v41 = vsel %vm178_vm3, %v3470_v48, %v3472_v5 }
 0x2c1   :  { %v7554_v11 = vadd.f32 -1.0, %v9894_v63  ;;  %v2092_v52 = vpop.f32.mrb[244].mxu0  ;;  %15033 = vst [vmem:[#allocation73_spill] sm:$0xff] %v12690_v41  ;;  %9265 = vmatmul.mubr.msk.f32.gmra.mrb[186].mxu1 %vm324_vm1, %v12690_v41 }
 0x2c2   :  { %15032 = vst [vmem:[#allocation5_spill] sm:$0xff] %v12684_v23  ;;  %9899 = vpow2.f32 %v2604_v25  ;;  %v2260_v62 = vadd.f32 %v2092_v52, %v15034_v42  ;;  %v9132_v47 = vpop.f32.mrb[245].mxu0  ;;  %v2485_v28 = vmin.f32 %v12687_v35, 0.0  ;;  %v3474_v29 = vrot.slane %v12684_v23, 1 }
 0x2c3   :  { %v2773_v27 = vsel %vm2408_vm13, %v12620_v51, %v7554_v11  ;;  %v15037_v11 = vld [vmem:[#allocation7_spill] sm:$0xff]  ;;  %vm2412_vm6 = vcmp.gt.f32.partialorder %v12687_v35, 0.0 }
 0x2c4   :  { %v9896_v24 = vpop.eup %9895  ;;  %v12699_v63 = vmul.f32 %v3098_v40, %v2773_v27  ;;  %v12702_v48 = vadd.f32 %v12407_v8, %v2260_v62  ;;  %v2606_v55 = vmul.f32 1.442695, %v2485_v28  ;;  %v12705_v42 = vsel %vm178_vm3, %v3472_v5, %v3474_v29  ;;  %v3103_v62 = vpop.permute.xlu1 %3102 }
 0x2c5   :  { %v7555_v25 = vadd.f32 -1.0, %v9896_v24  ;;  %v2097_v52 = vpop.f32.mrb[246].mxu0  ;;  %15036 = vst [vmem:[#allocation74_spill] sm:$0xff] %v12705_v42  ;;  %9267 = vmatprep.mubr.msk.f32.mxu1 %vm324_vm1, %v12705_v42 }
 0x2c6   :  { %15035 = vst [vmem:[#allocation6_spill] sm:$0xff] %v12699_v63  ;;  %v2486_v51 = vmin.f32 %v12702_v48, 0.0  ;;  %v2261_v47 = vadd.f32 %v2097_v52, %v15037_v11  ;;  %v9135_v40 = vpop.f32.mrb[247].mxu0  ;;  %v3476_v27 = vrot.slane %v12699_v63, 1  ;;  %9901 = vpow2.f32 %v2606_v55  ;;  %v15040_v55 = vld [vmem:[#allocation8_spill] sm:$0xff] }
 0x2c7   :  { %v2774_v24 = vsel %vm2409_vm14, %v12635_v57, %v7555_v25  ;;  %vm2413_vm7 = vcmp.gt.f32.partialorder %v12702_v48, 0.0 }
 0x2c8   :  { %v9898_v28 = vpop.eup %9897  ;;  %v12714_v41 = vmul.f32 %v3103_v62, %v2774_v24  ;;  %v2608_v5 = vmul.f32 1.442695, %v2486_v51  ;;  %v12717_v23 = vadd.f32 %v12407_v8, %v2261_v47  ;;  %v12720_v15 = vsel %vm178_vm3, %v3474_v29, %v3476_v27  ;;  %v3108_v51 = vpop.permute.xlu0 %3107 }
 0x2c9   :  { %15039 = vst [vmem:[#allocation75_spill] sm:$0xff] %v12720_v15  ;;  %v7556_v52 = vadd.f32 -1.0, %v9898_v28  ;;  %v2102_v11 = vpop.f32.mrb[248].mxu0  ;;  %9268 = vmatmul.mubr.msk.f32.gmra.mrb[188].mxu1 %vm324_vm1, %v12720_v15 }
 0x2ca   :  { %15038 = vst [vmem:[#allocation7_spill] sm:$0xff] %v12714_v41  ;;  %9903 = vpow2.f32 %v2608_v5  ;;  %v2487_v57 = vmin.f32 %v12717_v23, 0.0  ;;  %v2262_v25 = vadd.f32 %v2102_v11, %v15040_v55  ;;  %v9138_v40 = vpop.f32.mrb[249].mxu0  ;;  %v3478_v62 = vrot.slane %v12714_v41, 1 }
 0x2cb   :  { %v2775_v47 = vsel %vm2410_vm15, %v12650_v33, %v7556_v52  ;;  %v15043_v33 = vld [vmem:[#allocation9_spill] sm:$0xff]  ;;  %vm2414_vm2 = vcmp.gt.f32.partialorder %v12717_v23, 0.0 }
 0x2cc   :  { %v9900_v29 = vpop.eup %9899  ;;  %v12729_v24 = vmul.f32 %v3108_v51, %v2775_v47  ;;  %v2610_v28 = vmul.f32 1.442695, %v2487_v57  ;;  %v12732_v42 = vadd.f32 %v12407_v8, %v2262_v25  ;;  %v12735_v5 = vsel %vm178_vm3, %v3476_v27, %v3478_v62  ;;  %v3113_v57 = vpop.permute.xlu1 %3112 }
 0x2cd   :  { %v7557_v15 = vadd.f32 -1.0, %v9900_v29  ;;  %v2107_v63 = vpop.f32.mrb[250].mxu0  ;;  %15042 = vst [vmem:[#allocation76_spill] sm:$0xff] %v12735_v5  ;;  %9270 = vmatprep.mubr.msk.f32.mxu1 %vm324_vm1, %v12735_v5 }
 0x2ce   :  { %15041 = vst [vmem:[#allocation8_spill] sm:$0xff] %v12729_v24  ;;  %9905 = vpow2.f32 %v2610_v28  ;;  %v2488_v11 = vmin.f32 %v12732_v42, 0.0  ;;  %v2263_v52 = vadd.f32 %v2107_v63, %v15043_v33  ;;  %v9141_v55 = vpop.f32.mrb[251].mxu0  ;;  %v3480_v40 = vrot.slane %v12729_v24, 1 }
 0x2cf   :  { %v2776_v25 = vsel %vm2411_vm5, %v12672_v1, %v7557_v15  ;;  %v15046_v1 = vld [vmem:[#allocation10_spill] sm:$0xff]  ;;  %vm2415_vm8 = vcmp.gt.f32.partialorder %v12732_v42, 0.0 }
 0x2d0   :  { %v12744_v51 = vmul.f32 %v3113_v57, %v2776_v25  ;;  %v2612_v27 = vmul.f32 1.442695, %v2488_v11  ;;  %v12747_v47 = vadd.f32 %v12407_v8, %v2263_v52  ;;  %v9902_v29 = vpop.eup %9901  ;;  %v12750_v41 = vsel %vm178_vm3, %v3478_v62, %v3480_v40  ;;  %v3118_v57 = vpop.permute.xlu0 %3117 }
 0x2d1   :  { %v2112_v28 = vpop.f32.mrb[252].mxu0  ;;  %15045 = vst [vmem:[#allocation77_spill] sm:$0xff] %v12750_v41  ;;  %v7558_v63 = vadd.f32 -1.0, %v9902_v29  ;;  %9271 = vmatmul.mubr.msk.f32.gmra.mrb[190].mxu1 %vm324_vm1, %v12750_v41 }
 0x2d2   :  { %15044 = vst [vmem:[#allocation9_spill] sm:$0xff] %v12744_v51  ;;  %9907 = vpow2.f32 %v2612_v27  ;;  %v2489_v33 = vmin.f32 %v12747_v47, 0.0  ;;  %v9144_v15 = vpop.f32.mrb[253].mxu0  ;;  %v2264_v11 = vadd.f32 %v2112_v28, %v15046_v1  ;;  %v3482_v52 = vrot.slane %v12744_v51, 1  ;;  %v15049_v28 = vld [vmem:[#allocation11_spill] sm:$0xff] }
 0x2d3   :  { %v2777_v25 = vsel %vm2412_vm6, %v12687_v35, %v7558_v63  ;;  %v3123_v63 = vpop.permute.xlu1 %3122  ;;  %vm2416_vm9 = vcmp.gt.f32.partialorder %v12747_v47, 0.0 }
 0x2d4   :  { %v9904_v55 = vpop.eup %9903  ;;  %v2614_v62 = vmul.f32 1.442695, %v2489_v33  ;;  %v12759_v5 = vmul.f32 %v3118_v57, %v2777_v25  ;;  %v12762_v29 = vadd.f32 %v12407_v8, %v2264_v11  ;;  %v12765_v15 = vsel %vm178_vm3, %v3480_v40, %v3482_v52 }
 0x2d5   :  { %v7559_v27 = vadd.f32 -1.0, %v9904_v55  ;;  %v2117_v24 = vpop.f32.mrb[254].mxu0  ;;  %15048 = vst [vmem:[#allocation78_spill] sm:$0xff] %v12765_v15  ;;  %9273 = vmatprep.mubr.msk.f32.mxu1 %vm324_vm1, %v12765_v15 }
 0x2d6   :  { %15047 = vst [vmem:[#allocation10_spill] sm:$0xff] %v12759_v5  ;;  %9909 = vpow2.f32 %v2614_v62  ;;  %v2265_v1 = vadd.f32 %v2117_v24, %v15049_v28  ;;  %v9147_v35 = vpop.f32.mrb[255].mxu0  ;;  %v2490_v55 = vmin.f32 %v12762_v29, 0.0  ;;  %v3484_v11 = vrot.slane %v12759_v5, 1 }
 0x2d7   :  { %v2778_v33 = vsel %vm2413_vm7, %v12702_v48, %v7559_v27  ;;  %v15052_v27 = vld [vmem:[#allocation12_spill] sm:$0xff]  ;;  %vm2417_vm10 = vcmp.gt.f32.partialorder %v12762_v29, 0.0 }
 0x2d8   :  { %v9906_v57 = vpop.eup %9905  ;;  %v12774_v25 = vmul.f32 %v3123_v63, %v2778_v33  ;;  %v12777_v40 = vadd.f32 %v12407_v8, %v2265_v1  ;;  %v2616_v41 = vmul.f32 1.442695, %v2490_v55  ;;  %v12780_v28 = vsel %vm178_vm3, %v3482_v52, %v3484_v11  ;;  %v3128_v1 = vpop.permute.xlu0 %3127 }
 0x2d9   :  { %v7560_v62 = vadd.f32 -1.0, %v9906_v57  ;;  %v2122_v24 = vpop.f32.mrb[0].mxu0  ;;  %15051 = vst [vmem:[#allocation79_spill] sm:$0xff] %v12780_v28  ;;  %9274 = vmatmul.mubr.msk.f32.gmra.mrb[192].mxu1 %vm324_vm1, %v12780_v28 }
 0x2da   :  { %15050 = vst [vmem:[#allocation11_spill] sm:$0xff] %v12774_v25  ;;  %v2491_v48 = vmin.f32 %v12777_v40, 0.0  ;;  %v2266_v35 = vadd.f32 %v2122_v24, %v15052_v27  ;;  %v9150_v63 = vpop.f32.mrb[1].mxu0  ;;  %v3486_v33 = vrot.slane %v12774_v25, 1  ;;  %9911 = vpow2.f32 %v2616_v41  ;;  %v15055_v41 = vld [vmem:[#allocation13_spill] sm:$0xff] }
 0x2db   :  { %v2779_v57 = vsel %vm2414_vm2, %v12717_v23, %v7560_v62  ;;  %vm2418_vm11 = vcmp.gt.f32.partialorder %v12777_v40, 0.0 }
 0x2dc   :  { %v9908_v55 = vpop.eup %9907  ;;  %v12789_v15 = vmul.f32 %v3128_v1, %v2779_v57  ;;  %v2618_v52 = vmul.f32 1.442695, %v2491_v48  ;;  %v12792_v5 = vadd.f32 %v12407_v8, %v2266_v35  ;;  %v12795_v51 = vsel %vm178_vm3, %v3484_v11, %v3486_v33  ;;  %v3133_v48 = vpop.permute.xlu1 %3132 }
 0x2dd   :  { %15054 = vst [vmem:[#allocation80_spill] sm:$0xff] %v12795_v51  ;;  %v7561_v24 = vadd.f32 -1.0, %v9908_v55  ;;  %v2127_v27 = vpop.f32.mrb[2].mxu0  ;;  %9276 = vmatprep.mubr.msk.f32.mxu1 %vm324_vm1, %v12795_v51 }
 0x2de   :  { %15053 = vst [vmem:[#allocation12_spill] sm:$0xff] %v12789_v15  ;;  %9913 = vpow2.f32 %v2618_v52  ;;  %v2492_v23 = vmin.f32 %v12792_v5, 0.0  ;;  %v2267_v62 = vadd.f32 %v2127_v27, %v15055_v41  ;;  %v9153_v63 = vpop.f32.mrb[3].mxu0  ;;  %v3488_v1 = vrot.slane %v12789_v15, 1 }
 0x2df   :  { %v2780_v35 = vsel %vm2415_vm8, %v12732_v42, %v7561_v24  ;;  %v15058_v42 = vld [vmem:[#allocation14_spill] sm:$0xff]  ;;  %vm2419_vm12 = vcmp.gt.f32.partialorder %v12792_v5, 0.0 }
 0x2e0   :  { %v9910_v11 = vpop.eup %9909  ;;  %v12804_v57 = vmul.f32 %v3133_v48, %v2780_v35  ;;  %v2620_v55 = vmul.f32 1.442695, %v2492_v23  ;;  %v12807_v28 = vadd.f32 %v12407_v8, %v2267_v62  ;;  %v12810_v52 = vsel %vm178_vm3, %v3486_v33, %v3488_v1  ;;  %v3138_v23 = vpop.permute.xlu0 %3137 }
 0x2e1   :  { %v7562_v51 = vadd.f32 -1.0, %v9910_v11  ;;  %v2132_v25 = vpop.f32.mrb[4].mxu0  ;;  %15057 = vst [vmem:[#allocation81_spill] sm:$0xff] %v12810_v52  ;;  %9277 = vmatmul.mubr.msk.f32.gmra.mrb[194].mxu1 %vm324_vm1, %v12810_v52 }
 0x2e2   :  { %15056 = vst [vmem:[#allocation13_spill] sm:$0xff] %v12804_v57  ;;  %9915 = vpow2.f32 %v2620_v55  ;;  %v2493_v27 = vmin.f32 %v12807_v28, 0.0  ;;  %v2268_v24 = vadd.f32 %v2132_v25, %v15058_v42  ;;  %v9156_v41 = vpop.f32.mrb[5].mxu0  ;;  %v3490_v63 = vrot.slane %v12804_v57, 1 }
 0x2e3   :  { %v2781_v62 = vsel %vm2416_vm9, %v12747_v47, %v7562_v51  ;;  %v15061_v47 = vld [vmem:[#allocation15_spill] sm:$0xff]  ;;  %vm2420_vm13 = vcmp.gt.f32.partialorder %v12807_v28, 0.0 }
 0x2e4   :  { %v12819_v48 = vmul.f32 %v3138_v23, %v2781_v62  ;;  %v2622_v33 = vmul.f32 1.442695, %v2493_v27  ;;  %v12822_v35 = vadd.f32 %v12407_v8, %v2268_v24  ;;  %v9912_v11 = vpop.eup %9911  ;;  %v12825_v15 = vsel %vm178_vm3, %v3488_v1, %v3490_v63  ;;  %v3143_v23 = vpop.permute.xlu1 %3142 }
 0x2e5   :  { %v2137_v55 = vpop.f32.mrb[6].mxu0  ;;  %15060 = vst [vmem:[#allocation82_spill] sm:$0xff] %v12825_v15  ;;  %v7563_v25 = vadd.f32 -1.0, %v9912_v11  ;;  %9279 = vmatprep.mubr.msk.f32.mxu1 %vm324_vm1, %v12825_v15 }
 0x2e6   :  { %15059 = vst [vmem:[#allocation14_spill] sm:$0xff] %v12819_v48  ;;  %9917 = vpow2.f32 %v2622_v33  ;;  %v2494_v42 = vmin.f32 %v12822_v35, 0.0  ;;  %v9159_v51 = vpop.f32.mrb[7].mxu0  ;;  %v2269_v27 = vadd.f32 %v2137_v55, %v15061_v47  ;;  %v3492_v24 = vrot.slane %v12819_v48, 1  ;;  %v15064_v55 = vld [vmem:[#allocation16_spill] sm:$0xff] }
 0x2e7   :  { %v2782_v62 = vsel %vm2417_vm10, %v12762_v29, %v7563_v25  ;;  %v3148_v25 = vpop.permute.xlu0 %3147  ;;  %vm2421_vm14 = vcmp.gt.f32.partialorder %v12822_v35, 0.0 }
 0x2e8   :  { %v9914_v41 = vpop.eup %9913  ;;  %v2624_v1 = vmul.f32 1.442695, %v2494_v42  ;;  %v12834_v52 = vmul.f32 %v3143_v23, %v2782_v62  ;;  %v12837_v11 = vadd.f32 %v12407_v8, %v2269_v27  ;;  %v12840_v51 = vsel %vm178_vm3, %v3490_v63, %v3492_v24 }
 0x2e9   :  { %v7564_v33 = vadd.f32 -1.0, %v9914_v41  ;;  %v2142_v57 = vpop.f32.mrb[8].mxu0  ;;  %15063 = vst [vmem:[#allocation83_spill] sm:$0xff] %v12840_v51  ;;  %9280 = vmatmul.mubr.msk.f32.gmra.mrb[196].mxu1 %vm324_vm1, %v12840_v51 }
 0x2ea   :  { %15062 = vst [vmem:[#allocation15_spill] sm:$0xff] %v12834_v52  ;;  %9919 = vpow2.f32 %v2624_v1  ;;  %v2270_v47 = vadd.f32 %v2142_v57, %v15064_v55  ;;  %v9162_v29 = vpop.f32.mrb[9].mxu0  ;;  %v2495_v41 = vmin.f32 %v12837_v11, 0.0  ;;  %v3494_v27 = vrot.slane %v12834_v52, 1 }
 0x2eb   :  { %v2783_v42 = vsel %vm2418_vm11, %v12777_v40, %v7564_v33  ;;  %v15067_v33 = vld [vmem:[#allocation17_spill] sm:$0xff]  ;;  %vm2422_vm15 = vcmp.gt.f32.partialorder %v12837_v11, 0.0 }
 0x2ec   :  { %v9916_v23 = vpop.eup %9915  ;;  %v12849_v62 = vmul.f32 %v3148_v25, %v2783_v42  ;;  %v12852_v63 = vadd.f32 %v12407_v8, %v2270_v47  ;;  %v2626_v15 = vmul.f32 1.442695, %v2495_v41  ;;  %v12855_v55 = vsel %vm178_vm3, %v3492_v24, %v3494_v27  ;;  %v3153_v47 = vpop.permute.xlu1 %3152 }
 0x2ed   :  { %v7565_v1 = vadd.f32 -1.0, %v9916_v23  ;;  %v2147_v57 = vpop.f32.mrb[10].mxu0  ;;  %15066 = vst [vmem:[#allocation84_spill] sm:$0xff] %v12855_v55  ;;  %9282 = vmatprep.mubr.msk.f32.mxu1 %vm324_vm1, %v12855_v55 }
 0x2ee   :  { %15065 = vst [vmem:[#allocation16_spill] sm:$0xff] %v12849_v62  ;;  %v2496_v40 = vmin.f32 %v12852_v63, 0.0  ;;  %v2271_v29 = vadd.f32 %v2147_v57, %v15067_v33  ;;  %v9165_v25 = vpop.f32.mrb[11].mxu0  ;;  %v3496_v42 = vrot.slane %v12849_v62, 1  ;;  %9921 = vpow2.f32 %v2626_v15  ;;  %v15070_v15 = vld [vmem:[#allocation18_spill] sm:$0xff] }
 0x2ef   :  { %v2784_v23 = vsel %vm2419_vm12, %v12792_v5, %v7565_v1  ;;  %vm2423_vm5 = vcmp.gt.f32.partialorder %v12852_v63, 0.0 }
 0x2f0   :  { %v9918_v41 = vpop.eup %9917  ;;  %v12864_v51 = vmul.f32 %v3153_v47, %v2784_v23  ;;  %v2628_v24 = vmul.f32 1.442695, %v2496_v40  ;;  %v12867_v52 = vadd.f32 %v12407_v8, %v2271_v29  ;;  %v12870_v48 = vsel %vm178_vm3, %v3494_v27, %v3496_v42  ;;  %v3158_v40 = vpop.permute.xlu0 %3157 }
 0x2f1   :  { %15069 = vst [vmem:[#allocation85_spill] sm:$0xff] %v12870_v48  ;;  %v7566_v57 = vadd.f32 -1.0, %v9918_v41  ;;  %v2152_v33 = vpop.f32.mrb[12].mxu0  ;;  %9283 = vmatmul.mubr.msk.f32.gmra.mrb[198].mxu1 %vm324_vm1, %v12870_v48 }
 0x2f2   :  { %15068 = vst [vmem:[#allocation17_spill] sm:$0xff] %v12864_v51  ;;  %9923 = vpow2.f32 %v2628_v24  ;;  %v2497_v5 = vmin.f32 %v12867_v52, 0.0  ;;  %v2272_v1 = vadd.f32 %v2152_v33, %v15070_v15  ;;  %v9168_v25 = vpop.f32.mrb[13].mxu0  ;;  %v3498_v47 = vrot.slane %v12864_v51, 1 }
 0x2f3   :  { %v2785_v29 = vsel %vm2420_vm13, %v12807_v28, %v7566_v57  ;;  %v15073_v28 = vld [vmem:[#allocation19_spill] sm:$0xff]  ;;  %vm2424_vm6 = vcmp.gt.f32.partialorder %v12867_v52, 0.0 }
 0x2f4   :  { %v9920_v27 = vpop.eup %9919  ;;  %v12879_v23 = vmul.f32 %v3158_v40, %v2785_v29  ;;  %v2630_v41 = vmul.f32 1.442695, %v2497_v5  ;;  %v12882_v55 = vadd.f32 %v12407_v8, %v2272_v1  ;;  %v12885_v24 = vsel %vm178_vm3, %v3496_v42, %v3498_v47  ;;  %v3163_v5 = vpop.permute.xlu1 %3162  ;;  %v12899_v40 = vld [vmem:[%s14812_s2] ss:$0 sm:$0xff] }
 0x2f5   :  { %v7567_v48 = vadd.f32 -1.0, %v9920_v27  ;;  %v2157_v62 = vpop.f32.mrb[14].mxu0  ;;  %15072 = vst [vmem:[#allocation86_spill] sm:$0xff] %v12885_v24  ;;  %9285 = vmatprep.mubr.msk.f32.mxu1 %vm324_vm1, %v12885_v24 }
 0x2f6   :  { %15071 = vst [vmem:[#allocation18_spill] sm:$0xff] %v12879_v23  ;;  %9925 = vpow2.f32 %v2630_v41  ;;  %v2498_v33 = vmin.f32 %v12882_v55, 0.0  ;;  %v2273_v57 = vadd.f32 %v2157_v62, %v15073_v28  ;;  %v9171_v15 = vpop.f32.mrb[15].mxu0  ;;  %v3500_v1 = vrot.slane %v12879_v23, 1 }
 0x2f7   :  { %v2786_v8 = vsel %vm2421_vm14, %v12822_v35, %v7567_v48  ;;  %vm2425_vm7 = vcmp.gt.f32.partialorder %v12882_v55, 0.0 }
 0x2f8   :  { %v12894_v25 = vmul.f32 %v3163_v5, %v2786_v8  ;;  %v2632_v42 = vmul.f32 1.442695, %v2498_v33  ;;  %v12902_v29 = vadd.f32 %v12899_v40, %v2273_v57  ;;  %v9922_v62 = vpop.eup %9921  ;;  %v12905_v41 = vsel %vm178_vm3, %v3498_v47, %v3500_v1  ;;  %v15076_v33 = vld [vmem:[#allocation20_spill] sm:$0xff]  ;;  %v3168_v8 = vpop.permute.xlu0 %3167 }
 0x2f9   :  { %v2162_v27 = vpop.f32.mrb[16].mxu0  ;;  %15075 = vst [vmem:[#allocation87_spill] sm:$0xff] %v12905_v41  ;;  %v7568_v28 = vadd.f32 -1.0, %v9922_v62  ;;  %9286 = vmatmul.mubr.msk.f32.gmra.mrb[200].mxu1 %vm324_vm1, %v12905_v41 }
 0x2fa   :  { %15074 = vst [vmem:[#allocation19_spill] sm:$0xff] %v12894_v25  ;;  %9927 = vpow2.f32 %v2632_v42  ;;  %v2499_v48 = vmin.f32 %v12902_v29, 0.0  ;;  %v9174_v35 = vpop.f32.mrb[17].mxu0  ;;  %v2274_v15 = vadd.f32 %v2162_v27, %v15076_v33  ;;  %v3502_v57 = vrot.slane %v12894_v25, 1  ;;  %v15079_v27 = vld [vmem:[#allocation21_spill] sm:$0xff] }
 0x2fb   :  { %v2787_v24 = vsel %vm2422_vm15, %v12837_v11, %v7568_v28  ;;  %v3173_v28 = vpop.permute.xlu1 %3172  ;;  %vm2426_vm2 = vcmp.gt.f32.partialorder %v12902_v29, 0.0 }
 0x2fc   :  { %v9924_v5 = vpop.eup %9923  ;;  %v2634_v47 = vmul.f32 1.442695, %v2499_v48  ;;  %v12914_v23 = vmul.f32 %v3168_v8, %v2787_v24  ;;  %v12917_v62 = vadd.f32 %v12899_v40, %v2274_v15  ;;  %v12920_v35 = vsel %vm178_vm3, %v3500_v1, %v3502_v57 }
 0x2fd   :  { %v7569_v42 = vadd.f32 -1.0, %v9924_v5  ;;  %v2167_v51 = vpop.f32.mrb[18].mxu0  ;;  %15078 = vst [vmem:[#allocation88_spill] sm:$0xff] %v12920_v35  ;;  %9288 = vmatprep.mubr.msk.f32.mxu1 %vm324_vm1, %v12920_v35 }
 0x2fe   :  { %15077 = vst [vmem:[#allocation20_spill] sm:$0xff] %v12914_v23  ;;  %9929 = vpow2.f32 %v2634_v47  ;;  %v2275_v33 = vadd.f32 %v2167_v51, %v15079_v27  ;;  %v9177_v11 = vpop.f32.mrb[19].mxu0  ;;  %v2500_v48 = vmin.f32 %v12917_v62, 0.0  ;;  %v3504_v15 = vrot.slane %v12914_v23, 1 }
 0x2ff   :  { %v2788_v24 = vsel %vm2423_vm5, %v12852_v63, %v7569_v42  ;;  %v15082_v42 = vld [vmem:[#allocation22_spill] sm:$0xff]  ;;  %vm2427_vm8 = vcmp.gt.f32.partialorder %v12917_v62, 0.0 }
 0x300   :  { %v9926_v5 = vpop.eup %9925  ;;  %v12929_v8 = vmul.f32 %v3173_v28, %v2788_v24  ;;  %v12932_v1 = vadd.f32 %v12899_v40, %v2275_v33  ;;  %v2636_v41 = vmul.f32 1.442695, %v2500_v48  ;;  %v12935_v27 = vsel %vm178_vm3, %v3502_v57, %v3504_v15  ;;  %v3178_v33 = vpop.permute.xlu0 %3177 }
 0x301   :  { %v7570_v47 = vadd.f32 -1.0, %v9926_v5  ;;  %v2172_v51 = vpop.f32.mrb[20].mxu0  ;;  %15081 = vst [vmem:[#allocation89_spill] sm:$0xff] %v12935_v27  ;;  %9289 = vmatmul.mubr.msk.f32.gmra.mrb[202].mxu1 %vm324_vm1, %v12935_v27 }
 0x302   :  { %15080 = vst [vmem:[#allocation21_spill] sm:$0xff] %v12929_v8  ;;  %v2501_v63 = vmin.f32 %v12932_v1, 0.0  ;;  %v2276_v11 = vadd.f32 %v2172_v51, %v15082_v42  ;;  %v9180_v28 = vpop.f32.mrb[21].mxu0  ;;  %v3506_v24 = vrot.slane %v12929_v8, 1  ;;  %9931 = vpow2.f32 %v2636_v41  ;;  %v15085_v41 = vld [vmem:[#allocation23_spill] sm:$0xff] }
 0x303   :  { %v2789_v5 = vsel %vm2424_vm6, %v12867_v52, %v7570_v47  ;;  %vm2428_vm9 = vcmp.gt.f32.partialorder %v12932_v1, 0.0 }
 0x304   :  { %v9928_v48 = vpop.eup %9927  ;;  %v12944_v35 = vmul.f32 %v3178_v33, %v2789_v5  ;;  %v2638_v57 = vmul.f32 1.442695, %v2501_v63  ;;  %v12947_v23 = vadd.f32 %v12899_v40, %v2276_v11  ;;  %v12950_v25 = vsel %vm178_vm3, %v3504_v15, %v3506_v24  ;;  %v3183_v63 = vpop.permute.xlu1 %3182 }
 0x305   :  { %15084 = vst [vmem:[#allocation90_spill] sm:$0xff] %v12950_v25  ;;  %v7571_v51 = vadd.f32 -1.0, %v9928_v48  ;;  %v2177_v42 = vpop.f32.mrb[22].mxu0  ;;  %9291 = vmatprep.mubr.msk.f32.mxu1 %vm324_vm1, %v12950_v25 }
 0x306   :  { %15083 = vst [vmem:[#allocation22_spill] sm:$0xff] %v12944_v35  ;;  %9933 = vpow2.f32 %v2638_v57  ;;  %v2502_v52 = vmin.f32 %v12947_v23, 0.0  ;;  %v2277_v47 = vadd.f32 %v2177_v42, %v15085_v41  ;;  %v9183_v28 = vpop.f32.mrb[23].mxu0  ;;  %v3508_v33 = vrot.slane %v12944_v35, 1 }
 0x307   :  { %v2790_v11 = vsel %vm2425_vm7, %v12882_v55, %v7571_v51  ;;  %v15088_v55 = vld [vmem:[#allocation24_spill] sm:$0xff]  ;;  %vm2429_vm10 = vcmp.gt.f32.partialorder %v12947_v23, 0.0 }
 0x308   :  { %v9930_v15 = vpop.eup %9929  ;;  %v12959_v5 = vmul.f32 %v3183_v63, %v2790_v11  ;;  %v2640_v48 = vmul.f32 1.442695, %v2502_v52  ;;  %v12962_v27 = vadd.f32 %v12899_v40, %v2277_v47  ;;  %v12965_v57 = vsel %vm178_vm3, %v3506_v24, %v3508_v33  ;;  %v3188_v52 = vpop.permute.xlu0 %3187 }
 0x309   :  { %v7572_v25 = vadd.f32 -1.0, %v9930_v15  ;;  %v2182_v8 = vpop.f32.mrb[24].mxu0  ;;  %15087 = vst [vmem:[#allocation91_spill] sm:$0xff] %v12965_v57  ;;  %9292 = vmatmul.mubr.msk.f32.gmra.mrb[204].mxu1 %vm324_vm1, %v12965_v57 }
 0x30a   :  { %15086 = vst [vmem:[#allocation23_spill] sm:$0xff] %v12959_v5  ;;  %9935 = vpow2.f32 %v2640_v48  ;;  %v2503_v42 = vmin.f32 %v12962_v27, 0.0  ;;  %v2278_v51 = vadd.f32 %v2182_v8, %v15088_v55  ;;  %v9186_v41 = vpop.f32.mrb[25].mxu0  ;;  %v3510_v28 = vrot.slane %v12959_v5, 1 }
 0x30b   :  { %v2791_v47 = vsel %vm2426_vm2, %v12902_v29, %v7572_v25  ;;  %v15091_v29 = vld [vmem:[#allocation25_spill] sm:$0xff]  ;;  %vm2430_vm11 = vcmp.gt.f32.partialorder %v12962_v27, 0.0 }
 0x30c   :  { %v12974_v63 = vmul.f32 %v3188_v52, %v2791_v47  ;;  %v2642_v24 = vmul.f32 1.442695, %v2503_v42  ;;  %v12977_v11 = vadd.f32 %v12899_v40, %v2278_v51  ;;  %v9932_v15 = vpop.eup %9931  ;;  %v12980_v35 = vsel %vm178_vm3, %v3508_v33, %v3510_v28  ;;  %v3193_v52 = vpop.permute.xlu1 %3192 }
 0x30d   :  { %v2187_v48 = vpop.f32.mrb[26].mxu0  ;;  %15090 = vst [vmem:[#allocation92_spill] sm:$0xff] %v12980_v35  ;;  %v7573_v8 = vadd.f32 -1.0, %v9932_v15  ;;  %9294 = vmatprep.mubr.msk.f32.mxu1 %vm324_vm1, %v12980_v35 }
 0x30e   :  { %15089 = vst [vmem:[#allocation24_spill] sm:$0xff] %v12974_v63  ;;  %9937 = vpow2.f32 %v2642_v24  ;;  %v2504_v55 = vmin.f32 %v12977_v11, 0.0  ;;  %v9189_v25 = vpop.f32.mrb[27].mxu0  ;;  %v2279_v42 = vadd.f32 %v2187_v48, %v15091_v29  ;;  %v3512_v51 = vrot.slane %v12974_v63, 1  ;;  %v15094_v48 = vld [vmem:[#allocation26_spill] sm:$0xff] }
 0x30f   :  { %v2792_v47 = vsel %vm2427_vm8, %v12917_v62, %v7573_v8  ;;  %v3198_v8 = vpop.permute.xlu0 %3197  ;;  %vm2431_vm12 = vcmp.gt.f32.partialorder %v12977_v11, 0.0 }
 0x310   :  { %v9934_v41 = vpop.eup %9933  ;;  %v2644_v33 = vmul.f32 1.442695, %v2504_v55  ;;  %v12989_v57 = vmul.f32 %v3193_v52, %v2792_v47  ;;  %v12992_v15 = vadd.f32 %v12899_v40, %v2279_v42  ;;  %v12995_v25 = vsel %vm178_vm3, %v3510_v28, %v3512_v51  ;;  %v5980_v28 = vld [vmem:[%s14813_s5] sm:$0xff]  ;;  %v5981_v52 = vld [vmem:[%s14813_s5 + $0x8] sm:$0xff] }
 0x311   :  { %v7574_v24 = vadd.f32 -1.0, %v9934_v41  ;;  %v2192_v5 = vpop.f32.mrb[28].mxu0  ;;  %15093 = vst [vmem:[#allocation93_spill] sm:$0xff] %v12995_v25  ;;  %9295 = vmatmul.mubr.msk.f32.gmra.mrb[206].mxu1 %vm324_vm1, %v12995_v25 }
 0x312   :  { %15092 = vst [vmem:[#allocation25_spill] sm:$0xff] %v12989_v57  ;;  %9939 = vpow2.f32 %v2644_v33  ;;  %v2280_v29 = vadd.f32 %v2192_v5, %v15094_v48  ;;  %v9192_v62 = vpop.f32.mrb[29].mxu0  ;;  %v2505_v41 = vmin.f32 %v12992_v15, 0.0  ;;  %v3514_v42 = vrot.slane %v12989_v57, 1  ;;  %v15097_v57 = vld [vmem:[#allocation27_spill] sm:$0xff] }
 0x313   :  { %v2793_v55 = vsel %vm2428_vm9, %v12932_v1, %v7574_v24  ;;  %v9648_v48 = vpack.c.bf16 %v5981_v52, %v5980_v28  ;;  %vm2432_vm13 = vcmp.gt.f32.partialorder %v12992_v15, 0.0 }
 0x314   :  { %v9936_v5 = vpop.eup %9935  ;;  %v13010_v47 = vmul.f32 %v3198_v8, %v2793_v55  ;;  %v13013_v33 = vadd.f32 %v12899_v40, %v2280_v29  ;;  %v2646_v24 = vmul.f32 1.442695, %v2505_v41  ;;  %v13016_v35 = vsel %vm178_vm3, %v3512_v51, %v3514_v42  ;;  %v3203_v55 = vpop.permute.xlu1 %3202 }
 0x315   :  { %v7575_v1 = vadd.f32 -1.0, %v9936_v5  ;;  %v2197_v62 = vpop.f32.mrb[30].mxu0  ;;  %15096 = vst [vmem:[#allocation94_spill] sm:$0xff] %v13016_v35  ;;  %9297 = vmatprep.mubr.msk.f32.mxu1 %vm324_vm1, %v13016_v35  ;;  %9649 = vmatprep.subr.bf16.mxu0 %v9648_v48 }
 0x316   :  { %15095 = vst [vmem:[#allocation26_spill] sm:$0xff] %v13010_v47  ;;  %v2506_v25 = vmin.f32 %v13013_v33, 0.0  ;;  %v2281_v63 = vadd.f32 %v2197_v62, %v15097_v57  ;;  %v9195_v8 = vpop.f32.mrb[31].mxu0  ;;  %v3516_v29 = vrot.slane %v13010_v47, 1  ;;  %9941 = vpow2.f32 %v2646_v24  ;;  %9651 = vmatpush3.bf16.msra.mxu0 %v9648_v48 }
 0x317   :  { %v2794_v41 = vsel %vm2429_vm10, %v12947_v23, %v7575_v1  ;;  %v15100_v1 = vld [vmem:[#allocation28_spill] sm:$0xff]  ;;  %v3208_v8 = vpop.permute.xlu0 %3207  ;;  %vm2433_vm14 = vcmp.gt.f32.partialorder %v13013_v33, 0.0 }
 0x318   :  { %v9938_v51 = vpop.eup %9937  ;;  %v13025_v28 = vmul.f32 %v3203_v55, %v2794_v41  ;;  %v2648_v52 = vmul.f32 1.442695, %v2506_v25  ;;  %v2361_v5 = vadd.f32 %v12899_v40, %v2281_v63  ;;  %v13029_v57 = vsel %vm178_vm3, %v3514_v42, %v3516_v29 }
 0x319   :  { %15099 = vst [vmem:[#allocation95_spill] sm:$0xff] %v13029_v57  ;;  %v7576_v62 = vadd.f32 -1.0, %v9938_v51  ;;  %v2202_v35 = vpop.f32.mrb[32].mxu0  ;;  %9298 = vmatmul.mubr.msk.f32.gmra.mrb[208].mxu1 %vm324_vm1, %v13029_v57 }
 0x31a   :  { %15098 = vst [vmem:[#allocation27_spill] sm:$0xff] %v13025_v28  ;;  %9943 = vpow2.f32 %v2648_v52  ;;  %v2507_v23 = vmin.f32 %v2361_v5, 0.0  ;;  %v2282_v48 = vadd.f32 %v2202_v35, %v15100_v1  ;;  %v9198_v24 = vpop.f32.mrb[33].mxu0  ;;  %v3518_v63 = vrot.slane %v13025_v28, 1  ;;  %v15103_v52 = vld [vmem:[#allocation29_spill] sm:$0xff] }
 0x31b   :  { %v2795_v25 = vsel %vm2430_vm11, %v12962_v27, %v7576_v62  ;;  %v3213_v62 = vpop.permute.xlu1 %3212  ;;  %vm2434_vm15 = vcmp.gt.f32.partialorder %v2361_v5, 0.0 }
 0x31c   :  { %v9940_v55 = vpop.eup %9939  ;;  %v13037_v42 = vmul.f32 %v3208_v8, %v2795_v25  ;;  %v2650_v41 = vmul.f32 1.442695, %v2507_v23  ;;  %v2362_v51 = vadd.f32 %v12899_v40, %v2282_v48  ;;  %v13041_v61 = vsel %vm178_vm3, %v3516_v29, %v3518_v63 }
 0x31d   :  { %v7577_v47 = vadd.f32 -1.0, %v9940_v55  ;;  %v2207_v57 = vpop.f32.mrb[34].mxu0  ;;  %15102 = vst [vmem:[#allocation96_spill] sm:$0xff] %v13041_v61  ;;  %9300 = vmatprep.mubr.msk.f32.mxu1 %vm324_vm1, %v13041_v61  ;;  %v5983_v61 = vld [vmem:[%s14813_s5 + $0x18] sm:$0xff] }
 0x31e   :  { %15101 = vst [vmem:[#allocation28_spill] sm:$0xff] %v13037_v42  ;;  %9945 = vpow2.f32 %v2650_v41  ;;  %v2508_v35 = vmin.f32 %v2362_v51, 0.0  ;;  %v2283_v1 = vadd.f32 %v2207_v57, %v15103_v52  ;;  %v9201_v27 = vpop.f32.mrb[35].mxu0  ;;  %v3520_v48 = vrot.slane %v13037_v42, 1  ;;  %v3218_v52 = vpop.permute.xlu0 %3217 }
 0x31f   :  { %v2796_v23 = vsel %vm2431_vm12, %v12977_v11, %v7577_v47  ;;  %vm2435_vm5 = vcmp.gt.f32.partialorder %v2362_v51, 0.0 }
 0x320   :  { %v13049_v24 = vmul.f32 %v3213_v62, %v2796_v23  ;;  %v2652_v8 = vmul.f32 1.442695, %v2508_v35  ;;  %v2363_v29 = vadd.f32 %v12899_v40, %v2283_v1  ;;  %v9942_v25 = vpop.eup %9941  ;;  %v13053_v55 = vsel %vm178_vm3, %v3518_v63, %v3520_v48  ;;  %v3223_v62 = vpop.permute.xlu1 %3222 }
 0x321   :  { %15105 = vst [vmem:[#allocation97_spill] sm:$0xff] %v13053_v55  ;;  %v7578_v41 = vadd.f32 -1.0, %v9942_v25  ;;  %9301 = vmatmul.mubr.msk.f32.gmra.mrb[210].mxu1 %vm324_vm1, %v13053_v55 }
 0x322   :  { %15104 = vst [vmem:[#allocation29_spill] sm:$0xff] %v13049_v24  ;;  %9947 = vpow2.f32 %v2652_v8  ;;  %v2509_v57 = vmin.f32 %v2363_v29, 0.0  ;;  %v3522_v11 = vrot.slane %v13049_v24, 1  ;;  %vm2436_vm6 = vcmp.gt.f32.partialorder %v2363_v29, 0.0 }
 0x323   :  { %v2797_v35 = vsel %vm2432_vm13, %v12992_v15, %v7578_v41 }
 0x324   :  { %v9944_v47 = vpop.eup %9943  ;;  %v2654_v27 = vmul.f32 1.442695, %v2509_v57  ;;  %v13060_v40 = vmul.f32 %v3218_v52, %v2797_v35  ;;  %v13063_v63 = vsel %vm178_vm3, %v3520_v48, %v3522_v11 }
 0x325   :  { %v7579_v1 = vadd.f32 -1.0, %v9944_v47  ;;  %15107 = vst [vmem:[#allocation99_spill] sm:$0xff] %v13063_v63  ;;  %9303 = vmatprep.mubr.msk.f32.mxu1 %vm324_vm1, %v13063_v63  ;;  %v3228_v47 = vpop.permute.xlu0 %3227 }
 0x326   :  { %15106 = vst [vmem:[#allocation98_spill] sm:$0xff] %v13060_v40  ;;  %9949 = vpow2.f32 %v2654_v27  ;;  %v3524_v8 = vrot.slane %v13060_v40, 1 }
 0x327   :  { %v2798_v23 = vsel %vm2433_vm14, %v13013_v33, %v7579_v1 }
 0x328   :  { %v9946_v25 = vpop.eup %9945  ;;  %v13070_v15 = vmul.f32 %v3223_v62, %v2798_v23  ;;  %v13073_v57 = vsel %vm178_vm3, %v3522_v11, %v3524_v8  ;;  %v3233_v62 = vpop.permute.xlu1 %3232 }
 0x329   :  { %v7580_v41 = vadd.f32 -1.0, %v9946_v25  ;;  %15109 = vst [vmem:[#allocation101_spill] sm:$0xff] %v13073_v57  ;;  %9304 = vmatmul.mubr.msk.f32.gmra.mrb[212].mxu1 %vm324_vm1, %v13073_v57  ;;  %v5982_v57 = vld [vmem:[%s14813_s5 + $0x10] sm:$0xff] }
 0x32a   :  { %15108 = vst [vmem:[#allocation100_spill] sm:$0xff] %v13070_v15  ;;  %v3526_v48 = vrot.slane %v13070_v15, 1  ;;  %v9652_v55 = vpack.c.bf16 %v5983_v61, %v5982_v57  ;;  %v15136_v61 = vld [vmem:[#allocation21_spill] sm:$0xff]  ;;  %v15137_v57 = vld [vmem:[#allocation22_spill] sm:$0xff] }
 0x32b   :  { %v2799_v52 = vsel %vm2434_vm15, %v2361_v5, %v7580_v41 }
 0x32c   :  { %v9948_v35 = vpop.eup %9947  ;;  %v13078_v27 = vmul.f32 %v3228_v47, %v2799_v52  ;;  %v13081_v33 = vsel %vm178_vm3, %v3524_v8, %v3526_v48  ;;  %v3238_v47 = vpop.permute.xlu0 %3237  ;;  %9653 = vmatprep.subr.bf16.mxu0 %v9652_v55 }
 0x32d   :  { %15110 = vst [vmem:[#allocation102_spill] sm:$0xff] %v13081_v33  ;;  %v7581_v1 = vadd.f32 -1.0, %v9948_v35  ;;  %9306 = vmatprep.mubr.msk.f32.mxu1 %vm324_vm1, %v13081_v33  ;;  %9655 = vmatpush3.bf16.msra.mxu0 %v9652_v55  ;;  %v15139_v55 = vld [vmem:[#allocation24_spill] sm:$0xff] }
 0x32e   :  { %v3528_v11 = vrot.slane %v13078_v27, 1 }
 0x32f   :  { %v2800_v23 = vsel %vm2435_vm5, %v2362_v51, %v7581_v1  ;;  %v15116_v1 = vld [vmem:[#allocation32_spill] sm:$0xff] }
 0x330   :  { %v9950_v25 = vpop.eup %9949  ;;  %v13086_v63 = vmul.f32 %v3233_v62, %v2800_v23  ;;  %v13089_v5 = vsel %vm178_vm3, %v3526_v48, %v3528_v11  ;;  %v15119_v62 = vld [vmem:[#allocation4_spill] sm:$0xff]  ;;  %v15120_v23 = vld [vmem:[#allocation5_spill] sm:$0xff] }
 0x331   :  { %15111 = vst [vmem:[#allocation103_spill] sm:$0xff] %v13089_v5  ;;  %v7582_v41 = vadd.f32 -1.0, %v9950_v25  ;;  %9307 = vmatmul.mubr.msk.f32.gmra.mrb[214].mxu1 %vm324_vm1, %v13089_v5  ;;  %v15121_v25 = vld [vmem:[#allocation6_spill] sm:$0xff] }
 0x332   :  { %v3530_v8 = vrot.slane %v13086_v63, 1  ;;  %v15129_v5 = vld [vmem:[#allocation14_spill] sm:$0xff] }
 0x333   :  { %v2801_v52 = vsel %vm2436_vm6, %v2363_v29, %v7582_v41  ;;  %v15115_v29 = vld [vmem:[#allocation30_spill] sm:$0xff]  ;;  %v15122_v41 = vld [vmem:[#allocation7_spill] sm:$0xff] }
 0x334   :  { %v13094_v35 = vmul.f32 %v3238_v47, %v2801_v52  ;;  %v13097_v33 = vsel %vm178_vm3, %v3528_v11, %v3530_v8  ;;  %v15118_v11 = vld [vmem:[#allocation3_spill] sm:$0xff]  ;;  %v15124_v47 = vld [vmem:[#allocation9_spill] sm:$0xff]  ;;  %v15125_v52 = vld [vmem:[#allocation10_spill] sm:$0xff] }
 0x335   :  { %15113 = vst [vmem:[#allocation105_spill] sm:$0xff] %v13097_v33  ;;  %9309 = vmatprep.mubr.msk.f32.mxu1 %vm324_vm1, %v13097_v33  ;;  %v15127_v33 = vld [vmem:[#allocation12_spill] sm:$0xff] }
 0x336   :  { %15112 = vst [vmem:[#allocation104_spill] sm:$0xff] %v13094_v35  ;;  %v3532_v51 = vrot.slane %v13094_v35, 1  ;;  %v15130_v35 = vld [vmem:[#allocation15_spill] sm:$0xff] }
 0x338   :  { %v13103_v48 = vsel %vm178_vm3, %v3530_v8, %v3532_v51  ;;  %v15123_v8 = vld [vmem:[#allocation8_spill] sm:$0xff]  ;;  %v15126_v51 = vld [vmem:[#allocation11_spill] sm:$0xff] }
 0x339   :  { %15114 = vst [vmem:[#allocation106_spill] sm:$0xff] %v13103_v48  ;;  %9310 = vmatmul.mubr.msk.f32.gmra.mrb[216].mxu1 %vm324_vm1, %v13103_v48  ;;  %v15128_v48 = vld [vmem:[#allocation13_spill] sm:$0xff] }
 0x33a   :  { %9314 = vmatprep.mubr.msk.f32.mxu1 %vm324_vm1, %v11944_v39 }
 0x33d   :  { %9315 = vmatmul.mubr.msk.f32.vlgmr.msra.gmra.mrb[146].mxu1 %vm324_vm1, %v15115_v29 }
 0x33e   :  { %9423 = vmatpush3.msk.msra.mxu1 %vm471_vm0, %v12663_v3  ;;  %9317 = vmatprep.mubr.msk.f32.mxu1 %vm324_vm1, %v11977_v12  ;;  %v15117_v3 = vld [vmem:[#allocation2_spill] sm:$0xff]  ;;  %vm5991_vm0 = vcmask 261120  }
 0x341   :  { %9318 = vmatmul.mubr.msk.f32.gmra.mrb[148].mxu1 %vm324_vm1, %v15116_v1 }
 0x342   :  { %9320 = vmatprep.mubr.msk.f32.mxu1 %vm324_vm1, %v12018_v59 }
 0x345   :  { %9321 = vmatmul.mubr.msk.f32.gmra.mrb[150].mxu1 %vm324_vm1, %v12040_v22 }
 0x346   :  { %9323 = vmatprep.mubr.msk.f32.mxu1 %vm324_vm1, %v12065_v53 }
 0x349   :  { %9324 = vmatmul.mubr.msk.f32.gmra.mrb[152].mxu1 %vm324_vm1, %v12084_v49 }
 0x34a   :  { %9326 = vmatprep.mubr.msk.f32.mxu1 %vm324_vm1, %v12106_v50 }
 0x34d   :  { %9327 = vmatmul.mubr.msk.f32.gmra.mrb[154].mxu1 %vm324_vm1, %v12131_v9 }
 0x34e   :  { %9329 = vmatprep.mubr.msk.f32.mxu1 %vm324_vm1, %v12149_v26 }
 0x351   :  { %9330 = vmatmul.mubr.msk.f32.gmra.mrb[156].mxu1 %vm324_vm1, %v12178_v38 }
 0x352   :  { %9332 = vmatprep.mubr.msk.f32.mxu1 %vm324_vm1, %v12200_v32 }
 0x355   :  { %9333 = vmatmul.mubr.msk.f32.gmra.mrb[158].mxu1 %vm324_vm1, %v12219_v10 }
 0x356   :  { %9335 = vmatprep.mubr.msk.f32.mxu1 %vm324_vm1, %v12243_v17 }
 0x359   :  { %9336 = vmatmul.mubr.msk.f32.gmra.mrb[160].mxu1 %vm324_vm1, %v12252_v14 }
 0x35a   :  { %9338 = vmatprep.mubr.msk.f32.mxu1 %vm324_vm1, %v12270_v44 }
 0x35d   :  { %9339 = vmatmul.mubr.msk.f32.gmra.mrb[162].mxu1 %vm324_vm1, %v12279_v60 }
 0x35e   :  { %9341 = vmatprep.mubr.msk.f32.mxu1 %vm324_vm1, %v12303_v43 }
 0x361   :  { %9342 = vmatmul.mubr.msk.f32.gmra.mrb[164].mxu1 %vm324_vm1, %v12312_v2 }
 0x362   :  { %9344 = vmatprep.mubr.msk.f32.mxu1 %vm324_vm1, %v12330_v37 }
 0x365   :  { %9345 = vmatmul.mubr.msk.f32.gmra.mrb[166].mxu1 %vm324_vm1, %v12342_v34 }
 0x366   :  { %9347 = vmatprep.mubr.msk.f32.mxu1 %vm324_vm1, %v12357_v46 }
 0x369   :  { %9348 = vmatmul.mubr.msk.f32.gmra.mrb[168].mxu1 %vm324_vm1, %v12372_v45 }
 0x36a   :  { %9350 = vmatprep.mubr.msk.f32.mxu1 %vm324_vm1, %v12390_v0 }
 0x36d   :  { %9351 = vmatmul.mubr.msk.f32.gmra.mrb[170].mxu1 %vm324_vm1, %v12402_v18 }
 0x36e   :  { %9353 = vmatprep.mubr.msk.f32.mxu1 %vm324_vm1, %v12422_v21 }
 0x371   :  { %9354 = vmatmul.mubr.msk.f32.gmra.mrb[172].mxu1 %vm324_vm1, %v12437_v30 }
 0x372   :  { %9356 = vmatprep.mubr.msk.f32.mxu1 %vm324_vm1, %v12452_v4 }
 0x375   :  { %9357 = vmatmul.mubr.msk.f32.gmra.mrb[174].mxu1 %vm324_vm1, %v12467_v54 }
 0x376   :  { %9359 = vmatprep.mubr.msk.f32.mxu1 %vm324_vm1, %v12482_v56 }
 0x379   :  { %9360 = vmatmul.mubr.msk.f32.gmra.mrb[176].mxu1 %vm324_vm1, %v12497_v31 }
 0x37a   :  { %9362 = vmatprep.mubr.msk.f32.mxu1 %vm324_vm1, %v12512_v16 }
 0x37d   :  { %9363 = vmatmul.mubr.msk.f32.gmra.mrb[178].mxu1 %vm324_vm1, %v12527_v36 }
 0x37e   :  { %9365 = vmatprep.mubr.msk.f32.mxu1 %vm324_vm1, %v12542_v13 }
 0x381   :  { %9366 = vmatmul.mubr.msk.f32.gmra.mrb[180].mxu1 %vm324_vm1, %v12557_v19 }
 0x382   :  { %9368 = vmatprep.mubr.msk.f32.mxu1 %vm324_vm1, %v12572_v20 }
 0x385   :  { %9369 = vmatmul.mubr.msk.f32.gmra.mrb[182].mxu1 %vm324_vm1, %v12587_v7 }
 0x386   :  { %9371 = vmatprep.mubr.msk.f32.mxu1 %vm324_vm1, %v12602_v58 }
 0x389   :  { %9372 = vmatmul.mubr.msk.f32.gmra.mrb[184].mxu1 %vm324_vm1, %v12617_v6 }
 0x38a   :  { %9374 = vmatprep.mubr.msk.f32.mxu1 %vm324_vm1, %v15117_v3 }
 0x38d   :  { %9375 = vmatmul.mubr.msk.f32.gmra.mrb[186].mxu1 %vm324_vm1, %v15118_v11 }
 0x38e   :  { %9377 = vmatprep.mubr.msk.f32.mxu1 %vm324_vm1, %v15119_v62 }
 0x391   :  { %9378 = vmatmul.mubr.msk.f32.gmra.mrb[188].mxu1 %vm324_vm1, %v15120_v23 }
 0x392   :  { %9380 = vmatprep.mubr.msk.f32.mxu1 %vm324_vm1, %v15121_v25 }
 0x395   :  { %9381 = vmatmul.mubr.msk.f32.gmra.mrb[190].mxu1 %vm324_vm1, %v15122_v41 }
 0x396   :  { %9383 = vmatprep.mubr.msk.f32.mxu1 %vm324_vm1, %v15123_v8 }
 0x399   :  { %9384 = vmatmul.mubr.msk.f32.gmra.mrb[192].mxu1 %vm324_vm1, %v15124_v47 }
 0x39a   :  { %9386 = vmatprep.mubr.msk.f32.mxu1 %vm324_vm1, %v15125_v52  ;;  %v15135_v52 = vld [vmem:[#allocation20_spill] sm:$0xff] }
 0x39d   :  { %9387 = vmatmul.mubr.msk.f32.gmra.mrb[194].mxu1 %vm324_vm1, %v15126_v51  ;;  %v15134_v51 = vld [vmem:[#allocation19_spill] sm:$0xff] }
 0x39e   :  { %9389 = vmatprep.mubr.msk.f32.mxu1 %vm324_vm1, %v15127_v33  ;;  %v15131_v33 = vld [vmem:[#allocation16_spill] sm:$0xff] }
 0x3a1   :  { %9390 = vmatmul.mubr.msk.f32.gmra.mrb[196].mxu1 %vm324_vm1, %v15128_v48  ;;  %v15132_v48 = vld [vmem:[#allocation17_spill] sm:$0xff] }
 0x3a2   :  { %9392 = vmatprep.mubr.msk.f32.mxu1 %vm324_vm1, %v15129_v5  ;;  %v15133_v5 = vld [vmem:[#allocation18_spill] sm:$0xff] }
 0x3a5   :  { %9393 = vmatmul.mubr.msk.f32.gmra.mrb[198].mxu1 %vm324_vm1, %v15130_v35 }
 0x3a6   :  { %9395 = vmatprep.mubr.msk.f32.mxu1 %vm324_vm1, %v15131_v33  ;;  %v15138_v33 = vld [vmem:[#allocation23_spill] sm:$0xff] }
 0x3a9   :  { %9396 = vmatmul.mubr.msk.f32.gmra.mrb[200].mxu1 %vm324_vm1, %v15132_v48  ;;  %v15140_v48 = vld [vmem:[#allocation25_spill] sm:$0xff] }
 0x3aa   :  { %9398 = vmatprep.mubr.msk.f32.mxu1 %vm324_vm1, %v15133_v5  ;;  %v15141_v5 = vld [vmem:[#allocation26_spill] sm:$0xff] }
 0x3ad   :  { %9399 = vmatmul.mubr.msk.f32.gmra.mrb[202].mxu1 %vm324_vm1, %v15134_v51 }
 0x3ae   :  { %9401 = vmatprep.mubr.msk.f32.mxu1 %vm324_vm1, %v15135_v52 }
 0x3b1   :  { %9402 = vmatmul.mubr.msk.f32.gmra.mrb[204].mxu1 %vm324_vm1, %v15136_v61 }
 0x3b2   :  { %9404 = vmatprep.mubr.msk.f32.mxu1 %vm324_vm1, %v15137_v57 }
 0x3b5   :  { %9405 = vmatmul.mubr.msk.f32.gmra.mrb[206].mxu1 %vm324_vm1, %v15138_v33 }
 0x3b6   :  { %9407 = vmatprep.mubr.msk.f32.mxu1 %vm324_vm1, %v15139_v55  ;;  %v4681_v55 = vrot.slane %v15115_v29, 2  ;;  %v4687_v29 = vrot.slane %v12018_v59, 2 }
 0x3b9   :  { %9408 = vmatmul.mubr.msk.f32.gmra.mrb[208].mxu1 %vm324_vm1, %v15140_v48 }
 0x3ba   :  { %9410 = vmatprep.mubr.msk.f32.mxu1 %vm324_vm1, %v15141_v5  ;;  %v4680_v5 = vrot.slane %v11944_v39, 2 }
 0x3bd   :  { %9411 = vmatmul.mubr.msk.f32.gmra.mrb[210].mxu1 %vm324_vm1, %v13025_v28  ;;  %v4683_v28 = vrot.slane %v11977_v12, 2  ;;  %v4691_v12 = vrot.slane %v12065_v53, 2 }
 0x3be   :  { %9413 = vmatprep.mubr.msk.f32.mxu1 %vm324_vm1, %v13037_v42  ;;  %v4685_v42 = vrot.slane %v15116_v1, 2 }
 0x3c0   :  { %v4686_v39 = vsel %vm1486_vm4, %v4683_v28, %v4685_v42  ;;  %v4688_v1 = vsel %vm1486_vm4, %v4685_v42, %v4687_v29 }
 0x3c1   :  { %9414 = vmatmul.mubr.msk.f32.gmra.mrb[212].mxu1 %vm324_vm1, %v13049_v24  ;;  %v4682_v24 = vsel %vm1486_vm4, %v4680_v5, %v4681_v55  ;;  %v4693_v5 = vrot.slane %v12084_v49, 2  ;;  %v4699_v49 = vrot.slane %v12149_v26, 2 }
 0x3c2   :  { %9416 = vmatprep.mubr.msk.f32.mxu1 %vm324_vm1, %v13060_v40  ;;  %v4689_v40 = vrot.slane %v12040_v22, 2  ;;  %v4695_v22 = vrot.slane %v12106_v50, 2 }
 0x3c3   :  { %v4694_v53 = vsel %vm1486_vm4, %v4691_v12, %v4693_v5 }
 0x3c4   :  { %v4690_v59 = vsel %vm1486_vm4, %v4687_v29, %v4689_v40  ;;  %v4696_v42 = vsel %vm1486_vm4, %v4693_v5, %v4695_v22  ;;  %v4707_v29 = vrot.slane %v12243_v17, 2  ;;  %v4713_v5 = vrot.slane %v12279_v60, 2 }
 0x3c5   :  { %9417 = vmatmul.mubr.msk.f32.gmra.mrb[214].mxu1 %vm324_vm1, %v13070_v15  ;;  %v4684_v15 = vsel %vm1486_vm4, %v4681_v55, %v4683_v28  ;;  %v4697_v28 = vrot.slane %v12131_v9, 2  ;;  %v4705_v55 = vrot.slane %v12219_v10, 2  ;;  %v4711_v10 = vrot.slane %v12270_v44, 2 }
 0x3c6   :  { %9419 = vmatprep.mubr.msk.f32.mxu1 %vm324_vm1, %v13078_v27 }
 0x3c7   :  { %v4698_v50 = vsel %vm1486_vm4, %v4695_v22, %v4697_v28  ;;  %v4700_v9 = vsel %vm1486_vm4, %v4697_v28, %v4699_v49  ;;  %v4717_v22 = vrot.slane %v12312_v2, 2  ;;  %v4721_v28 = vrot.slane %v12342_v34, 2 }
 0x3c9   :  { %9420 = vmatmul.mubr.msk.f32.gmra.mrb[216].mxu1 %vm324_vm1, %v13086_v63 }
 0x3ca   :  { %9424 = vmatprep.mubr.msk.f32.mxu1 %vm324_vm1, %v4682_v24  ;;  %v4692_v24 = vsel %vm1486_vm4, %v4689_v40, %v4691_v12  ;;  %v4703_v40 = vrot.slane %v12200_v32, 2  ;;  %v4709_v12 = vrot.slane %v12252_v14, 2  ;;  %v4708_v32 = vsel %vm1486_vm4, %v4705_v55, %v4707_v29 }
 0x3cb   :  { %v4714_v14 = vsel %vm1486_vm4, %v4711_v10, %v4713_v5 }
 0x3cc   :  { %v4712_v17 = vsel %vm1486_vm4, %v4709_v12, %v4711_v10  ;;  %v4751_v10 = vrot.slane %v12572_v20, 2 }
 0x3cd   :  { %9425 = vmatmul.mubr.msk.f32.vlgmr.msra.gmra.mrb[146].mxu1 %vm324_vm1, %v4684_v15  ;;  %v4701_v15 = vrot.slane %v12178_v38, 2 }
 0x3ce   :  { %9427 = vmatprep.mubr.msk.f32.mxu1 %vm324_vm1, %v4686_v39  ;;  %v4706_v39 = vsel %vm1486_vm4, %v4703_v40, %v4705_v55  ;;  %v4737_v55 = vrot.slane %v12467_v54, 2 }
 0x3cf   :  { %v4702_v26 = vsel %vm1486_vm4, %v4699_v49, %v4701_v15  ;;  %v4704_v38 = vsel %vm1486_vm4, %v4701_v15, %v4703_v40  ;;  %v4725_v49 = vrot.slane %v12372_v45, 2  ;;  %v4729_v15 = vrot.slane %v12402_v18, 2 }
 0x3d0   :  { %v4735_v40 = vrot.slane %v12452_v4, 2 }
 0x3d1   :  { %9428 = vmatmul.mubr.msk.f32.gmra.mrb[148].mxu1 %vm324_vm1, %v4688_v1  ;;  %v4710_v1 = vsel %vm1486_vm4, %v4707_v29, %v4709_v12  ;;  %v4743_v29 = vrot.slane %v12512_v16, 2  ;;  %v4747_v12 = vrot.slane %v12542_v13, 2 }
 0x3d2   :  { %9430 = vmatprep.mubr.msk.f32.mxu1 %vm324_vm1, %v4690_v59  ;;  %v4715_v59 = vrot.slane %v12303_v43, 2 }
 0x3d4   :  { %v4716_v44 = vsel %vm1486_vm4, %v4713_v5, %v4715_v59  ;;  %v4718_v60 = vsel %vm1486_vm4, %v4715_v59, %v4717_v22  ;;  %v4755_v5 = vrot.slane %v12602_v58, 2  ;;  %v4759_v59 = vrot.slane %v15117_v3, 2 }
 0x3d5   :  { %9431 = vmatmul.mubr.msk.f32.gmra.mrb[150].mxu1 %vm324_vm1, %v4692_v24  ;;  %v4719_v24 = vrot.slane %v12330_v37, 2 }
 0x3d6   :  { %9433 = vmatprep.mubr.msk.f32.mxu1 %vm324_vm1, %v4694_v53  ;;  %v4723_v53 = vrot.slane %v12357_v46, 2 }
 0x3d7   :  { %v4720_v43 = vsel %vm1486_vm4, %v4717_v22, %v4719_v24  ;;  %v4722_v2 = vsel %vm1486_vm4, %v4719_v24, %v4721_v28  ;;  %v4763_v22 = vrot.slane %v15119_v62, 2  ;;  %v4767_v24 = vrot.slane %v15121_v25, 2 }
 0x3d8   :  { %v4724_v37 = vsel %vm1486_vm4, %v4721_v28, %v4723_v53  ;;  %v4726_v34 = vsel %vm1486_vm4, %v4723_v53, %v4725_v49  ;;  %v4771_v28 = vrot.slane %v15123_v8, 2  ;;  %v15142_v53 = vld [vmem:[#allocation10_spill] sm:$0xff] }
 0x3d9   :  { %9434 = vmatmul.mubr.msk.f32.gmra.mrb[152].mxu1 %vm324_vm1, %v4696_v42  ;;  %v4727_v42 = vrot.slane %v12390_v0, 2 }
 0x3da   :  { %9436 = vmatprep.mubr.msk.f32.mxu1 %vm324_vm1, %v4698_v50  ;;  %v4731_v50 = vrot.slane %v12422_v21, 2 }
 0x3db   :  { %v4728_v46 = vsel %vm1486_vm4, %v4725_v49, %v4727_v42  ;;  %v4730_v45 = vsel %vm1486_vm4, %v4727_v42, %v4729_v15  ;;  %v15143_v49 = vld [vmem:[#allocation11_spill] sm:$0xff]  ;;  %v15144_v42 = vld [vmem:[#allocation12_spill] sm:$0xff] }
 0x3dc   :  { %v4732_v0 = vsel %vm1486_vm4, %v4729_v15, %v4731_v50  ;;  %v15145_v15 = vld [vmem:[#allocation13_spill] sm:$0xff] }
 0x3dd   :  { %9437 = vmatmul.mubr.msk.f32.gmra.mrb[154].mxu1 %vm324_vm1, %v4700_v9  ;;  %v4733_v9 = vrot.slane %v12437_v30, 2  ;;  %v4738_v30 = vsel %vm1486_vm4, %v4735_v40, %v4737_v55 }
 0x3de   :  { %9439 = vmatprep.mubr.msk.f32.mxu1 %vm324_vm1, %v4702_v26  ;;  %v4739_v26 = vrot.slane %v12482_v56, 2 }
 0x3df   :  { %v4734_v18 = vsel %vm1486_vm4, %v4731_v50, %v4733_v9  ;;  %v4736_v21 = vsel %vm1486_vm4, %v4733_v9, %v4735_v40  ;;  %v4785_v40 = vrot.slane %v15130_v35, 2 }
 0x3e0   :  { %v4740_v4 = vsel %vm1486_vm4, %v4737_v55, %v4739_v26  ;;  %v15147_v55 = vld [vmem:[#allocation16_spill] sm:$0xff] }
 0x3e1   :  { %9440 = vmatmul.mubr.msk.f32.gmra.mrb[156].mxu1 %vm324_vm1, %v4704_v38  ;;  %v4741_v38 = vrot.slane %v12497_v31, 2 }
 0x3e2   :  { %9442 = vmatprep.mubr.msk.f32.mxu1 %vm324_vm1, %v4706_v39  ;;  %v4745_v39 = vrot.slane %v12527_v36, 2 }
 0x3e3   :  { %v4742_v54 = vsel %vm1486_vm4, %v4739_v26, %v4741_v38  ;;  %v4744_v56 = vsel %vm1486_vm4, %v4741_v38, %v4743_v29 }
 0x3e4   :  { %v4746_v31 = vsel %vm1486_vm4, %v4743_v29, %v4745_v39  ;;  %v4748_v16 = vsel %vm1486_vm4, %v4745_v39, %v4747_v12  ;;  %v15149_v29 = vld [vmem:[#allocation18_spill] sm:$0xff]  ;;  %v4793_v39 = vrot.slane %v15134_v51, 2 }
 0x3e5   :  { %9443 = vmatmul.mubr.msk.f32.gmra.mrb[158].mxu1 %vm324_vm1, %v4708_v32  ;;  %v4749_v32 = vrot.slane %v12557_v19, 2 }
 0x3e6   :  { %9445 = vmatprep.mubr.msk.f32.mxu1 %vm324_vm1, %v4710_v1  ;;  %v4753_v1 = vrot.slane %v12587_v7, 2 }
 0x3e7   :  { %v4750_v36 = vsel %vm1486_vm4, %v4747_v12, %v4749_v32  ;;  %v4752_v13 = vsel %vm1486_vm4, %v4749_v32, %v4751_v10  ;;  %v4795_v12 = vrot.slane %v15135_v52, 2  ;;  %v4797_v32 = vrot.slane %v15136_v61, 2 }
 0x3e8   :  { %v4754_v19 = vsel %vm1486_vm4, %v4751_v10, %v4753_v1  ;;  %v4756_v20 = vsel %vm1486_vm4, %v4753_v1, %v4755_v5  ;;  %v4799_v10 = vrot.slane %v15137_v57, 2  ;;  %v15150_v1 = vld [vmem:[#allocation24_spill] sm:$0xff] }
 0x3e9   :  { %9446 = vmatmul.mubr.msk.f32.gmra.mrb[160].mxu1 %vm324_vm1, %v4712_v17  ;;  %v4757_v17 = vrot.slane %v12617_v6, 2  ;;  %v4798_v51 = vsel %vm1486_vm4, %v4795_v12, %v4797_v32 }
 0x3ea   :  { %9448 = vmatprep.mubr.msk.f32.mxu1 %vm324_vm1, %v4714_v14  ;;  %v4761_v14 = vrot.slane %v15118_v11, 2  ;;  %v4800_v52 = vsel %vm1486_vm4, %v4797_v32, %v4799_v10 }
 0x3eb   :  { %v4758_v7 = vsel %vm1486_vm4, %v4755_v5, %v4757_v17  ;;  %v4760_v58 = vsel %vm1486_vm4, %v4757_v17, %v4759_v59  ;;  %v4805_v5 = vrot.slane %v15140_v48, 2 }
 0x3ec   :  { %v4762_v6 = vsel %vm1486_vm4, %v4759_v59, %v4761_v14  ;;  %v4764_v3 = vsel %vm1486_vm4, %v4761_v14, %v4763_v22  ;;  %v15153_v14 = vld [vmem:[#allocation28_spill] sm:$0xff] }
 0x3ed   :  { %9449 = vmatmul.mubr.msk.f32.gmra.mrb[162].mxu1 %vm324_vm1, %v4716_v44  ;;  %v4765_v44 = vrot.slane %v15120_v23, 2 }
 0x3ee   :  { %9451 = vmatprep.mubr.msk.f32.mxu1 %vm324_vm1, %v4718_v60  ;;  %v4769_v60 = vrot.slane %v15122_v41, 2 }
 0x3ef   :  { %v4766_v11 = vsel %vm1486_vm4, %v4763_v22, %v4765_v44  ;;  %v4768_v62 = vsel %vm1486_vm4, %v4765_v44, %v4767_v24  ;;  %v15154_v22 = vld [vmem:[#allocation29_spill] sm:$0xff] }
 0x3f0   :  { %v4770_v23 = vsel %vm1486_vm4, %v4767_v24, %v4769_v60  ;;  %v4772_v25 = vsel %vm1486_vm4, %v4769_v60, %v4771_v28  ;;  %v15156_v60 = vld [vmem:[#allocation100_spill] sm:$0xff] }
 0x3f1   :  { %9452 = vmatmul.mubr.msk.f32.gmra.mrb[164].mxu1 %vm324_vm1, %v4720_v43  ;;  %v4773_v43 = vrot.slane %v15124_v47, 2 }
 0x3f2   :  { %9454 = vmatprep.mubr.msk.f32.mxu1 %vm324_vm1, %v4722_v2  ;;  %v4775_v2 = vrot.slane %v15142_v53, 2 }
 0x3f3   :  { %v4774_v41 = vsel %vm1486_vm4, %v4771_v28, %v4773_v43 }
 0x3f4   :  { %v4776_v8 = vsel %vm1486_vm4, %v4773_v43, %v4775_v2 }
 0x3f5   :  { %9455 = vmatmul.mubr.msk.f32.gmra.mrb[166].mxu1 %vm324_vm1, %v4724_v37  ;;  %v4777_v37 = vrot.slane %v15143_v49, 2 }
 0x3f6   :  { %9457 = vmatprep.mubr.msk.f32.mxu1 %vm324_vm1, %v4726_v34  ;;  %v4779_v34 = vrot.slane %v15144_v42, 2 }
 0x3f7   :  { %v4778_v47 = vsel %vm1486_vm4, %v4775_v2, %v4777_v37  ;;  %v15157_v2 = vld [vmem:[#allocation104_spill] sm:$0xff] }
 0x3f8   :  { %v4780_v50 = vsel %vm1486_vm4, %v4777_v37, %v4779_v34 }
 0x3f9   :  { %9458 = vmatmul.mubr.msk.f32.gmra.mrb[168].mxu1 %vm324_vm1, %v4728_v46  ;;  %v4781_v46 = vrot.slane %v15145_v15, 2 }
 0x3fa   :  { %9460 = vmatprep.mubr.msk.f32.mxu1 %vm324_vm1, %v4730_v45  ;;  %v15146_v45 = vld [vmem:[#allocation14_spill] sm:$0xff] }
 0x3fb   :  { %v4783_v9 = vrot.slane %v15146_v45, 2 }
 0x3fd   :  { %9461 = vmatmul.mubr.msk.f32.gmra.mrb[170].mxu1 %vm324_vm1, %v4732_v0  ;;  %v4782_v0 = vsel %vm1486_vm4, %v4779_v34, %v4781_v46  ;;  %v4786_v26 = vsel %vm1486_vm4, %v4783_v9, %v4785_v40 }
 0x3fe   :  { %9463 = vmatprep.mubr.msk.f32.mxu1 %vm324_vm1, %v4734_v18  ;;  %v4784_v18 = vsel %vm1486_vm4, %v4781_v46, %v4783_v9 }
 0x401   :  { %9464 = vmatmul.mubr.msk.f32.gmra.mrb[172].mxu1 %vm324_vm1, %v4736_v21  ;;  %v4787_v21 = vrot.slane %v15147_v55, 2 }
 0x402   :  { %9466 = vmatprep.mubr.msk.f32.mxu1 %vm324_vm1, %v4738_v30  ;;  %v15148_v30 = vld [vmem:[#allocation17_spill] sm:$0xff] }
 0x403   :  { %v4789_v38 = vrot.slane %v15148_v30, 2 }
 0x405   :  { %9467 = vmatmul.mubr.msk.f32.gmra.mrb[174].mxu1 %vm324_vm1, %v4740_v4  ;;  %v4788_v4 = vsel %vm1486_vm4, %v4785_v40, %v4787_v21  ;;  %v4790_v35 = vsel %vm1486_vm4, %v4787_v21, %v4789_v38 }
 0x406   :  { %9469 = vmatprep.mubr.msk.f32.mxu1 %vm324_vm1, %v4742_v54  ;;  %v4791_v54 = vrot.slane %v15149_v29, 2 }
 0x409   :  { %9470 = vmatmul.mubr.msk.f32.gmra.mrb[176].mxu1 %vm324_vm1, %v4744_v56  ;;  %v4792_v56 = vsel %vm1486_vm4, %v4789_v38, %v4791_v54 }
 0x40a   :  { %9472 = vmatprep.mubr.msk.f32.mxu1 %vm324_vm1, %v4746_v31  ;;  %v4794_v31 = vsel %vm1486_vm4, %v4791_v54, %v4793_v39 }
 0x40d   :  { %9473 = vmatmul.mubr.msk.f32.gmra.mrb[178].mxu1 %vm324_vm1, %v4748_v16  ;;  %v4796_v16 = vsel %vm1486_vm4, %v4793_v39, %v4795_v12 }
 0x40e   :  { %9475 = vmatprep.mubr.msk.f32.mxu1 %vm324_vm1, %v4750_v36  ;;  %v4801_v36 = vrot.slane %v15138_v33, 2 }
 0x410   :  { %v4802_v61 = vsel %vm1486_vm4, %v4799_v10, %v4801_v36 }
 0x411   :  { %9476 = vmatmul.mubr.msk.f32.gmra.mrb[180].mxu1 %vm324_vm1, %v4752_v13  ;;  %v4803_v13 = vrot.slane %v15150_v1, 2 }
 0x412   :  { %9478 = vmatprep.mubr.msk.f32.mxu1 %vm324_vm1, %v4754_v19  ;;  %v15151_v19 = vld [vmem:[#allocation26_spill] sm:$0xff] }
 0x413   :  { %v4804_v57 = vsel %vm1486_vm4, %v4801_v36, %v4803_v13  ;;  %v4807_v17 = vrot.slane %v15151_v19, 2  ;;  %v4806_v33 = vsel %vm1486_vm4, %v4803_v13, %v4805_v5 }
 0x415   :  { %9479 = vmatmul.mubr.msk.f32.gmra.mrb[182].mxu1 %vm324_vm1, %v4756_v20  ;;  %v15152_v20 = vld [vmem:[#allocation27_spill] sm:$0xff] }
 0x416   :  { %9481 = vmatprep.mubr.msk.f32.mxu1 %vm324_vm1, %v4758_v7  ;;  %v4809_v59 = vrot.slane %v15152_v20, 2  ;;  %v4808_v7 = vsel %vm1486_vm4, %v4805_v5, %v4807_v17 }
 0x418   :  { %v4810_v48 = vsel %vm1486_vm4, %v4807_v17, %v4809_v59 }
 0x419   :  { %9482 = vmatmul.mubr.msk.f32.gmra.mrb[184].mxu1 %vm324_vm1, %v4760_v58  ;;  %v4811_v58 = vrot.slane %v15153_v14, 2 }
 0x41a   :  { %9484 = vmatprep.mubr.msk.f32.mxu1 %vm324_vm1, %v4762_v6  ;;  %v4813_v6 = vrot.slane %v15154_v22, 2 }
 0x41b   :  { %v4812_v44 = vsel %vm1486_vm4, %v4809_v59, %v4811_v58 }
 0x41d   :  { %9485 = vmatmul.mubr.msk.f32.gmra.mrb[186].mxu1 %vm324_vm1, %v4764_v3  ;;  %v15155_v3 = vld [vmem:[#allocation98_spill] sm:$0xff] }
 0x41e   :  { %9487 = vmatprep.mubr.msk.f32.mxu1 %vm324_vm1, %v4766_v11  ;;  %v4815_v24 = vrot.slane %v15155_v3, 2  ;;  %v4814_v11 = vsel %vm1486_vm4, %v4811_v58, %v4813_v6 }
 0x420   :  { %v4816_v28 = vsel %vm1486_vm4, %v4813_v6, %v4815_v24 }
 0x421   :  { %9488 = vmatmul.mubr.msk.f32.gmra.mrb[188].mxu1 %vm324_vm1, %v4768_v62  ;;  %v4817_v62 = vrot.slane %v15156_v60, 2 }
 0x422   :  { %9490 = vmatprep.mubr.msk.f32.mxu1 %vm324_vm1, %v4770_v23  ;;  %v4819_v23 = vrot.slane %v13078_v27, 2 }
 0x423   :  { %v4818_v43 = vsel %vm1486_vm4, %v4815_v24, %v4817_v62 }
 0x424   :  { %v4820_v53 = vsel %vm1486_vm4, %v4817_v62, %v4819_v23 }
 0x425   :  { %9491 = vmatmul.mubr.msk.f32.gmra.mrb[190].mxu1 %vm324_vm1, %v4772_v25  ;;  %v4821_v25 = vrot.slane %v13086_v63, 2  ;;  %v13479_v63 = vld [vmem:[%s14814_s4] ss:$0 sm:$0xff] }
 0x426   :  { %9493 = vmatprep.mubr.msk.f32.mxu1 %vm324_vm1, %v4774_v41  ;;  %v4823_v41 = vrot.slane %v15157_v2, 2 }
 0x427   :  { %v4822_v49 = vsel %vm1486_vm4, %v4819_v23, %v4821_v25 }
 0x428   :  { %v4824_v27 = vsel %vm1486_vm4, %v4821_v25, %v4823_v41 }
 0x429   :  { %9494 = vmatmul.mubr.msk.f32.gmra.mrb[192].mxu1 %vm324_vm1, %v4776_v8 }
 0x42a   :  { %9496 = vmatprep.mubr.msk.f32.mxu1 %vm324_vm1, %v4778_v47 }
 0x42d   :  { %9497 = vmatmul.mubr.msk.f32.gmra.mrb[194].mxu1 %vm324_vm1, %v4780_v50 }
 0x42e   :  { %9499 = vmatprep.mubr.msk.f32.mxu1 %vm324_vm1, %v4782_v0 }
 0x431   :  { %9500 = vmatmul.mubr.msk.f32.gmra.mrb[196].mxu1 %vm324_vm1, %v4784_v18 }
 0x432   :  { %9502 = vmatprep.mubr.msk.f32.mxu1 %vm324_vm1, %v4786_v26 }
 0x435   :  { %9503 = vmatmul.mubr.msk.f32.gmra.mrb[198].mxu1 %vm324_vm1, %v4788_v4 }
 0x436   :  { %9505 = vmatprep.mubr.msk.f32.mxu1 %vm324_vm1, %v4790_v35 }
 0x439   :  { %9506 = vmatmul.mubr.msk.f32.gmra.mrb[200].mxu1 %vm324_vm1, %v4792_v56 }
 0x43a   :  { %9508 = vmatprep.mubr.msk.f32.mxu1 %vm324_vm1, %v4794_v31 }
 0x43d   :  { %9509 = vmatmul.mubr.msk.f32.gmra.mrb[202].mxu1 %vm324_vm1, %v4796_v16 }
 0x43e   :  { %9511 = vmatprep.mubr.msk.f32.mxu1 %vm324_vm1, %v4798_v51 }
 0x441   :  { %9512 = vmatmul.mubr.msk.f32.gmra.mrb[204].mxu1 %vm324_vm1, %v4800_v52 }
 0x442   :  { %9514 = vmatprep.mubr.msk.f32.mxu1 %vm324_vm1, %v4802_v61 }
 0x445   :  { %9515 = vmatmul.mubr.msk.f32.gmra.mrb[206].mxu1 %vm324_vm1, %v4804_v57 }
 0x446   :  { %9517 = vmatprep.mubr.msk.f32.mxu1 %vm324_vm1, %v4806_v33 }
 0x449   :  { %9518 = vmatmul.mubr.msk.f32.gmra.mrb[208].mxu1 %vm324_vm1, %v4808_v7 }
 0x44a   :  { %9520 = vmatprep.mubr.msk.f32.mxu1 %vm324_vm1, %v4810_v48 }
 0x44d   :  { %9521 = vmatmul.mubr.msk.f32.gmra.mrb[210].mxu1 %vm324_vm1, %v4812_v44 }
 0x44e   :  { %9523 = vmatprep.mubr.msk.f32.mxu1 %vm324_vm1, %v4814_v11 }
 0x451   :  { %9524 = vmatmul.mubr.msk.f32.gmra.mrb[212].mxu1 %vm324_vm1, %v4816_v28 }
 0x452   :  { %9526 = vmatprep.mubr.msk.f32.mxu1 %vm324_vm1, %v4818_v43 }
 0x455   :  { %9527 = vmatmul.mubr.msk.f32.gmra.mrb[214].mxu1 %vm324_vm1, %v4820_v53 }
 0x456   :  { %9529 = vmatprep.mubr.msk.f32.mxu1 %vm324_vm1, %v4822_v49 }
 0x459   :  { %9530 = vmatmul.mubr.msk.f32.gmra.mrb[216].mxu1 %vm324_vm1, %v4824_v27 }
 0x4a0   :  { %v9426_v37 = vpop.f32.mrb[146].mxu1 }
 0x4a1   :  { %v5477_v8 = vadd.f32 %v9426_v37, %v13479_v63  ;;  %v5038_v42 = vpop.f32.mrb[147].mxu1 }
 0x4a2   :  { %v5476_v34 = vadd.f32 %v13479_v63, %v5038_v42 }
 0x4a3   :  { %v5621_v47 = vmin.f32 %v5477_v8, 0.0  ;;  %vm5549_vm4 = vcmp.gt.f32.partialorder %v5477_v8, 0.0 }
 0x4a4   :  { %v5620_v15 = vmin.f32 %v5476_v34, 0.0  ;;  %v9429_v46 = vpop.f32.mrb[148].mxu1  ;;  %vm5548_vm3 = vcmp.gt.f32.partialorder %v5476_v34, 0.0 }
 0x4a5   :  { %v5694_v50 = vmul.f32 1.442695, %v5621_v47  ;;  %v13484_v45 = vadd.f32 %v9429_v46, %v13479_v63  ;;  %v5048_v9 = vpop.f32.mrb[149].mxu1 }
 0x4a6   :  { %v5692_v0 = vmul.f32 1.442695, %v5620_v15  ;;  %v13487_v40 = vadd.f32 %v13479_v63, %v5048_v9 }
 0x4a7   :  { %9951 = vpow2.f32 %v5694_v50  ;;  %v5623_v18 = vmin.f32 %v13484_v45, 0.0  ;;  %vm5551_vm2 = vcmp.gt.f32.partialorder %v13484_v45, 0.0 }
 0x4a8   :  { %9953 = vpow2.f32 %v5692_v0  ;;  %v5622_v55 = vmin.f32 %v13487_v40, 0.0  ;;  %v9432_v21 = vpop.f32.mrb[150].mxu1  ;;  %vm5550_vm7 = vcmp.gt.f32.partialorder %v13487_v40, 0.0 }
 0x4a9   :  { %v5698_v26 = vmul.f32 1.442695, %v5623_v18  ;;  %v13492_v30 = vadd.f32 %v9432_v21, %v13479_v63  ;;  %v5058_v38 = vpop.f32.mrb[151].mxu1 }
 0x4aa   :  { %v5696_v4 = vmul.f32 1.442695, %v5622_v55  ;;  %v13495_v29 = vadd.f32 %v13479_v63, %v5058_v38 }
 0x4ab   :  { %9955 = vpow2.f32 %v5698_v26  ;;  %v5625_v54 = vmin.f32 %v13492_v30, 0.0  ;;  %vm5553_vm9 = vcmp.gt.f32.partialorder %v13492_v30, 0.0 }
 0x4ac   :  { %9957 = vpow2.f32 %v5696_v4  ;;  %v5624_v35 = vmin.f32 %v13495_v29, 0.0  ;;  %v9435_v39 = vpop.f32.mrb[152].mxu1  ;;  %vm5552_vm8 = vcmp.gt.f32.partialorder %v13495_v29, 0.0 }
 0x4ad   :  { %v5702_v56 = vmul.f32 1.442695, %v5625_v54  ;;  %v13500_v12 = vadd.f32 %v9435_v39, %v13479_v63  ;;  %v5068_v31 = vpop.f32.mrb[153].mxu1 }
 0x4ae   :  { %v5700_v32 = vmul.f32 1.442695, %v5624_v35  ;;  %v13503_v16 = vadd.f32 %v13479_v63, %v5068_v31 }
 0x4af   :  { %9959 = vpow2.f32 %v5702_v56  ;;  %v5627_v10 = vmin.f32 %v13500_v12, 0.0  ;;  %vm5555_vm11 = vcmp.gt.f32.partialorder %v13500_v12, 0.0 }
 0x4b0   :  { %9961 = vpow2.f32 %v5700_v32  ;;  %v5626_v51 = vmin.f32 %v13503_v16, 0.0  ;;  %v9438_v36 = vpop.f32.mrb[154].mxu1  ;;  %vm5554_vm10 = vcmp.gt.f32.partialorder %v13503_v16, 0.0 }
 0x4b1   :  { %v9952_v52 = vpop.eup %9951  ;;  %v5706_v1 = vmul.f32 1.442695, %v5627_v10  ;;  %v13508_v13 = vadd.f32 %v9438_v36, %v13479_v63  ;;  %v5078_v61 = vpop.f32.mrb[155].mxu1 }
 0x4b2   :  { %v9954_v5 = vpop.eup %9953  ;;  %v7806_v57 = vadd.f32 -1.0, %v9952_v52  ;;  %v5704_v19 = vmul.f32 1.442695, %v5626_v51  ;;  %v13511_v17 = vadd.f32 %v13479_v63, %v5078_v61 }
 0x4b3   :  { %9963 = vpow2.f32 %v5706_v1  ;;  %v5629_v33 = vmin.f32 %v13508_v13, 0.0  ;;  %v7805_v20 = vadd.f32 -1.0, %v9954_v5  ;;  %vm5557_vm13 = vcmp.gt.f32.partialorder %v13508_v13, 0.0 }
 0x4b4   :  { %9965 = vpow2.f32 %v5704_v19  ;;  %v5628_v59 = vmin.f32 %v13511_v17, 0.0  ;;  %v9441_v7 = vpop.f32.mrb[156].mxu1  ;;  %v5909_v3 = vsel %vm5549_vm4, %v5477_v8, %v7806_v57  ;;  %vm5556_vm12 = vcmp.gt.f32.partialorder %v13511_v17, 0.0 }
 0x4b5   :  { %v9956_v14 = vpop.eup %9955  ;;  %v5710_v58 = vmul.f32 1.442695, %v5629_v33  ;;  %v13516_v48 = vadd.f32 %v9441_v7, %v13479_v63  ;;  %v5088_v22 = vpop.f32.mrb[157].mxu1  ;;  %v5908_v6 = vsel %vm5548_vm3, %v5476_v34, %v7805_v20 }
 0x4b6   :  { %v9958_v44 = vpop.eup %9957  ;;  %v7808_v24 = vadd.f32 -1.0, %v9956_v14  ;;  %v5708_v11 = vmul.f32 1.442695, %v5628_v59  ;;  %v13519_v60 = vadd.f32 %v13479_v63, %v5088_v22  ;;  %9540 = vmatprep.mubr.msk.f32.mxu0 %vm5991_vm0, %v5908_v6 }
 0x4b7   :  { %9967 = vpow2.f32 %v5710_v58  ;;  %v5631_v62 = vmin.f32 %v13516_v48, 0.0  ;;  %9541 = vmatmul.mubr.msk.f32.vlgmr.msra.gmra.mrb[36].mxu0 %vm5991_vm0, %v5909_v3  ;;  %v7807_v28 = vadd.f32 -1.0, %v9958_v44  ;;  %vm5559_vm15 = vcmp.gt.f32.partialorder %v13516_v48, 0.0 }
 0x4b8   :  { %9969 = vpow2.f32 %v5708_v11  ;;  %v5630_v23 = vmin.f32 %v13519_v60, 0.0  ;;  %v9444_v43 = vpop.f32.mrb[158].mxu1  ;;  %v5911_v37 = vsel %vm5551_vm2, %v13484_v45, %v7808_v24  ;;  %vm5558_vm14 = vcmp.gt.f32.partialorder %v13519_v60, 0.0 }
 0x4b9   :  { %v9960_v25 = vpop.eup %9959  ;;  %v5714_v53 = vmul.f32 1.442695, %v5631_v62  ;;  %v13528_v2 = vadd.f32 %v9444_v43, %v13479_v63  ;;  %v5098_v41 = vpop.f32.mrb[159].mxu1  ;;  %v5910_v49 = vsel %vm5550_vm7, %v13487_v40, %v7807_v28 }
 0x4ba   :  { %v9962_v27 = vpop.eup %9961  ;;  %v7810_v8 = vadd.f32 -1.0, %v9960_v25  ;;  %v5712_v42 = vmul.f32 1.442695, %v5630_v23  ;;  %v13533_v34 = vadd.f32 %v13479_v63, %v5098_v41  ;;  %9543 = vmatprep.mubr.msk.f32.mxu0 %vm5991_vm0, %v5910_v49 }
 0x4bb   :  { %9971 = vpow2.f32 %v5714_v53  ;;  %v5633_v47 = vmin.f32 %v13528_v2, 0.0  ;;  %9544 = vmatmul.mubr.msk.f32.gmra.mrb[38].mxu0 %vm5991_vm0, %v5911_v37  ;;  %v7809_v15 = vadd.f32 -1.0, %v9962_v27  ;;  %vm5561_vm6 = vcmp.gt.f32.partialorder %v13528_v2, 0.0 }
 0x4bc   :  { %9973 = vpow2.f32 %v5712_v42  ;;  %v5632_v46 = vmin.f32 %v13533_v34, 0.0  ;;  %v9447_v50 = vpop.f32.mrb[160].mxu1  ;;  %v5913_v21 = vsel %vm5553_vm9, %v13492_v30, %v7810_v8  ;;  %vm5560_vm5 = vcmp.gt.f32.partialorder %v13533_v34, 0.0 }
 0x4bd   :  { %v9964_v45 = vpop.eup %9963  ;;  %v5718_v9 = vmul.f32 1.442695, %v5633_v47  ;;  %v13542_v0 = vadd.f32 %v9447_v50, %v13479_v63  ;;  %v5108_v40 = vpop.f32.mrb[161].mxu1  ;;  %v5912_v18 = vsel %vm5552_vm8, %v13495_v29, %v7809_v15 }
 0x4be   :  { %v9966_v55 = vpop.eup %9965  ;;  %v7812_v26 = vadd.f32 -1.0, %v9964_v45  ;;  %v5716_v38 = vmul.f32 1.442695, %v5632_v46  ;;  %v13547_v4 = vadd.f32 %v13479_v63, %v5108_v40  ;;  %9546 = vmatprep.mubr.msk.f32.mxu0 %vm5991_vm0, %v5912_v18 }
 0x4bf   :  { %9975 = vpow2.f32 %v5718_v9  ;;  %v5635_v54 = vmin.f32 %v13542_v0, 0.0  ;;  %9547 = vmatmul.mubr.msk.f32.gmra.mrb[40].mxu0 %vm5991_vm0, %v5913_v21  ;;  %v7811_v35 = vadd.f32 -1.0, %v9966_v55  ;;  %vm5563_vm4 = vcmp.gt.f32.partialorder %v13542_v0, 0.0 }
 0x4c0   :  { %9977 = vpow2.f32 %v5716_v38  ;;  %v5634_v29 = vmin.f32 %v13547_v4, 0.0  ;;  %v9450_v39 = vpop.f32.mrb[162].mxu1  ;;  %v5915_v36 = vsel %vm5555_vm11, %v13500_v12, %v7812_v26  ;;  %vm5562_vm3 = vcmp.gt.f32.partialorder %v13547_v4, 0.0 }
 0x4c1   :  { %v9968_v30 = vpop.eup %9967  ;;  %v5722_v56 = vmul.f32 1.442695, %v5635_v54  ;;  %v13556_v31 = vadd.f32 %v9450_v39, %v13479_v63  ;;  %v5118_v32 = vpop.f32.mrb[163].mxu1  ;;  %v5914_v10 = vsel %vm5554_vm10, %v13503_v16, %v7811_v35 }
 0x4c2   :  { %v9970_v51 = vpop.eup %9969  ;;  %v7814_v52 = vadd.f32 -1.0, %v9968_v30  ;;  %v5720_v1 = vmul.f32 1.442695, %v5634_v29  ;;  %v13561_v61 = vadd.f32 %v13479_v63, %v5118_v32  ;;  %9549 = vmatprep.mubr.msk.f32.mxu0 %vm5991_vm0, %v5914_v10 }
 0x4c3   :  { %9979 = vpow2.f32 %v5722_v56  ;;  %v5637_v5 = vmin.f32 %v13556_v31, 0.0  ;;  %9550 = vmatmul.mubr.msk.f32.gmra.mrb[42].mxu0 %vm5991_vm0, %v5915_v36  ;;  %v7813_v57 = vadd.f32 -1.0, %v9970_v51  ;;  %vm5565_vm2 = vcmp.gt.f32.partialorder %v13556_v31, 0.0 }
 0x4c4   :  { %9981 = vpow2.f32 %v5720_v1  ;;  %v5636_v16 = vmin.f32 %v13561_v61, 0.0  ;;  %v9453_v19 = vpop.f32.mrb[164].mxu1  ;;  %v5917_v58 = vsel %vm5557_vm13, %v13508_v13, %v7814_v52  ;;  %vm5564_vm7 = vcmp.gt.f32.partialorder %v13561_v61, 0.0 }
 0x4c5   :  { %v9972_v12 = vpop.eup %9971  ;;  %v5726_v33 = vmul.f32 1.442695, %v5637_v5  ;;  %v13570_v20 = vadd.f32 %v9453_v19, %v13479_v63  ;;  %v5128_v59 = vpop.f32.mrb[165].mxu1  ;;  %v5916_v7 = vsel %vm5556_vm12, %v13511_v17, %v7813_v57 }
 0x4c6   :  { %v9974_v14 = vpop.eup %9973  ;;  %v7816_v22 = vadd.f32 -1.0, %v9972_v12  ;;  %v5724_v6 = vmul.f32 1.442695, %v5636_v16  ;;  %v13575_v44 = vadd.f32 %v13479_v63, %v5128_v59  ;;  %9552 = vmatprep.mubr.msk.f32.mxu0 %vm5991_vm0, %v5916_v7 }
 0x4c7   :  { %9983 = vpow2.f32 %v5726_v33  ;;  %v5639_v3 = vmin.f32 %v13570_v20, 0.0  ;;  %9553 = vmatmul.mubr.msk.f32.gmra.mrb[44].mxu0 %vm5991_vm0, %v5917_v58  ;;  %v7815_v24 = vadd.f32 -1.0, %v9974_v14  ;;  %vm5567_vm9 = vcmp.gt.f32.partialorder %v13570_v20, 0.0 }
 0x4c8   :  { %9985 = vpow2.f32 %v5724_v6  ;;  %v5638_v17 = vmin.f32 %v13575_v44, 0.0  ;;  %v9456_v11 = vpop.f32.mrb[166].mxu1  ;;  %v5919_v53 = vsel %vm5559_vm15, %v13516_v48, %v7816_v22  ;;  %vm5566_vm8 = vcmp.gt.f32.partialorder %v13575_v44, 0.0 }
 0x4c9   :  { %v9976_v13 = vpop.eup %9975  ;;  %v5730_v62 = vmul.f32 1.442695, %v5639_v3  ;;  %v13584_v28 = vadd.f32 %v9456_v11, %v13479_v63  ;;  %v5138_v23 = vpop.f32.mrb[167].mxu1  ;;  %v5918_v43 = vsel %vm5558_vm14, %v13519_v60, %v7815_v24 }
 0x4ca   :  { %v9978_v25 = vpop.eup %9977  ;;  %v7818_v41 = vadd.f32 -1.0, %v9976_v13  ;;  %v5728_v49 = vmul.f32 1.442695, %v5638_v17  ;;  %v13589_v27 = vadd.f32 %v13479_v63, %v5138_v23  ;;  %9555 = vmatprep.mubr.msk.f32.mxu0 %vm5991_vm0, %v5918_v43 }
 0x4cb   :  { %9987 = vpow2.f32 %v5730_v62  ;;  %v5641_v37 = vmin.f32 %v13584_v28, 0.0  ;;  %9556 = vmatmul.mubr.msk.f32.gmra.mrb[46].mxu0 %vm5991_vm0, %v5919_v53  ;;  %v7817_v8 = vadd.f32 -1.0, %v9978_v25  ;;  %vm5569_vm11 = vcmp.gt.f32.partialorder %v13584_v28, 0.0 }
 0x4cc   :  { %9989 = vpow2.f32 %v5728_v49  ;;  %v5640_v60 = vmin.f32 %v13589_v27, 0.0  ;;  %v9459_v42 = vpop.f32.mrb[168].mxu1  ;;  %v5921_v9 = vsel %vm5561_vm6, %v13528_v2, %v7818_v41  ;;  %vm5568_vm10 = vcmp.gt.f32.partialorder %v13589_v27, 0.0 }
 0x4cd   :  { %v9980_v48 = vpop.eup %9979  ;;  %v5734_v47 = vmul.f32 1.442695, %v5641_v37  ;;  %v13598_v15 = vadd.f32 %v9459_v42, %v13479_v63  ;;  %v5148_v46 = vpop.f32.mrb[169].mxu1  ;;  %v5920_v50 = vsel %vm5560_vm5, %v13533_v34, %v7817_v8 }
 0x4ce   :  { %v9982_v45 = vpop.eup %9981  ;;  %v7820_v40 = vadd.f32 -1.0, %v9980_v48  ;;  %v5732_v18 = vmul.f32 1.442695, %v5640_v60  ;;  %v13603_v55 = vadd.f32 %v13479_v63, %v5148_v46  ;;  %9558 = vmatprep.mubr.msk.f32.mxu0 %vm5991_vm0, %v5920_v50 }
 0x4cf   :  { %9991 = vpow2.f32 %v5734_v47  ;;  %v5643_v21 = vmin.f32 %v13598_v15, 0.0  ;;  %9559 = vmatmul.mubr.msk.f32.gmra.mrb[48].mxu0 %vm5991_vm0, %v5921_v9  ;;  %v7819_v26 = vadd.f32 -1.0, %v9982_v45  ;;  %vm5571_vm13 = vcmp.gt.f32.partialorder %v13598_v15, 0.0 }
 0x4d0   :  { %9993 = vpow2.f32 %v5732_v18  ;;  %v5642_v34 = vmin.f32 %v13603_v55, 0.0  ;;  %v9462_v38 = vpop.f32.mrb[170].mxu1  ;;  %v5923_v56 = vsel %vm5563_vm4, %v13542_v0, %v7820_v40  ;;  %vm5570_vm12 = vcmp.gt.f32.partialorder %v13603_v55, 0.0 }
 0x4d1   :  { %v9984_v2 = vpop.eup %9983  ;;  %v5738_v54 = vmul.f32 1.442695, %v5643_v21  ;;  %v13612_v35 = vadd.f32 %v9462_v38, %v13479_v63  ;;  %v5158_v29 = vpop.f32.mrb[171].mxu1  ;;  %v5922_v39 = vsel %vm5562_vm3, %v13547_v4, %v7819_v26 }
 0x4d2   :  { %v9986_v30 = vpop.eup %9985  ;;  %v7822_v32 = vadd.f32 -1.0, %v9984_v2  ;;  %v5736_v10 = vmul.f32 1.442695, %v5642_v34  ;;  %v13617_v51 = vadd.f32 %v13479_v63, %v5158_v29  ;;  %9561 = vmatprep.mubr.msk.f32.mxu0 %vm5991_vm0, %v5922_v39 }
 0x4d3   :  { %9995 = vpow2.f32 %v5738_v54  ;;  %v5645_v36 = vmin.f32 %v13612_v35, 0.0  ;;  %9562 = vmatmul.mubr.msk.f32.gmra.mrb[50].mxu0 %vm5991_vm0, %v5923_v56  ;;  %v7821_v52 = vadd.f32 -1.0, %v9986_v30  ;;  %vm5573_vm15 = vcmp.gt.f32.partialorder %v13612_v35, 0.0 }
 0x4d4   :  { %9997 = vpow2.f32 %v5736_v10  ;;  %v5644_v4 = vmin.f32 %v13617_v51, 0.0  ;;  %v9465_v1 = vpop.f32.mrb[172].mxu1  ;;  %v5925_v33 = vsel %vm5565_vm2, %v13556_v31, %v7822_v32  ;;  %vm5572_vm14 = vcmp.gt.f32.partialorder %v13617_v51, 0.0 }
 0x4d5   :  { %v9988_v0 = vpop.eup %9987  ;;  %v5742_v5 = vmul.f32 1.442695, %v5645_v36  ;;  %v13626_v57 = vadd.f32 %v9465_v1, %v13479_v63  ;;  %v5168_v16 = vpop.f32.mrb[173].mxu1  ;;  %v5924_v19 = vsel %vm5564_vm7, %v13561_v61, %v7821_v52 }
 0x4d6   :  { %v9990_v12 = vpop.eup %9989  ;;  %v7824_v59 = vadd.f32 -1.0, %v9988_v0  ;;  %v5740_v7 = vmul.f32 1.442695, %v5644_v4  ;;  %v13631_v14 = vadd.f32 %v13479_v63, %v5168_v16  ;;  %9564 = vmatprep.mubr.msk.f32.mxu0 %vm5991_vm0, %v5924_v19 }
 0x4d7   :  { %9999 = vpow2.f32 %v5742_v5  ;;  %v5647_v58 = vmin.f32 %v13626_v57, 0.0  ;;  %9565 = vmatmul.mubr.msk.f32.gmra.mrb[52].mxu0 %vm5991_vm0, %v5925_v33  ;;  %v7823_v22 = vadd.f32 -1.0, %v9990_v12  ;;  %vm5575_vm6 = vcmp.gt.f32.partialorder %v13626_v57, 0.0 }
 0x4d8   :  { %10001 = vpow2.f32 %v5740_v7  ;;  %v5646_v61 = vmin.f32 %v13631_v14, 0.0  ;;  %v9468_v6 = vpop.f32.mrb[174].mxu1  ;;  %v5927_v62 = vsel %vm5567_vm9, %v13570_v20, %v7824_v59  ;;  %vm5574_vm5 = vcmp.gt.f32.partialorder %v13631_v14, 0.0 }
 0x4d9   :  { %v9992_v31 = vpop.eup %9991  ;;  %v5746_v3 = vmul.f32 1.442695, %v5647_v58  ;;  %v13640_v24 = vadd.f32 %v9468_v6, %v13479_v63  ;;  %v5178_v17 = vpop.f32.mrb[175].mxu1  ;;  %v5926_v11 = vsel %vm5566_vm8, %v13575_v44, %v7823_v22 }
 0x4da   :  { %v9994_v13 = vpop.eup %9993  ;;  %v7826_v23 = vadd.f32 -1.0, %v9992_v31  ;;  %v5744_v43 = vmul.f32 1.442695, %v5646_v61  ;;  %v13645_v25 = vadd.f32 %v13479_v63, %v5178_v17  ;;  %9567 = vmatprep.mubr.msk.f32.mxu0 %vm5991_vm0, %v5926_v11 }
 0x4db   :  { %10003 = vpow2.f32 %v5746_v3  ;;  %v5649_v53 = vmin.f32 %v13640_v24, 0.0  ;;  %9568 = vmatmul.mubr.msk.f32.gmra.mrb[54].mxu0 %vm5991_vm0, %v5927_v62  ;;  %v7825_v41 = vadd.f32 -1.0, %v9994_v13  ;;  %vm5577_vm4 = vcmp.gt.f32.partialorder %v13640_v24, 0.0 }
 0x4dc   :  { %10005 = vpow2.f32 %v5744_v43  ;;  %v5648_v44 = vmin.f32 %v13645_v25, 0.0  ;;  %v9471_v49 = vpop.f32.mrb[176].mxu1  ;;  %v5929_v47 = vsel %vm5569_vm11, %v13584_v28, %v7826_v23  ;;  %vm5576_vm3 = vcmp.gt.f32.partialorder %v13645_v25, 0.0 }
 0x4dd   :  { %v9996_v20 = vpop.eup %9995  ;;  %v5750_v37 = vmul.f32 1.442695, %v5649_v53  ;;  %v13654_v8 = vadd.f32 %v9471_v49, %v13479_v63  ;;  %v5188_v60 = vpop.f32.mrb[177].mxu1  ;;  %v5928_v42 = vsel %vm5568_vm10, %v13589_v27, %v7825_v41 }
 0x4de   :  { %v9998_v48 = vpop.eup %9997  ;;  %v7828_v46 = vadd.f32 -1.0, %v9996_v20  ;;  %v5748_v50 = vmul.f32 1.442695, %v5648_v44  ;;  %v13659_v45 = vadd.f32 %v13479_v63, %v5188_v60  ;;  %9570 = vmatprep.mubr.msk.f32.mxu0 %vm5991_vm0, %v5928_v42 }
 0x4df   :  { %10007 = vpow2.f32 %v5750_v37  ;;  %v5651_v9 = vmin.f32 %v13654_v8, 0.0  ;;  %9571 = vmatmul.mubr.msk.f32.gmra.mrb[56].mxu0 %vm5991_vm0, %v5929_v47  ;;  %v7827_v40 = vadd.f32 -1.0, %v9998_v48  ;;  %vm5579_vm2 = vcmp.gt.f32.partialorder %v13654_v8, 0.0 }
 0x4e0   :  { %10009 = vpow2.f32 %v5748_v50  ;;  %v5650_v27 = vmin.f32 %v13659_v45, 0.0  ;;  %v9474_v18 = vpop.f32.mrb[178].mxu1  ;;  %v5931_v54 = vsel %vm5571_vm13, %v13598_v15, %v7828_v46  ;;  %vm5578_vm7 = vcmp.gt.f32.partialorder %v13659_v45, 0.0 }
 0x4e1   :  { %v10000_v28 = vpop.eup %9999  ;;  %v5754_v21 = vmul.f32 1.442695, %v5651_v9  ;;  %v13668_v26 = vadd.f32 %v9474_v18, %v13479_v63  ;;  %v5198_v34 = vpop.f32.mrb[179].mxu1  ;;  %v5930_v38 = vsel %vm5570_vm12, %v13603_v55, %v7827_v40 }
 0x4e2   :  { %v10002_v2 = vpop.eup %10001  ;;  %v7830_v29 = vadd.f32 -1.0, %v10000_v28  ;;  %v5752_v39 = vmul.f32 1.442695, %v5650_v27  ;;  %v13673_v30 = vadd.f32 %v13479_v63, %v5198_v34  ;;  %9573 = vmatprep.mubr.msk.f32.mxu0 %vm5991_vm0, %v5930_v38 }
 0x4e3   :  { %10011 = vpow2.f32 %v5754_v21  ;;  %v5653_v56 = vmin.f32 %v13668_v26, 0.0  ;;  %9574 = vmatmul.mubr.msk.f32.gmra.mrb[58].mxu0 %vm5991_vm0, %v5931_v54  ;;  %v7829_v32 = vadd.f32 -1.0, %v10002_v2  ;;  %vm5581_vm9 = vcmp.gt.f32.partialorder %v13668_v26, 0.0 }
 0x4e4   :  { %10013 = vpow2.f32 %v5752_v39  ;;  %v5652_v55 = vmin.f32 %v13673_v30, 0.0  ;;  %v9477_v10 = vpop.f32.mrb[180].mxu1  ;;  %v5933_v5 = vsel %vm5573_vm15, %v13612_v35, %v7830_v29  ;;  %vm5580_vm8 = vcmp.gt.f32.partialorder %v13673_v30, 0.0 }
 0x4e5   :  { %v10004_v15 = vpop.eup %10003  ;;  %v5758_v36 = vmul.f32 1.442695, %v5653_v56  ;;  %v13682_v52 = vadd.f32 %v9477_v10, %v13479_v63  ;;  %v5208_v4 = vpop.f32.mrb[181].mxu1  ;;  %v5932_v1 = vsel %vm5572_vm14, %v13617_v51, %v7829_v32 }
 0x4e6   :  { %v10006_v0 = vpop.eup %10005  ;;  %v7832_v16 = vadd.f32 -1.0, %v10004_v15  ;;  %v5756_v19 = vmul.f32 1.442695, %v5652_v55  ;;  %v13687_v12 = vadd.f32 %v13479_v63, %v5208_v4  ;;  %9576 = vmatprep.mubr.msk.f32.mxu0 %vm5991_vm0, %v5932_v1 }
 0x4e7   :  { %10015 = vpow2.f32 %v5758_v36  ;;  %v5655_v33 = vmin.f32 %v13682_v52, 0.0  ;;  %9577 = vmatmul.mubr.msk.f32.gmra.mrb[60].mxu0 %vm5991_vm0, %v5933_v5  ;;  %v7831_v59 = vadd.f32 -1.0, %v10006_v0  ;;  %vm5583_vm11 = vcmp.gt.f32.partialorder %v13682_v52, 0.0 }
 0x4e8   :  { %10017 = vpow2.f32 %v5756_v19  ;;  %v5654_v51 = vmin.f32 %v13687_v12, 0.0  ;;  %v9480_v7 = vpop.f32.mrb[182].mxu1  ;;  %v5935_v3 = vsel %vm5575_vm6, %v13626_v57, %v7832_v16  ;;  %vm5582_vm10 = vcmp.gt.f32.partialorder %v13687_v12, 0.0 }
 0x4e9   :  { %v10008_v35 = vpop.eup %10007  ;;  %v5762_v58 = vmul.f32 1.442695, %v5655_v33  ;;  %v13696_v22 = vadd.f32 %v9480_v7, %v13479_v63  ;;  %v5218_v61 = vpop.f32.mrb[183].mxu1  ;;  %v5934_v6 = vsel %vm5574_vm5, %v13631_v14, %v7831_v59 }
 0x4ea   :  { %v10010_v31 = vpop.eup %10009  ;;  %v7834_v17 = vadd.f32 -1.0, %v10008_v35  ;;  %v5760_v11 = vmul.f32 1.442695, %v5654_v51  ;;  %v13701_v13 = vadd.f32 %v13479_v63, %v5218_v61  ;;  %9579 = vmatprep.mubr.msk.f32.mxu0 %vm5991_vm0, %v5934_v6 }
 0x4eb   :  { %10019 = vpow2.f32 %v5762_v58  ;;  %v5657_v62 = vmin.f32 %v13696_v22, 0.0  ;;  %9580 = vmatmul.mubr.msk.f32.gmra.mrb[62].mxu0 %vm5991_vm0, %v5935_v3  ;;  %v7833_v23 = vadd.f32 -1.0, %v10010_v31  ;;  %vm5585_vm13 = vcmp.gt.f32.partialorder %v13696_v22, 0.0 }
 0x4ec   :  { %10021 = vpow2.f32 %v5760_v11  ;;  %v5656_v14 = vmin.f32 %v13701_v13, 0.0  ;;  %v9483_v43 = vpop.f32.mrb[184].mxu1  ;;  %v5937_v37 = vsel %vm5577_vm4, %v13640_v24, %v7834_v17  ;;  %vm5584_vm12 = vcmp.gt.f32.partialorder %v13701_v13, 0.0 }
 0x4ed   :  { %v10012_v57 = vpop.eup %10011  ;;  %v5766_v53 = vmul.f32 1.442695, %v5657_v62  ;;  %v13710_v41 = vadd.f32 %v9483_v43, %v13479_v63  ;;  %v5228_v44 = vpop.f32.mrb[185].mxu1  ;;  %v5936_v49 = vsel %vm5576_vm3, %v13645_v25, %v7833_v23 }
 0x4ee   :  { %v10014_v20 = vpop.eup %10013  ;;  %v7836_v60 = vadd.f32 -1.0, %v10012_v57  ;;  %v5764_v42 = vmul.f32 1.442695, %v5656_v14  ;;  %v13715_v48 = vadd.f32 %v13479_v63, %v5228_v44  ;;  %9582 = vmatprep.mubr.msk.f32.mxu0 %vm5991_vm0, %v5936_v49 }
 0x4ef   :  { %10023 = vpow2.f32 %v5766_v53  ;;  %v5659_v47 = vmin.f32 %v13710_v41, 0.0  ;;  %9583 = vmatmul.mubr.msk.f32.gmra.mrb[64].mxu0 %vm5991_vm0, %v5937_v37  ;;  %v7835_v46 = vadd.f32 -1.0, %v10014_v20  ;;  %vm5587_vm15 = vcmp.gt.f32.partialorder %v13710_v41, 0.0 }
 0x4f0   :  { %10025 = vpow2.f32 %v5764_v42  ;;  %v5658_v25 = vmin.f32 %v13715_v48, 0.0  ;;  %v9486_v50 = vpop.f32.mrb[186].mxu1  ;;  %v5939_v21 = vsel %vm5579_vm2, %v13654_v8, %v7836_v60  ;;  %vm5586_vm14 = vcmp.gt.f32.partialorder %v13715_v48, 0.0 }
 0x4f1   :  { %v10016_v24 = vpop.eup %10015  ;;  %v5770_v9 = vmul.f32 1.442695, %v5659_v47  ;;  %v13724_v40 = vadd.f32 %v9486_v50, %v13479_v63  ;;  %v5238_v27 = vpop.f32.mrb[187].mxu1  ;;  %v5938_v18 = vsel %vm5578_vm7, %v13659_v45, %v7835_v46 }
 0x4f2   :  { %v10018_v28 = vpop.eup %10017  ;;  %v7838_v34 = vadd.f32 -1.0, %v10016_v24  ;;  %v5768_v38 = vmul.f32 1.442695, %v5658_v25  ;;  %v13729_v2 = vadd.f32 %v13479_v63, %v5238_v27  ;;  %9585 = vmatprep.mubr.msk.f32.mxu0 %vm5991_vm0, %v5938_v18 }
 0x4f3   :  { %10027 = vpow2.f32 %v5770_v9  ;;  %v5661_v54 = vmin.f32 %v13724_v40, 0.0  ;;  %9586 = vmatmul.mubr.msk.f32.gmra.mrb[66].mxu0 %vm5991_vm0, %v5939_v21  ;;  %v7837_v29 = vadd.f32 -1.0, %v10018_v28  ;;  %vm5589_vm6 = vcmp.gt.f32.partialorder %v13724_v40, 0.0 }
 0x4f4   :  { %10029 = vpow2.f32 %v5768_v38  ;;  %v5660_v45 = vmin.f32 %v13729_v2, 0.0  ;;  %v9489_v39 = vpop.f32.mrb[188].mxu1  ;;  %v5941_v36 = vsel %vm5581_vm9, %v13668_v26, %v7838_v34  ;;  %vm5588_vm5 = vcmp.gt.f32.partialorder %v13729_v2, 0.0 }
 0x4f5   :  { %v10020_v8 = vpop.eup %10019  ;;  %v5774_v56 = vmul.f32 1.442695, %v5661_v54  ;;  %v13738_v32 = vadd.f32 %v9489_v39, %v13479_v63  ;;  %v5248_v55 = vpop.f32.mrb[189].mxu1  ;;  %v5940_v10 = vsel %vm5580_vm8, %v13673_v30, %v7837_v29 }
 0x4f6   :  { %v10022_v15 = vpop.eup %10021  ;;  %v7840_v4 = vadd.f32 -1.0, %v10020_v8  ;;  %v5772_v1 = vmul.f32 1.442695, %v5660_v45  ;;  %v13743_v0 = vadd.f32 %v13479_v63, %v5248_v55  ;;  %9588 = vmatprep.mubr.msk.f32.mxu0 %vm5991_vm0, %v5940_v10 }
 0x4f7   :  { %10031 = vpow2.f32 %v5774_v56  ;;  %v5663_v5 = vmin.f32 %v13738_v32, 0.0  ;;  %9589 = vmatmul.mubr.msk.f32.gmra.mrb[68].mxu0 %vm5991_vm0, %v5941_v36  ;;  %v7839_v16 = vadd.f32 -1.0, %v10022_v15  ;;  %vm5591_vm4 = vcmp.gt.f32.partialorder %v13738_v32, 0.0 }
 0x4f8   :  { %10033 = vpow2.f32 %v5772_v1  ;;  %v5662_v30 = vmin.f32 %v13743_v0, 0.0  ;;  %v9492_v19 = vpop.f32.mrb[190].mxu1  ;;  %v5943_v58 = vsel %vm5583_vm11, %v13682_v52, %v7840_v4  ;;  %vm5590_vm3 = vcmp.gt.f32.partialorder %v13743_v0, 0.0 }
 0x4f9   :  { %v10024_v26 = vpop.eup %10023  ;;  %v5778_v33 = vmul.f32 1.442695, %v5663_v5  ;;  %v13752_v59 = vadd.f32 %v9492_v19, %v13479_v63  ;;  %v5258_v51 = vpop.f32.mrb[191].mxu1  ;;  %v5942_v7 = vsel %vm5582_vm10, %v13687_v12, %v7839_v16 }
 0x4fa   :  { %v10026_v35 = vpop.eup %10025  ;;  %v7842_v61 = vadd.f32 -1.0, %v10024_v26  ;;  %v5776_v6 = vmul.f32 1.442695, %v5662_v30  ;;  %v13757_v31 = vadd.f32 %v13479_v63, %v5258_v51  ;;  %9591 = vmatprep.mubr.msk.f32.mxu0 %vm5991_vm0, %v5942_v7 }
 0x4fb   :  { %10035 = vpow2.f32 %v5778_v33  ;;  %v5665_v3 = vmin.f32 %v13752_v59, 0.0  ;;  %9592 = vmatmul.mubr.msk.f32.gmra.mrb[70].mxu0 %vm5991_vm0, %v5943_v58  ;;  %v7841_v17 = vadd.f32 -1.0, %v10026_v35  ;;  %vm5593_vm2 = vcmp.gt.f32.partialorder %v13752_v59, 0.0 }
 0x4fc   :  { %10037 = vpow2.f32 %v5776_v6  ;;  %v5664_v12 = vmin.f32 %v13757_v31, 0.0  ;;  %v9495_v11 = vpop.f32.mrb[192].mxu1  ;;  %v5945_v53 = vsel %vm5585_vm13, %v13696_v22, %v7842_v61  ;;  %vm5592_vm7 = vcmp.gt.f32.partialorder %v13757_v31, 0.0 }
 0x4fd   :  { %v10028_v52 = vpop.eup %10027  ;;  %v5782_v62 = vmul.f32 1.442695, %v5665_v3  ;;  %v13766_v23 = vadd.f32 %v9495_v11, %v13479_v63  ;;  %v5268_v14 = vpop.f32.mrb[193].mxu1  ;;  %v5944_v43 = vsel %vm5584_vm12, %v13701_v13, %v7841_v17 }
 0x4fe   :  { %v10030_v57 = vpop.eup %10029  ;;  %v7844_v44 = vadd.f32 -1.0, %v10028_v52  ;;  %v5780_v49 = vmul.f32 1.442695, %v5664_v12  ;;  %v13771_v20 = vadd.f32 %v13479_v63, %v5268_v14  ;;  %9594 = vmatprep.mubr.msk.f32.mxu0 %vm5991_vm0, %v5944_v43 }
 0x4ff   :  { %10039 = vpow2.f32 %v5782_v62  ;;  %v5667_v37 = vmin.f32 %v13766_v23, 0.0  ;;  %9595 = vmatmul.mubr.msk.f32.gmra.mrb[72].mxu0 %vm5991_vm0, %v5945_v53  ;;  %v7843_v60 = vadd.f32 -1.0, %v10030_v57  ;;  %vm5595_vm9 = vcmp.gt.f32.partialorder %v13766_v23, 0.0 }
 0x500   :  { %10041 = vpow2.f32 %v5780_v49  ;;  %v5666_v13 = vmin.f32 %v13771_v20, 0.0  ;;  %v9498_v42 = vpop.f32.mrb[194].mxu1  ;;  %v5947_v9 = vsel %vm5587_vm15, %v13710_v41, %v7844_v44  ;;  %vm5594_vm8 = vcmp.gt.f32.partialorder %v13771_v20, 0.0 }
 0x501   :  { %v10032_v22 = vpop.eup %10031  ;;  %v5786_v47 = vmul.f32 1.442695, %v5667_v37  ;;  %v13780_v46 = vadd.f32 %v9498_v42, %v13479_v63  ;;  %v5278_v25 = vpop.f32.mrb[195].mxu1  ;;  %v5946_v50 = vsel %vm5586_vm14, %v13715_v48, %v7843_v60 }
 0x502   :  { %v10034_v24 = vpop.eup %10033  ;;  %v7846_v27 = vadd.f32 -1.0, %v10032_v22  ;;  %v5784_v18 = vmul.f32 1.442695, %v5666_v13  ;;  %v13785_v28 = vadd.f32 %v13479_v63, %v5278_v25  ;;  %9597 = vmatprep.mubr.msk.f32.mxu0 %vm5991_vm0, %v5946_v50 }
 0x503   :  { %10043 = vpow2.f32 %v5786_v47  ;;  %v5669_v21 = vmin.f32 %v13780_v46, 0.0  ;;  %9598 = vmatmul.mubr.msk.f32.gmra.mrb[74].mxu0 %vm5991_vm0, %v5947_v9  ;;  %v7845_v34 = vadd.f32 -1.0, %v10034_v24  ;;  %vm5597_vm11 = vcmp.gt.f32.partialorder %v13780_v46, 0.0 }
 0x504   :  { %10045 = vpow2.f32 %v5784_v18  ;;  %v5668_v48 = vmin.f32 %v13785_v28, 0.0  ;;  %v9501_v38 = vpop.f32.mrb[196].mxu1  ;;  %v5949_v56 = vsel %vm5589_vm6, %v13724_v40, %v7846_v27  ;;  %vm5596_vm10 = vcmp.gt.f32.partialorder %v13785_v28, 0.0 }
 0x505   :  { %v10036_v41 = vpop.eup %10035  ;;  %v5790_v54 = vmul.f32 1.442695, %v5669_v21  ;;  %v13794_v29 = vadd.f32 %v9501_v38, %v13479_v63  ;;  %v5288_v45 = vpop.f32.mrb[197].mxu1  ;;  %v5948_v39 = vsel %vm5588_vm5, %v13729_v2, %v7845_v34 }
 0x506   :  { %v10038_v8 = vpop.eup %10037  ;;  %v7848_v55 = vadd.f32 -1.0, %v10036_v41  ;;  %v5788_v10 = vmul.f32 1.442695, %v5668_v48  ;;  %v13799_v15 = vadd.f32 %v13479_v63, %v5288_v45  ;;  %9600 = vmatprep.mubr.msk.f32.mxu0 %vm5991_vm0, %v5948_v39 }
 0x507   :  { %10047 = vpow2.f32 %v5790_v54  ;;  %v5671_v36 = vmin.f32 %v13794_v29, 0.0  ;;  %9601 = vmatmul.mubr.msk.f32.gmra.mrb[76].mxu0 %vm5991_vm0, %v5949_v56  ;;  %v7847_v4 = vadd.f32 -1.0, %v10038_v8  ;;  %vm5599_vm13 = vcmp.gt.f32.partialorder %v13794_v29, 0.0 }
 0x508   :  { %10049 = vpow2.f32 %v5788_v10  ;;  %v5670_v2 = vmin.f32 %v13799_v15, 0.0  ;;  %v9504_v1 = vpop.f32.mrb[198].mxu1  ;;  %v5951_v33 = vsel %vm5591_vm4, %v13738_v32, %v7848_v55  ;;  %vm5598_vm12 = vcmp.gt.f32.partialorder %v13799_v15, 0.0 }
 0x509   :  { %v10040_v40 = vpop.eup %10039  ;;  %v5794_v5 = vmul.f32 1.442695, %v5671_v36  ;;  %v13808_v16 = vadd.f32 %v9504_v1, %v13479_v63  ;;  %v5298_v30 = vpop.f32.mrb[199].mxu1  ;;  %v5950_v19 = vsel %vm5590_vm3, %v13743_v0, %v7847_v4 }
 0x50a   :  { %v10042_v26 = vpop.eup %10041  ;;  %v7850_v51 = vadd.f32 -1.0, %v10040_v40  ;;  %v5792_v7 = vmul.f32 1.442695, %v5670_v2  ;;  %v13813_v35 = vadd.f32 %v13479_v63, %v5298_v30  ;;  %9603 = vmatprep.mubr.msk.f32.mxu0 %vm5991_vm0, %v5950_v19 }
 0x50b   :  { %10051 = vpow2.f32 %v5794_v5  ;;  %v5673_v58 = vmin.f32 %v13808_v16, 0.0  ;;  %9604 = vmatmul.mubr.msk.f32.gmra.mrb[78].mxu0 %vm5991_vm0, %v5951_v33  ;;  %v7849_v61 = vadd.f32 -1.0, %v10042_v26  ;;  %vm5601_vm15 = vcmp.gt.f32.partialorder %v13808_v16, 0.0 }
 0x50c   :  { %10053 = vpow2.f32 %v5792_v7  ;;  %v5672_v0 = vmin.f32 %v13813_v35, 0.0  ;;  %v9507_v6 = vpop.f32.mrb[200].mxu1  ;;  %v5953_v62 = vsel %vm5593_vm2, %v13752_v59, %v7850_v51  ;;  %vm5600_vm14 = vcmp.gt.f32.partialorder %v13813_v35, 0.0 }
 0x50d   :  { %v10044_v32 = vpop.eup %10043  ;;  %v5798_v3 = vmul.f32 1.442695, %v5673_v58  ;;  %v13822_v17 = vadd.f32 %v9507_v6, %v13479_v63  ;;  %v5308_v12 = vpop.f32.mrb[201].mxu1  ;;  %v5952_v11 = vsel %vm5592_vm7, %v13757_v31, %v7849_v61 }
 0x50e   :  { %v10046_v52 = vpop.eup %10045  ;;  %v7852_v14 = vadd.f32 -1.0, %v10044_v32  ;;  %v5796_v43 = vmul.f32 1.442695, %v5672_v0  ;;  %v13827_v57 = vadd.f32 %v13479_v63, %v5308_v12  ;;  %9606 = vmatprep.mubr.msk.f32.mxu0 %vm5991_vm0, %v5952_v11  ;;  %v13838_v63 = vld [vmem:[%s14814_s4] ss:$0 sm:$0xff] }
 0x50f   :  { %10055 = vpow2.f32 %v5798_v3  ;;  %v5675_v53 = vmin.f32 %v13822_v17, 0.0  ;;  %9607 = vmatmul.mubr.msk.f32.gmra.mrb[80].mxu0 %vm5991_vm0, %v5953_v62  ;;  %v7851_v44 = vadd.f32 -1.0, %v10046_v52  ;;  %vm5603_vm6 = vcmp.gt.f32.partialorder %v13822_v17, 0.0 }
 0x510   :  { %10057 = vpow2.f32 %v5796_v43  ;;  %v5674_v31 = vmin.f32 %v13827_v57, 0.0  ;;  %v9510_v49 = vpop.f32.mrb[202].mxu1  ;;  %v5955_v47 = vsel %vm5595_vm9, %v13766_v23, %v7852_v14  ;;  %vm5602_vm5 = vcmp.gt.f32.partialorder %v13827_v57, 0.0 }
 0x511   :  { %v10048_v59 = vpop.eup %10047  ;;  %v5802_v37 = vmul.f32 1.442695, %v5675_v53  ;;  %v13841_v60 = vadd.f32 %v13838_v63, %v9510_v49  ;;  %v5318_v13 = vpop.f32.mrb[203].mxu1  ;;  %v5954_v42 = vsel %vm5594_vm8, %v13771_v20, %v7851_v44 }
 0x512   :  { %v10050_v22 = vpop.eup %10049  ;;  %v7854_v25 = vadd.f32 -1.0, %v10048_v59  ;;  %v5800_v50 = vmul.f32 1.442695, %v5674_v31  ;;  %v13846_v24 = vadd.f32 %v13838_v63, %v5318_v13  ;;  %9609 = vmatprep.mubr.msk.f32.mxu0 %vm5991_vm0, %v5954_v42 }
 0x513   :  { %10059 = vpow2.f32 %v5802_v37  ;;  %v5677_v9 = vmin.f32 %v13841_v60, 0.0  ;;  %9610 = vmatmul.mubr.msk.f32.gmra.mrb[82].mxu0 %vm5991_vm0, %v5955_v47  ;;  %v7853_v27 = vadd.f32 -1.0, %v10050_v22  ;;  %vm5605_vm4 = vcmp.gt.f32.partialorder %v13841_v60, 0.0 }
 0x514   :  { %10061 = vpow2.f32 %v5800_v50  ;;  %v5676_v20 = vmin.f32 %v13846_v24, 0.0  ;;  %v9513_v18 = vpop.f32.mrb[204].mxu1  ;;  %v5957_v54 = vsel %vm5597_vm11, %v13780_v46, %v7854_v25  ;;  %vm5604_vm3 = vcmp.gt.f32.partialorder %v13846_v24, 0.0 }
 0x515   :  { %v10052_v23 = vpop.eup %10051  ;;  %v5806_v21 = vmul.f32 1.442695, %v5677_v9  ;;  %v13855_v34 = vadd.f32 %v13838_v63, %v9513_v18  ;;  %v5328_v48 = vpop.f32.mrb[205].mxu1  ;;  %v5956_v38 = vsel %vm5596_vm10, %v13785_v28, %v7853_v27 }
 0x516   :  { %v10054_v41 = vpop.eup %10053  ;;  %v7856_v45 = vadd.f32 -1.0, %v10052_v23  ;;  %v5804_v39 = vmul.f32 1.442695, %v5676_v20  ;;  %v13860_v8 = vadd.f32 %v13838_v63, %v5328_v48  ;;  %9612 = vmatprep.mubr.msk.f32.mxu0 %vm5991_vm0, %v5956_v38 }
 0x517   :  { %10063 = vpow2.f32 %v5806_v21  ;;  %v5679_v56 = vmin.f32 %v13855_v34, 0.0  ;;  %9613 = vmatmul.mubr.msk.f32.gmra.mrb[84].mxu0 %vm5991_vm0, %v5957_v54  ;;  %v7855_v55 = vadd.f32 -1.0, %v10054_v41  ;;  %vm5607_vm2 = vcmp.gt.f32.partialorder %v13855_v34, 0.0 }
 0x518   :  { %10065 = vpow2.f32 %v5804_v39  ;;  %v5678_v28 = vmin.f32 %v13860_v8, 0.0  ;;  %v9516_v10 = vpop.f32.mrb[206].mxu1  ;;  %v5959_v5 = vsel %vm5599_vm13, %v13794_v29, %v7856_v45  ;;  %vm5606_vm7 = vcmp.gt.f32.partialorder %v13860_v8, 0.0 }
 0x519   :  { %v10056_v46 = vpop.eup %10055  ;;  %v5810_v36 = vmul.f32 1.442695, %v5679_v56  ;;  %v13869_v4 = vadd.f32 %v13838_v63, %v9516_v10  ;;  %v5338_v2 = vpop.f32.mrb[207].mxu1  ;;  %v5958_v1 = vsel %vm5598_vm12, %v13799_v15, %v7855_v55 }
 0x51a   :  { %v10058_v40 = vpop.eup %10057  ;;  %v7858_v30 = vadd.f32 -1.0, %v10056_v46  ;;  %v5808_v19 = vmul.f32 1.442695, %v5678_v28  ;;  %v13874_v26 = vadd.f32 %v13838_v63, %v5338_v2  ;;  %9615 = vmatprep.mubr.msk.f32.mxu0 %vm5991_vm0, %v5958_v1 }
 0x51b   :  { %10067 = vpow2.f32 %v5810_v36  ;;  %v5681_v33 = vmin.f32 %v13869_v4, 0.0  ;;  %9616 = vmatmul.mubr.msk.f32.gmra.mrb[86].mxu0 %vm5991_vm0, %v5959_v5  ;;  %v7857_v51 = vadd.f32 -1.0, %v10058_v40  ;;  %vm5609_vm9 = vcmp.gt.f32.partialorder %v13869_v4, 0.0 }
 0x51c   :  { %10069 = vpow2.f32 %v5808_v19  ;;  %v5680_v15 = vmin.f32 %v13874_v26, 0.0  ;;  %v9519_v7 = vpop.f32.mrb[208].mxu1  ;;  %v5961_v3 = vsel %vm5601_vm15, %v13808_v16, %v7858_v30  ;;  %vm5608_vm8 = vcmp.gt.f32.partialorder %v13874_v26, 0.0 }
 0x51d   :  { %v10060_v29 = vpop.eup %10059  ;;  %v5814_v58 = vmul.f32 1.442695, %v5681_v33  ;;  %v13883_v61 = vadd.f32 %v13838_v63, %v9519_v7  ;;  %v5348_v0 = vpop.f32.mrb[209].mxu1  ;;  %v5960_v6 = vsel %vm5600_vm14, %v13813_v35, %v7857_v51 }
 0x51e   :  { %v10062_v32 = vpop.eup %10061  ;;  %v7860_v12 = vadd.f32 -1.0, %v10060_v29  ;;  %v5812_v11 = vmul.f32 1.442695, %v5680_v15  ;;  %v13888_v52 = vadd.f32 %v13838_v63, %v5348_v0  ;;  %9618 = vmatprep.mubr.msk.f32.mxu0 %vm5991_vm0, %v5960_v6 }
 0x51f   :  { %10071 = vpow2.f32 %v5814_v58  ;;  %v5683_v62 = vmin.f32 %v13883_v61, 0.0  ;;  %9619 = vmatmul.mubr.msk.f32.gmra.mrb[88].mxu0 %vm5991_vm0, %v5961_v3  ;;  %v7859_v14 = vadd.f32 -1.0, %v10062_v32  ;;  %vm5611_vm11 = vcmp.gt.f32.partialorder %v13883_v61, 0.0 }
 0x520   :  { %10073 = vpow2.f32 %v5812_v11  ;;  %v5682_v35 = vmin.f32 %v13888_v52, 0.0  ;;  %v9522_v43 = vpop.f32.mrb[210].mxu1  ;;  %v5963_v37 = vsel %vm5603_vm6, %v13822_v17, %v7860_v12  ;;  %vm5610_vm10 = vcmp.gt.f32.partialorder %v13888_v52, 0.0 }
 0x521   :  { %v10064_v16 = vpop.eup %10063  ;;  %v5818_v53 = vmul.f32 1.442695, %v5683_v62  ;;  %v13897_v44 = vadd.f32 %v13838_v63, %v9522_v43  ;;  %v5358_v31 = vpop.f32.mrb[211].mxu1  ;;  %v5962_v49 = vsel %vm5602_vm5, %v13827_v57, %v7859_v14 }
 0x522   :  { %v10066_v59 = vpop.eup %10065  ;;  %v7862_v13 = vadd.f32 -1.0, %v10064_v16  ;;  %v5816_v42 = vmul.f32 1.442695, %v5682_v35  ;;  %v13902_v22 = vadd.f32 %v13838_v63, %v5358_v31  ;;  %9621 = vmatprep.mubr.msk.f32.mxu0 %vm5991_vm0, %v5962_v49 }
 0x523   :  { %10075 = vpow2.f32 %v5818_v53  ;;  %v5685_v47 = vmin.f32 %v13897_v44, 0.0  ;;  %9622 = vmatmul.mubr.msk.f32.gmra.mrb[90].mxu0 %vm5991_vm0, %v5963_v37  ;;  %v7861_v25 = vadd.f32 -1.0, %v10066_v59  ;;  %vm5613_vm13 = vcmp.gt.f32.partialorder %v13897_v44, 0.0 }
 0x524   :  { %10077 = vpow2.f32 %v5816_v42  ;;  %v5684_v57 = vmin.f32 %v13902_v22, 0.0  ;;  %v9525_v50 = vpop.f32.mrb[212].mxu1  ;;  %v5965_v21 = vsel %vm5605_vm4, %v13841_v60, %v7862_v13  ;;  %vm5612_vm12 = vcmp.gt.f32.partialorder %v13902_v22, 0.0 }
 0x525   :  { %v10068_v17 = vpop.eup %10067  ;;  %v5822_v9 = vmul.f32 1.442695, %v5685_v47  ;;  %v13911_v27 = vadd.f32 %v13838_v63, %v9525_v50  ;;  %v5368_v20 = vpop.f32.mrb[213].mxu1  ;;  %v5964_v18 = vsel %vm5604_vm3, %v13846_v24, %v7861_v25 }
 0x526   :  { %v10070_v23 = vpop.eup %10069  ;;  %v7864_v48 = vadd.f32 -1.0, %v10068_v17  ;;  %v5820_v38 = vmul.f32 1.442695, %v5684_v57  ;;  %v13916_v41 = vadd.f32 %v13838_v63, %v5368_v20  ;;  %9624 = vmatprep.mubr.msk.f32.mxu0 %vm5991_vm0, %v5964_v18 }
 0x527   :  { %10079 = vpow2.f32 %v5822_v9  ;;  %v5687_v54 = vmin.f32 %v13911_v27, 0.0  ;;  %9625 = vmatmul.mubr.msk.f32.gmra.mrb[92].mxu0 %vm5991_vm0, %v5965_v21  ;;  %v7863_v45 = vadd.f32 -1.0, %v10070_v23  ;;  %vm5615_vm15 = vcmp.gt.f32.partialorder %v13911_v27, 0.0  ;;  %v13978_v23 = vld [vmem:[%s14815_s6] ss:$0 sm:$0xff] }
 0x528   :  { %10081 = vpow2.f32 %v5820_v38  ;;  %v5686_v24 = vmin.f32 %v13916_v41, 0.0  ;;  %v9528_v39 = vpop.f32.mrb[214].mxu1  ;;  %v5967_v36 = vsel %vm5607_vm2, %v13855_v34, %v7864_v48  ;;  %vm5614_vm14 = vcmp.gt.f32.partialorder %v13916_v41, 0.0 }
 0x529   :  { %v10072_v60 = vpop.eup %10071  ;;  %v5826_v56 = vmul.f32 1.442695, %v5687_v54  ;;  %v13925_v55 = vadd.f32 %v13838_v63, %v9528_v39  ;;  %v5378_v28 = vpop.f32.mrb[215].mxu1  ;;  %v5966_v10 = vsel %vm5606_vm7, %v13860_v8, %v7863_v45  ;;  %v15158_v54 = vld [vmem:[#allocation33_spill] sm:$0xff] }
 0x52a   :  { %v10074_v46 = vpop.eup %10073  ;;  %v7866_v2 = vadd.f32 -1.0, %v10072_v60  ;;  %v5824_v1 = vmul.f32 1.442695, %v5686_v24  ;;  %v13930_v40 = vadd.f32 %v13838_v63, %v5378_v28  ;;  %9627 = vmatprep.mubr.msk.f32.mxu0 %vm5991_vm0, %v5966_v10  ;;  %v15159_v24 = vld [vmem:[#allocation31_spill] sm:$0xff] }
 0x52b   :  { %10083 = vpow2.f32 %v5826_v56  ;;  %v5689_v5 = vmin.f32 %v13925_v55, 0.0  ;;  %9628 = vmatmul.mubr.msk.f32.gmra.mrb[94].mxu0 %vm5991_vm0, %v5967_v36  ;;  %v7865_v30 = vadd.f32 -1.0, %v10074_v46  ;;  %vm5617_vm6 = vcmp.gt.f32.partialorder %v13925_v55, 0.0 }
 0x52c   :  { %10085 = vpow2.f32 %v5824_v1  ;;  %v5688_v8 = vmin.f32 %v13930_v40, 0.0  ;;  %v9531_v19 = vpop.f32.mrb[216].mxu1  ;;  %v5969_v58 = vsel %vm5609_vm9, %v13869_v4, %v7866_v2  ;;  %vm5616_vm5 = vcmp.gt.f32.partialorder %v13930_v40, 0.0  ;;  %v15160_v2 = vld [vmem:[#allocation35_spill] sm:$0xff] }
 0x52d   :  { %v10076_v34 = vpop.eup %10075  ;;  %v5830_v33 = vmul.f32 1.442695, %v5689_v5  ;;  %v13939_v51 = vadd.f32 %v13838_v63, %v9531_v19  ;;  %v5388_v15 = vpop.f32.mrb[217].mxu1  ;;  %v5968_v7 = vsel %vm5608_vm8, %v13874_v26, %v7865_v30  ;;  %v15161_v5 = vld [vmem:[#allocation34_spill] sm:$0xff] }
 0x52e   :  { %v10078_v29 = vpop.eup %10077  ;;  %v7868_v0 = vadd.f32 -1.0, %v10076_v34  ;;  %v5828_v6 = vmul.f32 1.442695, %v5688_v8  ;;  %v5546_v32 = vadd.f32 %v13838_v63, %v5388_v15  ;;  %9630 = vmatprep.mubr.msk.f32.mxu0 %vm5991_vm0, %v5968_v7 }
 0x52f   :  { %10087 = vpow2.f32 %v5830_v33  ;;  %v5691_v3 = vmin.f32 %v13939_v51, 0.0  ;;  %9631 = vmatmul.mubr.msk.f32.gmra.mrb[96].mxu0 %vm5991_vm0, %v5969_v58  ;;  %v7867_v12 = vadd.f32 -1.0, %v10078_v29  ;;  %vm5619_vm4 = vcmp.gt.f32.partialorder %v13939_v51, 0.0  ;;  %v15162_v29 = vld [vmem:[#allocation37_spill] sm:$0xff] }
 0x530   :  { %10089 = vpow2.f32 %v5828_v6  ;;  %v5690_v11 = vmin.f32 %v5546_v32, 0.0  ;;  %v5971_v63 = vsel %vm5611_vm11, %v13883_v61, %v7868_v0  ;;  %vm5618_vm3 = vcmp.gt.f32.partialorder %v5546_v32, 0.0  ;;  %v15163_v6 = vld [vmem:[#allocation36_spill] sm:$0xff] }
 0x531   :  { %v10080_v26 = vpop.eup %10079  ;;  %v5834_v4 = vmul.f32 1.442695, %v5691_v3  ;;  %v5970_v62 = vsel %vm5610_vm10, %v13888_v52, %v7867_v12 }
 0x532   :  { %v10082_v14 = vpop.eup %10081  ;;  %v7870_v35 = vadd.f32 -1.0, %v10080_v26  ;;  %v5832_v43 = vmul.f32 1.442695, %v5690_v11  ;;  %9633 = vmatprep.mubr.msk.f32.mxu0 %vm5991_vm0, %v5970_v62 }
 0x533   :  { %10091 = vpow2.f32 %v5834_v4  ;;  %9634 = vmatmul.mubr.msk.f32.gmra.mrb[98].mxu0 %vm5991_vm0, %v5971_v63  ;;  %v7869_v16 = vadd.f32 -1.0, %v10082_v14  ;;  %v15164_v63 = vld [vmem:[#allocation39_spill] sm:$0xff] }
 0x534   :  { %10093 = vpow2.f32 %v5832_v43  ;;  %v5973_v49 = vsel %vm5613_vm13, %v13897_v44, %v7870_v35 }
 0x535   :  { %v10084_v53 = vpop.eup %10083  ;;  %v5972_v31 = vsel %vm5612_vm12, %v13902_v22, %v7869_v16  ;;  %v15165_v16 = vld [vmem:[#allocation38_spill] sm:$0xff] }
 0x536   :  { %v10086_v52 = vpop.eup %10085  ;;  %v7872_v61 = vadd.f32 -1.0, %v10084_v53  ;;  %9636 = vmatprep.mubr.msk.f32.mxu0 %vm5991_vm0, %v5972_v31 }
 0x537   :  { %9637 = vmatmul.mubr.msk.f32.gmra.mrb[100].mxu0 %vm5991_vm0, %v5973_v49  ;;  %v7871_v59 = vadd.f32 -1.0, %v10086_v52 }
 0x538   :  { %v5975_v47 = vsel %vm5615_vm15, %v13911_v27, %v7872_v61 }
 0x539   :  { %v10088_v37 = vpop.eup %10087  ;;  %v5974_v13 = vsel %vm5614_vm14, %v13916_v41, %v7871_v59 }
 0x53a   :  { %v10090_v42 = vpop.eup %10089  ;;  %v7874_v22 = vadd.f32 -1.0, %v10088_v37  ;;  %9639 = vmatprep.mubr.msk.f32.mxu0 %vm5991_vm0, %v5974_v13 }
 0x53b   :  { %9640 = vmatmul.mubr.msk.f32.gmra.mrb[102].mxu0 %vm5991_vm0, %v5975_v47  ;;  %v7873_v44 = vadd.f32 -1.0, %v10090_v42  ;;  %v15166_v47 = vld [vmem:[#allocation41_spill] sm:$0xff] }
 0x53c   :  { %v5977_v17 = vsel %vm5617_vm6, %v13925_v55, %v7874_v22 }
 0x53d   :  { %v10092_v25 = vpop.eup %10091  ;;  %v5976_v57 = vsel %vm5616_vm5, %v13930_v40, %v7873_v44 }
 0x53e   :  { %v10094_v50 = vpop.eup %10093  ;;  %v7876_v9 = vadd.f32 -1.0, %v10092_v25  ;;  %9642 = vmatprep.mubr.msk.f32.mxu0 %vm5991_vm0, %v5976_v57 }
 0x53f   :  { %9643 = vmatmul.mubr.msk.f32.gmra.mrb[104].mxu0 %vm5991_vm0, %v5977_v17  ;;  %v7875_v27 = vadd.f32 -1.0, %v10094_v50  ;;  %v15167_v50 = vld [vmem:[#allocation40_spill] sm:$0xff] }
 0x540   :  { %v5979_v18 = vsel %vm5619_vm4, %v13939_v51, %v7876_v9 }
 0x541   :  { %v5978_v20 = vsel %vm5618_vm3, %v5546_v32, %v7875_v27 }
 0x542   :  { %9645 = vmatprep.mubr.msk.f32.mxu0 %vm5991_vm0, %v5978_v20 }
 0x543   :  { %9646 = vmatmul.mubr.msk.f32.gmra.mrb[106].mxu0 %vm5991_vm0, %v5979_v18 }
 0x58a   :  { %v9542_v21 = vpop.f32.mrb[36].mxu0 }
 0x58b   :  { %v6280_v48 = vadd.f32 %v9542_v21, %v13978_v23  ;;  %v6274_v38 = vpop.f32.mrb[37].mxu0 }
 0x58c   :  { %v6275_v41 = vadd.f32 %v13978_v23, %v6274_v38 }
 0x58d   :  { %v6706_v45 = vadd.f32 %v6280_v48, %v15158_v54 }
 0x58e   :  { %v13984_v39 = vadd.f32 %v6275_v41, %v15159_v24  ;;  %v9545_v60 = vpop.f32.mrb[38].mxu0 }
 0x58f   :  { %v6850_v56 = vmin.f32 %v6706_v45, 0.0  ;;  %v6290_v55 = vadd.f32 %v9545_v60, %v13978_v23  ;;  %v6284_v28 = vpop.f32.mrb[39].mxu0  ;;  %vm6778_vm0 = vcmp.gt.f32.partialorder %v6706_v45, 0.0 }
 0x590   :  { %v6849_v10 = vmin.f32 %v13984_v39, 0.0  ;;  %v6285_v46 = vadd.f32 %v13978_v23, %v6284_v28  ;;  %vm6777_vm7 = vcmp.gt.f32.partialorder %v13984_v39, 0.0 }
 0x591   :  { %v6923_v36 = vmul.f32 1.442695, %v6850_v56  ;;  %v13990_v1 = vadd.f32 %v6290_v55, %v15160_v2 }
 0x592   :  { %v6921_v40 = vmul.f32 1.442695, %v6849_v10  ;;  %v13993_v30 = vadd.f32 %v6285_v46, %v15161_v5  ;;  %v9548_v8 = vpop.f32.mrb[40].mxu0 }
 0x593   :  { %10095 = vpow2.f32 %v6923_v36  ;;  %v6852_v19 = vmin.f32 %v13990_v1, 0.0  ;;  %v6300_v34 = vadd.f32 %v9548_v8, %v13978_v23  ;;  %v6294_v33 = vpop.f32.mrb[41].mxu0  ;;  %vm6780_vm2 = vcmp.gt.f32.partialorder %v13990_v1, 0.0  ;;  %v15169_v36 = vld [vmem:[#allocation42_spill] sm:$0xff] }
 0x594   :  { %10097 = vpow2.f32 %v6921_v40  ;;  %v6851_v51 = vmin.f32 %v13993_v30, 0.0  ;;  %v6295_v15 = vadd.f32 %v13978_v23, %v6294_v33  ;;  %vm6779_vm8 = vcmp.gt.f32.partialorder %v13993_v30, 0.0 }
 0x595   :  { %v6927_v7 = vmul.f32 1.442695, %v6852_v19  ;;  %v14000_v58 = vadd.f32 %v6300_v34, %v15162_v29  ;;  %v15170_v29 = vld [vmem:[#allocation45_spill] sm:$0xff] }
 0x596   :  { %v6925_v0 = vmul.f32 1.442695, %v6851_v51  ;;  %v14003_v32 = vadd.f32 %v6295_v15, %v15163_v6  ;;  %v9551_v3 = vpop.f32.mrb[42].mxu0  ;;  %v15171_v6 = vld [vmem:[#allocation44_spill] sm:$0xff] }
 0x597   :  { %10099 = vpow2.f32 %v6927_v7  ;;  %v6854_v12 = vmin.f32 %v14000_v58, 0.0  ;;  %v6310_v11 = vadd.f32 %v9551_v3, %v13978_v23  ;;  %v6304_v26 = vpop.f32.mrb[43].mxu0  ;;  %vm6782_vm9 = vcmp.gt.f32.partialorder %v14000_v58, 0.0 }
 0x598   :  { %10101 = vpow2.f32 %v6925_v0  ;;  %v6853_v4 = vmin.f32 %v14003_v32, 0.0  ;;  %v6305_v62 = vadd.f32 %v13978_v23, %v6304_v26  ;;  %vm6781_vm10 = vcmp.gt.f32.partialorder %v14003_v32, 0.0 }
 0x599   :  { %v6931_v14 = vmul.f32 1.442695, %v6854_v12  ;;  %v14010_v35 = vadd.f32 %v6310_v11, %v15164_v63 }
 0x59a   :  { %v6929_v43 = vmul.f32 1.442695, %v6853_v4  ;;  %v14013_v53 = vadd.f32 %v6305_v62, %v15165_v16  ;;  %v9554_v31 = vpop.f32.mrb[44].mxu0 }
 0x59b   :  { %10103 = vpow2.f32 %v6931_v14  ;;  %v6856_v52 = vmin.f32 %v14010_v35, 0.0  ;;  %v6320_v49 = vadd.f32 %v9554_v31, %v13978_v23  ;;  %v6314_v61 = vpop.f32.mrb[45].mxu0  ;;  %vm6784_vm11 = vcmp.gt.f32.partialorder %v14010_v35, 0.0 }
 0x59c   :  { %10105 = vpow2.f32 %v6929_v43  ;;  %v6855_v59 = vmin.f32 %v14013_v53, 0.0  ;;  %v6315_v37 = vadd.f32 %v13978_v23, %v6314_v61  ;;  %v15172_v61 = vld [vmem:[#allocation47_spill] sm:$0xff]  ;;  %vm6783_vm12 = vcmp.gt.f32.partialorder %v14013_v53, 0.0 }
 0x59d   :  { %v10096_v13 = vpop.eup %10095  ;;  %v6935_v42 = vmul.f32 1.442695, %v6856_v52  ;;  %v14020_v22 = vadd.f32 %v6320_v49, %v15166_v47 }
 0x59e   :  { %v10098_v44 = vpop.eup %10097  ;;  %v7951_v25 = vadd.f32 -1.0, %v10096_v13  ;;  %v6933_v57 = vmul.f32 1.442695, %v6855_v59  ;;  %v14023_v17 = vadd.f32 %v6315_v37, %v15167_v50  ;;  %v9557_v9 = vpop.f32.mrb[46].mxu0 }
 0x59f   :  { %v7950_v27 = vadd.f32 -1.0, %v10098_v44  ;;  %10107 = vpow2.f32 %v6935_v42  ;;  %v6858_v20 = vmin.f32 %v14020_v22, 0.0  ;;  %v6324_v18 = vpop.f32.mrb[47].mxu0  ;;  %v6330_v24 = vadd.f32 %v9557_v9, %v13978_v23 }
 0x5a0   :  { %v7138_v21 = vsel %vm6778_vm0, %v6706_v45, %v7951_v25  ;;  %10109 = vpow2.f32 %v6933_v57  ;;  %v6857_v48 = vmin.f32 %v14023_v17, 0.0  ;;  %v6325_v60 = vadd.f32 %v13978_v23, %v6324_v18  ;;  %v15174_v18 = vld [vmem:[#allocation49_spill] sm:$0xff] }
 0x5a1   :  { %v10100_v38 = vpop.eup %10099  ;;  %7210 = vst.msk [vmem:[%s14816_s8 + $0x8] sm:$0xff] %vm324_vm1, %v7138_v21  ;;  %v7137_v41 = vsel %vm6777_vm7, %v13984_v39, %v7950_v27  ;;  %v6939_v54 = vmul.f32 1.442695, %v6858_v20  ;;  %v15168_v39 = vld [vmem:[#allocation43_spill] sm:$0xff]  ;;  %v15173_v27 = vld [vmem:[#allocation46_spill] sm:$0xff]  ;;  %vm6786_vm13 = vcmp.gt.f32.partialorder %v14020_v22, 0.0 }
 0x5a2   :  { %v10102_v56 = vpop.eup %10101  ;;  %7209 = vst.msk [vmem:[%s14816_s8] sm:$0xff] %vm324_vm1, %v7137_v41  ;;  %v7953_v45 = vadd.f32 -1.0, %v10100_v38  ;;  %v6937_v55 = vmul.f32 1.442695, %v6857_v48  ;;  %v9560_v28 = vpop.f32.mrb[48].mxu0  ;;  %v14042_v46 = vadd.f32 %v6330_v24, %v15168_v39  ;;  %v14045_v2 = vadd.f32 %v6325_v60, %v15169_v36 }
 0x5a3   :  { %v7952_v10 = vadd.f32 -1.0, %v10102_v56  ;;  %10111 = vpow2.f32 %v6939_v54  ;;  %v6334_v40 = vpop.f32.mrb[49].mxu0  ;;  %v6340_v8 = vadd.f32 %v9560_v28, %v13978_v23  ;;  %vm6785_vm14 = vcmp.gt.f32.partialorder %v14023_v17, 0.0 }
 0x5a4   :  { %v7140_v5 = vsel %vm6780_vm2, %v13990_v1, %v7953_v45  ;;  %10113 = vpow2.f32 %v6937_v55  ;;  %v6335_v19 = vadd.f32 %v13978_v23, %v6334_v40  ;;  %v6860_v51 = vmin.f32 %v14042_v46, 0.0  ;;  %v15175_v55 = vld [vmem:[#allocation48_spill] sm:$0xff] }
 0x5a5   :  { %v10104_v34 = vpop.eup %10103  ;;  %7212 = vst.msk [vmem:[%s14816_s8 + $0x18] sm:$0xff] %vm324_vm1, %v7140_v5  ;;  %v7139_v33 = vsel %vm6779_vm8, %v13993_v30, %v7952_v10  ;;  %v6859_v7 = vmin.f32 %v14045_v2, 0.0  ;;  %v14062_v0 = vadd.f32 %v6340_v8, %v15170_v29  ;;  %vm6788_vm15 = vcmp.gt.f32.partialorder %v14042_v46, 0.0 }
 0x5a6   :  { %v10106_v15 = vpop.eup %10105  ;;  %7211 = vst.msk [vmem:[%s14816_s8 + $0x10] sm:$0xff] %vm324_vm1, %v7139_v33  ;;  %v7955_v1 = vadd.f32 -1.0, %v10104_v34  ;;  %v14065_v3 = vadd.f32 %v6335_v19, %v15171_v6  ;;  %v9563_v12 = vpop.f32.mrb[50].mxu0  ;;  %v6943_v11 = vmul.f32 1.442695, %v6860_v51  ;;  %v15176_v34 = vld [vmem:[#allocation51_spill] sm:$0xff] }
 0x5a7   :  { %v7954_v30 = vadd.f32 -1.0, %v10106_v15  ;;  %v6350_v26 = vadd.f32 %v9563_v12, %v13978_v23  ;;  %v6344_v4 = vpop.f32.mrb[51].mxu0  ;;  %v6941_v14 = vmul.f32 1.442695, %v6859_v7  ;;  %v6862_v63 = vmin.f32 %v14062_v0, 0.0 }
 0x5a8   :  { %v7142_v62 = vsel %vm6782_vm9, %v14000_v58, %v7955_v1  ;;  %10115 = vpow2.f32 %v6943_v11  ;;  %v6861_v31 = vmin.f32 %v14065_v3, 0.0  ;;  %v6345_v42 = vadd.f32 %v13978_v23, %v6344_v4 }
 0x5a9   :  { %v10108_v43 = vpop.eup %10107  ;;  %7214 = vst.msk [vmem:[%s14816_s8 + $0x28] sm:$0xff] %vm324_vm1, %v7142_v62  ;;  %v7141_v16 = vsel %vm6781_vm10, %v14003_v32, %v7954_v30  ;;  %10117 = vpow2.f32 %v6941_v14  ;;  %v6947_v49 = vmul.f32 1.442695, %v6862_v63  ;;  %v14084_v59 = vadd.f32 %v6350_v26, %v15172_v61  ;;  %v15178_v14 = vld [vmem:[#allocation53_spill] sm:$0xff] }
 0x5aa   :  { %v10110_v52 = vpop.eup %10109  ;;  %7213 = vst.msk [vmem:[%s14816_s8 + $0x20] sm:$0xff] %vm324_vm1, %v7141_v16  ;;  %v7957_v58 = vadd.f32 -1.0, %v10108_v43  ;;  %v9566_v37 = vpop.f32.mrb[52].mxu0  ;;  %v6945_v32 = vmul.f32 1.442695, %v6861_v31  ;;  %v14097_v20 = vadd.f32 %v6345_v42, %v15173_v27  ;;  %vm6787_vm5 = vcmp.gt.f32.partialorder %v14045_v2, 0.0 }
 0x5ab   :  { %v7956_v13 = vadd.f32 -1.0, %v10110_v52  ;;  %v6360_v47 = vadd.f32 %v9566_v37, %v13978_v23  ;;  %v6354_v44 = vpop.f32.mrb[53].mxu0  ;;  %10119 = vpow2.f32 %v6947_v49  ;;  %v6864_v57 = vmin.f32 %v14084_v59, 0.0  ;;  %v15179_v49 = vld [vmem:[#allocation52_spill] sm:$0xff] }
 0x5ac   :  { %v7144_v25 = vsel %vm6784_vm11, %v14010_v35, %v7957_v58  ;;  %10121 = vpow2.f32 %v6945_v32  ;;  %v6355_v41 = vadd.f32 %v13978_v23, %v6354_v44  ;;  %v6863_v24 = vmin.f32 %v14097_v20, 0.0 }
 0x5ad   :  { %v10112_v50 = vpop.eup %10111  ;;  %7216 = vst.msk [vmem:[%s14816_s8 + $0x38] sm:$0xff] %vm324_vm1, %v7144_v25  ;;  %v7143_v9 = vsel %vm6783_vm12, %v14013_v53, %v7956_v13  ;;  %v14100_v21 = vadd.f32 %v6360_v47, %v15174_v18  ;;  %v6951_v38 = vmul.f32 1.442695, %v6864_v57  ;;  %vm6790_vm6 = vcmp.gt.f32.partialorder %v14062_v0, 0.0 }
 0x5ae   :  { %v10114_v35 = vpop.eup %10113  ;;  %7215 = vst.msk [vmem:[%s14816_s8 + $0x30] sm:$0xff] %vm324_vm1, %v7143_v9  ;;  %v7959_v48 = vadd.f32 -1.0, %v10112_v50  ;;  %v9569_v54 = vpop.f32.mrb[54].mxu0  ;;  %v14113_v28 = vadd.f32 %v6355_v41, %v15175_v55  ;;  %v6949_v39 = vmul.f32 1.442695, %v6863_v24  ;;  %vm6789_vm3 = vcmp.gt.f32.partialorder %v14065_v3, 0.0 }
 0x5af   :  { %v7958_v53 = vadd.f32 -1.0, %v10114_v35  ;;  %v6364_v60 = vpop.f32.mrb[55].mxu0  ;;  %10123 = vpow2.f32 %v6951_v38  ;;  %v6866_v45 = vmin.f32 %v14100_v21, 0.0  ;;  %v6370_v36 = vadd.f32 %v9569_v54, %v13978_v23 }
 0x5b0   :  { %v7146_v56 = vsel %vm6786_vm13, %v14020_v22, %v7959_v48  ;;  %v6365_v40 = vadd.f32 %v13978_v23, %v6364_v60  ;;  %v6865_v5 = vmin.f32 %v14113_v28, 0.0  ;;  %10125 = vpow2.f32 %v6949_v39  ;;  %v15182_v60 = vld [vmem:[#allocation57_spill] sm:$0xff]  ;;  %v15183_v39 = vld [vmem:[#allocation56_spill] sm:$0xff] }
 0x5b1   :  { %7218 = vst.msk [vmem:[%s14816_s8 + $0x48] sm:$0xff] %vm324_vm1, %v7146_v56  ;;  %v7145_v10 = vsel %vm6785_vm14, %v14023_v17, %v7958_v53  ;;  %v6955_v22 = vmul.f32 1.442695, %v6866_v45  ;;  %v14128_v33 = vadd.f32 %v6370_v36, %v15176_v34  ;;  %v15177_v17 = vld [vmem:[#allocation50_spill] sm:$0xff]  ;;  %vm6792_vm4 = vcmp.gt.f32.partialorder %v14084_v59, 0.0 }
 0x5b2   :  { %7217 = vst.msk [vmem:[%s14816_s8 + $0x40] sm:$0xff] %vm324_vm1, %v7145_v10  ;;  %v9572_v8 = vpop.f32.mrb[56].mxu0  ;;  %v10116_v19 = vpop.eup %10115  ;;  %v14131_v51 = vadd.f32 %v6365_v40, %v15177_v17  ;;  %v6953_v6 = vmul.f32 1.442695, %v6865_v5  ;;  %v15181_v53 = vld [vmem:[#allocation54_spill] sm:$0xff]  ;;  %vm6791_vm0 = vcmp.gt.f32.partialorder %v14097_v20, 0.0 }
 0x5b3   :  { %v6380_v15 = vadd.f32 %v9572_v8, %v13978_v23  ;;  %v6374_v1 = vpop.f32.mrb[57].mxu0  ;;  %v10118_v7 = vpop.eup %10117  ;;  %v7961_v29 = vadd.f32 -1.0, %v10116_v19  ;;  %10127 = vpow2.f32 %v6955_v22  ;;  %v6868_v11 = vmin.f32 %v14128_v33, 0.0 }
 0x5b4   :  { %v6375_v12 = vadd.f32 %v13978_v23, %v6374_v1  ;;  %v7960_v30 = vadd.f32 -1.0, %v10118_v7  ;;  %10129 = vpow2.f32 %v6953_v6  ;;  %v6867_v62 = vmin.f32 %v14131_v51, 0.0 }
 0x5b5   :  { %v10120_v26 = vpop.eup %10119  ;;  %v7148_v4 = vsel %vm6788_vm15, %v14042_v46, %v7961_v29  ;;  %v14141_v63 = vadd.f32 %v6380_v15, %v15178_v14  ;;  %v6959_v58 = vmul.f32 1.442695, %v6868_v11  ;;  %vm6794_vm7 = vcmp.gt.f32.partialorder %v14100_v21, 0.0 }
 0x5b6   :  { %v9575_v43 = vpop.f32.mrb[58].mxu0  ;;  %v10122_v16 = vpop.eup %10121  ;;  %7220 = vst.msk [vmem:[%s14816_s8 + $0x58] sm:$0xff] %vm324_vm1, %v7148_v4  ;;  %v7147_v31 = vsel %vm6787_vm5, %v14045_v2, %v7960_v30  ;;  %v7963_v52 = vadd.f32 -1.0, %v10120_v26  ;;  %v14149_v61 = vadd.f32 %v6375_v12, %v15179_v49  ;;  %v6957_v13 = vmul.f32 1.442695, %v6867_v62  ;;  %v15186_v49 = vld [vmem:[#allocation61_spill] sm:$0xff] }
 0x5b7   :  { %v6384_v46 = vpop.f32.mrb[59].mxu0  ;;  %7219 = vst.msk [vmem:[%s14816_s8 + $0x50] sm:$0xff] %vm324_vm1, %v7147_v31  ;;  %v7962_v37 = vadd.f32 -1.0, %v10122_v16  ;;  %v6870_v32 = vmin.f32 %v14141_v63, 0.0  ;;  %10131 = vpow2.f32 %v6959_v58  ;;  %v6390_v57 = vadd.f32 %v9575_v43, %v13978_v23  ;;  %v15184_v16 = vld [vmem:[#allocation59_spill] sm:$0xff] }
 0x5b8   :  { %v7150_v42 = vsel %vm6790_vm6, %v14062_v0, %v7963_v52  ;;  %v6869_v2 = vmin.f32 %v14149_v61, 0.0  ;;  %10133 = vpow2.f32 %v6957_v13  ;;  %v6385_v27 = vadd.f32 %v13978_v23, %v6384_v46  ;;  %v15185_v52 = vld [vmem:[#allocation58_spill] sm:$0xff] }
 0x5b9   :  { %v10124_v47 = vpop.eup %10123  ;;  %7222 = vst.msk [vmem:[%s14816_s8 + $0x68] sm:$0xff] %vm324_vm1, %v7150_v42  ;;  %v7149_v44 = vsel %vm6789_vm3, %v14065_v3, %v7962_v37  ;;  %v6963_v25 = vmul.f32 1.442695, %v6870_v32  ;;  %v15180_v3 = vld [vmem:[#allocation55_spill] sm:$0xff]  ;;  %vm6793_vm2 = vcmp.gt.f32.partialorder %v14113_v28, 0.0  ;;  %vm6796_vm8 = vcmp.gt.f32.partialorder %v14128_v33, 0.0 }
 0x5ba   :  { %v9578_v50 = vpop.f32.mrb[60].mxu0  ;;  %7221 = vst.msk [vmem:[%s14816_s8 + $0x60] sm:$0xff] %vm324_vm1, %v7149_v44  ;;  %v7965_v0 = vadd.f32 -1.0, %v10124_v47  ;;  %v6961_v9 = vmul.f32 1.442695, %v6869_v2  ;;  %v14174_v48 = vadd.f32 %v6390_v57, %v15180_v3  ;;  %v10126_v41 = vpop.eup %10125  ;;  %v14179_v24 = vadd.f32 %v6385_v27, %v15181_v53  ;;  %v15187_v27 = vld [vmem:[#allocation60_spill] sm:$0xff] }
 0x5bb   :  { %v6400_v18 = vadd.f32 %v9578_v50, %v13978_v23  ;;  %v6394_v35 = vpop.f32.mrb[61].mxu0  ;;  %10135 = vpow2.f32 %v6963_v25  ;;  %v7964_v55 = vadd.f32 -1.0, %v10126_v41  ;;  %vm6795_vm9 = vcmp.gt.f32.partialorder %v14131_v51, 0.0 }
 0x5bc   :  { %v6395_v38 = vadd.f32 %v13978_v23, %v6394_v35  ;;  %v7152_v54 = vsel %vm6792_vm4, %v14084_v59, %v7965_v0  ;;  %10137 = vpow2.f32 %v6961_v9  ;;  %v6872_v10 = vmin.f32 %v14174_v48, 0.0 }
 0x5bd   :  { %v14182_v56 = vadd.f32 %v6400_v18, %v15182_v60  ;;  %v10128_v45 = vpop.eup %10127  ;;  %7224 = vst.msk [vmem:[%s14816_s8 + $0x78] sm:$0xff] %vm324_vm1, %v7152_v54  ;;  %v6871_v22 = vmin.f32 %v14179_v24, 0.0  ;;  %v7151_v19 = vsel %vm6791_vm0, %v14097_v20, %v7964_v55  ;;  %vm6798_vm10 = vcmp.gt.f32.partialorder %v14141_v63, 0.0  ;;  %v15188_v60 = vld [vmem:[#allocation63_spill] sm:$0xff]  ;;  %v15189_v55 = vld [vmem:[#allocation62_spill] sm:$0xff] }
 0x5be   :  { %v14191_v59 = vadd.f32 %v6395_v38, %v15183_v39  ;;  %v9581_v36 = vpop.f32.mrb[62].mxu0  ;;  %v7967_v40 = vadd.f32 -1.0, %v10128_v45  ;;  %v10130_v8 = vpop.eup %10129  ;;  %v6967_v34 = vmul.f32 1.442695, %v6872_v10  ;;  %7223 = vst.msk [vmem:[%s14816_s8 + $0x70] sm:$0xff] %vm324_vm1, %v7151_v19  ;;  %vm6797_vm11 = vcmp.gt.f32.partialorder %v14149_v61, 0.0 }
 0x5bf   :  { %v6404_v5 = vpop.f32.mrb[63].mxu0  ;;  %v6874_v17 = vmin.f32 %v14182_v56, 0.0  ;;  %v7966_v1 = vadd.f32 -1.0, %v10130_v8  ;;  %v6965_v7 = vmul.f32 1.442695, %v6871_v22  ;;  %v6410_v6 = vadd.f32 %v9581_v36, %v13978_v23 }
 0x5c0   :  { %v7154_v15 = vsel %vm6794_vm7, %v14100_v21, %v7967_v40  ;;  %v6873_v29 = vmin.f32 %v14191_v59, 0.0  ;;  %10139 = vpow2.f32 %v6967_v34  ;;  %v6405_v12 = vadd.f32 %v13978_v23, %v6404_v5 }
 0x5c1   :  { %7226 = vst.msk [vmem:[%s14816_s8 + $0x88] sm:$0xff] %vm324_vm1, %v7154_v15  ;;  %v6971_v20 = vmul.f32 1.442695, %v6874_v17  ;;  %v10132_v11 = vpop.eup %10131  ;;  %v7153_v21 = vsel %vm6793_vm2, %v14113_v28, %v7966_v1  ;;  %10141 = vpow2.f32 %v6965_v7  ;;  %v14220_v31 = vadd.f32 %v6410_v6, %v15184_v16  ;;  %v15190_v1 = vld [vmem:[#allocation65_spill] sm:$0xff] }
 0x5c2   :  { %v9584_v30 = vpop.f32.mrb[64].mxu0  ;;  %v6969_v26 = vmul.f32 1.442695, %v6873_v29  ;;  %v10134_v14 = vpop.eup %10133  ;;  %7225 = vst.msk [vmem:[%s14816_s8 + $0x80] sm:$0xff] %vm324_vm1, %v7153_v21  ;;  %v7969_v43 = vadd.f32 -1.0, %v10132_v11  ;;  %v14223_v58 = vadd.f32 %v6405_v12, %v15185_v52  ;;  %vm6800_vm12 = vcmp.gt.f32.partialorder %v14174_v48, 0.0 }
 0x5c3   :  { %v6420_v4 = vadd.f32 %v9584_v30, %v13978_v23  ;;  %v6414_v62 = vpop.f32.mrb[65].mxu0  ;;  %10143 = vpow2.f32 %v6971_v20  ;;  %v7968_v28 = vadd.f32 -1.0, %v10134_v14  ;;  %v6876_v42 = vmin.f32 %v14220_v31, 0.0  ;;  %v15191_v14 = vld [vmem:[#allocation64_spill] sm:$0xff] }
 0x5c4   :  { %10145 = vpow2.f32 %v6969_v26  ;;  %v6415_v37 = vadd.f32 %v13978_v23, %v6414_v62  ;;  %v7156_v32 = vsel %vm6796_vm8, %v14128_v33, %v7969_v43  ;;  %v6875_v33 = vmin.f32 %v14223_v58, 0.0 }
 0x5c5   :  { %v14226_v46 = vadd.f32 %v6420_v4, %v15186_v49  ;;  %v10136_v13 = vpop.eup %10135  ;;  %7228 = vst.msk [vmem:[%s14816_s8 + $0x98] sm:$0xff] %vm324_vm1, %v7156_v32  ;;  %v7155_v44 = vsel %vm6795_vm9, %v14131_v51, %v7968_v28  ;;  %v6975_v0 = vmul.f32 1.442695, %v6876_v42  ;;  %vm6799_vm13 = vcmp.gt.f32.partialorder %v14179_v24, 0.0  ;;  %v15192_v42 = vld [vmem:[#allocation67_spill] sm:$0xff] }
 0x5c6   :  { %v9587_v2 = vpop.f32.mrb[66].mxu0  ;;  %v10138_v47 = vpop.eup %10137  ;;  %v7971_v25 = vadd.f32 -1.0, %v10136_v13  ;;  %7227 = vst.msk [vmem:[%s14816_s8 + $0x90] sm:$0xff] %vm324_vm1, %v7155_v44  ;;  %v14248_v18 = vadd.f32 %v6415_v37, %v15187_v27  ;;  %v6973_v35 = vmul.f32 1.442695, %v6875_v33  ;;  %vm6802_vm14 = vcmp.gt.f32.partialorder %v14182_v56, 0.0 }
 0x5c7   :  { %v6424_v57 = vpop.f32.mrb[67].mxu0  ;;  %v7970_v50 = vadd.f32 -1.0, %v10138_v47  ;;  %v6878_v9 = vmin.f32 %v14226_v46, 0.0  ;;  %v6430_v3 = vadd.f32 %v9587_v2, %v13978_v23  ;;  %10147 = vpow2.f32 %v6975_v0  ;;  %v15193_v2 = vld [vmem:[#allocation66_spill] sm:$0xff] }
 0x5c8   :  { %v7158_v51 = vsel %vm6798_vm10, %v14141_v63, %v7971_v25  ;;  %v6425_v38 = vadd.f32 %v13978_v23, %v6424_v57  ;;  %10149 = vpow2.f32 %v6973_v35  ;;  %v6877_v63 = vmin.f32 %v14248_v18, 0.0 }
 0x5c9   :  { %7230 = vst.msk [vmem:[%s14816_s8 + $0xa8] sm:$0xff] %vm324_vm1, %v7158_v51  ;;  %v7157_v41 = vsel %vm6797_vm11, %v14149_v61, %v7970_v50  ;;  %v6979_v54 = vmul.f32 1.442695, %v6878_v9  ;;  %v14264_v45 = vadd.f32 %v6430_v3, %v15188_v60  ;;  %vm6801_vm15 = vcmp.gt.f32.partialorder %v14191_v59, 0.0  ;;  %v15194_v50 = vld [vmem:[#allocation69_spill] sm:$0xff] }
 0x5ca   :  { %v9590_v53 = vpop.f32.mrb[68].mxu0  ;;  %7229 = vst.msk [vmem:[%s14816_s8 + $0xa0] sm:$0xff] %vm324_vm1, %v7157_v41  ;;  %v14267_v10 = vadd.f32 %v6425_v38, %v15189_v55  ;;  %v10140_v36 = vpop.eup %10139  ;;  %v6977_v5 = vmul.f32 1.442695, %v6877_v63  ;;  %vm6804_vm5 = vcmp.gt.f32.partialorder %v14220_v31, 0.0  ;;  %vm6803_vm6 = vcmp.gt.f32.partialorder %v14223_v58, 0.0 }
 0x5cb   :  { %v6434_v39 = vpop.f32.mrb[69].mxu0  ;;  %10151 = vpow2.f32 %v6979_v54  ;;  %v6440_v61 = vadd.f32 %v9590_v53, %v13978_v23  ;;  %v10142_v40 = vpop.eup %10141  ;;  %v7973_v22 = vadd.f32 -1.0, %v10140_v36  ;;  %v6880_v8 = vmin.f32 %v14264_v45, 0.0  ;;  %v15195_v36 = vld [vmem:[#allocation68_spill] sm:$0xff] }
 0x5cc   :  { %v6435_v19 = vadd.f32 %v13978_v23, %v6434_v39  ;;  %v7972_v17 = vadd.f32 -1.0, %v10142_v40  ;;  %v6879_v15 = vmin.f32 %v14267_v10, 0.0  ;;  %10153 = vpow2.f32 %v6977_v5 }
 0x5cd   :  { %v10144_v34 = vpop.eup %10143  ;;  %v14277_v7 = vadd.f32 %v6440_v61, %v15190_v1  ;;  %v7160_v6 = vsel %vm6800_vm12, %v14174_v48, %v7973_v22  ;;  %v6983_v30 = vmul.f32 1.442695, %v6880_v8  ;;  %vm6806_vm3 = vcmp.gt.f32.partialorder %v14226_v46, 0.0 }
 0x5ce   :  { %v9593_v29 = vpop.f32.mrb[70].mxu0  ;;  %v10146_v20 = vpop.eup %10145  ;;  %v7975_v12 = vadd.f32 -1.0, %v10144_v34  ;;  %7232 = vst.msk [vmem:[%s14816_s8 + $0xb8] sm:$0xff] %vm324_vm1, %v7160_v6  ;;  %v7159_v21 = vsel %vm6799_vm13, %v14179_v24, %v7972_v17  ;;  %v6981_v4 = vmul.f32 1.442695, %v6879_v15  ;;  %v14299_v43 = vadd.f32 %v6435_v19, %v15191_v14  ;;  %v15196_v34 = vld [vmem:[#allocation71_spill] sm:$0xff] }
 0x5cf   :  { %v6444_v11 = vpop.f32.mrb[71].mxu0  ;;  %v7974_v26 = vadd.f32 -1.0, %v10146_v20  ;;  %7231 = vst.msk [vmem:[%s14816_s8 + $0xb0] sm:$0xff] %vm324_vm1, %v7159_v21  ;;  %10155 = vpow2.f32 %v6983_v30  ;;  %v6882_v62 = vmin.f32 %v14277_v7, 0.0  ;;  %v6450_v16 = vadd.f32 %v9593_v29, %v13978_v23  ;;  %v15197_v6 = vld [vmem:[#allocation70_spill] sm:$0xff] }
 0x5d0   :  { %v7162_v48 = vsel %vm6802_vm14, %v14182_v56, %v7975_v12  ;;  %10157 = vpow2.f32 %v6981_v4  ;;  %v6445_v52 = vadd.f32 %v13978_v23, %v6444_v11  ;;  %v6881_v49 = vmin.f32 %v14299_v43, 0.0 }
 0x5d1   :  { %7234 = vst.msk [vmem:[%s14816_s8 + $0xc8] sm:$0xff] %vm324_vm1, %v7162_v48  ;;  %v7161_v24 = vsel %vm6801_vm15, %v14191_v59, %v7974_v26  ;;  %v6987_v56 = vmul.f32 1.442695, %v6882_v62  ;;  %v10148_v32 = vpop.eup %10147  ;;  %v14315_v59 = vadd.f32 %v6450_v16, %v15192_v42  ;;  %vm6805_vm4 = vcmp.gt.f32.partialorder %v14248_v18, 0.0 }
 0x5d2   :  { %v9596_v28 = vpop.f32.mrb[72].mxu0  ;;  %7233 = vst.msk [vmem:[%s14816_s8 + $0xc0] sm:$0xff] %vm324_vm1, %v7161_v24  ;;  %v14318_v47 = vadd.f32 %v6445_v52, %v15193_v2  ;;  %v10150_v25 = vpop.eup %10149  ;;  %v7977_v33 = vadd.f32 -1.0, %v10148_v32  ;;  %v6985_v57 = vmul.f32 1.442695, %v6881_v49  ;;  %vm6808_vm0 = vcmp.gt.f32.partialorder %v14264_v45, 0.0 }
 0x5d3   :  { %v6460_v37 = vadd.f32 %v9596_v28, %v13978_v23  ;;  %v6454_v13 = vpop.f32.mrb[73].mxu0  ;;  %10159 = vpow2.f32 %v6987_v56  ;;  %v7976_v27 = vadd.f32 -1.0, %v10150_v25  ;;  %v6884_v51 = vmin.f32 %v14315_v59, 0.0  ;;  %v15198_v56 = vld [vmem:[#allocation73_spill] sm:$0xff] }
 0x5d4   :  { %v6455_v44 = vadd.f32 %v13978_v23, %v6454_v13  ;;  %v7164_v3 = vsel %vm6804_vm5, %v14220_v31, %v7977_v33  ;;  %10161 = vpow2.f32 %v6985_v57  ;;  %v6883_v41 = vmin.f32 %v14318_v47, 0.0 }
 0x5d5   :  { %v14322_v0 = vadd.f32 %v6460_v37, %v15194_v50  ;;  %v10152_v9 = vpop.eup %10151  ;;  %7236 = vst.msk [vmem:[%s14816_s8 + $0xd8] sm:$0xff] %vm324_vm1, %v7164_v3  ;;  %v7163_v53 = vsel %vm6803_vm6, %v14223_v58, %v7976_v27  ;;  %v6991_v63 = vmul.f32 1.442695, %v6884_v51  ;;  %vm6807_vm7 = vcmp.gt.f32.partialorder %v14267_v10, 0.0  ;;  %v15200_v50 = vld [vmem:[#allocation75_spill] sm:$0xff] }
 0x5d6   :  { %v9599_v35 = vpop.f32.mrb[74].mxu0  ;;  %v7979_v38 = vadd.f32 -1.0, %v10152_v9  ;;  %v10154_v55 = vpop.eup %10153  ;;  %7235 = vst.msk [vmem:[%s14816_s8 + $0xd0] sm:$0xff] %vm324_vm1, %v7163_v53  ;;  %v6989_v39 = vmul.f32 1.442695, %v6883_v41  ;;  %v14342_v61 = vadd.f32 %v6455_v44, %v15195_v36  ;;  %vm6810_vm2 = vcmp.gt.f32.partialorder %v14277_v7, 0.0 }
 0x5d7   :  { %v6464_v54 = vpop.f32.mrb[75].mxu0  ;;  %v6886_v60 = vmin.f32 %v14322_v0, 0.0  ;;  %v6470_v40 = vadd.f32 %v9599_v35, %v13978_v23  ;;  %v7978_v58 = vadd.f32 -1.0, %v10154_v55  ;;  %10163 = vpow2.f32 %v6991_v63  ;;  %v15201_v35 = vld [vmem:[#allocation74_spill] sm:$0xff] }
 0x5d8   :  { %v7166_v31 = vsel %vm6806_vm3, %v14226_v46, %v7979_v38  ;;  %v6465_v5 = vadd.f32 %v13978_v23, %v6464_v54  ;;  %10165 = vpow2.f32 %v6989_v39  ;;  %v6885_v46 = vmin.f32 %v14342_v61, 0.0 }
 0x5d9   :  { %7238 = vst.msk [vmem:[%s14816_s8 + $0xe8] sm:$0xff] %vm324_vm1, %v7166_v31  ;;  %v6995_v22 = vmul.f32 1.442695, %v6886_v60  ;;  %v10156_v19 = vpop.eup %10155  ;;  %v14353_v17 = vadd.f32 %v6470_v40, %v15196_v34  ;;  %v7165_v29 = vsel %vm6805_vm4, %v14248_v18, %v7978_v58  ;;  %vm6809_vm8 = vcmp.gt.f32.partialorder %v14299_v43, 0.0 }
 0x5da   :  { %v9602_v8 = vpop.f32.mrb[76].mxu0  ;;  %v10158_v1 = vpop.eup %10157  ;;  %v7981_v20 = vadd.f32 -1.0, %v10156_v19  ;;  %v14357_v12 = vadd.f32 %v6465_v5, %v15197_v6  ;;  %7237 = vst.msk [vmem:[%s14816_s8 + $0xe0] sm:$0xff] %vm324_vm1, %v7165_v29  ;;  %v6993_v11 = vmul.f32 1.442695, %v6885_v46  ;;  %vm6812_vm9 = vcmp.gt.f32.partialorder %v14315_v59, 0.0 }
 0x5db   :  { %v6474_v15 = vpop.f32.mrb[77].mxu0  ;;  %10167 = vpow2.f32 %v6995_v22  ;;  %v7980_v30 = vadd.f32 -1.0, %v10158_v1  ;;  %v6888_v21 = vmin.f32 %v14353_v17, 0.0  ;;  %v6480_v4 = vadd.f32 %v9602_v8, %v13978_v23  ;;  %v15202_v22 = vld [vmem:[#allocation77_spill] sm:$0xff]  ;;  %v15203_v29 = vld [vmem:[#allocation76_spill] sm:$0xff] }
 0x5dc   :  { %v7168_v26 = vsel %vm6808_vm0, %v14264_v45, %v7981_v20  ;;  %v6887_v18 = vmin.f32 %v14357_v12, 0.0  ;;  %10169 = vpow2.f32 %v6993_v11  ;;  %v6475_v16 = vadd.f32 %v13978_v23, %v6474_v15 }
 0x5dd   :  { %v10160_v62 = vpop.eup %10159  ;;  %7240 = vst.msk [vmem:[%s14816_s8 + $0xf8] sm:$0xff] %vm324_vm1, %v7168_v26  ;;  %v7167_v14 = vsel %vm6807_vm7, %v14267_v10, %v7980_v30  ;;  %v6999_v24 = vmul.f32 1.442695, %v6888_v21  ;;  %v14380_v49 = vadd.f32 %v6480_v4, %v15198_v56  ;;  %v15199_v10 = vld [vmem:[#allocation72_spill] sm:$0xff]  ;;  %vm6811_vm10 = vcmp.gt.f32.partialorder %v14318_v47, 0.0 }
 0x5de   :  { %v9605_v48 = vpop.f32.mrb[78].mxu0  ;;  %7239 = vst.msk [vmem:[%s14816_s8 + $0xf0] sm:$0xff] %vm324_vm1, %v7167_v14  ;;  %v7983_v52 = vadd.f32 -1.0, %v10160_v62  ;;  %v6997_v28 = vmul.f32 1.442695, %v6887_v18  ;;  %v10162_v13 = vpop.eup %10161  ;;  %v14385_v32 = vadd.f32 %v6475_v16, %v15199_v10  ;;  %vm6814_vm11 = vcmp.gt.f32.partialorder %v14322_v0, 0.0 }
 0x5df   :  { %v6484_v45 = vpop.f32.mrb[79].mxu0  ;;  %v6490_v37 = vadd.f32 %v9605_v48, %v13978_v23  ;;  %10171 = vpow2.f32 %v6999_v24  ;;  %v7982_v44 = vadd.f32 -1.0, %v10162_v13  ;;  %v6890_v33 = vmin.f32 %v14380_v49, 0.0  ;;  %v15204_v14 = vld [vmem:[#allocation79_spill] sm:$0xff]  ;;  %v15205_v16 = vld [vmem:[#allocation78_spill] sm:$0xff] }
 0x5e0   :  { %v6485_v42 = vadd.f32 %v13978_v23, %v6484_v45  ;;  %v7170_v2 = vsel %vm6810_vm2, %v14277_v7, %v7983_v52  ;;  %10173 = vpow2.f32 %v6997_v28  ;;  %v6889_v57 = vmin.f32 %v14385_v32, 0.0 }
 0x5e1   :  { %7242 = vst.msk [vmem:[%s14816_s8 + $0x108] sm:$0xff] %vm324_vm1, %v7170_v2  ;;  %v14398_v9 = vadd.f32 %v6490_v37, %v15200_v50  ;;  %v10164_v27 = vpop.eup %10163  ;;  %v7169_v51 = vsel %vm6809_vm8, %v14299_v43, %v7982_v44  ;;  %v7003_v53 = vmul.f32 1.442695, %v6890_v33  ;;  %vm6813_vm12 = vcmp.gt.f32.partialorder %v14342_v61, 0.0  ;;  %v15206_v2 = vld [vmem:[#allocation81_spill] sm:$0xff] }
 0x5e2   :  { %v9608_v25 = vpop.f32.mrb[80].mxu0  ;;  %v14403_v3 = vadd.f32 %v6485_v42, %v15201_v35  ;;  %v10166_v41 = vpop.eup %10165  ;;  %7241 = vst.msk [vmem:[%s14816_s8 + $0x100] sm:$0xff] %vm324_vm1, %v7169_v51  ;;  %v7985_v54 = vadd.f32 -1.0, %v10164_v27  ;;  %v7001_v63 = vmul.f32 1.442695, %v6889_v57  ;;  %vm6816_vm13 = vcmp.gt.f32.partialorder %v14353_v17, 0.0 }
 0x5e3   :  { %v6494_v7 = vpop.f32.mrb[81].mxu0  ;;  %v6500_v38 = vadd.f32 %v9608_v25, %v13978_v23  ;;  %v7984_v43 = vadd.f32 -1.0, %v10166_v41  ;;  %v6892_v31 = vmin.f32 %v14398_v9, 0.0  ;;  %10175 = vpow2.f32 %v7003_v53 }
 0x5e4   :  { %v6495_v60 = vadd.f32 %v13978_v23, %v6494_v7  ;;  %v6891_v39 = vmin.f32 %v14403_v3, 0.0  ;;  %v7172_v40 = vsel %vm6812_vm9, %v14315_v59, %v7985_v54  ;;  %10177 = vpow2.f32 %v7001_v63  ;;  %v15208_v54 = vld [vmem:[#allocation83_spill] sm:$0xff] }
 0x5e5   :  { %v10168_v55 = vpop.eup %10167  ;;  %v14418_v5 = vadd.f32 %v6500_v38, %v15202_v22  ;;  %7244 = vst.msk [vmem:[%s14816_s8 + $0x118] sm:$0xff] %vm324_vm1, %v7172_v40  ;;  %v7171_v19 = vsel %vm6811_vm10, %v14318_v47, %v7984_v43  ;;  %v7007_v46 = vmul.f32 1.442695, %v6892_v31  ;;  %vm6815_vm14 = vcmp.gt.f32.partialorder %v14357_v12, 0.0  ;;  %v15207_v38 = vld [vmem:[#allocation80_spill] sm:$0xff] }
 0x5e6   :  { %v9611_v36 = vpop.f32.mrb[82].mxu0  ;;  %v7987_v58 = vadd.f32 -1.0, %v10168_v55  ;;  %v7005_v34 = vmul.f32 1.442695, %v6891_v39  ;;  %v10170_v15 = vpop.eup %10169  ;;  %7243 = vst.msk [vmem:[%s14816_s8 + $0x110] sm:$0xff] %vm324_vm1, %v7171_v19  ;;  %v14437_v20 = vadd.f32 %v6495_v60, %v15203_v29  ;;  %vm6818_vm15 = vcmp.gt.f32.partialorder %v14380_v49, 0.0 }
 0x5e7   :  { %v6504_v8 = vpop.f32.mrb[83].mxu0  ;;  %v6894_v1 = vmin.f32 %v14418_v5, 0.0  ;;  %v7986_v47 = vadd.f32 -1.0, %v10170_v15  ;;  %10179 = vpow2.f32 %v7007_v46  ;;  %v6510_v6 = vadd.f32 %v9611_v36, %v13978_v23  ;;  %v15209_v55 = vld [vmem:[#allocation82_spill] sm:$0xff] }
 0x5e8   :  { %v7174_v59 = vsel %vm6814_vm11, %v14322_v0, %v7987_v58  ;;  %v6505_v30 = vadd.f32 %v13978_v23, %v6504_v8  ;;  %10181 = vpow2.f32 %v7005_v34  ;;  %v6893_v26 = vmin.f32 %v14437_v20, 0.0  ;;  %v14518_v29 = vld [vmem:[%s14815_s6] ss:$0 sm:$0xff] }
 0x5e9   :  { %7246 = vst.msk [vmem:[%s14816_s8 + $0x128] sm:$0xff] %vm324_vm1, %v7174_v59  ;;  %v10172_v0 = vpop.eup %10171  ;;  %v7011_v21 = vmul.f32 1.442695, %v6894_v1  ;;  %v7173_v48 = vsel %vm6813_vm12, %v14342_v61, %v7986_v47  ;;  %v14451_v24 = vadd.f32 %v6510_v6, %v15204_v14  ;;  %vm6817_vm5 = vcmp.gt.f32.partialorder %v14385_v32, 0.0 }
 0x5ea   :  { %v9614_v11 = vpop.f32.mrb[84].mxu0  ;;  %v10174_v4 = vpop.eup %10173  ;;  %v7989_v62 = vadd.f32 -1.0, %v10172_v0  ;;  %v14454_v45 = vadd.f32 %v6505_v30, %v15205_v16  ;;  %7245 = vst.msk [vmem:[%s14816_s8 + $0x120] sm:$0xff] %vm324_vm1, %v7173_v48  ;;  %v7009_v28 = vmul.f32 1.442695, %v6893_v26  ;;  %vm6820_vm6 = vcmp.gt.f32.partialorder %v14398_v9, 0.0 }
 0x5eb   :  { %v6514_v18 = vpop.f32.mrb[85].mxu0  ;;  %v7988_v52 = vadd.f32 -1.0, %v10174_v4  ;;  %10183 = vpow2.f32 %v7011_v21  ;;  %v6520_v56 = vadd.f32 %v9614_v11, %v13978_v23  ;;  %v6896_v61 = vmin.f32 %v14451_v24, 0.0  ;;  %v15210_v26 = vld [vmem:[#allocation85_spill] sm:$0xff]  ;;  %v15211_v4 = vld [vmem:[#allocation84_spill] sm:$0xff] }
 0x5ec   :  { %v7176_v37 = vsel %vm6816_vm13, %v14353_v17, %v7989_v62  ;;  %10185 = vpow2.f32 %v7009_v28  ;;  %v6895_v42 = vmin.f32 %v14454_v45, 0.0  ;;  %v6515_v33 = vadd.f32 %v13978_v23, %v6514_v18 }
 0x5ed   :  { %7248 = vst.msk [vmem:[%s14816_s8 + $0x138] sm:$0xff] %vm324_vm1, %v7176_v37  ;;  %v7175_v10 = vsel %vm6815_vm14, %v14357_v12, %v7988_v52  ;;  %v14471_v44 = vadd.f32 %v6520_v56, %v15206_v2  ;;  %v7015_v17 = vmul.f32 1.442695, %v6896_v61  ;;  %v10176_v12 = vpop.eup %10175  ;;  %vm6819_vm3 = vcmp.gt.f32.partialorder %v14403_v3, 0.0 }
 0x5ee   :  { %v9617_v13 = vpop.f32.mrb[86].mxu0  ;;  %7247 = vst.msk [vmem:[%s14816_s8 + $0x130] sm:$0xff] %vm324_vm1, %v7175_v10  ;;  %v7013_v7 = vmul.f32 1.442695, %v6895_v42  ;;  %v10178_v51 = vpop.eup %10177  ;;  %v7991_v35 = vadd.f32 -1.0, %v10176_v12  ;;  %v14484_v41 = vadd.f32 %v6515_v33, %v15207_v38  ;;  %vm6822_vm4 = vcmp.gt.f32.partialorder %v14418_v5, 0.0 }
 0x5ef   :  { %v6524_v25 = vpop.f32.mrb[87].mxu0  ;;  %v6530_v57 = vadd.f32 %v9617_v13, %v13978_v23  ;;  %v6898_v27 = vmin.f32 %v14471_v44, 0.0  ;;  %10187 = vpow2.f32 %v7015_v17  ;;  %v7990_v60 = vadd.f32 -1.0, %v10178_v51  ;;  %v15212_v13 = vld [vmem:[#allocation87_spill] sm:$0xff]  ;;  %v15213_v42 = vld [vmem:[#allocation86_spill] sm:$0xff] }
 0x5f0   :  { %v6525_v50 = vadd.f32 %v13978_v23, %v6524_v25  ;;  %10189 = vpow2.f32 %v7013_v7  ;;  %v7178_v36 = vsel %vm6818_vm15, %v14380_v49, %v7991_v35  ;;  %v6897_v40 = vmin.f32 %v14484_v41, 0.0 }
 0x5f1   :  { %v14487_v53 = vadd.f32 %v6530_v57, %v15208_v54  ;;  %v7019_v23 = vmul.f32 1.442695, %v6898_v27  ;;  %v10180_v39 = vpop.eup %10179  ;;  %7250 = vst.msk [vmem:[%s14816_s8 + $0x148] sm:$0xff] %vm324_vm1, %v7178_v36  ;;  %v7177_v22 = vsel %vm6817_vm5, %v14385_v32, %v7990_v60  ;;  %vm6821_vm0 = vcmp.gt.f32.partialorder %v14437_v20, 0.0  ;;  %v15214_v54 = vld [vmem:[#allocation89_spill] sm:$0xff]  ;;  %v15215_v36 = vld [vmem:[#allocation88_spill] sm:$0xff] }
 0x5f2   :  { %v9620_v63 = vpop.f32.mrb[88].mxu0  ;;  %v14490_v43 = vadd.f32 %v6525_v50, %v15209_v55  ;;  %v10182_v58 = vpop.eup %10181  ;;  %v7993_v8 = vadd.f32 -1.0, %v10180_v39  ;;  %7249 = vst.msk [vmem:[%s14816_s8 + $0x140] sm:$0xff] %vm324_vm1, %v7177_v22  ;;  %v7017_v46 = vmul.f32 1.442695, %v6897_v40  ;;  %vm6824_vm7 = vcmp.gt.f32.partialorder %v14451_v24, 0.0 }
 0x5f3   :  { %v6534_v31 = vpop.f32.mrb[89].mxu0  ;;  %10191 = vpow2.f32 %v7019_v23  ;;  %v6900_v49 = vmin.f32 %v14487_v53, 0.0  ;;  %v7992_v19 = vadd.f32 -1.0, %v10182_v58  ;;  %v6540_v47 = vadd.f32 %v14518_v29, %v9620_v63 }
 0x5f4   :  { %v6899_v34 = vmin.f32 %v14490_v43, 0.0  ;;  %v7180_v32 = vsel %vm6820_vm6, %v14398_v9, %v7993_v8  ;;  %v6535_v6 = vadd.f32 %v14518_v29, %v6534_v31  ;;  %10193 = vpow2.f32 %v7017_v46 }
 0x5f5   :  { %v10184_v59 = vpop.eup %10183  ;;  %v7023_v1 = vmul.f32 1.442695, %v6900_v49  ;;  %7252 = vst.msk [vmem:[%s14816_s8 + $0x158] sm:$0xff] %vm324_vm1, %v7180_v32  ;;  %v7179_v9 = vsel %vm6819_vm3, %v14403_v3, %v7992_v19  ;;  %v14534_v18 = vadd.f32 %v6540_v47, %v15210_v26  ;;  %vm6823_vm2 = vcmp.gt.f32.partialorder %v14454_v45, 0.0 }
 0x5f6   :  { %v9623_v15 = vpop.f32.mrb[90].mxu0  ;;  %v7995_v11 = vadd.f32 -1.0, %v10184_v59  ;;  %v7021_v0 = vmul.f32 1.442695, %v6899_v34  ;;  %v10186_v21 = vpop.eup %10185  ;;  %7251 = vst.msk [vmem:[%s14816_s8 + $0x150] sm:$0xff] %vm324_vm1, %v7179_v9  ;;  %v14537_v48 = vadd.f32 %v6535_v6, %v15211_v4  ;;  %vm6826_vm8 = vcmp.gt.f32.partialorder %v14471_v44, 0.0 }
 0x5f7   :  { %v6544_v30 = vpop.f32.mrb[91].mxu0  ;;  %10195 = vpow2.f32 %v7023_v1  ;;  %v6550_v62 = vadd.f32 %v14518_v29, %v9623_v15  ;;  %v7994_v14 = vadd.f32 -1.0, %v10186_v21  ;;  %v6902_v28 = vmin.f32 %v14534_v18, 0.0  ;;  %v15216_v1 = vld [vmem:[#allocation91_spill] sm:$0xff]  ;;  %v15217_v6 = vld [vmem:[#allocation90_spill] sm:$0xff] }
 0x5f8   :  { %v7182_v3 = vsel %vm6822_vm4, %v14418_v5, %v7995_v11  ;;  %10197 = vpow2.f32 %v7021_v0  ;;  %v6545_v16 = vadd.f32 %v14518_v29, %v6544_v30  ;;  %v6901_v56 = vmin.f32 %v14537_v48, 0.0 }
 0x5f9   :  { %7254 = vst.msk [vmem:[%s14816_s8 + $0x168] sm:$0xff] %vm324_vm1, %v7182_v3  ;;  %v10188_v5 = vpop.eup %10187  ;;  %v7181_v61 = vsel %vm6821_vm0, %v14437_v20, %v7994_v14  ;;  %v14554_v10 = vadd.f32 %v6550_v62, %v15212_v13  ;;  %v7027_v57 = vmul.f32 1.442695, %v6902_v28  ;;  %vm6825_vm9 = vcmp.gt.f32.partialorder %v14484_v41, 0.0  ;;  %v15218_v14 = vld [vmem:[#allocation93_spill] sm:$0xff] }
 0x5fa   :  { %v9626_v52 = vpop.f32.mrb[92].mxu0  ;;  %v14557_v2 = vadd.f32 %v6545_v16, %v15213_v42  ;;  %v10190_v17 = vpop.eup %10189  ;;  %7253 = vst.msk [vmem:[%s14816_s8 + $0x160] sm:$0xff] %vm324_vm1, %v7181_v61  ;;  %v7997_v33 = vadd.f32 -1.0, %v10188_v5  ;;  %v7025_v50 = vmul.f32 1.442695, %v6901_v56  ;;  %vm6828_vm10 = vcmp.gt.f32.partialorder %v14487_v53, 0.0 }
 0x5fb   :  { %v6554_v37 = vpop.f32.mrb[93].mxu0  ;;  %v6560_v25 = vadd.f32 %v14518_v29, %v9626_v52  ;;  %v7996_v20 = vadd.f32 -1.0, %v10190_v17  ;;  %v6904_v7 = vmin.f32 %v14554_v10, 0.0  ;;  %10199 = vpow2.f32 %v7027_v57 }
 0x5fc   :  { %v6555_v12 = vadd.f32 %v14518_v29, %v6554_v37  ;;  %v7184_v35 = vsel %vm6824_vm7, %v14451_v24, %v7997_v33  ;;  %v6903_v38 = vmin.f32 %v14557_v2, 0.0  ;;  %10201 = vpow2.f32 %v7025_v50  ;;  %v15220_v33 = vld [vmem:[#allocation95_spill] sm:$0xff] }
 0x5fd   :  { %v10192_v51 = vpop.eup %10191  ;;  %v14573_v63 = vadd.f32 %v6560_v25, %v15214_v54  ;;  %7256 = vst.msk [vmem:[%s14816_s8 + $0x178] sm:$0xff] %vm324_vm1, %v7184_v35  ;;  %v7183_v23 = vsel %vm6823_vm2, %v14454_v45, %v7996_v20  ;;  %v7031_v31 = vmul.f32 1.442695, %v6904_v7  ;;  %vm6827_vm11 = vcmp.gt.f32.partialorder %v14490_v43, 0.0  ;;  %v15219_v25 = vld [vmem:[#allocation92_spill] sm:$0xff]  ;;  %v15221_v7 = vld [vmem:[#allocation94_spill] sm:$0xff] }
 0x5fe   :  { %v9629_v27 = vpop.f32.mrb[94].mxu0  ;;  %v7999_v55 = vadd.f32 -1.0, %v10192_v51  ;;  %7255 = vst.msk [vmem:[%s14816_s8 + $0x170] sm:$0xff] %vm324_vm1, %v7183_v23  ;;  %v7029_v24 = vmul.f32 1.442695, %v6903_v38  ;;  %v14587_v40 = vadd.f32 %v6555_v12, %v15215_v36  ;;  %v10194_v58 = vpop.eup %10193  ;;  %vm6830_vm12 = vcmp.gt.f32.partialorder %v14534_v18, 0.0 }
 0x5ff   :  { %v6564_v60 = vpop.f32.mrb[95].mxu0  ;;  %v6906_v39 = vmin.f32 %v14573_v63, 0.0  ;;  %10203 = vpow2.f32 %v7031_v31  ;;  %v6570_v22 = vadd.f32 %v14518_v29, %v9629_v27  ;;  %v7998_v46 = vadd.f32 -1.0, %v10194_v58 }
 0x600   :  { %v7186_v45 = vsel %vm6826_vm8, %v14471_v44, %v7999_v55  ;;  %v6565_v8 = vadd.f32 %v14518_v29, %v6564_v60  ;;  %10205 = vpow2.f32 %v7029_v24  ;;  %v6905_v32 = vmin.f32 %v14587_v40, 0.0 }
 0x601   :  { %v10196_v19 = vpop.eup %10195  ;;  %7258 = vst.msk [vmem:[%s14816_s8 + $0x188] sm:$0xff] %vm324_vm1, %v7186_v45  ;;  %v7035_v34 = vmul.f32 1.442695, %v6906_v39  ;;  %v14601_v47 = vadd.f32 %v6570_v22, %v15216_v1  ;;  %v7185_v9 = vsel %vm6825_vm9, %v14484_v41, %v7998_v46  ;;  %vm6829_vm13 = vcmp.gt.f32.partialorder %v14537_v48, 0.0 }
 0x602   :  { %v9632_v49 = vpop.f32.mrb[96].mxu0  ;;  %v10198_v59 = vpop.eup %10197  ;;  %v8001_v44 = vadd.f32 -1.0, %v10196_v19  ;;  %v14604_v30 = vadd.f32 %v6565_v8, %v15217_v6  ;;  %7257 = vst.msk [vmem:[%s14816_s8 + $0x180] sm:$0xff] %vm324_vm1, %v7185_v9  ;;  %v7033_v26 = vmul.f32 1.442695, %v6905_v32  ;;  %vm6832_vm14 = vcmp.gt.f32.partialorder %v14554_v10, 0.0 }
 0x603   :  { %v6574_v15 = vpop.f32.mrb[97].mxu0  ;;  %v8000_v11 = vadd.f32 -1.0, %v10198_v59  ;;  %10207 = vpow2.f32 %v7035_v34  ;;  %v6580_v0 = vadd.f32 %v14518_v29, %v9632_v49  ;;  %v6908_v4 = vmin.f32 %v14601_v47, 0.0  ;;  %v15223_v59 = vld [vmem:[#allocation96_spill] sm:$0xff] }
 0x604   :  { %v7188_v21 = vsel %vm6828_vm10, %v14487_v53, %v8001_v44  ;;  %v6907_v3 = vmin.f32 %v14604_v30, 0.0  ;;  %10209 = vpow2.f32 %v7033_v26  ;;  %v6575_v28 = vadd.f32 %v14518_v29, %v6574_v15 }
 0x605   :  { %7260 = vst.msk [vmem:[%s14816_s8 + $0x198] sm:$0xff] %vm324_vm1, %v7188_v21  ;;  %v7187_v41 = vsel %vm6827_vm11, %v14490_v43, %v8000_v11  ;;  %v14625_v16 = vadd.f32 %v6580_v0, %v15218_v14  ;;  %v7039_v52 = vmul.f32 1.442695, %v6908_v4  ;;  %v10200_v43 = vpop.eup %10199  ;;  %vm6831_vm15 = vcmp.gt.f32.partialorder %v14557_v2, 0.0  ;;  %v15224_v4 = vld [vmem:[#allocation101_spill] sm:$0xff] }
 0x606   :  { %v9635_v62 = vpop.f32.mrb[98].mxu0  ;;  %7259 = vst.msk [vmem:[%s14816_s8 + $0x190] sm:$0xff] %vm324_vm1, %v7187_v41  ;;  %v7037_v37 = vmul.f32 1.442695, %v6907_v3  ;;  %v10202_v13 = vpop.eup %10201  ;;  %v8003_v42 = vadd.f32 -1.0, %v10200_v43  ;;  %v14637_v17 = vadd.f32 %v6575_v28, %v15219_v25  ;;  %vm6834_vm5 = vcmp.gt.f32.partialorder %v14573_v63, 0.0 }
 0x607   :  { %v6584_v53 = vpop.f32.mrb[99].mxu0  ;;  %v6590_v56 = vadd.f32 %v14518_v29, %v9635_v62  ;;  %v6910_v5 = vmin.f32 %v14625_v16, 0.0  ;;  %10211 = vpow2.f32 %v7039_v52  ;;  %v8002_v12 = vadd.f32 -1.0, %v10202_v13  ;;  %v15225_v41 = vld [vmem:[#allocation99_spill] sm:$0xff] }
 0x608   :  { %v6585_v61 = vadd.f32 %v14518_v29, %v6584_v53  ;;  %10213 = vpow2.f32 %v7037_v37  ;;  %v7190_v38 = vsel %vm6830_vm12, %v14534_v18, %v8003_v42  ;;  %v6909_v54 = vmin.f32 %v14637_v17, 0.0 }
 0x609   :  { %v14640_v57 = vadd.f32 %v6590_v56, %v15220_v33  ;;  %v7043_v20 = vmul.f32 1.442695, %v6910_v5  ;;  %v10204_v35 = vpop.eup %10203  ;;  %7262 = vst.msk [vmem:[%s14816_s8 + $0x1a8] sm:$0xff] %vm324_vm1, %v7190_v38  ;;  %v7189_v23 = vsel %vm6829_vm13, %v14537_v48, %v8002_v12  ;;  %vm6833_vm6 = vcmp.gt.f32.partialorder %v14587_v40, 0.0 }
 0x60a   :  { %v9638_v50 = vpop.f32.mrb[100].mxu0  ;;  %v14643_v27 = vadd.f32 %v6585_v61, %v15221_v7  ;;  %v10206_v60 = vpop.eup %10205  ;;  %v8005_v55 = vadd.f32 -1.0, %v10204_v35  ;;  %7261 = vst.msk [vmem:[%s14816_s8 + $0x1a0] sm:$0xff] %vm324_vm1, %v7189_v23  ;;  %v7041_v24 = vmul.f32 1.442695, %v6909_v54  ;;  %vm6836_vm3 = vcmp.gt.f32.partialorder %v14601_v47, 0.0 }
 0x60b   :  { %v6594_v51 = vpop.f32.mrb[101].mxu0  ;;  %10215 = vpow2.f32 %v7043_v20  ;;  %v6912_v18 = vmin.f32 %v14640_v57, 0.0  ;;  %v8004_v31 = vadd.f32 -1.0, %v10206_v60  ;;  %v6600_v22 = vadd.f32 %v14518_v29, %v9638_v50  ;;  %v15226_v7 = vld [vmem:[#allocation103_spill] sm:$0xff]  ;;  %v15227_v35 = vld [vmem:[#allocation102_spill] sm:$0xff] }
 0x60c   :  { %v6911_v39 = vmin.f32 %v14643_v27, 0.0  ;;  %v7192_v48 = vsel %vm6832_vm14, %v14554_v10, %v8005_v55  ;;  %v6595_v8 = vadd.f32 %v14518_v29, %v6594_v51  ;;  %10217 = vpow2.f32 %v7041_v24  ;;  %v15222_v10 = vld [vmem:[#allocation97_spill] sm:$0xff] }
 0x60d   :  { %v10208_v58 = vpop.eup %10207  ;;  %v7047_v45 = vmul.f32 1.442695, %v6912_v18  ;;  %7264 = vst.msk [vmem:[%s14816_s8 + $0x1b8] sm:$0xff] %vm324_vm1, %v7192_v48  ;;  %v7191_v19 = vsel %vm6831_vm15, %v14557_v2, %v8004_v31  ;;  %v14682_v15 = vadd.f32 %v6600_v22, %v15222_v10  ;;  %vm6835_vm4 = vcmp.gt.f32.partialorder %v14604_v30, 0.0  ;;  %v15229_v22 = vld [vmem:[#allocation105_spill] sm:$0xff] }
 0x60e   :  { %v9641_v36 = vpop.f32.mrb[102].mxu0  ;;  %v8007_v46 = vadd.f32 -1.0, %v10208_v58  ;;  %v7045_v34 = vmul.f32 1.442695, %v6911_v39  ;;  %7263 = vst.msk [vmem:[%s14816_s8 + $0x1b0] sm:$0xff] %vm324_vm1, %v7191_v19  ;;  %v14685_v44 = vadd.f32 %v6595_v8, %v15223_v59  ;;  %v10210_v1 = vpop.eup %10209  ;;  %vm6838_vm0 = vcmp.gt.f32.partialorder %v14625_v16, 0.0 }
 0x60f   :  { %v6604_v49 = vpop.f32.mrb[103].mxu0  ;;  %10219 = vpow2.f32 %v7047_v45  ;;  %v6610_v32 = vadd.f32 %v14518_v29, %v9641_v36  ;;  %v8006_v11 = vadd.f32 -1.0, %v10210_v1  ;;  %v6914_v0 = vmin.f32 %v14682_v15, 0.0  ;;  %v15228_v36 = vld [vmem:[#allocation106_spill] sm:$0xff] }
 0x610   :  { %v7194_v2 = vsel %vm6834_vm5, %v14573_v63, %v8007_v46  ;;  %10221 = vpow2.f32 %v7045_v34  ;;  %v6605_v6 = vadd.f32 %v14518_v29, %v6604_v49  ;;  %v6913_v63 = vmin.f32 %v14685_v44, 0.0 }
 0x611   :  { %7266 = vst.msk [vmem:[%s14816_s8 + $0x1c8] sm:$0xff] %vm324_vm1, %v7194_v2  ;;  %v10212_v26 = vpop.eup %10211  ;;  %v14701_v62 = vadd.f32 %v6610_v32, %v15224_v4  ;;  %v7193_v52 = vsel %vm6833_vm6, %v14587_v40, %v8006_v11  ;;  %v7051_v56 = vmul.f32 1.442695, %v6914_v0  ;;  %vm6837_vm7 = vcmp.gt.f32.partialorder %v14637_v17, 0.0 }
 0x612   :  { %v9644_v9 = vpop.f32.mrb[104].mxu0  ;;  %v14704_v3 = vadd.f32 %v6605_v6, %v15225_v41  ;;  %v10214_v53 = vpop.eup %10213  ;;  %v8009_v28 = vadd.f32 -1.0, %v10212_v26  ;;  %7265 = vst.msk [vmem:[%s14816_s8 + $0x1c0] sm:$0xff] %vm324_vm1, %v7193_v52  ;;  %v7049_v5 = vmul.f32 1.442695, %v6913_v63  ;;  %vm6840_vm2 = vcmp.gt.f32.partialorder %v14640_v57, 0.0 }
 0x613   :  { %v6614_v21 = vpop.f32.mrb[105].mxu0  ;;  %v6620_v14 = vadd.f32 %v14518_v29, %v9644_v9  ;;  %v8008_v37 = vadd.f32 -1.0, %v10214_v53  ;;  %v6916_v61 = vmin.f32 %v14701_v62, 0.0  ;;  %10223 = vpow2.f32 %v7051_v56 }
 0x614   :  { %v6615_v43 = vadd.f32 %v14518_v29, %v6614_v21  ;;  %v7196_v40 = vsel %vm6836_vm3, %v14601_v47, %v8009_v28  ;;  %v6915_v25 = vmin.f32 %v14704_v3, 0.0  ;;  %10225 = vpow2.f32 %v7049_v5 }
 0x615   :  { %v10216_v42 = vpop.eup %10215  ;;  %7268 = vst.msk [vmem:[%s14816_s8 + $0x1d8] sm:$0xff] %vm324_vm1, %v7196_v40  ;;  %v7195_v50 = vsel %vm6835_vm4, %v14604_v30, %v8008_v37  ;;  %v7055_v20 = vmul.f32 1.442695, %v6916_v61  ;;  %v14730_v51 = vadd.f32 %v6620_v14, %v15226_v7  ;;  %vm6839_vm8 = vcmp.gt.f32.partialorder %v14643_v27, 0.0 }
 0x616   :  { %v9647_v13 = vpop.f32.mrb[106].mxu0  ;;  %v8011_v12 = vadd.f32 -1.0, %v10216_v42  ;;  %7267 = vst.msk [vmem:[%s14816_s8 + $0x1d0] sm:$0xff] %vm324_vm1, %v7195_v50  ;;  %v7053_v47 = vmul.f32 1.442695, %v6915_v25  ;;  %v14733_v38 = vadd.f32 %v6615_v43, %v15227_v35  ;;  %v10218_v60 = vpop.eup %10217  ;;  %vm6842_vm9 = vcmp.gt.f32.partialorder %v14682_v15, 0.0 }
 0x617   :  { %v6624_v33 = vpop.f32.mrb[107].mxu0  ;;  %v6630_v54 = vadd.f32 %v14518_v29, %v9647_v13  ;;  %10227 = vpow2.f32 %v7055_v20  ;;  %v8010_v18 = vadd.f32 -1.0, %v10218_v60  ;;  %v6918_v31 = vmin.f32 %v14730_v51, 0.0 }
 0x618   :  { %v7198_v30 = vsel %vm6838_vm0, %v14625_v16, %v8011_v12  ;;  %v6625_v23 = vadd.f32 %v14518_v29, %v6624_v33  ;;  %10229 = vpow2.f32 %v7053_v47  ;;  %v6917_v16 = vmin.f32 %v14733_v38, 0.0 }
 0x619   :  { %v10220_v55 = vpop.eup %10219  ;;  %7270 = vst.msk [vmem:[%s14816_s8 + $0x1e8] sm:$0xff] %vm324_vm1, %v7198_v30  ;;  %v6776_v29 = vadd.f32 %v6630_v54, %v15228_v36  ;;  %v7197_v58 = vsel %vm6837_vm7, %v14637_v17, %v8010_v18  ;;  %v7059_v45 = vmul.f32 1.442695, %v6918_v31  ;;  %vm6841_vm10 = vcmp.gt.f32.partialorder %v14685_v44, 0.0 }
 0x61a   :  { %v10222_v24 = vpop.eup %10221  ;;  %v8013_v39 = vadd.f32 -1.0, %v10220_v55  ;;  %v6775_v8 = vadd.f32 %v6625_v23, %v15229_v22  ;;  %7269 = vst.msk [vmem:[%s14816_s8 + $0x1e0] sm:$0xff] %vm324_vm1, %v7197_v58  ;;  %v7057_v19 = vmul.f32 1.442695, %v6917_v16  ;;  %vm6844_vm11 = vcmp.gt.f32.partialorder %v14701_v62, 0.0 }
 0x61b   :  { %v8012_v48 = vadd.f32 -1.0, %v10222_v24  ;;  %v6920_v46 = vmin.f32 %v6776_v29, 0.0  ;;  %10231 = vpow2.f32 %v7059_v45  ;;  %vm6843_vm12 = vcmp.gt.f32.partialorder %v14704_v3, 0.0 }
 0x61c   :  { %v7200_v49 = vsel %vm6840_vm2, %v14640_v57, %v8013_v39  ;;  %v6919_v34 = vmin.f32 %v6775_v8, 0.0  ;;  %10233 = vpow2.f32 %v7057_v19  ;;  %vm6846_vm13 = vcmp.gt.f32.partialorder %v14730_v51, 0.0 }
 0x61d   :  { %7272 = vst.msk [vmem:[%s14816_s8 + $0x1f8] sm:$0xff] %vm324_vm1, %v7200_v49  ;;  %v7199_v17 = vsel %vm6839_vm8, %v14643_v27, %v8012_v48  ;;  %v7063_v57 = vmul.f32 1.442695, %v6920_v46  ;;  %v10224_v10 = vpop.eup %10223  ;;  %vm6845_vm14 = vcmp.gt.f32.partialorder %v14733_v38, 0.0  ;;  %vm6848_vm15 = vcmp.gt.f32.partialorder %v6776_v29, 0.0 }
 0x61e   :  { %7271 = vst.msk [vmem:[%s14816_s8 + $0x1f0] sm:$0xff] %vm324_vm1, %v7199_v17  ;;  %v7061_v59 = vmul.f32 1.442695, %v6919_v34  ;;  %v10226_v32 = vpop.eup %10225  ;;  %v8015_v1 = vadd.f32 -1.0, %v10224_v10  ;;  %vm6847_vm5 = vcmp.gt.f32.partialorder %v6775_v8, 0.0 }
 0x61f   :  { %10235 = vpow2.f32 %v7063_v57  ;;  %v8014_v2 = vadd.f32 -1.0, %v10226_v32 }
 0x620   :  { %10237 = vpow2.f32 %v7061_v59  ;;  %v7202_v27 = vsel %vm6842_vm9, %v14682_v15, %v8015_v1 }
 0x621   :  { %v10228_v6 = vpop.eup %10227  ;;  %7274 = vst.msk [vmem:[%s14816_s8 + $0x208] sm:$0xff] %vm324_vm1, %v7202_v27  ;;  %v7201_v11 = vsel %vm6841_vm10, %v14685_v44, %v8014_v2 }
 0x622   :  { %v10230_v9 = vpop.eup %10229  ;;  %v8017_v0 = vadd.f32 -1.0, %v10228_v6  ;;  %7273 = vst.msk [vmem:[%s14816_s8 + $0x200] sm:$0xff] %vm324_vm1, %v7201_v11 }
 0x623   :  { %v8016_v21 = vadd.f32 -1.0, %v10230_v9 }
 0x624   :  { %v7204_v15 = vsel %vm6844_vm11, %v14701_v62, %v8017_v0 }
 0x625   :  { %7276 = vst.msk [vmem:[%s14816_s8 + $0x218] sm:$0xff] %vm324_vm1, %v7204_v15  ;;  %v7203_v44 = vsel %vm6843_vm12, %v14704_v3, %v8016_v21  ;;  %v10232_v26 = vpop.eup %10231 }
 0x626   :  { %7275 = vst.msk [vmem:[%s14816_s8 + $0x210] sm:$0xff] %vm324_vm1, %v7203_v44  ;;  %v10234_v63 = vpop.eup %10233  ;;  %v8019_v4 = vadd.f32 -1.0, %v10232_v26 }
 0x627   :  { %v8018_v62 = vadd.f32 -1.0, %v10234_v63 }
 0x628   :  { %v7206_v14 = vsel %vm6846_vm13, %v14730_v51, %v8019_v4 }
 0x629   :  { %v10236_v41 = vpop.eup %10235  ;;  %7278 = vst.msk [vmem:[%s14816_s8 + $0x228] sm:$0xff] %vm324_vm1, %v7206_v14  ;;  %v7205_v3 = vsel %vm6845_vm14, %v14733_v38, %v8018_v62 }
 0x62a   :  { %v10238_v53 = vpop.eup %10237  ;;  %v8021_v52 = vadd.f32 -1.0, %v10236_v41  ;;  %7277 = vst.msk [vmem:[%s14816_s8 + $0x220] sm:$0xff] %vm324_vm1, %v7205_v3 }
 0x62b   :  { %v8020_v28 = vadd.f32 -1.0, %v10238_v53 }
 0x62c   :  { %v7208_v56 = vsel %vm6848_vm15, %v6776_v29, %v8021_v52 }
 0x62d   :  { %7280 = vst.msk [vmem:[%s14816_s8 + $0x238] sm:$0xff] %vm324_vm1, %v7208_v56  ;;  %v7207_v43 = vsel %vm6847_vm5, %v6775_v8, %v8020_v28 }
 0x62e   :  { %7279 = vst.msk [vmem:[%s14816_s8 + $0x230] sm:$0xff] %vm324_vm1, %v7207_v43 }

</bundles_post_ra>
